<compile_context>
chip_gen: v7x
topology: tpu7x:2x2x1
jax: 0.10.0
libtpu: 0.0.40
codegen_flags: <defaults>
</compile_context>

<pallas_src>
import jax
import jax.numpy as jnp
from jax import lax
from jax.experimental import pallas as pl
from jax.experimental.pallas import tpu as pltpu
import numpy as np

LANES = 128


# ----------------------------- Pallas kernels ------------------------------ #

def conv_pool_kernel(p_ref, w_ref, b_ref, o_ref):
    """Fused conv-as-GEMM + 2x2/2 max-pool + bias.

    p_ref: [4, TM, K] bf16 im2col patches (one slab per pool offset)
    w_ref: [K, Npad] bf16 filter matrix     b_ref: [1, Npad] f32 bias
    o_ref: [TM, Npad] f32 pooled conv output (lane-dense, Npad = 128)
    """
    w = w_ref[...]
    d0 = jnp.dot(p_ref[0], w, preferred_element_type=jnp.float32)
    d1 = jnp.dot(p_ref[1], w, preferred_element_type=jnp.float32)
    d2 = jnp.dot(p_ref[2], w, preferred_element_type=jnp.float32)
    d3 = jnp.dot(p_ref[3], w, preferred_element_type=jnp.float32)
    # Tree-reduce the 4 pool offsets, add the shared bias once after the max.
    pooled = jnp.maximum(jnp.maximum(d0, d1), jnp.maximum(d2, d3))
    o_ref[...] = (pooled + b_ref[...]).astype(o_ref.dtype)


def mlp_kernel(x_ref, w1_ref, b1_ref, w2_ref, b2_ref, o_ref):
    """fc1 (bf16 MXU, f32 acc) + ReLU + fc2 (lane-dense padded output)."""
    h = jnp.dot(x_ref[...], w1_ref[...], preferred_element_type=jnp.float32) + b1_ref[...]
    h = jnp.maximum(h, 0.0)
    o_ref[...] = (jnp.dot(h, w2_ref[...], preferred_element_type=jnp.float32)
                  + b2_ref[...]).astype(o_ref.dtype)


# --------------------------- pallas_call wrappers --------------------------- #

def _pick_tile(m, cap, align=16):
    """Largest tile <= cap that is a multiple of `align` and divides m (else m if small)."""
    if m <= cap:
        return m
    t = (cap // align) * align
    while t >= align:
        if m % t == 0:
            return t
        t -= align
    return (cap // align) * align  # ragged last block; Pallas masks OOB writes


def conv_pool_matmul(patches, w, b, *, tm_cap=1024):
    """patches [4,M,K] bf16, w [K,Npad] bf16, b [1,Npad] f32 -> [M,Npad] f32."""
    T, M, K = patches.shape
    N = w.shape[1]
    tm = _pick_tile(M, tm_cap)
    cost = pl.CostEstimate(
        flops=2 * T * M * K * N,
        transcendentals=0,
        bytes_accessed=(patches.size * patches.dtype.itemsize
                        + w.size * w.dtype.itemsize + b.size * 4 + M * N * 4),
    )
    return pl.pallas_call(
        conv_pool_kernel,
        out_shape=jax.ShapeDtypeStruct((M, N), jnp.float32),
        grid=(pl.cdiv(M, tm),),
        in_specs=[
            pl.BlockSpec((T, tm, K), lambda i: (0, i, 0)),
            pl.BlockSpec((K, N), lambda i: (0, 0)),
            pl.BlockSpec((1, N), lambda i: (0, 0)),
        ],
        out_specs=pl.BlockSpec((tm, N), lambda i: (i, 0)),
        compiler_params=pltpu.CompilerParams(dimension_semantics=("parallel",)),
        cost_estimate=cost,
    )(patches, w, b)


def mlp(x, w1, b1, w2, b2, *, tb_cap=512):
    """x [B,D] bf16, w1 [D,H] bf16, b1 [1,H] f32, w2 [H,Npad] f32, b2 [1,Npad] f32."""
    B, D = x.shape
    H = w1.shape[1]
    N = w2.shape[1]
    tb = _pick_tile(B, tb_cap)
    cost = pl.CostEstimate(
        flops=2 * B * D * H + 2 * B * H * N,
        transcendentals=0,
        bytes_accessed=(x.size * x.dtype.itemsize + w1.size * w1.dtype.itemsize
                        + (b1.size + w2.size + b2.size + B * N) * 4),
    )
    return pl.pallas_call(
        mlp_kernel,
        out_shape=jax.ShapeDtypeStruct((B, N), jnp.float32),
        grid=(pl.cdiv(B, tb),),
        in_specs=[
            pl.BlockSpec((tb, D), lambda i: (i, 0)),
            pl.BlockSpec((D, H), lambda i: (0, 0)),
            pl.BlockSpec((1, H), lambda i: (0, 0)),
            pl.BlockSpec((H, N), lambda i: (0, 0)),
            pl.BlockSpec((1, N), lambda i: (0, 0)),
        ],
        out_specs=pl.BlockSpec((tb, N), lambda i: (i, 0)),
        compiler_params=pltpu.CompilerParams(dimension_semantics=("parallel",)),
        cost_estimate=cost,
    )(x, w1, b1, w2, b2)


# ------------------------------- JAX glue ---------------------------------- #

def _pad_last(a, n):
    pad = [(0, 0)] * (a.ndim - 1) + [(0, n - a.shape[-1])]
    return jnp.pad(a, pad)


def _pad2(a, rows, cols):
    return jnp.pad(a, ((0, rows - a.shape[0]), (0, cols - a.shape[1])))


def _im2col_pool2(x_nhwc, k, oh, ow):
    """im2col patches for a VALID KxK conv fused with a 2x2/2 max-pool.

    Returns [4, B*oh*ow, k*k*C]; pure layout glue (all reductions/matmuls run in Pallas).
    """
    B, H, W, C = x_nhwc.shape
    slabs = []
    for di in range(2):
        for dj in range(2):
            cols = []
            for kh in range(k):
                for kw in range(k):
                    sl = x_nhwc[:, di + kh:di + kh + 2 * oh - 1:2,
                                dj + kw:dj + kw + 2 * ow - 1:2, :]
                    cols.append(sl.reshape(B * oh * ow, C))
            slabs.append(jnp.concatenate(cols, axis=-1))
    return jnp.stack(slabs, axis=0)


def mnist_tier_forward(x_nchw, params):
    """Forward pass of MNISTtier with PyTorch (NCHW / torch-layout weight) semantics."""
    w1, b1, w2, b2, wf1, bf1, wf2, bf2 = params   # torch-layout parameter tensors
    B = x_nchw.shape[0]
    x = jnp.transpose(x_nchw, (0, 2, 3, 1)).astype(jnp.bfloat16)   # NHWC, bf16 MXU input

    # conv1 (3->32, k=5, VALID) fused with 2x2 max-pool  -> [B,12,12,32]
    p1 = _pad_last(_im2col_pool2(x, 5, 12, 12), LANES)             # [4, B*144, 128] bf16
    w1k = _pad2(jnp.transpose(w1, (2, 3, 1, 0)).reshape(75, 32),   # rows = (kh,kw,cin)
                LANES, LANES).astype(jnp.bfloat16)                 # [128, 128]
    b1p = _pad_last(b1.reshape(1, 32), LANES)                      # [1, 128] f32
    y1 = conv_pool_matmul(p1, w1k, b1p)[:, :32]                    # [B*144, 32] f32
    y1 = y1.astype(jnp.bfloat16).reshape(B, 12, 12, 32)

    # conv2 (32->64, k=5, VALID) fused with 2x2 max-pool -> [B,4,4,64]
    p2 = _im2col_pool2(y1, 5, 4, 4)                                # [4, B*16, 800] bf16
    w2k = _pad2(jnp.transpose(w2, (2, 3, 1, 0)).reshape(800, 64),
                800, LANES).astype(jnp.bfloat16)                   # [800, 128]
    b2p = _pad_last(b2.reshape(1, 64), LANES)                      # [1, 128] f32
    y2 = conv_pool_matmul(p2, w2k, b2p)[:, :64]                    # [B*16, 64] f32

    # Flatten in NHWC order; permute fc1 weights so semantics match torch's NCHW
    # flatten: torch column index c*16+h*4+w  ->  our row index h*256+w*64+c.
    xf = y2.astype(jnp.bfloat16).reshape(B, 1024)
    Bpad = ((B + 15) // 16) * 16
    xf = jnp.pad(xf, ((0, Bpad - B), (0, 0)))
    wf1k = jnp.transpose(wf1.reshape(512, 64, 4, 4),
                         (2, 3, 1, 0)).reshape(1024, 512).astype(jnp.bfloat16)
    wf2k = _pad2(jnp.transpose(wf2), 512, LANES)                   # [512, 128] f32 (fc2 lane-dense)
    bf2p = _pad_last(bf2.reshape(1, 1), LANES)                     # [1, 128] f32
    out = mlp(xf, wf1k, bf1.reshape(1, 512), wf2k, bf2p)           # [Bpad, 128] f32
    return jnp.squeeze(out[:B, 0])                                 # matches x.squeeze()


# -------------------------- pure-JAX reference ------------------------------ #

def ref_forward(x, params):
    w1, b1, w2, b2, wf1, bf1, wf2, bf2 = params
    dn = ("NCHW", "OIHW", "NCHW")
    hi = lax.Precision.HIGHEST
    y = lax.conv_general_dilated(x, w1, (1, 1), "VALID",
                                 dimension_numbers=dn, precision=hi)
    y = y + b1[None, :, None, None]
    b, c, h, w = y.shape
    y = y.reshape(b, c, h // 2, 2, w // 2, 2).max(axis=(3, 5))
    y = lax.conv_general_dilated(y, w2, (1, 1), "VALID",
                                 dimension_numbers=dn, precision=hi)
    y = y + b2[None, :, None, None]
    b, c, h, w = y.shape
    y = y.reshape(b, c, h // 2, 2, w // 2, 2).max(axis=(3, 5))
    y = y.reshape(b, -1)
    hdd = jnp.maximum(jnp.dot(y, wf1.T, precision=hi) + bf1, 0.0)
    return jnp.squeeze(jnp.dot(hdd, wf2.T, precision=hi) + bf2)


# ---------------------------------- main ------------------------------------ #

if __name__ == "__main__":
    key = jax.random.PRNGKey(0)
    ks = jax.random.split(key, 9)
    # Deterministic synthetic parameters in PyTorch layouts:
    params = (
        0.10 * jax.random.normal(ks[0], (32, 3, 5, 5), jnp.float32),   # conv1.weight
        0.10 * jax.random.normal(ks[1], (32,), jnp.float32),           # conv1.bias
        0.05 * jax.random.normal(ks[2], (64, 32, 5, 5), jnp.float32),  # conv2.weight
        0.05 * jax.random.normal(ks[3], (64,), jnp.float32),           # conv2.bias
        0.03 * jax.random.normal(ks[4], (512, 1024), jnp.float32),     # fc1.weight
        0.03 * jax.random.normal(ks[5], (512,), jnp.float32),          # fc1.bias
        0.05 * jax.random.normal(ks[6], (1, 512), jnp.float32),        # fc2.weight
        0.05 * jax.random.normal(ks[7], (1,), jnp.float32),            # fc2.bias
    )
    # 28x28 spatial size is forced by fc1 in_features=1024 (= 64*4*4); batch 8 makes the
    # conv1 GEMM row dimension (M = 8*144 = 1152) large enough to exercise a multi-step
    # "parallel" grid (tile 576 -> 2 pipelined grid steps).
    x = jax.random.normal(ks[8], (8, 3, 28, 28), jnp.float32)

    out = jax.block_until_ready(jax.jit(mnist_tier_forward)(x, params))
    ref = jax.block_until_ready(ref_forward(x, params))

    assert out.shape == ref.shape == (8,)
    # bf16 MXU inputs with f32 accumulation vs. an f32 HIGHEST-precision reference.
    np.testing.assert_allclose(np.asarray(out), np.asarray(ref), rtol=2e-2, atol=2e-2)
    print("KERNEL_OK")
</pallas_src>

<mosaic_0001>
module attributes {stable_mosaic.version = 11 : i64} {
  func.func @conv_pool_kernel(%arg0: i32, %arg1: memref<4x576x128xbf16, #tpu.memory_space<vmem>>, %arg2: memref<128x128xbf16, #tpu.memory_space<vmem>>, %arg3: memref<1x128xf32, #tpu.memory_space<vmem>>, %arg4: memref<576x128xf32, #tpu.memory_space<vmem>>) attributes {dimension_semantics = [#tpu.dimension_semantics<parallel>], iteration_bounds = array<i64: 2>, scalar_prefetch = 0 : i64, scratch_operands = 0 : i64, tpu.core_type = #tpu.core_type<tc>, window_params = [{transform_indices = @transform_0, window_bounds = array<i64: 4, 576, 128>}, {pipeline_mode = #tpu.pipeline_mode<synchronous>, transform_indices = @transform_1, window_bounds = array<i64: 128, 128>}, {pipeline_mode = #tpu.pipeline_mode<synchronous>, transform_indices = @transform_2, window_bounds = array<i64: 1, 128>}, {transform_indices = @transform_3, window_bounds = array<i64: 576, 128>}]} {
    %c0 = arith.constant 0 : index
    %c0_0 = arith.constant 0 : index
    %0 = vector.load %arg2[%c0, %c0_0] : memref<128x128xbf16, #tpu.memory_space<vmem>>, vector<128x128xbf16>
    %c0_1 = arith.constant 0 : index
    %c0_2 = arith.constant 0 : index
    %c0_3 = arith.constant 0 : index
    %1 = vector.load %arg1[%c0_1, %c0_2, %c0_3] : memref<4x576x128xbf16, #tpu.memory_space<vmem>>, vector<1x576x128xbf16>
    %2 = vector.shape_cast %1 : vector<1x576x128xbf16> to vector<576x128xbf16>
    %cst = arith.constant dense<0.000000e+00> : vector<576x128xf32>
    %3 = tpu.matmul %2, %0, %cst {dimension_numbers = #tpu.dot_dimension_numbers<[1], [0], [0], [1], [0, 0, 1, 1], [], []>} : vector<576x128xbf16>, vector<128x128xbf16>, vector<576x128xf32> -> vector<576x128xf32>
    %c1 = arith.constant 1 : index
    %c0_4 = arith.constant 0 : index
    %c0_5 = arith.constant 0 : index
    %4 = vector.load %arg1[%c1, %c0_4, %c0_5] : memref<4x576x128xbf16, #tpu.memory_space<vmem>>, vector<1x576x128xbf16>
    %5 = vector.shape_cast %4 : vector<1x576x128xbf16> to vector<576x128xbf16>
    %cst_6 = arith.constant dense<0.000000e+00> : vector<576x128xf32>
    %6 = tpu.matmul %5, %0, %cst_6 {dimension_numbers = #tpu.dot_dimension_numbers<[1], [0], [0], [1], [0, 0, 1, 1], [], []>} : vector<576x128xbf16>, vector<128x128xbf16>, vector<576x128xf32> -> vector<576x128xf32>
    %c2 = arith.constant 2 : index
    %c0_7 = arith.constant 0 : index
    %c0_8 = arith.constant 0 : index
    %7 = vector.load %arg1[%c2, %c0_7, %c0_8] : memref<4x576x128xbf16, #tpu.memory_space<vmem>>, vector<1x576x128xbf16>
    %8 = vector.shape_cast %7 : vector<1x576x128xbf16> to vector<576x128xbf16>
    %cst_9 = arith.constant dense<0.000000e+00> : vector<576x128xf32>
    %9 = tpu.matmul %8, %0, %cst_9 {dimension_numbers = #tpu.dot_dimension_numbers<[1], [0], [0], [1], [0, 0, 1, 1], [], []>} : vector<576x128xbf16>, vector<128x128xbf16>, vector<576x128xf32> -> vector<576x128xf32>
    %c3 = arith.constant 3 : index
    %c0_10 = arith.constant 0 : index
    %c0_11 = arith.constant 0 : index
    %10 = vector.load %arg1[%c3, %c0_10, %c0_11] : memref<4x576x128xbf16, #tpu.memory_space<vmem>>, vector<1x576x128xbf16>
    %11 = vector.shape_cast %10 : vector<1x576x128xbf16> to vector<576x128xbf16>
    %cst_12 = arith.constant dense<0.000000e+00> : vector<576x128xf32>
    %12 = tpu.matmul %11, %0, %cst_12 {dimension_numbers = #tpu.dot_dimension_numbers<[1], [0], [0], [1], [0, 0, 1, 1], [], []>} : vector<576x128xbf16>, vector<128x128xbf16>, vector<576x128xf32> -> vector<576x128xf32>
    %13 = arith.maximumf %3, %6 : vector<576x128xf32>
    %14 = arith.maximumf %9, %12 : vector<576x128xf32>
    %15 = arith.maximumf %13, %14 : vector<576x128xf32>
    %c0_13 = arith.constant 0 : index
    %c0_14 = arith.constant 0 : index
    %16 = vector.load %arg3[%c0_13, %c0_14] : memref<1x128xf32, #tpu.memory_space<vmem>>, vector<1x128xf32>
    %17 = vector.broadcast %16 : vector<1x128xf32> to vector<576x128xf32>
    %18 = arith.addf %15, %17 : vector<576x128xf32>
    %c0_15 = arith.constant 0 : index
    %c0_16 = arith.constant 0 : index
    %19 = vector.load %arg4[%c0_15, %c0_16] : memref<576x128xf32, #tpu.memory_space<vmem>>, vector<576x128xf32>
    tpu.vector_store %arg4[%c0_15, %c0_16], %18 {strides = array<i32>} : memref<576x128xf32, #tpu.memory_space<vmem>>, vector<576x128xf32>,
    return
  }
  func.func @transform_0(%arg0: i32) -> (i32, i32, i32) {
    %c0_i32 = arith.constant 0 : i32
    %c0_i32_0 = arith.constant 0 : i32
    %c0_i32_1 = arith.constant 0 : i32
    return %c0_i32, %arg0, %c0_i32_0 : i32, i32, i32
  }
  func.func @transform_1(%arg0: i32) -> (i32, i32) {
    %c0_i32 = arith.constant 0 : i32
    %c0_i32_0 = arith.constant 0 : i32
    %c0_i32_1 = arith.constant 0 : i32
    return %c0_i32, %c0_i32_0 : i32, i32
  }
  func.func @transform_2(%arg0: i32) -> (i32, i32) {
    %c0_i32 = arith.constant 0 : i32
    %c0_i32_0 = arith.constant 0 : i32
    %c0_i32_1 = arith.constant 0 : i32
    return %c0_i32, %c0_i32_0 : i32, i32
  }
  func.func @transform_3(%arg0: i32) -> (i32, i32) {
    %c0_i32 = arith.constant 0 : i32
    %c0_i32_0 = arith.constant 0 : i32
    return %arg0, %c0_i32 : i32, i32
  }
}

module attributes {stable_mosaic.version = 11 : i64} {
  func.func @conv_pool_kernel(%arg0: i32, %arg1: memref<4x128x800xbf16, #tpu.memory_space<vmem>>, %arg2: memref<800x128xbf16, #tpu.memory_space<vmem>>, %arg3: memref<1x128xf32, #tpu.memory_space<vmem>>, %arg4: memref<128x128xf32, #tpu.memory_space<vmem>>) attributes {dimension_semantics = [#tpu.dimension_semantics<parallel>], iteration_bounds = array<i64: 1>, scalar_prefetch = 0 : i64, scratch_operands = 0 : i64, tpu.core_type = #tpu.core_type<tc>, window_params = [{transform_indices = @transform_0, window_bounds = array<i64: 4, 128, 800>}, {pipeline_mode = #tpu.pipeline_mode<synchronous>, transform_indices = @transform_1, window_bounds = array<i64: 800, 128>}, {pipeline_mode = #tpu.pipeline_mode<synchronous>, transform_indices = @transform_2, window_bounds = array<i64: 1, 128>}, {transform_indices = @transform_3, window_bounds = array<i64: 128, 128>}]} {
    %c0 = arith.constant 0 : index
    %c0_0 = arith.constant 0 : index
    %0 = vector.load %arg2[%c0, %c0_0] : memref<800x128xbf16, #tpu.memory_space<vmem>>, vector<800x128xbf16>
    %c0_1 = arith.constant 0 : index
    %c0_2 = arith.constant 0 : index
    %c0_3 = arith.constant 0 : index
    %1 = vector.load %arg1[%c0_1, %c0_2, %c0_3] : memref<4x128x800xbf16, #tpu.memory_space<vmem>>, vector<1x128x800xbf16>
    %2 = vector.shape_cast %1 : vector<1x128x800xbf16> to vector<128x800xbf16>
    %cst = arith.constant dense<0.000000e+00> : vector<128x128xf32>
    %3 = tpu.matmul %2, %0, %cst {dimension_numbers = #tpu.dot_dimension_numbers<[1], [0], [0], [1], [0, 0, 1, 1], [], []>} : vector<128x800xbf16>, vector<800x128xbf16>, vector<128x128xf32> -> vector<128x128xf32>
    %c1 = arith.constant 1 : index
    %c0_4 = arith.constant 0 : index
    %c0_5 = arith.constant 0 : index
    %4 = vector.load %arg1[%c1, %c0_4, %c0_5] : memref<4x128x800xbf16, #tpu.memory_space<vmem>>, vector<1x128x800xbf16>
    %5 = vector.shape_cast %4 : vector<1x128x800xbf16> to vector<128x800xbf16>
    %cst_6 = arith.constant dense<0.000000e+00> : vector<128x128xf32>
    %6 = tpu.matmul %5, %0, %cst_6 {dimension_numbers = #tpu.dot_dimension_numbers<[1], [0], [0], [1], [0, 0, 1, 1], [], []>} : vector<128x800xbf16>, vector<800x128xbf16>, vector<128x128xf32> -> vector<128x128xf32>
    %c2 = arith.constant 2 : index
    %c0_7 = arith.constant 0 : index
    %c0_8 = arith.constant 0 : index
    %7 = vector.load %arg1[%c2, %c0_7, %c0_8] : memref<4x128x800xbf16, #tpu.memory_space<vmem>>, vector<1x128x800xbf16>
    %8 = vector.shape_cast %7 : vector<1x128x800xbf16> to vector<128x800xbf16>
    %cst_9 = arith.constant dense<0.000000e+00> : vector<128x128xf32>
    %9 = tpu.matmul %8, %0, %cst_9 {dimension_numbers = #tpu.dot_dimension_numbers<[1], [0], [0], [1], [0, 0, 1, 1], [], []>} : vector<128x800xbf16>, vector<800x128xbf16>, vector<128x128xf32> -> vector<128x128xf32>
    %c3 = arith.constant 3 : index
    %c0_10 = arith.constant 0 : index
    %c0_11 = arith.constant 0 : index
    %10 = vector.load %arg1[%c3, %c0_10, %c0_11] : memref<4x128x800xbf16, #tpu.memory_space<vmem>>, vector<1x128x800xbf16>
    %11 = vector.shape_cast %10 : vector<1x128x800xbf16> to vector<128x800xbf16>
    %cst_12 = arith.constant dense<0.000000e+00> : vector<128x128xf32>
    %12 = tpu.matmul %11, %0, %cst_12 {dimension_numbers = #tpu.dot_dimension_numbers<[1], [0], [0], [1], [0, 0, 1, 1], [], []>} : vector<128x800xbf16>, vector<800x128xbf16>, vector<128x128xf32> -> vector<128x128xf32>
    %13 = arith.maximumf %3, %6 : vector<128x128xf32>
    %14 = arith.maximumf %9, %12 : vector<128x128xf32>
    %15 = arith.maximumf %13, %14 : vector<128x128xf32>
    %c0_13 = arith.constant 0 : index
    %c0_14 = arith.constant 0 : index
    %16 = vector.load %arg3[%c0_13, %c0_14] : memref<1x128xf32, #tpu.memory_space<vmem>>, vector<1x128xf32>
    %17 = vector.broadcast %16 : vector<1x128xf32> to vector<128x128xf32>
    %18 = arith.addf %15, %17 : vector<128x128xf32>
    %c0_15 = arith.constant 0 : index
    %c0_16 = arith.constant 0 : index
    %19 = vector.load %arg4[%c0_15, %c0_16] : memref<128x128xf32, #tpu.memory_space<vmem>>, vector<128x128xf32>
    tpu.vector_store %arg4[%c0_15, %c0_16], %18 {strides = array<i32>} : memref<128x128xf32, #tpu.memory_space<vmem>>, vector<128x128xf32>,
    return
  }
  func.func @transform_0(%arg0: i32) -> (i32, i32, i32) {
    %c0_i32 = arith.constant 0 : i32
    %c0_i32_0 = arith.constant 0 : i32
    %c0_i32_1 = arith.constant 0 : i32
    return %c0_i32, %arg0, %c0_i32_0 : i32, i32, i32
  }
  func.func @transform_1(%arg0: i32) -> (i32, i32) {
    %c0_i32 = arith.constant 0 : i32
    %c0_i32_0 = arith.constant 0 : i32
    %c0_i32_1 = arith.constant 0 : i32
    return %c0_i32, %c0_i32_0 : i32, i32
  }
  func.func @transform_2(%arg0: i32) -> (i32, i32) {
    %c0_i32 = arith.constant 0 : i32
    %c0_i32_0 = arith.constant 0 : i32
    %c0_i32_1 = arith.constant 0 : i32
    return %c0_i32, %c0_i32_0 : i32, i32
  }
  func.func @transform_3(%arg0: i32) -> (i32, i32) {
    %c0_i32 = arith.constant 0 : i32
    %c0_i32_0 = arith.constant 0 : i32
    return %arg0, %c0_i32 : i32, i32
  }
}

module attributes {stable_mosaic.version = 11 : i64} {
  func.func @mlp_kernel(%arg0: i32, %arg1: memref<16x1024xbf16, #tpu.memory_space<vmem>>, %arg2: memref<1024x512xbf16, #tpu.memory_space<vmem>>, %arg3: memref<1x512xf32, #tpu.memory_space<vmem>>, %arg4: memref<512x128xf32, #tpu.memory_space<vmem>>, %arg5: memref<1x128xf32, #tpu.memory_space<vmem>>, %arg6: memref<16x128xf32, #tpu.memory_space<vmem>>) attributes {dimension_semantics = [#tpu.dimension_semantics<parallel>], iteration_bounds = array<i64: 1>, scalar_prefetch = 0 : i64, scratch_operands = 0 : i64, tpu.core_type = #tpu.core_type<tc>, window_params = [{transform_indices = @transform_0, window_bounds = array<i64: 16, 1024>}, {pipeline_mode = #tpu.pipeline_mode<synchronous>, transform_indices = @transform_1, window_bounds = array<i64: 1024, 512>}, {pipeline_mode = #tpu.pipeline_mode<synchronous>, transform_indices = @transform_2, window_bounds = array<i64: 1, 512>}, {pipeline_mode = #tpu.pipeline_mode<synchronous>, transform_indices = @transform_3, window_bounds = array<i64: 512, 128>}, {pipeline_mode = #tpu.pipeline_mode<synchronous>, transform_indices = @transform_4, window_bounds = array<i64: 1, 128>}, {transform_indices = @transform_5, window_bounds = array<i64: 16, 128>}]} {
    %c0 = arith.constant 0 : index
    %c0_0 = arith.constant 0 : index
    %0 = vector.load %arg1[%c0, %c0_0] : memref<16x1024xbf16, #tpu.memory_space<vmem>>, vector<16x1024xbf16>
    %c0_1 = arith.constant 0 : index
    %c0_2 = arith.constant 0 : index
    %1 = vector.load %arg2[%c0_1, %c0_2] : memref<1024x512xbf16, #tpu.memory_space<vmem>>, vector<1024x512xbf16>
    %cst = arith.constant dense<0.000000e+00> : vector<16x512xf32>
    %2 = tpu.matmul %0, %1, %cst {dimension_numbers = #tpu.dot_dimension_numbers<[1], [0], [0], [1], [0, 0, 1, 1], [], []>} : vector<16x1024xbf16>, vector<1024x512xbf16>, vector<16x512xf32> -> vector<16x512xf32>
    %c0_3 = arith.constant 0 : index
    %c0_4 = arith.constant 0 : index
    %3 = vector.load %arg3[%c0_3, %c0_4] : memref<1x512xf32, #tpu.memory_space<vmem>>, vector<1x512xf32>
    %4 = vector.broadcast %3 : vector<1x512xf32> to vector<16x512xf32>
    %5 = arith.addf %2, %4 : vector<16x512xf32>
    %cst_5 = arith.constant 0.000000e+00 : f32
    %6 = vector.broadcast %cst_5 : f32 to vector<16x512xf32>
    %7 = arith.maximumf %5, %6 : vector<16x512xf32>
    %c0_6 = arith.constant 0 : index
    %c0_7 = arith.constant 0 : index
    %8 = vector.load %arg4[%c0_6, %c0_7] : memref<512x128xf32, #tpu.memory_space<vmem>>, vector<512x128xf32>
    %cst_8 = arith.constant dense<0.000000e+00> : vector<16x128xf32>
    %9 = tpu.matmul %7, %8, %cst_8 {dimension_numbers = #tpu.dot_dimension_numbers<[1], [0], [0], [1], [0, 0, 1, 1], [], []>} : vector<16x512xf32>, vector<512x128xf32>, vector<16x128xf32> -> vector<16x128xf32>
    %c0_9 = arith.constant 0 : index
    %c0_10 = arith.constant 0 : index
    %10 = vector.load %arg5[%c0_9, %c0_10] : memref<1x128xf32, #tpu.memory_space<vmem>>, vector<1x128xf32>
    %11 = vector.broadcast %10 : vector<1x128xf32> to vector<16x128xf32>
    %12 = arith.addf %9, %11 : vector<16x128xf32>
    %c0_11 = arith.constant 0 : index
    %c0_12 = arith.constant 0 : index
    %13 = vector.load %arg6[%c0_11, %c0_12] : memref<16x128xf32, #tpu.memory_space<vmem>>, vector<16x128xf32>
    tpu.vector_store %arg6[%c0_11, %c0_12], %12 {strides = array<i32>} : memref<16x128xf32, #tpu.memory_space<vmem>>, vector<16x128xf32>,
    return
  }
  func.func @transform_0(%arg0: i32) -> (i32, i32) {
    %c0_i32 = arith.constant 0 : i32
    %c0_i32_0 = arith.constant 0 : i32
    return %arg0, %c0_i32 : i32, i32
  }
  func.func @transform_1(%arg0: i32) -> (i32, i32) {
    %c0_i32 = arith.constant 0 : i32
    %c0_i32_0 = arith.constant 0 : i32
    %c0_i32_1 = arith.constant 0 : i32
    return %c0_i32, %c0_i32_0 : i32, i32
  }
  func.func @transform_2(%arg0: i32) -> (i32, i32) {
    %c0_i32 = arith.constant 0 : i32
    %c0_i32_0 = arith.constant 0 : i32
    %c0_i32_1 = arith.constant 0 : i32
    return %c0_i32, %c0_i32_0 : i32, i32
  }
  func.func @transform_3(%arg0: i32) -> (i32, i32) {
    %c0_i32 = arith.constant 0 : i32
    %c0_i32_0 = arith.constant 0 : i32
    %c0_i32_1 = arith.constant 0 : i32
    return %c0_i32, %c0_i32_0 : i32, i32
  }
  func.func @transform_4(%arg0: i32) -> (i32, i32) {
    %c0_i32 = arith.constant 0 : i32
    %c0_i32_0 = arith.constant 0 : i32
    %c0_i32_1 = arith.constant 0 : i32
    return %c0_i32, %c0_i32_0 : i32, i32
  }
  func.func @transform_5(%arg0: i32) -> (i32, i32) {
    %c0_i32 = arith.constant 0 : i32
    %c0_i32_0 = arith.constant 0 : i32
    return %arg0, %c0_i32 : i32, i32
  }
}

</mosaic_0001>

<bundles_post_ra>
// kernel: mnist_tier_forward.3
= control target key start
LH: loop header
LB: loop body
LE: loop exit
PB: predicated region body
PF: predicated region fallthrough
CT: control target
= control target key end

     0   :  { %s5425_s12 = smov 0   ;;  %s5427_s13 = smov 0   ;;  %s6808_s0 = inlined_call_operand.vmem [shape: bf16[4,1152,128], index: 0, kind: input, shape index: {}]   ;;  %s6809_s1 = inlined_call_operand.vmem [shape: bf16[128,128], index: 1, kind: input, shape index: {}]   ;;  %s6810_s2 = inlined_call_operand.vmem [shape: f32[1,128], index: 2, kind: input, shape index: {}]   ;;  %s6811_s3 = inlined_call_operand.vmem [shape: f32[1152,128], index: 3, kind: output, shape index: {}]  }
   0x1   :  { %s5429_s14 = smov 0  }
   0x2 LB: > { %s4296_s15 = sadd.s32 4294967295, %s5403_s14   ;;  %s5442_s16 = sadd.s32 1, %s5403_s14   ;;  %s5403_s14 = sphi %s5429_s14, %s7168_s14   ;;  %s5399_s13 = sphi %s5427_s13, %s7167_s13   ;;  %s5395_s12 = sphi %s5425_s12, %s7166_s12  }
   0x3   : > { %s17_s17 = ssub.s32 %s5403_s14, %s5442_s16  ;;  %s20_s18 = sadd.s32 1, %s5399_s13 }
   0x4   : > { %p18_p0 = scmp.eq.s32.totalorder %s17_s17, 0  ;;  %p27_p1 = scmp.ne.s32.totalorder %s5399_s13, %s5395_s12 }
   0x5   : > { %p28_p2 = scmp.eq.s32.totalorder %s5403_s14, 0  ;;  %p4299_p4 = scmp.ge.s32.totalorder %s5403_s14, 2 }
   0x6   : > { %s5451_s19 = scalar_select %p18_p0, %s5399_s13, %s20_s18  }
   0x7   : > { %p29_p3 = por %p28_p2, %p27_p1  ;;  %127 = sbr.rel (%p4299_p4) target bundleno = 91 (0x5b), region = 24 }
   0xe   : > { %130 = sbr.rel (!%p29_p3) target bundleno = 91 (0x5b), region = 28  ;;  %s132_s20 = sand.u32 (%p29_p3), 1, %s5399_s13  }
   0xf   : > { %s4674_s21 = smul.u32 (%p29_p3), 288, %s5403_s14 }
  0x10   : > { %s5203_s22 = smul.u32 (%p29_p3), 1152, %s132_s20 }
  0x11   : > { %s5459_s25 = scalar_lea.vmem (%p29_p3), %s6808_s0, %s4674_s21 }
  0x12   : > { %v153_v0 = vld [vmem:[%s5459_s25] sm:$0xff] (%p29_p3)   ;;  %v157_v1 = vld [vmem:[%s5459_s25 + $0x8] sm:$0xff] (%p29_p3)   ;;  %v161_v2 = vld [vmem:[%s5459_s25 + $0x10] sm:$0xff] (%p29_p3)   ;;  %s5464_s26 = scalar_lea.vmem (%p29_p3), [#allocation2], %s5203_s22 }
  0x13   : > { %154 = vst [vmem:[%s5464_s26] sm:$0xff] (%p29_p3), %v153_v0   ;;  %158 = vst [vmem:[%s5464_s26 + $0x8] sm:$0xff] (%p29_p3), %v157_v1   ;;  %v165_v3 = vld [vmem:[%s5459_s25 + $0x18] sm:$0xff] (%p29_p3)   ;;  %v169_v4 = vld [vmem:[%s5459_s25 + $0x20] sm:$0xff] (%p29_p3)  }
  0x14   : > { %162 = vst [vmem:[%s5464_s26 + $0x10] sm:$0xff] (%p29_p3), %v161_v2   ;;  %v173_v5 = vld [vmem:[%s5459_s25 + $0x28] sm:$0xff] (%p29_p3)   ;;  %166 = vst [vmem:[%s5464_s26 + $0x18] sm:$0xff] (%p29_p3), %v165_v3   ;;  %v177_v6 = vld [vmem:[%s5459_s25 + $0x30] sm:$0xff] (%p29_p3)  }
  0x15   : > { %170 = vst [vmem:[%s5464_s26 + $0x20] sm:$0xff] %v169_v4   ;;  %174 = vst [vmem:[%s5464_s26 + $0x28] sm:$0xff] %v173_v5   ;;  %v181_v7 = vld [vmem:[%s5459_s25 + $0x38] sm:$0xff]   ;;  %v185_v8 = vld [vmem:[%s5459_s25 + $0x40] sm:$0xff]  }
  0x16   : > { %178 = vst [vmem:[%s5464_s26 + $0x30] sm:$0xff] %v177_v6   ;;  %182 = vst [vmem:[%s5464_s26 + $0x38] sm:$0xff] %v181_v7   ;;  %v189_v9 = vld [vmem:[%s5459_s25 + $0x48] sm:$0xff]   ;;  %v193_v10 = vld [vmem:[%s5459_s25 + $0x50] sm:$0xff]  }
  0x17   : > { %186 = vst [vmem:[%s5464_s26 + $0x40] sm:$0xff] %v185_v8   ;;  %v197_v11 = vld [vmem:[%s5459_s25 + $0x58] sm:$0xff]   ;;  %190 = vst [vmem:[%s5464_s26 + $0x48] sm:$0xff] %v189_v9   ;;  %v201_v12 = vld [vmem:[%s5459_s25 + $0x60] sm:$0xff]  }
  0x18   : > { %194 = vst [vmem:[%s5464_s26 + $0x50] sm:$0xff] %v193_v10   ;;  %198 = vst [vmem:[%s5464_s26 + $0x58] sm:$0xff] %v197_v11   ;;  %v205_v13 = vld [vmem:[%s5459_s25 + $0x68] sm:$0xff]   ;;  %v209_v14 = vld [vmem:[%s5459_s25 + $0x70] sm:$0xff]  }
  0x19   : > { %202 = vst [vmem:[%s5464_s26 + $0x60] sm:$0xff] %v201_v12   ;;  %206 = vst [vmem:[%s5464_s26 + $0x68] sm:$0xff] %v205_v13   ;;  %v213_v15 = vld [vmem:[%s5459_s25 + $0x78] sm:$0xff]   ;;  %v217_v16 = vld [vmem:[%s5459_s25 + $0x80] sm:$0xff]  }
  0x1a   : > { %210 = vst [vmem:[%s5464_s26 + $0x70] sm:$0xff] %v209_v14   ;;  %v221_v17 = vld [vmem:[%s5459_s25 + $0x88] sm:$0xff]   ;;  %214 = vst [vmem:[%s5464_s26 + $0x78] sm:$0xff] %v213_v15   ;;  %v225_v18 = vld [vmem:[%s5459_s25 + $0x90] sm:$0xff]  }
  0x1b   : > { %218 = vst [vmem:[%s5464_s26 + $0x80] sm:$0xff] %v217_v16   ;;  %222 = vst [vmem:[%s5464_s26 + $0x88] sm:$0xff] %v221_v17   ;;  %v229_v19 = vld [vmem:[%s5459_s25 + $0x98] sm:$0xff]   ;;  %v233_v20 = vld [vmem:[%s5459_s25 + $0xa0] sm:$0xff]  }
  0x1c   : > { %226 = vst [vmem:[%s5464_s26 + $0x90] sm:$0xff] %v225_v18   ;;  %230 = vst [vmem:[%s5464_s26 + $0x98] sm:$0xff] %v229_v19   ;;  %v237_v21 = vld [vmem:[%s5459_s25 + $0xa8] sm:$0xff]   ;;  %v241_v22 = vld [vmem:[%s5459_s25 + $0xb0] sm:$0xff]  }
  0x1d   : > { %234 = vst [vmem:[%s5464_s26 + $0xa0] sm:$0xff] %v233_v20   ;;  %v245_v23 = vld [vmem:[%s5459_s25 + $0xb8] sm:$0xff]   ;;  %238 = vst [vmem:[%s5464_s26 + $0xa8] sm:$0xff] %v237_v21   ;;  %v249_v24 = vld [vmem:[%s5459_s25 + $0xc0] sm:$0xff]  }
  0x1e   : > { %242 = vst [vmem:[%s5464_s26 + $0xb0] sm:$0xff] %v241_v22   ;;  %246 = vst [vmem:[%s5464_s26 + $0xb8] sm:$0xff] %v245_v23   ;;  %v253_v25 = vld [vmem:[%s5459_s25 + $0xc8] sm:$0xff]   ;;  %v257_v26 = vld [vmem:[%s5459_s25 + $0xd0] sm:$0xff]  }
  0x1f   : > { %250 = vst [vmem:[%s5464_s26 + $0xc0] sm:$0xff] %v249_v24   ;;  %254 = vst [vmem:[%s5464_s26 + $0xc8] sm:$0xff] %v253_v25   ;;  %v261_v27 = vld [vmem:[%s5459_s25 + $0xd8] sm:$0xff]   ;;  %v265_v28 = vld [vmem:[%s5459_s25 + $0xe0] sm:$0xff]  }
  0x20   : > { %258 = vst [vmem:[%s5464_s26 + $0xd0] sm:$0xff] %v257_v26   ;;  %v269_v29 = vld [vmem:[%s5459_s25 + $0xe8] sm:$0xff]   ;;  %262 = vst [vmem:[%s5464_s26 + $0xd8] sm:$0xff] %v261_v27   ;;  %v273_v30 = vld [vmem:[%s5459_s25 + $0xf0] sm:$0xff]  }
  0x21   : > { %266 = vst [vmem:[%s5464_s26 + $0xe0] sm:$0xff] %v265_v28   ;;  %270 = vst [vmem:[%s5464_s26 + $0xe8] sm:$0xff] %v269_v29   ;;  %v277_v31 = vld [vmem:[%s5459_s25 + $0xf8] sm:$0xff]   ;;  %v281_v32 = vld [vmem:[%s5459_s25 + $0x100] sm:$0xff]  }
  0x22   : > { %274 = vst [vmem:[%s5464_s26 + $0xf0] sm:$0xff] %v273_v30   ;;  %278 = vst [vmem:[%s5464_s26 + $0xf8] sm:$0xff] %v277_v31   ;;  %v285_v33 = vld [vmem:[%s5459_s25 + $0x108] sm:$0xff]   ;;  %v289_v34 = vld [vmem:[%s5459_s25 + $0x110] sm:$0xff]  }
  0x23   : > { %282 = vst [vmem:[%s5464_s26 + $0x100] sm:$0xff] %v281_v32   ;;  %v293_v35 = vld [vmem:[%s5459_s25 + $0x118] sm:$0xff]   ;;  %286 = vst [vmem:[%s5464_s26 + $0x108] sm:$0xff] %v285_v33   ;;  %v297_v36 = vld [vmem:[%s5459_s25 + $0x240] sm:$0xff]  }
  0x24   : > { %290 = vst [vmem:[%s5464_s26 + $0x110] sm:$0xff] %v289_v34   ;;  %294 = vst [vmem:[%s5464_s26 + $0x118] sm:$0xff] %v293_v35   ;;  %v301_v37 = vld [vmem:[%s5459_s25 + $0x248] sm:$0xff]   ;;  %v305_v38 = vld [vmem:[%s5459_s25 + $0x250] sm:$0xff]  }
  0x25   : > { %298 = vst [vmem:[%s5464_s26 + $0x120] sm:$0xff] %v297_v36   ;;  %302 = vst [vmem:[%s5464_s26 + $0x128] sm:$0xff] %v301_v37   ;;  %v309_v39 = vld [vmem:[%s5459_s25 + $0x258] sm:$0xff]   ;;  %v313_v40 = vld [vmem:[%s5459_s25 + $0x260] sm:$0xff]  }
  0x26   : > { %306 = vst [vmem:[%s5464_s26 + $0x130] sm:$0xff] %v305_v38   ;;  %v317_v41 = vld [vmem:[%s5459_s25 + $0x268] sm:$0xff]   ;;  %310 = vst [vmem:[%s5464_s26 + $0x138] sm:$0xff] %v309_v39   ;;  %v321_v42 = vld [vmem:[%s5459_s25 + $0x270] sm:$0xff]  }
  0x27   : > { %314 = vst [vmem:[%s5464_s26 + $0x140] sm:$0xff] %v313_v40   ;;  %318 = vst [vmem:[%s5464_s26 + $0x148] sm:$0xff] %v317_v41   ;;  %v325_v43 = vld [vmem:[%s5459_s25 + $0x278] sm:$0xff]   ;;  %v329_v44 = vld [vmem:[%s5459_s25 + $0x280] sm:$0xff]  }
  0x28   : > { %322 = vst [vmem:[%s5464_s26 + $0x150] sm:$0xff] %v321_v42   ;;  %326 = vst [vmem:[%s5464_s26 + $0x158] sm:$0xff] %v325_v43   ;;  %v333_v45 = vld [vmem:[%s5459_s25 + $0x288] sm:$0xff]   ;;  %v337_v46 = vld [vmem:[%s5459_s25 + $0x290] sm:$0xff]  }
  0x29   : > { %330 = vst [vmem:[%s5464_s26 + $0x160] sm:$0xff] %v329_v44   ;;  %v341_v47 = vld [vmem:[%s5459_s25 + $0x298] sm:$0xff]   ;;  %334 = vst [vmem:[%s5464_s26 + $0x168] sm:$0xff] %v333_v45   ;;  %v345_v48 = vld [vmem:[%s5459_s25 + $0x2a0] sm:$0xff]  }
  0x2a   : > { %338 = vst [vmem:[%s5464_s26 + $0x170] sm:$0xff] %v337_v46   ;;  %342 = vst [vmem:[%s5464_s26 + $0x178] sm:$0xff] %v341_v47   ;;  %v349_v49 = vld [vmem:[%s5459_s25 + $0x2a8] sm:$0xff]   ;;  %v353_v50 = vld [vmem:[%s5459_s25 + $0x2b0] sm:$0xff]  }
  0x2b   : > { %346 = vst [vmem:[%s5464_s26 + $0x180] sm:$0xff] %v345_v48   ;;  %350 = vst [vmem:[%s5464_s26 + $0x188] sm:$0xff] %v349_v49   ;;  %v357_v51 = vld [vmem:[%s5459_s25 + $0x2b8] sm:$0xff]   ;;  %v361_v52 = vld [vmem:[%s5459_s25 + $0x2c0] sm:$0xff]  }
  0x2c   : > { %354 = vst [vmem:[%s5464_s26 + $0x190] sm:$0xff] %v353_v50   ;;  %v365_v53 = vld [vmem:[%s5459_s25 + $0x2c8] sm:$0xff]   ;;  %358 = vst [vmem:[%s5464_s26 + $0x198] sm:$0xff] %v357_v51   ;;  %v369_v54 = vld [vmem:[%s5459_s25 + $0x2d0] sm:$0xff]  }
  0x2d   : > { %362 = vst [vmem:[%s5464_s26 + $0x1a0] sm:$0xff] %v361_v52   ;;  %366 = vst [vmem:[%s5464_s26 + $0x1a8] sm:$0xff] %v365_v53   ;;  %v373_v55 = vld [vmem:[%s5459_s25 + $0x2d8] sm:$0xff]   ;;  %v377_v56 = vld [vmem:[%s5459_s25 + $0x2e0] sm:$0xff]  }
  0x2e   : > { %370 = vst [vmem:[%s5464_s26 + $0x1b0] sm:$0xff] %v369_v54   ;;  %374 = vst [vmem:[%s5464_s26 + $0x1b8] sm:$0xff] %v373_v55   ;;  %v381_v57 = vld [vmem:[%s5459_s25 + $0x2e8] sm:$0xff]   ;;  %v385_v58 = vld [vmem:[%s5459_s25 + $0x2f0] sm:$0xff]  }
  0x2f   : > { %378 = vst [vmem:[%s5464_s26 + $0x1c0] sm:$0xff] %v377_v56   ;;  %v389_v59 = vld [vmem:[%s5459_s25 + $0x2f8] sm:$0xff]   ;;  %382 = vst [vmem:[%s5464_s26 + $0x1c8] sm:$0xff] %v381_v57   ;;  %v393_v60 = vld [vmem:[%s5459_s25 + $0x300] sm:$0xff]  }
  0x30   : > { %386 = vst [vmem:[%s5464_s26 + $0x1d0] sm:$0xff] %v385_v58   ;;  %390 = vst [vmem:[%s5464_s26 + $0x1d8] sm:$0xff] %v389_v59   ;;  %v397_v61 = vld [vmem:[%s5459_s25 + $0x308] sm:$0xff]   ;;  %v401_v62 = vld [vmem:[%s5459_s25 + $0x310] sm:$0xff]  }
  0x31   : > { %394 = vst [vmem:[%s5464_s26 + $0x1e0] sm:$0xff] %v393_v60   ;;  %398 = vst [vmem:[%s5464_s26 + $0x1e8] sm:$0xff] %v397_v61   ;;  %v405_v63 = vld [vmem:[%s5459_s25 + $0x318] sm:$0xff]   ;;  %v409_v0 = vld [vmem:[%s5459_s25 + $0x320] sm:$0xff]  }
  0x32   : > { %402 = vst [vmem:[%s5464_s26 + $0x1f0] sm:$0xff] %v401_v62   ;;  %v413_v1 = vld [vmem:[%s5459_s25 + $0x328] sm:$0xff]   ;;  %406 = vst [vmem:[%s5464_s26 + $0x1f8] sm:$0xff] %v405_v63   ;;  %v417_v2 = vld [vmem:[%s5459_s25 + $0x330] sm:$0xff]  }
  0x33   : > { %410 = vst [vmem:[%s5464_s26 + $0x200] sm:$0xff] %v409_v0   ;;  %414 = vst [vmem:[%s5464_s26 + $0x208] sm:$0xff] %v413_v1   ;;  %v421_v3 = vld [vmem:[%s5459_s25 + $0x338] sm:$0xff]   ;;  %v425_v4 = vld [vmem:[%s5459_s25 + $0x340] sm:$0xff]  }
  0x34   : > { %418 = vst [vmem:[%s5464_s26 + $0x210] sm:$0xff] %v417_v2   ;;  %422 = vst [vmem:[%s5464_s26 + $0x218] sm:$0xff] %v421_v3   ;;  %v429_v5 = vld [vmem:[%s5459_s25 + $0x348] sm:$0xff]   ;;  %v433_v6 = vld [vmem:[%s5459_s25 + $0x350] sm:$0xff]  }
  0x35   : > { %426 = vst [vmem:[%s5464_s26 + $0x220] sm:$0xff] %v425_v4   ;;  %v437_v7 = vld [vmem:[%s5459_s25 + $0x358] sm:$0xff]   ;;  %430 = vst [vmem:[%s5464_s26 + $0x228] sm:$0xff] %v429_v5   ;;  %v441_v8 = vld [vmem:[%s5459_s25 + $0x480] sm:$0xff]  }
  0x36   : > { %434 = vst [vmem:[%s5464_s26 + $0x230] sm:$0xff] %v433_v6   ;;  %438 = vst [vmem:[%s5464_s26 + $0x238] sm:$0xff] %v437_v7   ;;  %v445_v9 = vld [vmem:[%s5459_s25 + $0x488] sm:$0xff]   ;;  %v449_v10 = vld [vmem:[%s5459_s25 + $0x490] sm:$0xff]  }
  0x37   : > { %442 = vst [vmem:[%s5464_s26 + $0x240] sm:$0xff] %v441_v8   ;;  %446 = vst [vmem:[%s5464_s26 + $0x248] sm:$0xff] %v445_v9   ;;  %v453_v11 = vld [vmem:[%s5459_s25 + $0x498] sm:$0xff]   ;;  %v457_v12 = vld [vmem:[%s5459_s25 + $0x4a0] sm:$0xff]  }
  0x38   : > { %450 = vst [vmem:[%s5464_s26 + $0x250] sm:$0xff] %v449_v10   ;;  %v461_v13 = vld [vmem:[%s5459_s25 + $0x4a8] sm:$0xff]   ;;  %454 = vst [vmem:[%s5464_s26 + $0x258] sm:$0xff] %v453_v11   ;;  %v465_v14 = vld [vmem:[%s5459_s25 + $0x4b0] sm:$0xff]  }
  0x39   : > { %458 = vst [vmem:[%s5464_s26 + $0x260] sm:$0xff] %v457_v12   ;;  %462 = vst [vmem:[%s5464_s26 + $0x268] sm:$0xff] %v461_v13   ;;  %v469_v15 = vld [vmem:[%s5459_s25 + $0x4b8] sm:$0xff]   ;;  %v473_v16 = vld [vmem:[%s5459_s25 + $0x4c0] sm:$0xff]  }
  0x3a   : > { %466 = vst [vmem:[%s5464_s26 + $0x270] sm:$0xff] %v465_v14   ;;  %470 = vst [vmem:[%s5464_s26 + $0x278] sm:$0xff] %v469_v15   ;;  %v477_v17 = vld [vmem:[%s5459_s25 + $0x4c8] sm:$0xff]   ;;  %v481_v18 = vld [vmem:[%s5459_s25 + $0x4d0] sm:$0xff]  }
  0x3b   : > { %474 = vst [vmem:[%s5464_s26 + $0x280] sm:$0xff] %v473_v16   ;;  %v485_v19 = vld [vmem:[%s5459_s25 + $0x4d8] sm:$0xff]   ;;  %478 = vst [vmem:[%s5464_s26 + $0x288] sm:$0xff] %v477_v17   ;;  %v489_v20 = vld [vmem:[%s5459_s25 + $0x4e0] sm:$0xff]  }
  0x3c   : > { %482 = vst [vmem:[%s5464_s26 + $0x290] sm:$0xff] %v481_v18   ;;  %486 = vst [vmem:[%s5464_s26 + $0x298] sm:$0xff] %v485_v19   ;;  %v493_v21 = vld [vmem:[%s5459_s25 + $0x4e8] sm:$0xff]   ;;  %v497_v22 = vld [vmem:[%s5459_s25 + $0x4f0] sm:$0xff]  }
  0x3d   : > { %490 = vst [vmem:[%s5464_s26 + $0x2a0] sm:$0xff] %v489_v20   ;;  %494 = vst [vmem:[%s5464_s26 + $0x2a8] sm:$0xff] %v493_v21   ;;  %v501_v23 = vld [vmem:[%s5459_s25 + $0x4f8] sm:$0xff]   ;;  %v505_v24 = vld [vmem:[%s5459_s25 + $0x500] sm:$0xff]  }
  0x3e   : > { %498 = vst [vmem:[%s5464_s26 + $0x2b0] sm:$0xff] %v497_v22   ;;  %v509_v25 = vld [vmem:[%s5459_s25 + $0x508] sm:$0xff]   ;;  %502 = vst [vmem:[%s5464_s26 + $0x2b8] sm:$0xff] %v501_v23   ;;  %v513_v26 = vld [vmem:[%s5459_s25 + $0x510] sm:$0xff]  }
  0x3f   : > { %506 = vst [vmem:[%s5464_s26 + $0x2c0] sm:$0xff] %v505_v24   ;;  %510 = vst [vmem:[%s5464_s26 + $0x2c8] sm:$0xff] %v509_v25   ;;  %v517_v27 = vld [vmem:[%s5459_s25 + $0x518] sm:$0xff]   ;;  %v521_v28 = vld [vmem:[%s5459_s25 + $0x520] sm:$0xff]  }
  0x40   : > { %514 = vst [vmem:[%s5464_s26 + $0x2d0] sm:$0xff] %v513_v26   ;;  %518 = vst [vmem:[%s5464_s26 + $0x2d8] sm:$0xff] %v517_v27   ;;  %v525_v29 = vld [vmem:[%s5459_s25 + $0x528] sm:$0xff]   ;;  %v529_v30 = vld [vmem:[%s5459_s25 + $0x530] sm:$0xff]  }
  0x41   : > { %522 = vst [vmem:[%s5464_s26 + $0x2e0] sm:$0xff] %v521_v28   ;;  %v533_v31 = vld [vmem:[%s5459_s25 + $0x538] sm:$0xff]   ;;  %526 = vst [vmem:[%s5464_s26 + $0x2e8] sm:$0xff] %v525_v29   ;;  %v537_v32 = vld [vmem:[%s5459_s25 + $0x540] sm:$0xff]  }
  0x42   : > { %530 = vst [vmem:[%s5464_s26 + $0x2f0] sm:$0xff] %v529_v30   ;;  %534 = vst [vmem:[%s5464_s26 + $0x2f8] sm:$0xff] %v533_v31   ;;  %v541_v33 = vld [vmem:[%s5459_s25 + $0x548] sm:$0xff]   ;;  %v545_v34 = vld [vmem:[%s5459_s25 + $0x550] sm:$0xff]  }
  0x43   : > { %538 = vst [vmem:[%s5464_s26 + $0x300] sm:$0xff] %v537_v32   ;;  %542 = vst [vmem:[%s5464_s26 + $0x308] sm:$0xff] %v541_v33   ;;  %v549_v35 = vld [vmem:[%s5459_s25 + $0x558] sm:$0xff]   ;;  %v553_v36 = vld [vmem:[%s5459_s25 + $0x560] sm:$0xff]  }
  0x44   : > { %546 = vst [vmem:[%s5464_s26 + $0x310] sm:$0xff] %v545_v34   ;;  %v557_v37 = vld [vmem:[%s5459_s25 + $0x568] sm:$0xff]   ;;  %550 = vst [vmem:[%s5464_s26 + $0x318] sm:$0xff] %v549_v35   ;;  %v561_v38 = vld [vmem:[%s5459_s25 + $0x570] sm:$0xff]  }
  0x45   : > { %554 = vst [vmem:[%s5464_s26 + $0x320] sm:$0xff] %v553_v36   ;;  %558 = vst [vmem:[%s5464_s26 + $0x328] sm:$0xff] %v557_v37   ;;  %v565_v39 = vld [vmem:[%s5459_s25 + $0x578] sm:$0xff]   ;;  %v569_v40 = vld [vmem:[%s5459_s25 + $0x580] sm:$0xff]  }
  0x46   : > { %562 = vst [vmem:[%s5464_s26 + $0x330] sm:$0xff] %v561_v38   ;;  %566 = vst [vmem:[%s5464_s26 + $0x338] sm:$0xff] %v565_v39   ;;  %v573_v41 = vld [vmem:[%s5459_s25 + $0x588] sm:$0xff]   ;;  %v577_v42 = vld [vmem:[%s5459_s25 + $0x590] sm:$0xff]  }
  0x47   : > { %570 = vst [vmem:[%s5464_s26 + $0x340] sm:$0xff] %v569_v40   ;;  %v581_v43 = vld [vmem:[%s5459_s25 + $0x598] sm:$0xff]   ;;  %574 = vst [vmem:[%s5464_s26 + $0x348] sm:$0xff] %v573_v41   ;;  %v585_v44 = vld [vmem:[%s5459_s25 + $0x6c0] sm:$0xff]  }
  0x48   : > { %578 = vst [vmem:[%s5464_s26 + $0x350] sm:$0xff] %v577_v42   ;;  %582 = vst [vmem:[%s5464_s26 + $0x358] sm:$0xff] %v581_v43   ;;  %v589_v45 = vld [vmem:[%s5459_s25 + $0x6c8] sm:$0xff]   ;;  %v593_v46 = vld [vmem:[%s5459_s25 + $0x6d0] sm:$0xff]  }
  0x49   : > { %586 = vst [vmem:[%s5464_s26 + $0x360] sm:$0xff] %v585_v44   ;;  %590 = vst [vmem:[%s5464_s26 + $0x368] sm:$0xff] %v589_v45   ;;  %v597_v47 = vld [vmem:[%s5459_s25 + $0x6d8] sm:$0xff]   ;;  %v601_v48 = vld [vmem:[%s5459_s25 + $0x6e0] sm:$0xff]  }
  0x4a   : > { %594 = vst [vmem:[%s5464_s26 + $0x370] sm:$0xff] %v593_v46   ;;  %v605_v49 = vld [vmem:[%s5459_s25 + $0x6e8] sm:$0xff]   ;;  %598 = vst [vmem:[%s5464_s26 + $0x378] sm:$0xff] %v597_v47   ;;  %v609_v50 = vld [vmem:[%s5459_s25 + $0x6f0] sm:$0xff]  }
  0x4b   : > { %602 = vst [vmem:[%s5464_s26 + $0x380] sm:$0xff] %v601_v48   ;;  %606 = vst [vmem:[%s5464_s26 + $0x388] sm:$0xff] %v605_v49   ;;  %v613_v51 = vld [vmem:[%s5459_s25 + $0x6f8] sm:$0xff]   ;;  %v617_v52 = vld [vmem:[%s5459_s25 + $0x700] sm:$0xff]  }
  0x4c   : > { %610 = vst [vmem:[%s5464_s26 + $0x390] sm:$0xff] %v609_v50   ;;  %614 = vst [vmem:[%s5464_s26 + $0x398] sm:$0xff] %v613_v51   ;;  %v621_v53 = vld [vmem:[%s5459_s25 + $0x708] sm:$0xff]   ;;  %v625_v54 = vld [vmem:[%s5459_s25 + $0x710] sm:$0xff]  }
  0x4d   : > { %618 = vst [vmem:[%s5464_s26 + $0x3a0] sm:$0xff] %v617_v52   ;;  %v629_v55 = vld [vmem:[%s5459_s25 + $0x718] sm:$0xff]   ;;  %622 = vst [vmem:[%s5464_s26 + $0x3a8] sm:$0xff] %v621_v53   ;;  %v633_v56 = vld [vmem:[%s5459_s25 + $0x720] sm:$0xff]  }
  0x4e   : > { %626 = vst [vmem:[%s5464_s26 + $0x3b0] sm:$0xff] %v625_v54   ;;  %630 = vst [vmem:[%s5464_s26 + $0x3b8] sm:$0xff] %v629_v55   ;;  %v637_v57 = vld [vmem:[%s5459_s25 + $0x728] sm:$0xff]   ;;  %v641_v58 = vld [vmem:[%s5459_s25 + $0x730] sm:$0xff]  }
  0x4f   : > { %634 = vst [vmem:[%s5464_s26 + $0x3c0] sm:$0xff] %v633_v56   ;;  %638 = vst [vmem:[%s5464_s26 + $0x3c8] sm:$0xff] %v637_v57   ;;  %v645_v59 = vld [vmem:[%s5459_s25 + $0x738] sm:$0xff]   ;;  %v649_v60 = vld [vmem:[%s5459_s25 + $0x740] sm:$0xff]  }
  0x50   : > { %642 = vst [vmem:[%s5464_s26 + $0x3d0] sm:$0xff] %v641_v58   ;;  %v653_v61 = vld [vmem:[%s5459_s25 + $0x748] sm:$0xff]   ;;  %646 = vst [vmem:[%s5464_s26 + $0x3d8] sm:$0xff] %v645_v59   ;;  %v657_v62 = vld [vmem:[%s5459_s25 + $0x750] sm:$0xff]  }
  0x51   : > { %650 = vst [vmem:[%s5464_s26 + $0x3e0] sm:$0xff] %v649_v60   ;;  %654 = vst [vmem:[%s5464_s26 + $0x3e8] sm:$0xff] %v653_v61   ;;  %v661_v63 = vld [vmem:[%s5459_s25 + $0x758] sm:$0xff]   ;;  %v665_v0 = vld [vmem:[%s5459_s25 + $0x760] sm:$0xff]  }
  0x52   : > { %658 = vst [vmem:[%s5464_s26 + $0x3f0] sm:$0xff] %v657_v62   ;;  %662 = vst [vmem:[%s5464_s26 + $0x3f8] sm:$0xff] %v661_v63   ;;  %v669_v1 = vld [vmem:[%s5459_s25 + $0x768] sm:$0xff]   ;;  %v673_v2 = vld [vmem:[%s5459_s25 + $0x770] sm:$0xff]  }
  0x53   : > { %666 = vst [vmem:[%s5464_s26 + $0x400] sm:$0xff] %v665_v0   ;;  %v677_v3 = vld [vmem:[%s5459_s25 + $0x778] sm:$0xff]   ;;  %670 = vst [vmem:[%s5464_s26 + $0x408] sm:$0xff] %v669_v1   ;;  %v681_v4 = vld [vmem:[%s5459_s25 + $0x780] sm:$0xff]  }
  0x54   : > { %674 = vst [vmem:[%s5464_s26 + $0x410] sm:$0xff] %v673_v2   ;;  %678 = vst [vmem:[%s5464_s26 + $0x418] sm:$0xff] %v677_v3   ;;  %v685_v5 = vld [vmem:[%s5459_s25 + $0x788] sm:$0xff]   ;;  %v689_v6 = vld [vmem:[%s5459_s25 + $0x790] sm:$0xff]  }
  0x55   : > { %682 = vst [vmem:[%s5464_s26 + $0x420] sm:$0xff] %v681_v4   ;;  %686 = vst [vmem:[%s5464_s26 + $0x428] sm:$0xff] %v685_v5   ;;  %v693_v7 = vld [vmem:[%s5459_s25 + $0x798] sm:$0xff]   ;;  %v697_v8 = vld [vmem:[%s5459_s25 + $0x7a0] sm:$0xff]  }
  0x56   : > { %690 = vst [vmem:[%s5464_s26 + $0x430] sm:$0xff] %v689_v6   ;;  %v701_v9 = vld [vmem:[%s5459_s25 + $0x7a8] sm:$0xff]   ;;  %694 = vst [vmem:[%s5464_s26 + $0x438] sm:$0xff] %v693_v7   ;;  %v705_v10 = vld [vmem:[%s5459_s25 + $0x7b0] sm:$0xff]  }
  0x57   : > { %698 = vst [vmem:[%s5464_s26 + $0x440] sm:$0xff] %v697_v8   ;;  %702 = vst [vmem:[%s5464_s26 + $0x448] sm:$0xff] %v701_v9   ;;  %v709_v11 = vld [vmem:[%s5459_s25 + $0x7b8] sm:$0xff]   ;;  %v713_v12 = vld [vmem:[%s5459_s25 + $0x7c0] sm:$0xff]  }
  0x58   : > { %706 = vst [vmem:[%s5464_s26 + $0x450] sm:$0xff] %v705_v10   ;;  %710 = vst [vmem:[%s5464_s26 + $0x458] sm:$0xff] %v709_v11   ;;  %v717_v13 = vld [vmem:[%s5459_s25 + $0x7c8] sm:$0xff]   ;;  %v721_v14 = vld [vmem:[%s5459_s25 + $0x7d0] sm:$0xff]  }
  0x59   : > { %714 = vst [vmem:[%s5464_s26 + $0x460] sm:$0xff] %v713_v12   ;;  %v725_v15 = vld [vmem:[%s5459_s25 + $0x7d8] sm:$0xff]   ;;  %718 = vst [vmem:[%s5464_s26 + $0x468] sm:$0xff] %v717_v13  }
  0x5a   : > { %722 = vst [vmem:[%s5464_s26 + $0x470] sm:$0xff] %v721_v14   ;;  %726 = vst [vmem:[%s5464_s26 + $0x478] sm:$0xff] %v725_v15  }
  0x5b PF: > { %p4301_p5 = scmp.ge.s32.totalorder %s5403_s14, 1  ;;  %p1326_p6 = scmp.lt.s32.totalorder %s5403_s14, 3 }
  0x5d   : > { %p1327_p7 = pnand %p4301_p5, %p1326_p6 }
  0x5f   : > { %1330 = sbr.rel (%p1327_p7) target bundleno = 637 (0x27d), region = 69 }
  0x66   : > { %v5229_v16 = vld [vmem:[%s6809_s1] sm:$0xff]   ;;  %s1333_s29 = sand.u32 1, %s5395_s12   ;;  %v5760_v17 = vld [vmem:[%s6809_s1 + $0x8] sm:$0xff]   ;;  %v5767_v18 = vld [vmem:[%s6809_s1 + $0x10] sm:$0xff]   ;;  %s1357_s24 = smul.u32 72, %s4296_s15 }
  0x67   : > { %s5204_s5 = smul.u32 1152, %s1333_s29  ;;  %4851 = vmatprep.subr.bf16.mxu0 %v5229_v16  ;;  %4939 = vmatprep.subr.bf16.mxu1 %v5229_v16  ;;  %v5774_v19 = vld [vmem:[%s6809_s1 + $0x18] sm:$0xff]   ;;  %v5789_v22 = vld [vmem:[%s6809_s1 + $0x20] sm:$0xff]   ;;  %v5798_v23 = vld [vmem:[%s6809_s1 + $0x28] sm:$0xff]  }
  0x68   : > { %4852 = vmatpush3.bf16.msra.mxu0 %v5229_v16  ;;  %4940 = vmatpush3.bf16.msra.mxu1 %v5229_v16  ;;  %v5807_v24 = vld [vmem:[%s6809_s1 + $0x30] sm:$0xff]   ;;  %v5816_v25 = vld [vmem:[%s6809_s1 + $0x38] sm:$0xff]   ;;  %p1358_p8 = scmp.lt.s32.totalorder %s1357_s24, 143 }
  0x69   : > { %4853 = vmatprep.subr.bf16.mxu0 %v5760_v17  ;;  %4941 = vmatprep.subr.bf16.mxu1 %v5760_v17  ;;  %s5778_s10 = scalar_lea.vmem [#allocation2], %s5204_s5 }
  0x6a   : > { %v5237_v20 = vld [vmem:[%s5778_s10] sm:$0xff]   ;;  %v5239_v26 = vld [vmem:[%s5778_s10 + $0x8] sm:$0xff]   ;;  %v5241_v28 = vld [vmem:[%s5778_s10 + $0x10] sm:$0xff]   ;;  %s7170_s24 = smov (!%p1358_p8, %s1357_s24), 143 }
  0x6b   : > { %v5238_v21 = vld [vmem:[%s5778_s10 + $0x120] sm:$0xff]   ;;  %4867 = vmatprep.mubr.bf16.mxu0 %v5237_v20  ;;  %v5240_v27 = vld [vmem:[%s5778_s10 + $0x128] sm:$0xff]   ;;  %v5242_v29 = vld [vmem:[%s5778_s10 + $0x130] sm:$0xff]   ;;  %s4302_s14 = sshll.u32 %s7170_s24, 3 }
  0x6c   : > { %4854 = vmatpush3.bf16.msra.mxu0 %v5760_v17  ;;  %4942 = vmatpush3.bf16.msra.mxu1 %v5760_v17  ;;  %v5243_v30 = vld [vmem:[%s5778_s10 + $0x18] sm:$0xff]   ;;  %v5245_v32 = vld [vmem:[%s5778_s10 + $0x20] sm:$0xff]   ;;  %v5247_v34 = vld [vmem:[%s5778_s10 + $0x28] sm:$0xff]   ;;  %s6439_s28 = scalar_lea.vmem %s6811_s3, %s4302_s14 }
  0x6d   : > { %4855 = vmatprep.subr.bf16.mxu0 %v5767_v18  ;;  %4943 = vmatprep.subr.bf16.mxu1 %v5767_v18  ;;  %v5244_v31 = vld [vmem:[%s5778_s10 + $0x138] sm:$0xff]   ;;  %v5246_v33 = vld [vmem:[%s5778_s10 + $0x140] sm:$0xff]   ;;  %v5248_v35 = vld [vmem:[%s5778_s10 + $0x148] sm:$0xff]  }
  0x6e   : > { %4955 = vmatprep.mubr.bf16.mxu1 %v5238_v21  ;;  %v5249_v36 = vld [vmem:[%s5778_s10 + $0x30] sm:$0xff]   ;;  %v5251_v38 = vld [vmem:[%s5778_s10 + $0x38] sm:$0xff]   ;;  %v5253_v40 = vld [vmem:[%s5778_s10 + $0x40] sm:$0xff]  }
  0x6f   : > { %v5250_v37 = vld [vmem:[%s5778_s10 + $0x150] sm:$0xff]   ;;  %v5252_v39 = vld [vmem:[%s5778_s10 + $0x158] sm:$0xff]   ;;  %v5254_v41 = vld [vmem:[%s5778_s10 + $0x160] sm:$0xff]  }
  0x70   : > { %4856 = vmatpush3.bf16.msra.mxu0 %v5767_v18  ;;  %4944 = vmatpush3.bf16.msra.mxu1 %v5767_v18  ;;  %v5255_v42 = vld [vmem:[%s5778_s10 + $0x48] sm:$0xff]   ;;  %v5257_v44 = vld [vmem:[%s5778_s10 + $0x50] sm:$0xff]   ;;  %v5259_v46 = vld [vmem:[%s5778_s10 + $0x58] sm:$0xff]  }
  0x71   : > { %4857 = vmatprep.subr.bf16.mxu0 %v5774_v19  ;;  %4945 = vmatprep.subr.bf16.mxu1 %v5774_v19  ;;  %v5256_v43 = vld [vmem:[%s5778_s10 + $0x168] sm:$0xff]   ;;  %v5258_v45 = vld [vmem:[%s5778_s10 + $0x170] sm:$0xff]   ;;  %v5260_v47 = vld [vmem:[%s5778_s10 + $0x178] sm:$0xff]  }
  0x72   : > { %v5261_v48 = vld [vmem:[%s5778_s10 + $0x60] sm:$0xff]   ;;  %v5263_v50 = vld [vmem:[%s5778_s10 + $0x68] sm:$0xff]   ;;  %v5265_v52 = vld [vmem:[%s5778_s10 + $0x70] sm:$0xff]  }
  0x73   : > { %v5262_v49 = vld [vmem:[%s5778_s10 + $0x180] sm:$0xff]   ;;  %v5264_v51 = vld [vmem:[%s5778_s10 + $0x188] sm:$0xff]   ;;  %v5266_v53 = vld [vmem:[%s5778_s10 + $0x190] sm:$0xff]  }
  0x74   : > { %4858 = vmatpush3.bf16.msra.mxu0 %v5774_v19  ;;  %4946 = vmatpush3.bf16.msra.mxu1 %v5774_v19  ;;  %v5267_v54 = vld [vmem:[%s5778_s10 + $0x78] sm:$0xff]   ;;  %v5269_v56 = vld [vmem:[%s5778_s10 + $0x80] sm:$0xff]   ;;  %v5271_v58 = vld [vmem:[%s5778_s10 + $0x88] sm:$0xff]  }
  0x75   : > { %4859 = vmatprep.subr.bf16.mxu0 %v5789_v22  ;;  %4947 = vmatprep.subr.bf16.mxu1 %v5789_v22  ;;  %v5268_v55 = vld [vmem:[%s5778_s10 + $0x198] sm:$0xff]   ;;  %v5270_v57 = vld [vmem:[%s5778_s10 + $0x1a0] sm:$0xff]   ;;  %v5272_v59 = vld [vmem:[%s5778_s10 + $0x1a8] sm:$0xff]  }
  0x76   : > { %v5273_v60 = vld [vmem:[%s5778_s10 + $0x90] sm:$0xff]   ;;  %v5275_v62 = vld [vmem:[%s5778_s10 + $0x98] sm:$0xff]   ;;  %v5277_v0 = vld [vmem:[%s5778_s10 + $0xa0] sm:$0xff]  }
  0x77   : > { %v5274_v61 = vld [vmem:[%s5778_s10 + $0x1b0] sm:$0xff]   ;;  %v5276_v63 = vld [vmem:[%s5778_s10 + $0x1b8] sm:$0xff]   ;;  %v5278_v1 = vld [vmem:[%s5778_s10 + $0x1c0] sm:$0xff]  }
  0x78   : > { %4860 = vmatpush3.bf16.msra.mxu0 %v5789_v22  ;;  %4948 = vmatpush3.bf16.msra.mxu1 %v5789_v22  ;;  %v5279_v2 = vld [vmem:[%s5778_s10 + $0xa8] sm:$0xff]   ;;  %v5281_v4 = vld [vmem:[%s5778_s10 + $0xb0] sm:$0xff]   ;;  %v5283_v6 = vld [vmem:[%s5778_s10 + $0xb8] sm:$0xff]  }
  0x79   : > { %4861 = vmatprep.subr.bf16.mxu0 %v5798_v23  ;;  %4949 = vmatprep.subr.bf16.mxu1 %v5798_v23  ;;  %v5280_v3 = vld [vmem:[%s5778_s10 + $0x1c8] sm:$0xff]   ;;  %v5282_v5 = vld [vmem:[%s5778_s10 + $0x1d0] sm:$0xff]   ;;  %v5284_v7 = vld [vmem:[%s5778_s10 + $0x1d8] sm:$0xff]  }
  0x7a   : > { %v5285_v8 = vld [vmem:[%s5778_s10 + $0xc0] sm:$0xff]   ;;  %v5287_v10 = vld [vmem:[%s5778_s10 + $0xc8] sm:$0xff]   ;;  %v5289_v12 = vld [vmem:[%s5778_s10 + $0xd0] sm:$0xff]  }
  0x7b   : > { %v5286_v9 = vld [vmem:[%s5778_s10 + $0x1e0] sm:$0xff]   ;;  %v5288_v11 = vld [vmem:[%s5778_s10 + $0x1e8] sm:$0xff]   ;;  %v5290_v13 = vld [vmem:[%s5778_s10 + $0x1f0] sm:$0xff]  }
  0x7c   : > { %4862 = vmatpush3.bf16.msra.mxu0 %v5798_v23  ;;  %4950 = vmatpush3.bf16.msra.mxu1 %v5798_v23  ;;  %v5291_v14 = vld [vmem:[%s5778_s10 + $0xd8] sm:$0xff]   ;;  %v5297_v20 = vld [vmem:[%s5778_s10 + $0xf0] sm:$0xff]  }
  0x7d   : > { %4863 = vmatprep.subr.bf16.mxu0 %v5807_v24  ;;  %4951 = vmatprep.subr.bf16.mxu1 %v5807_v24  ;;  %v5292_v15 = vld [vmem:[%s5778_s10 + $0x1f8] sm:$0xff]   ;;  %v5298_v21 = vld [vmem:[%s5778_s10 + $0x210] sm:$0xff]  }
  0x80   : > { %4864 = vmatpush3.bf16.msra.mxu0 %v5807_v24  ;;  %4952 = vmatpush3.bf16.msra.mxu1 %v5807_v24 }
  0x81   : > { %4865 = vmatprep.subr.bf16.mxu0 %v5816_v25  ;;  %4953 = vmatprep.subr.bf16.mxu1 %v5816_v25 }
  0x84   : > { %4866 = vmatpush3.bf16.msra.mxu0 %v5816_v25  ;;  %4954 = vmatpush3.bf16.msra.mxu1 %v5816_v25 }
  0x85   : > { %5027 = vmatprep.subr.bf16.mxu0 %v5229_v16  ;;  %5115 = vmatprep.subr.bf16.mxu1 %v5229_v16 }
  0x87   : > { %4868 = vmatmul.mubr.bf16.vlgmr.msra.gmra.mrb[0].mxu0 %v5239_v26  ;;  %4956 = vmatmul.mubr.bf16.vlgmr.msra.gmra.mrb[0].mxu1 %v5240_v27  ;;  %v5303_v26 = vld [vmem:[%s5778_s10 + $0x108] sm:$0xff]  }
  0x88   : > { %5028 = vmatpush3.bf16.msra.mxu0 %v5229_v16  ;;  %5116 = vmatpush3.bf16.msra.mxu1 %v5229_v16  ;;  %v5293_v16 = vld [vmem:[%s5778_s10 + $0xe0] sm:$0xff]   ;;  %v5304_v27 = vld [vmem:[%s5778_s10 + $0x228] sm:$0xff]  }
  0x89   : > { %4871 = vmatprep.mubr.bf16.mxu0 %v5241_v28  ;;  %4959 = vmatprep.mubr.bf16.mxu1 %v5242_v29  ;;  %v5305_v28 = vld [vmem:[%s5778_s10 + $0x110] sm:$0xff]  }
  0x8a   : > { %5029 = vmatprep.subr.bf16.mxu0 %v5760_v17  ;;  %5117 = vmatprep.subr.bf16.mxu1 %v5760_v17  ;;  %v5306_v29 = vld [vmem:[%s5778_s10 + $0x230] sm:$0xff]  }
  0x8c   : > { %5030 = vmatpush3.bf16.msra.mxu0 %v5760_v17  ;;  %5118 = vmatpush3.bf16.msra.mxu1 %v5760_v17  ;;  %v5294_v17 = vld [vmem:[%s5778_s10 + $0x200] sm:$0xff]  }
  0x8d   : > { %5031 = vmatprep.subr.bf16.mxu0 %v5767_v18  ;;  %5119 = vmatprep.subr.bf16.mxu1 %v5767_v18 }
  0x8f   : > { %4872 = vmatmul.mubr.bf16.gmra.mrb[4].mxu0 %v5243_v30  ;;  %4960 = vmatmul.mubr.bf16.gmra.mrb[4].mxu1 %v5244_v31  ;;  %v5307_v30 = vld [vmem:[%s5778_s10 + $0x118] sm:$0xff]  }
  0x90   : > { %4875 = vmatprep.mubr.bf16.mxu0 %v5245_v32  ;;  %4963 = vmatprep.mubr.bf16.mxu1 %v5246_v33  ;;  %v5308_v31 = vld [vmem:[%s5778_s10 + $0x238] sm:$0xff]   ;;  %v5309_v32 = vld [vmem:[%s5778_s10 + $0x240] sm:$0xff]  }
  0x91   : > { %5032 = vmatpush3.bf16.msra.mxu0 %v5767_v18  ;;  %5120 = vmatpush3.bf16.msra.mxu1 %v5767_v18  ;;  %v5295_v18 = vld [vmem:[%s5778_s10 + $0xe8] sm:$0xff]   ;;  %v5310_v33 = vld [vmem:[%s5778_s10 + $0x360] sm:$0xff]  }
  0x92   : > { %5033 = vmatprep.subr.bf16.mxu0 %v5774_v19  ;;  %5121 = vmatprep.subr.bf16.mxu1 %v5774_v19 }
  0x95   : > { %5034 = vmatpush3.bf16.msra.mxu0 %v5774_v19  ;;  %5122 = vmatpush3.bf16.msra.mxu1 %v5774_v19  ;;  %v5296_v19 = vld [vmem:[%s5778_s10 + $0x208] sm:$0xff]  }
  0x96   : > { %5035 = vmatprep.subr.bf16.mxu0 %v5789_v22  ;;  %5123 = vmatprep.subr.bf16.mxu1 %v5789_v22 }
  0x97   : > { %4876 = vmatmul.mubr.bf16.gmra.mrb[8].mxu0 %v5247_v34  ;;  %4964 = vmatmul.mubr.bf16.gmra.mrb[8].mxu1 %v5248_v35  ;;  %v5311_v34 = vld [vmem:[%s5778_s10 + $0x248] sm:$0xff]  }
  0x98   : > { %4879 = vmatprep.mubr.bf16.mxu0 %v5249_v36  ;;  %4967 = vmatprep.mubr.bf16.mxu1 %v5250_v37  ;;  %v5312_v35 = vld [vmem:[%s5778_s10 + $0x368] sm:$0xff]   ;;  %v5313_v36 = vld [vmem:[%s5778_s10 + $0x250] sm:$0xff]  }
  0x99   : > { %5036 = vmatpush3.bf16.msra.mxu0 %v5789_v22  ;;  %5124 = vmatpush3.bf16.msra.mxu1 %v5789_v22  ;;  %v5299_v22 = vld [vmem:[%s5778_s10 + $0xf8] sm:$0xff]   ;;  %v5314_v37 = vld [vmem:[%s5778_s10 + $0x370] sm:$0xff]  }
  0x9a   : > { %5037 = vmatprep.subr.bf16.mxu0 %v5798_v23  ;;  %5125 = vmatprep.subr.bf16.mxu1 %v5798_v23 }
  0x9d   : > { %5038 = vmatpush3.bf16.msra.mxu0 %v5798_v23  ;;  %5126 = vmatpush3.bf16.msra.mxu1 %v5798_v23  ;;  %v5300_v23 = vld [vmem:[%s5778_s10 + $0x218] sm:$0xff]  }
  0x9e   : > { %5039 = vmatprep.subr.bf16.mxu0 %v5807_v24  ;;  %5127 = vmatprep.subr.bf16.mxu1 %v5807_v24 }
  0x9f   : > { %4880 = vmatmul.mubr.bf16.gmra.mrb[12].mxu0 %v5251_v38  ;;  %4968 = vmatmul.mubr.bf16.gmra.mrb[12].mxu1 %v5252_v39  ;;  %v5315_v38 = vld [vmem:[%s5778_s10 + $0x258] sm:$0xff]  }
  0xa0   : > { %4883 = vmatprep.mubr.bf16.mxu0 %v5253_v40  ;;  %4971 = vmatprep.mubr.bf16.mxu1 %v5254_v41  ;;  %v5316_v39 = vld [vmem:[%s5778_s10 + $0x378] sm:$0xff]   ;;  %v5317_v40 = vld [vmem:[%s5778_s10 + $0x260] sm:$0xff]  }
  0xa1   : > { %5040 = vmatpush3.bf16.msra.mxu0 %v5807_v24  ;;  %5128 = vmatpush3.bf16.msra.mxu1 %v5807_v24  ;;  %v5301_v24 = vld [vmem:[%s5778_s10 + $0x100] sm:$0xff]  }
  0xa2   : > { %5041 = vmatprep.subr.bf16.mxu0 %v5816_v25  ;;  %5129 = vmatprep.subr.bf16.mxu1 %v5816_v25  ;;  %v5318_v41 = vld [vmem:[%s5778_s10 + $0x380] sm:$0xff]  }
  0xa5   : > { %5042 = vmatpush3.bf16.msra.mxu0 %v5816_v25  ;;  %5130 = vmatpush3.bf16.msra.mxu1 %v5816_v25  ;;  %v5302_v25 = vld [vmem:[%s5778_s10 + $0x220] sm:$0xff]  }
  0xa7   : > { %4884 = vmatmul.mubr.bf16.gmra.mrb[16].mxu0 %v5255_v42  ;;  %4972 = vmatmul.mubr.bf16.gmra.mrb[16].mxu1 %v5256_v43  ;;  %v5319_v42 = vld [vmem:[%s5778_s10 + $0x268] sm:$0xff]  }
  0xa8   : > { %4887 = vmatprep.mubr.bf16.mxu0 %v5257_v44  ;;  %4975 = vmatprep.mubr.bf16.mxu1 %v5258_v45  ;;  %v5320_v43 = vld [vmem:[%s5778_s10 + $0x388] sm:$0xff]   ;;  %v5321_v44 = vld [vmem:[%s5778_s10 + $0x270] sm:$0xff]  }
  0xa9   : > { %v5322_v45 = vld [vmem:[%s5778_s10 + $0x390] sm:$0xff]  }
  0xaf   : > { %4888 = vmatmul.mubr.bf16.gmra.mrb[20].mxu0 %v5259_v46  ;;  %4976 = vmatmul.mubr.bf16.gmra.mrb[20].mxu1 %v5260_v47  ;;  %v5323_v46 = vld [vmem:[%s5778_s10 + $0x278] sm:$0xff]  }
  0xb0   : > { %4891 = vmatprep.mubr.bf16.mxu0 %v5261_v48  ;;  %4979 = vmatprep.mubr.bf16.mxu1 %v5262_v49  ;;  %v5324_v47 = vld [vmem:[%s5778_s10 + $0x398] sm:$0xff]   ;;  %v5325_v48 = vld [vmem:[%s5778_s10 + $0x280] sm:$0xff]  }
  0xb1   : > { %v5326_v49 = vld [vmem:[%s5778_s10 + $0x3a0] sm:$0xff]  }
  0xb7   : > { %4892 = vmatmul.mubr.bf16.gmra.mrb[24].mxu0 %v5263_v50  ;;  %4980 = vmatmul.mubr.bf16.gmra.mrb[24].mxu1 %v5264_v51  ;;  %v5327_v50 = vld [vmem:[%s5778_s10 + $0x288] sm:$0xff]  }
  0xb8   : > { %4895 = vmatprep.mubr.bf16.mxu0 %v5265_v52  ;;  %4983 = vmatprep.mubr.bf16.mxu1 %v5266_v53  ;;  %v5328_v51 = vld [vmem:[%s5778_s10 + $0x3a8] sm:$0xff]   ;;  %v5329_v52 = vld [vmem:[%s5778_s10 + $0x290] sm:$0xff]  }
  0xb9   : > { %v5330_v53 = vld [vmem:[%s5778_s10 + $0x3b0] sm:$0xff]  }
  0xbf   : > { %4896 = vmatmul.mubr.bf16.gmra.mrb[28].mxu0 %v5267_v54  ;;  %4984 = vmatmul.mubr.bf16.gmra.mrb[28].mxu1 %v5268_v55  ;;  %v5331_v54 = vld [vmem:[%s5778_s10 + $0x298] sm:$0xff]  }
  0xc0   : > { %4899 = vmatprep.mubr.bf16.mxu0 %v5269_v56  ;;  %4987 = vmatprep.mubr.bf16.mxu1 %v5270_v57  ;;  %v5332_v55 = vld [vmem:[%s5778_s10 + $0x3b8] sm:$0xff]   ;;  %v5333_v56 = vld [vmem:[%s5778_s10 + $0x2a0] sm:$0xff]  }
  0xc1   : > { %v5334_v57 = vld [vmem:[%s5778_s10 + $0x3c0] sm:$0xff]  }
  0xc7   : > { %4900 = vmatmul.mubr.bf16.gmra.mrb[32].mxu0 %v5271_v58  ;;  %4988 = vmatmul.mubr.bf16.gmra.mrb[32].mxu1 %v5272_v59  ;;  %v5335_v58 = vld [vmem:[%s5778_s10 + $0x2a8] sm:$0xff]  }
  0xc8   : > { %4903 = vmatprep.mubr.bf16.mxu0 %v5273_v60  ;;  %4991 = vmatprep.mubr.bf16.mxu1 %v5274_v61  ;;  %v5336_v59 = vld [vmem:[%s5778_s10 + $0x3c8] sm:$0xff]   ;;  %v5337_v60 = vld [vmem:[%s5778_s10 + $0x2b0] sm:$0xff]  }
  0xc9   : > { %v5338_v61 = vld [vmem:[%s5778_s10 + $0x3d0] sm:$0xff]  }
  0xcf   : > { %4904 = vmatmul.mubr.bf16.gmra.mrb[36].mxu0 %v5275_v62  ;;  %4992 = vmatmul.mubr.bf16.gmra.mrb[36].mxu1 %v5276_v63  ;;  %v5339_v62 = vld [vmem:[%s5778_s10 + $0x2b8] sm:$0xff]  }
  0xd0   : > { %4907 = vmatprep.mubr.bf16.mxu0 %v5277_v0  ;;  %4995 = vmatprep.mubr.bf16.mxu1 %v5278_v1  ;;  %v5340_v63 = vld [vmem:[%s5778_s10 + $0x3d8] sm:$0xff]   ;;  %v5341_v0 = vld [vmem:[%s5778_s10 + $0x2c0] sm:$0xff]  }
  0xd1   : > { %v5342_v1 = vld [vmem:[%s5778_s10 + $0x3e0] sm:$0xff]  }
  0xd7   : > { %4908 = vmatmul.mubr.bf16.gmra.mrb[40].mxu0 %v5279_v2  ;;  %4996 = vmatmul.mubr.bf16.gmra.mrb[40].mxu1 %v5280_v3  ;;  %v5343_v2 = vld [vmem:[%s5778_s10 + $0x2c8] sm:$0xff]  }
  0xd8   : > { %4911 = vmatprep.mubr.bf16.mxu0 %v5281_v4  ;;  %4999 = vmatprep.mubr.bf16.mxu1 %v5282_v5  ;;  %v5344_v3 = vld [vmem:[%s5778_s10 + $0x3e8] sm:$0xff]   ;;  %v5345_v4 = vld [vmem:[%s5778_s10 + $0x2d0] sm:$0xff]  }
  0xd9   : > { %v5346_v5 = vld [vmem:[%s5778_s10 + $0x3f0] sm:$0xff]  }
  0xdf   : > { %4912 = vmatmul.mubr.bf16.gmra.mrb[44].mxu0 %v5283_v6  ;;  %5000 = vmatmul.mubr.bf16.gmra.mrb[44].mxu1 %v5284_v7 }
  0xe0   : > { %4915 = vmatprep.mubr.bf16.mxu0 %v5285_v8  ;;  %5003 = vmatprep.mubr.bf16.mxu1 %v5286_v9 }
  0xe7   : > { %4916 = vmatmul.mubr.bf16.gmra.mrb[48].mxu0 %v5287_v10  ;;  %5004 = vmatmul.mubr.bf16.gmra.mrb[48].mxu1 %v5288_v11  ;;  %v5347_v11 = vld [vmem:[%s5778_s10 + $0x2d8] sm:$0xff]  }
  0xe8   : > { %4919 = vmatprep.mubr.bf16.mxu0 %v5289_v12  ;;  %5007 = vmatprep.mubr.bf16.mxu1 %v5290_v13  ;;  %v5348_v12 = vld [vmem:[%s5778_s10 + $0x3f8] sm:$0xff]  }
  0xef   : > { %4920 = vmatmul.mubr.bf16.gmra.mrb[52].mxu0 %v5291_v14  ;;  %5008 = vmatmul.mubr.bf16.gmra.mrb[52].mxu1 %v5292_v15 }
  0xf0   : > { %4923 = vmatprep.mubr.bf16.mxu0 %v5293_v16  ;;  %5011 = vmatprep.mubr.bf16.mxu1 %v5294_v17  ;;  %v5349_v16 = vld [vmem:[%s5778_s10 + $0x2e0] sm:$0xff]  }
  0xf1   : > { %v5350_v17 = vld [vmem:[%s5778_s10 + $0x400] sm:$0xff]  }
  0xf7   : > { %4924 = vmatmul.mubr.bf16.gmra.mrb[56].mxu0 %v5295_v18  ;;  %5012 = vmatmul.mubr.bf16.gmra.mrb[56].mxu1 %v5296_v19 }
  0xf8   : > { %4927 = vmatprep.mubr.bf16.mxu0 %v5297_v20  ;;  %5015 = vmatprep.mubr.bf16.mxu1 %v5298_v21 }
  0xff   : > { %4928 = vmatmul.mubr.bf16.gmra.mrb[60].mxu0 %v5299_v22  ;;  %5016 = vmatmul.mubr.bf16.gmra.mrb[60].mxu1 %v5300_v23 }
 0x100   : > { %4931 = vmatprep.mubr.bf16.mxu0 %v5301_v24  ;;  %5019 = vmatprep.mubr.bf16.mxu1 %v5302_v25  ;;  %v5372_v24 = vld [vmem:[%s5778_s10 + $0x458] sm:$0xff]  }
 0x107   : > { %4932 = vmatmul.mubr.bf16.gmra.mrb[64].mxu0 %v5303_v26  ;;  %5020 = vmatmul.mubr.bf16.gmra.mrb[64].mxu1 %v5304_v27  ;;  %v5351_v27 = vld [vmem:[%s5778_s10 + $0x2e8] sm:$0xff]  }
 0x108   : > { %4935 = vmatprep.mubr.bf16.mxu0 %v5305_v28  ;;  %5023 = vmatprep.mubr.bf16.mxu1 %v5306_v29  ;;  %v5352_v28 = vld [vmem:[%s5778_s10 + $0x408] sm:$0xff]   ;;  %v5371_v29 = vld [vmem:[%s5778_s10 + $0x338] sm:$0xff]  }
 0x10f   : > { %4936 = vmatmul.mubr.bf16.gmra.mrb[68].mxu0 %v5307_v30  ;;  %5024 = vmatmul.mubr.bf16.gmra.mrb[68].mxu1 %v5308_v31 }
 0x110   : > { %5043 = vmatprep.mubr.bf16.mxu0 %v5309_v32  ;;  %5131 = vmatprep.mubr.bf16.mxu1 %v5310_v33  ;;  %v5353_v32 = vld [vmem:[%s5778_s10 + $0x2f0] sm:$0xff]  }
 0x111   : > { %v5354_v33 = vld [vmem:[%s5778_s10 + $0x410] sm:$0xff]  }
 0x117   : > { %5044 = vmatmul.mubr.bf16.vlgmr.msra.gmra.mrb[72].mxu0 %v5311_v34  ;;  %5132 = vmatmul.mubr.bf16.vlgmr.msra.gmra.mrb[72].mxu1 %v5312_v35 }
 0x118   : > { %5047 = vmatprep.mubr.bf16.mxu0 %v5313_v36  ;;  %5135 = vmatprep.mubr.bf16.mxu1 %v5314_v37 }
 0x11f   : > { %5048 = vmatmul.mubr.bf16.gmra.mrb[76].mxu0 %v5315_v38  ;;  %5136 = vmatmul.mubr.bf16.gmra.mrb[76].mxu1 %v5316_v39 }
 0x120   : > { %5051 = vmatprep.mubr.bf16.mxu0 %v5317_v40  ;;  %5139 = vmatprep.mubr.bf16.mxu1 %v5318_v41 }
 0x127   : > { %5052 = vmatmul.mubr.bf16.gmra.mrb[80].mxu0 %v5319_v42  ;;  %5140 = vmatmul.mubr.bf16.gmra.mrb[80].mxu1 %v5320_v43  ;;  %v5355_v43 = vld [vmem:[%s5778_s10 + $0x2f8] sm:$0xff]  }
 0x128   : > { %5055 = vmatprep.mubr.bf16.mxu0 %v5321_v44  ;;  %5143 = vmatprep.mubr.bf16.mxu1 %v5322_v45  ;;  %v5356_v44 = vld [vmem:[%s5778_s10 + $0x418] sm:$0xff]  }
 0x12f   : > { %5056 = vmatmul.mubr.bf16.gmra.mrb[84].mxu0 %v5323_v46  ;;  %5144 = vmatmul.mubr.bf16.gmra.mrb[84].mxu1 %v5324_v47 }
 0x130   : > { %5059 = vmatprep.mubr.bf16.mxu0 %v5325_v48  ;;  %5147 = vmatprep.mubr.bf16.mxu1 %v5326_v49  ;;  %v5357_v48 = vld [vmem:[%s5778_s10 + $0x300] sm:$0xff]  }
 0x131   : > { %v5358_v49 = vld [vmem:[%s5778_s10 + $0x420] sm:$0xff]  }
 0x137   : > { %5060 = vmatmul.mubr.bf16.gmra.mrb[88].mxu0 %v5327_v50  ;;  %5148 = vmatmul.mubr.bf16.gmra.mrb[88].mxu1 %v5328_v51 }
 0x138   : > { %5063 = vmatprep.mubr.bf16.mxu0 %v5329_v52  ;;  %5151 = vmatprep.mubr.bf16.mxu1 %v5330_v53 }
 0x13f   : > { %5064 = vmatmul.mubr.bf16.gmra.mrb[92].mxu0 %v5331_v54  ;;  %5152 = vmatmul.mubr.bf16.gmra.mrb[92].mxu1 %v5332_v55 }
 0x140   : > { %5067 = vmatprep.mubr.bf16.mxu0 %v5333_v56  ;;  %5155 = vmatprep.mubr.bf16.mxu1 %v5334_v57  ;;  %v5368_v56 = vld [vmem:[%s5778_s10 + $0x448] sm:$0xff]  }
 0x147   : > { %5068 = vmatmul.mubr.bf16.gmra.mrb[96].mxu0 %v5335_v58  ;;  %5156 = vmatmul.mubr.bf16.gmra.mrb[96].mxu1 %v5336_v59  ;;  %v5359_v59 = vld [vmem:[%s5778_s10 + $0x308] sm:$0xff]  }
 0x148   : > { %5071 = vmatprep.mubr.bf16.mxu0 %v5337_v60  ;;  %5159 = vmatprep.mubr.bf16.mxu1 %v5338_v61  ;;  %v5360_v60 = vld [vmem:[%s5778_s10 + $0x428] sm:$0xff]  }
 0x149   : > { %v5367_v61 = vld [vmem:[%s5778_s10 + $0x328] sm:$0xff]  }
 0x14f   : > { %5072 = vmatmul.mubr.bf16.gmra.mrb[100].mxu0 %v5339_v62  ;;  %5160 = vmatmul.mubr.bf16.gmra.mrb[100].mxu1 %v5340_v63 }
 0x150   : > { %5075 = vmatprep.mubr.bf16.mxu0 %v5341_v0  ;;  %5163 = vmatprep.mubr.bf16.mxu1 %v5342_v1  ;;  %v5361_v0 = vld [vmem:[%s5778_s10 + $0x310] sm:$0xff]  }
 0x151   : > { %v5362_v1 = vld [vmem:[%s5778_s10 + $0x430] sm:$0xff]  }
 0x157   : > { %5076 = vmatmul.mubr.bf16.gmra.mrb[104].mxu0 %v5343_v2  ;;  %5164 = vmatmul.mubr.bf16.gmra.mrb[104].mxu1 %v5344_v3 }
 0x158   : > { %5079 = vmatprep.mubr.bf16.mxu0 %v5345_v4  ;;  %5167 = vmatprep.mubr.bf16.mxu1 %v5346_v5 }
 0x15a   : > { %v5960_v6 = vpop.f32.mrb[0].mxu0  ;;  %v5962_v7 = vpop.f32.mrb[0].mxu1 }
 0x15b   : > { %v5966_v9 = vpop.f32.mrb[1].mxu0  ;;  %v5968_v10 = vpop.f32.mrb[1].mxu1 }
 0x15c   : > { %v5974_v14 = vpop.f32.mrb[2].mxu0  ;;  %v5976_v15 = vpop.f32.mrb[2].mxu1 }
 0x15d   : > { %v5982_v19 = vpop.f32.mrb[3].mxu0  ;;  %v5984_v20 = vpop.f32.mrb[3].mxu1 }
 0x15f   : > { %5080 = vmatmul.mubr.bf16.gmra.mrb[108].mxu0 %v5347_v11  ;;  %5168 = vmatmul.mubr.bf16.gmra.mrb[108].mxu1 %v5348_v12 }
 0x160   : > { %5083 = vmatprep.mubr.bf16.mxu0 %v5349_v16  ;;  %5171 = vmatprep.mubr.bf16.mxu1 %v5350_v17 }
 0x162   : > { %v5988_v22 = vpop.f32.mrb[4].mxu0  ;;  %v5990_v23 = vpop.f32.mrb[4].mxu1 }
 0x163   : > { %v5994_v25 = vpop.f32.mrb[5].mxu0  ;;  %v5996_v26 = vpop.f32.mrb[5].mxu1 }
 0x164   : > { %v6002_v30 = vpop.f32.mrb[6].mxu0  ;;  %v6004_v31 = vpop.f32.mrb[6].mxu1 }
 0x165   : > { %v6010_v35 = vpop.f32.mrb[7].mxu0  ;;  %v6012_v36 = vpop.f32.mrb[7].mxu1 }
 0x167   : > { %5084 = vmatmul.mubr.bf16.gmra.mrb[112].mxu0 %v5351_v27  ;;  %5172 = vmatmul.mubr.bf16.gmra.mrb[112].mxu1 %v5352_v28  ;;  %v5363_v28 = vld [vmem:[%s5778_s10 + $0x318] sm:$0xff]  }
 0x168   : > { %5087 = vmatprep.mubr.bf16.mxu0 %v5353_v32  ;;  %5175 = vmatprep.mubr.bf16.mxu1 %v5354_v33  ;;  %v5364_v32 = vld [vmem:[%s5778_s10 + $0x438] sm:$0xff]  }
 0x16a   : > { %v6016_v38 = vpop.f32.mrb[8].mxu0  ;;  %v6018_v39 = vpop.f32.mrb[8].mxu1 }
 0x16b   : > { %v6022_v41 = vpop.f32.mrb[9].mxu0  ;;  %v6024_v42 = vpop.f32.mrb[9].mxu1 }
 0x16c   : > { %v6030_v46 = vpop.f32.mrb[10].mxu0  ;;  %v6032_v47 = vpop.f32.mrb[10].mxu1 }
 0x16d   : > { %v6038_v51 = vpop.f32.mrb[11].mxu0  ;;  %v6040_v52 = vpop.f32.mrb[11].mxu1 }
 0x16f   : > { %5088 = vmatmul.mubr.bf16.gmra.mrb[116].mxu0 %v5355_v43  ;;  %5176 = vmatmul.mubr.bf16.gmra.mrb[116].mxu1 %v5356_v44 }
 0x170   : > { %5091 = vmatprep.mubr.bf16.mxu0 %v5357_v48  ;;  %5179 = vmatprep.mubr.bf16.mxu1 %v5358_v49  ;;  %v5365_v48 = vld [vmem:[%s5778_s10 + $0x320] sm:$0xff]  }
 0x171   : > { %v5366_v49 = vld [vmem:[%s5778_s10 + $0x440] sm:$0xff]  }
 0x172   : > { %v6044_v54 = vpop.f32.mrb[12].mxu0  ;;  %v6046_v55 = vpop.f32.mrb[12].mxu1 }
 0x173   : > { %v6050_v57 = vpop.f32.mrb[13].mxu0  ;;  %v6052_v58 = vpop.f32.mrb[13].mxu1 }
 0x174   : > { %v6058_v62 = vpop.f32.mrb[14].mxu0  ;;  %v6060_v63 = vpop.f32.mrb[14].mxu1 }
 0x175   : > { %v6066_v3 = vpop.f32.mrb[15].mxu0  ;;  %v6068_v4 = vpop.f32.mrb[15].mxu1 }
 0x177   : > { %5092 = vmatmul.mubr.bf16.gmra.mrb[120].mxu0 %v5359_v59  ;;  %5180 = vmatmul.mubr.bf16.gmra.mrb[120].mxu1 %v5360_v60 }
 0x178   : > { %5095 = vmatprep.mubr.bf16.mxu0 %v5361_v0  ;;  %5183 = vmatprep.mubr.bf16.mxu1 %v5362_v1 }
 0x17a   : > { %v6072_v11 = vpop.f32.mrb[16].mxu0  ;;  %v6074_v12 = vpop.f32.mrb[16].mxu1 }
 0x17b   : > { %v6078_v17 = vpop.f32.mrb[17].mxu0  ;;  %v6080_v27 = vpop.f32.mrb[17].mxu1 }
 0x17c   : > { %v6086_v43 = vpop.f32.mrb[18].mxu0  ;;  %v6088_v44 = vpop.f32.mrb[18].mxu1 }
 0x17d   : > { %v6094_v60 = vpop.f32.mrb[19].mxu0  ;;  %v6096_v0 = vpop.f32.mrb[19].mxu1 }
 0x17f   : > { %5096 = vmatmul.mubr.bf16.gmra.mrb[124].mxu0 %v5363_v28  ;;  %5184 = vmatmul.mubr.bf16.gmra.mrb[124].mxu1 %v5364_v32 }
 0x180   : > { %5099 = vmatprep.mubr.bf16.mxu0 %v5365_v48  ;;  %5187 = vmatprep.mubr.bf16.mxu1 %v5366_v49  ;;  %v5369_v48 = vld [vmem:[%s5778_s10 + $0x330] sm:$0xff]  }
 0x181   : > { %v5370_v49 = vld [vmem:[%s5778_s10 + $0x450] sm:$0xff]  }
 0x182   : > { %v6100_v33 = vpop.f32.mrb[20].mxu0  ;;  %v6102_v16 = vpop.f32.mrb[20].mxu1 }
 0x183   : > { %v6106_v5 = vpop.f32.mrb[21].mxu0  ;;  %v6108_v2 = vpop.f32.mrb[21].mxu1 }
 0x184   : > { %v6114_v28 = vpop.f32.mrb[22].mxu0  ;;  %v6116_v32 = vpop.f32.mrb[22].mxu1 }
 0x185   : > { %v6122_v53 = vpop.f32.mrb[23].mxu0  ;;  %v6124_v50 = vpop.f32.mrb[23].mxu1 }
 0x187   : > { %5100 = vmatmul.mubr.bf16.gmra.mrb[128].mxu0 %v5367_v61  ;;  %5188 = vmatmul.mubr.bf16.gmra.mrb[128].mxu1 %v5368_v56 }
 0x188   : > { %5103 = vmatprep.mubr.bf16.mxu0 %v5369_v48  ;;  %5191 = vmatprep.mubr.bf16.mxu1 %v5370_v49  ;;  %v5373_v48 = vld [vmem:[%s5778_s10 + $0x340] sm:$0xff]  }
 0x189   : > { %v5374_v49 = vld [vmem:[%s5778_s10 + $0x460] sm:$0xff]  }
 0x18a   : > { %v6128_v1 = vpop.f32.mrb[24].mxu0  ;;  %v6130_v40 = vpop.f32.mrb[24].mxu1 }
 0x18b   : > { %v6134_v37 = vpop.f32.mrb[25].mxu0  ;;  %v6136_v34 = vpop.f32.mrb[25].mxu1 }
 0x18c   : > { %6906 = vst [vmem:[#allocation3_spill] sm:$0xff] %v6134_v37  ;;  %6907 = vst [vmem:[#allocation4_spill] sm:$0xff] %v6136_v34  ;;  %v6142_v61 = vpop.f32.mrb[26].mxu0  ;;  %v6144_v56 = vpop.f32.mrb[26].mxu1  ;;  %v5375_v34 = vld [vmem:[%s5778_s10 + $0x348] sm:$0xff]  }
 0x18d   : > { %6908 = vst [vmem:[#allocation5_spill] sm:$0xff] %v6142_v61  ;;  %6909 = vst [vmem:[#allocation6_spill] sm:$0xff] %v6144_v56  ;;  %v6150_v21 = vpop.f32.mrb[27].mxu0  ;;  %v6152_v18 = vpop.f32.mrb[27].mxu1  ;;  %v5376_v37 = vld [vmem:[%s5778_s10 + $0x468] sm:$0xff]  }
 0x18e   : > { %6910 = vst [vmem:[#allocation7_spill] sm:$0xff] %v6150_v21  ;;  %6911 = vst [vmem:[#allocation8_spill] sm:$0xff] %v6152_v18 }
 0x18f   : > { %5104 = vmatmul.mubr.bf16.gmra.mrb[132].mxu0 %v5371_v29  ;;  %5192 = vmatmul.mubr.bf16.gmra.mrb[132].mxu1 %v5372_v24 }
 0x190   : > { %5107 = vmatprep.mubr.bf16.mxu0 %v5373_v48  ;;  %5195 = vmatprep.mubr.bf16.mxu1 %v5374_v49  ;;  %v5377_v48 = vld [vmem:[%s5778_s10 + $0x350] sm:$0xff]  }
 0x191   : > { %v5378_v49 = vld [vmem:[%s5778_s10 + $0x470] sm:$0xff]  }
 0x192   : > { %v6156_v45 = vpop.f32.mrb[28].mxu0  ;;  %v6158_v8 = vpop.f32.mrb[28].mxu1 }
 0x193   : > { %6912 = vst [vmem:[#allocation9_spill] sm:$0xff] %v6156_v45  ;;  %6913 = vst [vmem:[#allocation10_spill] sm:$0xff] %v6158_v8  ;;  %v6162_v56 = vpop.f32.mrb[29].mxu0  ;;  %v6164_v61 = vpop.f32.mrb[29].mxu1 }
 0x194   : > { %6914 = vst [vmem:[#allocation11_spill] sm:$0xff] %v6162_v56  ;;  %6915 = vst [vmem:[#allocation12_spill] sm:$0xff] %v6164_v61  ;;  %v6170_v29 = vpop.f32.mrb[30].mxu0  ;;  %v6172_v24 = vpop.f32.mrb[30].mxu1 }
 0x195   : > { %6916 = vst [vmem:[#allocation13_spill] sm:$0xff] %v6170_v29  ;;  %6917 = vst [vmem:[#allocation14_spill] sm:$0xff] %v6172_v24  ;;  %v6178_v8 = vpop.f32.mrb[31].mxu0  ;;  %v6180_v45 = vpop.f32.mrb[31].mxu1  ;;  %v5379_v24 = vld [vmem:[%s5778_s10 + $0x358] sm:$0xff]  }
 0x196   : > { %6918 = vst [vmem:[#allocation15_spill] sm:$0xff] %v6178_v8  ;;  %6919 = vst [vmem:[#allocation16_spill] sm:$0xff] %v6180_v45  ;;  %v5380_v29 = vld [vmem:[%s5778_s10 + $0x478] sm:$0xff]  }
 0x197   : > { %5108 = vmatmul.mubr.bf16.gmra.mrb[136].mxu0 %v5375_v34  ;;  %5196 = vmatmul.mubr.bf16.gmra.mrb[136].mxu1 %v5376_v37 }
 0x198   : > { %5111 = vmatprep.mubr.bf16.mxu0 %v5377_v48  ;;  %5199 = vmatprep.mubr.bf16.mxu1 %v5378_v49 }
 0x19a   : > { %v6184_v13 = vpop.f32.mrb[32].mxu0  ;;  %v6186_v61 = vpop.f32.mrb[32].mxu1 }
 0x19b   : > { %6920 = vst [vmem:[#allocation17_spill] sm:$0xff] %v6184_v13  ;;  %6921 = vst [vmem:[#allocation18_spill] sm:$0xff] %v6186_v61  ;;  %v6190_v21 = vpop.f32.mrb[33].mxu0  ;;  %v6192_v59 = vpop.f32.mrb[33].mxu1 }
 0x19c   : > { %6922 = vst [vmem:[#allocation19_spill] sm:$0xff] %v6190_v21  ;;  %6923 = vst [vmem:[#allocation20_spill] sm:$0xff] %v6192_v59  ;;  %v6198_v34 = vpop.f32.mrb[34].mxu0  ;;  %v6200_v37 = vpop.f32.mrb[34].mxu1 }
 0x19d   : > { %6924 = vst [vmem:[#allocation21_spill] sm:$0xff] %v6198_v34  ;;  %6925 = vst [vmem:[#allocation22_spill] sm:$0xff] %v6200_v37  ;;  %v6204_v49 = vpop.f32.mrb[35].mxu0  ;;  %v6206_v45 = vpop.f32.mrb[35].mxu1 }
 0x19e   : > { %6926 = vst [vmem:[#allocation23_spill] sm:$0xff] %v6204_v49  ;;  %6927 = vst [vmem:[#allocation24_spill] sm:$0xff] %v6206_v45  ;;  %v7000_v49 = vmax.f32 %v5960_v6, %v5962_v7  ;;  %v7002_v7 = vmax.f32 %v5974_v14, %v5976_v15 }
 0x19f   : > { %5112 = vmatmul.mubr.bf16.gmra.mrb[140].mxu0 %v5379_v24  ;;  %5200 = vmatmul.mubr.bf16.gmra.mrb[140].mxu1 %v5380_v29 }
 0x1a2   : > { %v6210_v61 = vpop.f32.mrb[36].mxu0  ;;  %v6212_v13 = vpop.f32.mrb[36].mxu1 }
 0x1a3   : > { %6928 = vst [vmem:[#allocation25_spill] sm:$0xff] %v6210_v61  ;;  %6929 = vst [vmem:[#allocation26_spill] sm:$0xff] %v6212_v13  ;;  %v6216_v59 = vpop.f32.mrb[37].mxu0  ;;  %v6218_v21 = vpop.f32.mrb[37].mxu1 }
 0x1a4   : > { %6930 = vst [vmem:[#allocation27_spill] sm:$0xff] %v6216_v59  ;;  %6931 = vst [vmem:[#allocation28_spill] sm:$0xff] %v6218_v21  ;;  %v6222_v37 = vpop.f32.mrb[38].mxu0  ;;  %v6224_v34 = vpop.f32.mrb[38].mxu1 }
 0x1a5   : > { %6932 = vst [vmem:[#allocation29_spill] sm:$0xff] %v6222_v37  ;;  %6933 = vst [vmem:[#allocation30_spill] sm:$0xff] %v6224_v34  ;;  %v6228_v24 = vpop.f32.mrb[39].mxu0  ;;  %v6230_v56 = vpop.f32.mrb[39].mxu1 }
 0x1a6   : > { %6934 = vst [vmem:[#allocation31_spill] sm:$0xff] %v6228_v24  ;;  %6935 = vst [vmem:[#allocation32_spill] sm:$0xff] %v6230_v56 }
 0x1aa   : > { %v6234_v13 = vpop.f32.mrb[40].mxu0  ;;  %v6236_v61 = vpop.f32.mrb[40].mxu1 }
 0x1ab   : > { %6936 = vst [vmem:[#allocation33_spill] sm:$0xff] %v6234_v13  ;;  %6937 = vst [vmem:[#allocation34_spill] sm:$0xff] %v6236_v61  ;;  %v6240_v21 = vpop.f32.mrb[41].mxu0  ;;  %v6242_v59 = vpop.f32.mrb[41].mxu1 }
 0x1ac   : > { %6938 = vst [vmem:[#allocation35_spill] sm:$0xff] %v6240_v21  ;;  %6939 = vst [vmem:[#allocation36_spill] sm:$0xff] %v6242_v59  ;;  %v6246_v34 = vpop.f32.mrb[42].mxu0  ;;  %v6248_v37 = vpop.f32.mrb[42].mxu1 }
 0x1ad   : > { %6940 = vst [vmem:[#allocation37_spill] sm:$0xff] %v6246_v34  ;;  %6941 = vst [vmem:[#allocation38_spill] sm:$0xff] %v6248_v37  ;;  %v6252_v56 = vpop.f32.mrb[43].mxu0  ;;  %v6254_v24 = vpop.f32.mrb[43].mxu1 }
 0x1ae   : > { %6942 = vst [vmem:[#allocation39_spill] sm:$0xff] %v6252_v56  ;;  %6943 = vst [vmem:[#allocation40_spill] sm:$0xff] %v6254_v24 }
 0x1b2   : > { %v6258_v61 = vpop.f32.mrb[44].mxu0  ;;  %v6260_v13 = vpop.f32.mrb[44].mxu1 }
 0x1b3   : > { %6944 = vst [vmem:[#allocation41_spill] sm:$0xff] %v6258_v61  ;;  %6945 = vst [vmem:[#allocation42_spill] sm:$0xff] %v6260_v13  ;;  %v6264_v59 = vpop.f32.mrb[45].mxu0  ;;  %v6266_v21 = vpop.f32.mrb[45].mxu1 }
 0x1b4   : > { %6946 = vst [vmem:[#allocation43_spill] sm:$0xff] %v6264_v59  ;;  %6947 = vst [vmem:[#allocation44_spill] sm:$0xff] %v6266_v21  ;;  %v6270_v37 = vpop.f32.mrb[46].mxu0  ;;  %v6272_v34 = vpop.f32.mrb[46].mxu1 }
 0x1b5   : > { %6948 = vst [vmem:[#allocation45_spill] sm:$0xff] %v6270_v37  ;;  %6949 = vst [vmem:[#allocation46_spill] sm:$0xff] %v6272_v34  ;;  %v6276_v24 = vpop.f32.mrb[47].mxu0  ;;  %v6278_v56 = vpop.f32.mrb[47].mxu1 }
 0x1b6   : > { %6950 = vst [vmem:[#allocation47_spill] sm:$0xff] %v6276_v24  ;;  %6951 = vst [vmem:[#allocation48_spill] sm:$0xff] %v6278_v56 }
 0x1ba   : > { %v6282_v13 = vpop.f32.mrb[48].mxu0  ;;  %v6284_v61 = vpop.f32.mrb[48].mxu1 }
 0x1bb   : > { %6952 = vst [vmem:[#allocation49_spill] sm:$0xff] %v6282_v13  ;;  %6953 = vst [vmem:[#allocation50_spill] sm:$0xff] %v6284_v61  ;;  %v6288_v21 = vpop.f32.mrb[49].mxu0  ;;  %v6290_v59 = vpop.f32.mrb[49].mxu1 }
 0x1bc   : > { %6954 = vst [vmem:[#allocation51_spill] sm:$0xff] %v6288_v21  ;;  %6955 = vst [vmem:[#allocation52_spill] sm:$0xff] %v6290_v59  ;;  %v6294_v34 = vpop.f32.mrb[50].mxu0  ;;  %v6296_v37 = vpop.f32.mrb[50].mxu1 }
 0x1bd   : > { %6956 = vst [vmem:[#allocation53_spill] sm:$0xff] %v6294_v34  ;;  %6957 = vst [vmem:[#allocation54_spill] sm:$0xff] %v6296_v37  ;;  %v6300_v56 = vpop.f32.mrb[51].mxu0  ;;  %v6302_v24 = vpop.f32.mrb[51].mxu1 }
 0x1be   : > { %6958 = vst [vmem:[#allocation55_spill] sm:$0xff] %v6300_v56  ;;  %6959 = vst [vmem:[#allocation56_spill] sm:$0xff] %v6302_v24 }
 0x1c2   : > { %v6306_v61 = vpop.f32.mrb[52].mxu0  ;;  %v6308_v13 = vpop.f32.mrb[52].mxu1 }
 0x1c3   : > { %6960 = vst [vmem:[#allocation57_spill] sm:$0xff] %v6306_v61  ;;  %6961 = vst [vmem:[#allocation58_spill] sm:$0xff] %v6308_v13  ;;  %v6312_v59 = vpop.f32.mrb[53].mxu0  ;;  %v6314_v21 = vpop.f32.mrb[53].mxu1 }
 0x1c4   : > { %6962 = vst [vmem:[#allocation59_spill] sm:$0xff] %v6312_v59  ;;  %6963 = vst [vmem:[#allocation60_spill] sm:$0xff] %v6314_v21  ;;  %v6318_v37 = vpop.f32.mrb[54].mxu0  ;;  %v6320_v34 = vpop.f32.mrb[54].mxu1 }
 0x1c5   : > { %6964 = vst [vmem:[#allocation61_spill] sm:$0xff] %v6318_v37  ;;  %6965 = vst [vmem:[#allocation62_spill] sm:$0xff] %v6320_v34  ;;  %v6324_v24 = vpop.f32.mrb[55].mxu0  ;;  %v6326_v56 = vpop.f32.mrb[55].mxu1 }
 0x1c6   : > { %6966 = vst [vmem:[#allocation63_spill] sm:$0xff] %v6324_v24  ;;  %6967 = vst [vmem:[#allocation64_spill] sm:$0xff] %v6326_v56 }
 0x1ca   : > { %v6330_v13 = vpop.f32.mrb[56].mxu0  ;;  %v6332_v61 = vpop.f32.mrb[56].mxu1 }
 0x1cb   : > { %6968 = vst [vmem:[#allocation65_spill] sm:$0xff] %v6330_v13  ;;  %6969 = vst [vmem:[#allocation66_spill] sm:$0xff] %v6332_v61  ;;  %v6336_v21 = vpop.f32.mrb[57].mxu0  ;;  %v6338_v59 = vpop.f32.mrb[57].mxu1 }
 0x1cc   : > { %6970 = vst [vmem:[#allocation67_spill] sm:$0xff] %v6336_v21  ;;  %6971 = vst [vmem:[#allocation68_spill] sm:$0xff] %v6338_v59  ;;  %v6342_v34 = vpop.f32.mrb[58].mxu0  ;;  %v6344_v37 = vpop.f32.mrb[58].mxu1 }
 0x1cd   : > { %6972 = vst [vmem:[#allocation69_spill] sm:$0xff] %v6342_v34  ;;  %6973 = vst [vmem:[#allocation70_spill] sm:$0xff] %v6344_v37  ;;  %v6348_v56 = vpop.f32.mrb[59].mxu0  ;;  %v6350_v24 = vpop.f32.mrb[59].mxu1 }
 0x1ce   : > { %6974 = vst [vmem:[#allocation71_spill] sm:$0xff] %v6348_v56  ;;  %6975 = vst [vmem:[#allocation72_spill] sm:$0xff] %v6350_v24 }
 0x1d2   : > { %v6354_v61 = vpop.f32.mrb[60].mxu0  ;;  %v6356_v13 = vpop.f32.mrb[60].mxu1 }
 0x1d3   : > { %6976 = vst [vmem:[#allocation73_spill] sm:$0xff] %v6354_v61  ;;  %6977 = vst [vmem:[#allocation74_spill] sm:$0xff] %v6356_v13  ;;  %v6360_v59 = vpop.f32.mrb[61].mxu0  ;;  %v6362_v21 = vpop.f32.mrb[61].mxu1 }
 0x1d4   : > { %6978 = vst [vmem:[#allocation75_spill] sm:$0xff] %v6360_v59  ;;  %6979 = vst [vmem:[#allocation76_spill] sm:$0xff] %v6362_v21  ;;  %v6366_v37 = vpop.f32.mrb[62].mxu0  ;;  %v6368_v34 = vpop.f32.mrb[62].mxu1 }
 0x1d5   : > { %6980 = vst [vmem:[#allocation77_spill] sm:$0xff] %v6366_v37  ;;  %6981 = vst [vmem:[#allocation78_spill] sm:$0xff] %v6368_v34  ;;  %v6372_v24 = vpop.f32.mrb[63].mxu0  ;;  %v6374_v56 = vpop.f32.mrb[63].mxu1 }
 0x1d6   : > { %6982 = vst [vmem:[#allocation79_spill] sm:$0xff] %v6372_v24  ;;  %6983 = vst [vmem:[#allocation80_spill] sm:$0xff] %v6374_v56 }
 0x1da   : > { %v6378_v13 = vpop.f32.mrb[64].mxu0  ;;  %v6380_v61 = vpop.f32.mrb[64].mxu1 }
 0x1db   : > { %6984 = vst [vmem:[#allocation81_spill] sm:$0xff] %v6378_v13  ;;  %6985 = vst [vmem:[#allocation82_spill] sm:$0xff] %v6380_v61  ;;  %v6384_v21 = vpop.f32.mrb[65].mxu0  ;;  %v6386_v59 = vpop.f32.mrb[65].mxu1 }
 0x1dc   : > { %6986 = vst [vmem:[#allocation83_spill] sm:$0xff] %v6384_v21  ;;  %6987 = vst [vmem:[#allocation84_spill] sm:$0xff] %v6386_v59  ;;  %v6390_v34 = vpop.f32.mrb[66].mxu0  ;;  %v6392_v37 = vpop.f32.mrb[66].mxu1 }
 0x1dd   : > { %6988 = vst [vmem:[#allocation85_spill] sm:$0xff] %v6390_v34  ;;  %6989 = vst [vmem:[#allocation86_spill] sm:$0xff] %v6392_v37  ;;  %v6396_v56 = vpop.f32.mrb[67].mxu0  ;;  %v6398_v24 = vpop.f32.mrb[67].mxu1 }
 0x1de   : > { %6990 = vst [vmem:[#allocation87_spill] sm:$0xff] %v6396_v56  ;;  %6991 = vst [vmem:[#allocation88_spill] sm:$0xff] %v6398_v24 }
 0x1e2   : > { %v6404_v61 = vpop.f32.mrb[68].mxu0  ;;  %v6406_v13 = vpop.f32.mrb[68].mxu1 }
 0x1e3   : > { %6992 = vst [vmem:[#allocation89_spill] sm:$0xff] %v6404_v61  ;;  %6993 = vst [vmem:[#allocation90_spill] sm:$0xff] %v6406_v13  ;;  %v6410_v59 = vpop.f32.mrb[69].mxu0  ;;  %v6412_v21 = vpop.f32.mrb[69].mxu1 }
 0x1e4   : > { %6994 = vst [vmem:[#allocation91_spill] sm:$0xff] %v6410_v59  ;;  %6995 = vst [vmem:[#allocation92_spill] sm:$0xff] %v6412_v21  ;;  %v6416_v37 = vpop.f32.mrb[70].mxu0  ;;  %v6418_v48 = vpop.f32.mrb[70].mxu1  ;;  %v6431_v59 = vld [vmem:[%s6810_s2] ss:$0 sm:$0xff] }
 0x1e5   : > { %6996 = vst [vmem:[#allocation93_spill] sm:$0xff] %v6416_v37  ;;  %6997 = vst [vmem:[#allocation94_spill] sm:$0xff] %v6418_v48  ;;  %v6422_v56 = vpop.f32.mrb[71].mxu0  ;;  %v6424_v34 = vpop.f32.mrb[71].mxu1 }
 0x1e6   : > { %6998 = vst [vmem:[#allocation95_spill] sm:$0xff] %v6422_v56  ;;  %6999 = vst [vmem:[#allocation96_spill] sm:$0xff] %v6424_v34 }
 0x1ea   : > { %v5045_v13 = vpop.f32.mrb[72].mxu0  ;;  %v5133_v61 = vpop.f32.mrb[72].mxu1 }
 0x1eb   : > { %v3941_v45 = vmax.f32 %v5045_v13, %v5133_v61  ;;  %v2970_v18 = vpop.f32.mrb[73].mxu0  ;;  %v3580_v21 = vpop.f32.mrb[73].mxu1  ;;  %v7001_v13 = vmax.f32 %v5966_v9, %v5968_v10 }
 0x1ec   : > { %v3939_v24 = vmax.f32 %v2970_v18, %v3580_v21  ;;  %v5046_v48 = vpop.f32.mrb[74].mxu0  ;;  %v5134_v37 = vpop.f32.mrb[74].mxu1 }
 0x1ed   : > { %v4013_v8 = vmax.f32 %v7000_v49, %v3941_v45  ;;  %v3942_v29 = vmax.f32 %v5046_v48, %v5134_v37  ;;  %v2973_v34 = vpop.f32.mrb[75].mxu0  ;;  %v3583_v56 = vpop.f32.mrb[75].mxu1  ;;  %v7003_v37 = vmax.f32 %v5982_v19, %v5984_v20  ;;  %v7004_v19 = vmax.f32 %v5988_v22, %v5990_v23 }
 0x1ee   : > { %v4011_v18 = vmax.f32 %v7001_v13, %v3939_v24  ;;  %v3940_v21 = vmax.f32 %v2973_v34, %v3583_v56  ;;  %v7007_v22 = vmax.f32 %v6010_v35, %v6012_v36  ;;  %v7008_v35 = vmax.f32 %v6016_v38, %v6018_v39 }
 0x1ef   : > { %v4092_v6 = vadd.f32 %v6431_v59, %v4013_v8  ;;  %v4014_v45 = vmax.f32 %v7002_v7, %v3942_v29  ;;  %v7011_v38 = vmax.f32 %v6038_v51, %v6040_v52  ;;  %v7012_v51 = vmax.f32 %v6044_v54, %v6046_v55 }
 0x1f0   : > { %v4090_v61 = vadd.f32 %v6431_v59, %v4011_v18  ;;  %v4012_v48 = vmax.f32 %v7003_v37, %v3940_v21  ;;  %v7006_v37 = vmax.f32 %v6002_v30, %v6004_v31  ;;  %v7015_v54 = vmax.f32 %v6066_v3, %v6068_v4 }
 0x1f1   : > { %4164 = vst [vmem:[%s6439_s28 + $0x10] sm:$0xff] %v4092_v6  ;;  %v4093_v9 = vadd.f32 %v6431_v59, %v4014_v45  ;;  %v7005_v6 = vmax.f32 %v5994_v25, %v5996_v26  ;;  %v7016_v3 = vmax.f32 %v6072_v11, %v6074_v12  ;;  %v7019_v11 = vmax.f32 %v6094_v60, %v6096_v0 }
 0x1f2   : > { %4162 = vst [vmem:[%s6439_s28] sm:$0xff] %v4090_v61  ;;  %v4091_v10 = vadd.f32 %v6431_v59, %v4012_v48  ;;  %v5049_v49 = vpop.f32.mrb[76].mxu0  ;;  %v5137_v56 = vpop.f32.mrb[76].mxu1  ;;  %v7020_v60 = vmax.f32 %v6100_v33, %v6102_v16  ;;  %v7023_v16 = vmax.f32 %v6122_v53, %v6124_v50  ;;  %v7024_v50 = vmax.f32 %v6128_v1, %v6130_v40  ;;  %v7031_v40 = vld [vmem:[#allocation7_spill] sm:$0xff]  ;;  %v7032_v1 = vld [vmem:[#allocation8_spill] sm:$0xff] }
 0x1f3   : > { %4165 = vst [vmem:[%s6439_s28 + $0x18] sm:$0xff] %v4093_v9  ;;  %v3945_v8 = vmax.f32 %v5049_v49, %v5137_v56  ;;  %v2986_v34 = vpop.f32.mrb[77].mxu0  ;;  %v3596_v14 = vpop.f32.mrb[77].mxu1 }
 0x1f4   : > { %4163 = vst [vmem:[%s6439_s28 + $0x8] sm:$0xff] %v4091_v10  ;;  %v3943_v15 = vmax.f32 %v2986_v34, %v3596_v14  ;;  %v5050_v29 = vpop.f32.mrb[78].mxu0  ;;  %v5138_v24 = vpop.f32.mrb[78].mxu1 }
 0x1f5   : > { %v4017_v20 = vmax.f32 %v7004_v19, %v3945_v8  ;;  %v3946_v13 = vmax.f32 %v5050_v29, %v5138_v24  ;;  %v2989_v18 = vpop.f32.mrb[79].mxu0  ;;  %v3599_v21 = vpop.f32.mrb[79].mxu1  ;;  %v7009_v19 = vmax.f32 %v6022_v41, %v6024_v42 }
 0x1f6   : > { %v4015_v7 = vmax.f32 %v7005_v6, %v3943_v15  ;;  %v3944_v45 = vmax.f32 %v2989_v18, %v3599_v21  ;;  %v7010_v21 = vmax.f32 %v6030_v46, %v6032_v47 }
 0x1f7   : > { %v4096_v61 = vadd.f32 %v6431_v59, %v4017_v20  ;;  %v4018_v48 = vmax.f32 %v7006_v37, %v3946_v13 }
 0x1f8   : > { %v4094_v9 = vadd.f32 %v6431_v59, %v4015_v7  ;;  %v4016_v23 = vmax.f32 %v7007_v22, %v3944_v45 }
 0x1f9   : > { %4168 = vst [vmem:[%s6439_s28 + $0x30] sm:$0xff] %v4096_v61  ;;  %v4097_v10 = vadd.f32 %v6431_v59, %v4018_v48 }
 0x1fa   : > { %4166 = vst [vmem:[%s6439_s28 + $0x20] sm:$0xff] %v4094_v9  ;;  %v4095_v25 = vadd.f32 %v6431_v59, %v4016_v23  ;;  %v5053_v26 = vpop.f32.mrb[80].mxu0  ;;  %v5141_v49 = vpop.f32.mrb[80].mxu1 }
 0x1fb   : > { %4169 = vst [vmem:[%s6439_s28 + $0x38] sm:$0xff] %v4097_v10  ;;  %v3949_v56 = vmax.f32 %v5053_v26, %v5141_v49  ;;  %v3002_v8 = vpop.f32.mrb[81].mxu0  ;;  %v3612_v30 = vpop.f32.mrb[81].mxu1  ;;  %v7013_v26 = vmax.f32 %v6050_v57, %v6052_v58 }
 0x1fc   : > { %4167 = vst [vmem:[%s6439_s28 + $0x28] sm:$0xff] %v4095_v25  ;;  %v3947_v31 = vmax.f32 %v3002_v8, %v3612_v30  ;;  %v5054_v34 = vpop.f32.mrb[82].mxu0  ;;  %v5142_v14 = vpop.f32.mrb[82].mxu1  ;;  %v7014_v30 = vmax.f32 %v6058_v62, %v6060_v63 }
 0x1fd   : > { %v4021_v36 = vmax.f32 %v7008_v35, %v3949_v56  ;;  %v3950_v15 = vmax.f32 %v5054_v34, %v5142_v14  ;;  %v3005_v29 = vpop.f32.mrb[83].mxu0  ;;  %v3615_v24 = vpop.f32.mrb[83].mxu1 }
 0x1fe   : > { %v4019_v20 = vmax.f32 %v7009_v19, %v3947_v31  ;;  %v3948_v13 = vmax.f32 %v3005_v29, %v3615_v24 }
 0x1ff   : > { %v4100_v18 = vadd.f32 %v6431_v59, %v4021_v36  ;;  %v4022_v6 = vmax.f32 %v7010_v21, %v3950_v15 }
 0x200   : > { %v4098_v7 = vadd.f32 %v6431_v59, %v4019_v20  ;;  %v4020_v39 = vmax.f32 %v7011_v38, %v3948_v13  ;;  %v7018_v38 = vmax.f32 %v6086_v43, %v6088_v44 }
 0x201   : > { %4172 = vst [vmem:[%s6439_s28 + $0x50] sm:$0xff] %v4100_v18  ;;  %v4101_v45 = vadd.f32 %v6431_v59, %v4022_v6  ;;  %v7017_v18 = vmax.f32 %v6078_v17, %v6080_v27 }
 0x202   : > { %4170 = vst [vmem:[%s6439_s28 + $0x40] sm:$0xff] %v4098_v7  ;;  %v4099_v41 = vadd.f32 %v6431_v59, %v4020_v39  ;;  %v5057_v42 = vpop.f32.mrb[84].mxu0  ;;  %v5145_v61 = vpop.f32.mrb[84].mxu1 }
 0x203   : > { %4173 = vst [vmem:[%s6439_s28 + $0x58] sm:$0xff] %v4101_v45  ;;  %v3953_v37 = vmax.f32 %v5057_v42, %v5145_v61  ;;  %v3018_v48 = vpop.f32.mrb[85].mxu0  ;;  %v3628_v46 = vpop.f32.mrb[85].mxu1 }
 0x204   : > { %4171 = vst [vmem:[%s6439_s28 + $0x48] sm:$0xff] %v4099_v41  ;;  %v3951_v47 = vmax.f32 %v3018_v48, %v3628_v46  ;;  %v5058_v9 = vpop.f32.mrb[86].mxu0  ;;  %v5146_v22 = vpop.f32.mrb[86].mxu1 }
 0x205   : > { %v4025_v52 = vmax.f32 %v7012_v51, %v3953_v37  ;;  %v3954_v23 = vmax.f32 %v5058_v9, %v5146_v22  ;;  %v3021_v10 = vpop.f32.mrb[87].mxu0  ;;  %v3631_v25 = vpop.f32.mrb[87].mxu1  ;;  %v7021_v51 = vmax.f32 %v6106_v5, %v6108_v2 }
 0x206   : > { %v4023_v49 = vmax.f32 %v7013_v26, %v3951_v47  ;;  %v3952_v56 = vmax.f32 %v3021_v10, %v3631_v25  ;;  %v7022_v25 = vmax.f32 %v6114_v28, %v6116_v32 }
 0x207   : > { %v4104_v8 = vadd.f32 %v6431_v59, %v4025_v52  ;;  %v4026_v31 = vmax.f32 %v7014_v30, %v3954_v23 }
 0x208   : > { %v4102_v34 = vadd.f32 %v6431_v59, %v4023_v49  ;;  %v4024_v55 = vmax.f32 %v7015_v54, %v3952_v56 }
 0x209   : > { %4176 = vst [vmem:[%s6439_s28 + $0x70] sm:$0xff] %v4104_v8  ;;  %v4105_v14 = vadd.f32 %v6431_v59, %v4026_v31 }
 0x20a   : > { %4174 = vst [vmem:[%s6439_s28 + $0x60] sm:$0xff] %v4102_v34  ;;  %v4103_v57 = vadd.f32 %v6431_v59, %v4024_v55  ;;  %v5061_v58 = vpop.f32.mrb[88].mxu0  ;;  %v5149_v35 = vpop.f32.mrb[88].mxu1 }
 0x20b   : > { %4177 = vst [vmem:[%s6439_s28 + $0x78] sm:$0xff] %v4105_v14  ;;  %v3957_v36 = vmax.f32 %v5061_v58, %v5149_v35  ;;  %v3034_v15 = vpop.f32.mrb[89].mxu0  ;;  %v3644_v62 = vpop.f32.mrb[89].mxu1  ;;  %v7025_v58 = vld [vmem:[#allocation3_spill] sm:$0xff]  ;;  %v7026_v35 = vld [vmem:[#allocation4_spill] sm:$0xff] }
 0x20c   : > { %4175 = vst [vmem:[%s6439_s28 + $0x68] sm:$0xff] %v4103_v57  ;;  %v3955_v63 = vmax.f32 %v3034_v15, %v3644_v62  ;;  %v5062_v29 = vpop.f32.mrb[90].mxu0  ;;  %v5150_v24 = vpop.f32.mrb[90].mxu1 }
 0x20d   : > { %v4029_v4 = vmax.f32 %v7016_v3, %v3957_v36  ;;  %v3958_v19 = vmax.f32 %v5062_v29, %v5150_v24  ;;  %v3037_v20 = vpop.f32.mrb[91].mxu0  ;;  %v3647_v13 = vpop.f32.mrb[91].mxu1  ;;  %v7027_v36 = vmax.f32 %v7025_v58, %v7026_v35  ;;  %v7028_v29 = vld [vmem:[#allocation5_spill] sm:$0xff]  ;;  %v7029_v24 = vld [vmem:[#allocation6_spill] sm:$0xff]  ;;  %v7049_v35 = vld [vmem:[#allocation19_spill] sm:$0xff] }
 0x20e   : > { %v4027_v21 = vmax.f32 %v7017_v18, %v3955_v63  ;;  %v3956_v6 = vmax.f32 %v3037_v20, %v3647_v13  ;;  %v7030_v3 = vmax.f32 %v7028_v29, %v7029_v24  ;;  %v7033_v20 = vmax.f32 %v7031_v40, %v7032_v1  ;;  %v7052_v24 = vld [vmem:[#allocation21_spill] sm:$0xff]  ;;  %v7055_v1 = vld [vmem:[#allocation23_spill] sm:$0xff] }
 0x20f   : > { %v4108_v7 = vadd.f32 %v6431_v59, %v4029_v4  ;;  %v4030_v39 = vmax.f32 %v7018_v38, %v3958_v19 }
 0x210   : > { %v4106_v45 = vadd.f32 %v6431_v59, %v4027_v21  ;;  %v4028_v12 = vmax.f32 %v7019_v11, %v3956_v6 }
 0x211   : > { %4180 = vst [vmem:[%s6439_s28 + $0x90] sm:$0xff] %v4108_v7  ;;  %v4109_v41 = vadd.f32 %v6431_v59, %v4030_v39 }
 0x212   : > { %4178 = vst [vmem:[%s6439_s28 + $0x80] sm:$0xff] %v4106_v45  ;;  %v4107_v17 = vadd.f32 %v6431_v59, %v4028_v12  ;;  %v5065_v27 = vpop.f32.mrb[92].mxu0  ;;  %v5153_v42 = vpop.f32.mrb[92].mxu1 }
 0x213   : > { %4181 = vst [vmem:[%s6439_s28 + $0x98] sm:$0xff] %v4109_v41  ;;  %v3961_v61 = vmax.f32 %v5065_v27, %v5153_v42  ;;  %v3050_v37 = vpop.f32.mrb[93].mxu0  ;;  %v3660_v43 = vpop.f32.mrb[93].mxu1  ;;  %v7035_v27 = vld [vmem:[#allocation10_spill] sm:$0xff] }
 0x214   : > { %4179 = vst [vmem:[%s6439_s28 + $0x88] sm:$0xff] %v4107_v17  ;;  %v3959_v44 = vmax.f32 %v3050_v37, %v3660_v43  ;;  %v5066_v48 = vpop.f32.mrb[94].mxu0  ;;  %v5154_v46 = vpop.f32.mrb[94].mxu1  ;;  %v7034_v17 = vld [vmem:[#allocation9_spill] sm:$0xff] }
 0x215   : > { %v4033_v0 = vmax.f32 %v7020_v60, %v3961_v61  ;;  %v3962_v47 = vmax.f32 %v5066_v48, %v5154_v46  ;;  %v3053_v9 = vpop.f32.mrb[95].mxu0  ;;  %v3663_v22 = vpop.f32.mrb[95].mxu1  ;;  %v7036_v42 = vmax.f32 %v7034_v17, %v7035_v27  ;;  %v7037_v48 = vld [vmem:[#allocation11_spill] sm:$0xff]  ;;  %v7038_v46 = vld [vmem:[#allocation12_spill] sm:$0xff]  ;;  %v7058_v27 = vld [vmem:[#allocation25_spill] sm:$0xff] }
 0x216   : > { %v4031_v52 = vmax.f32 %v7021_v51, %v3959_v44  ;;  %v3960_v23 = vmax.f32 %v3053_v9, %v3663_v22  ;;  %v7039_v60 = vmax.f32 %v7037_v48, %v7038_v46  ;;  %v7040_v22 = vld [vmem:[#allocation13_spill] sm:$0xff]  ;;  %v7041_v51 = vld [vmem:[#allocation14_spill] sm:$0xff]  ;;  %v7061_v46 = vld [vmem:[#allocation27_spill] sm:$0xff] }
 0x217   : > { %v4112_v10 = vadd.f32 %v6431_v59, %v4033_v0  ;;  %v4034_v26 = vmax.f32 %v7022_v25, %v3962_v47  ;;  %v7043_v25 = vld [vmem:[#allocation15_spill] sm:$0xff] }
 0x218   : > { %v4110_v49 = vadd.f32 %v6431_v59, %v4031_v52  ;;  %v4032_v33 = vmax.f32 %v7023_v16, %v3960_v23  ;;  %v7042_v52 = vmax.f32 %v7040_v22, %v7041_v51  ;;  %v7064_v51 = vld [vmem:[#allocation29_spill] sm:$0xff] }
 0x219   : > { %4184 = vst [vmem:[%s6439_s28 + $0xb0] sm:$0xff] %v4112_v10  ;;  %v4113_v56 = vadd.f32 %v6431_v59, %v4034_v26  ;;  %v7044_v26 = vld [vmem:[#allocation16_spill] sm:$0xff] }
 0x21a   : > { %4182 = vst [vmem:[%s6439_s28 + $0xa0] sm:$0xff] %v4110_v49  ;;  %v4111_v2 = vadd.f32 %v6431_v59, %v4032_v33  ;;  %v5069_v5 = vpop.f32.mrb[96].mxu0  ;;  %v5157_v8 = vpop.f32.mrb[96].mxu1  ;;  %v7045_v49 = vmax.f32 %v7043_v25, %v7044_v26  ;;  %v7067_v26 = vld [vmem:[#allocation31_spill] sm:$0xff] }
 0x21b   : > { %4185 = vst [vmem:[%s6439_s28 + $0xb8] sm:$0xff] %v4113_v56  ;;  %v3965_v30 = vmax.f32 %v5069_v5, %v5157_v8  ;;  %v3066_v31 = vpop.f32.mrb[97].mxu0  ;;  %v3676_v28 = vpop.f32.mrb[97].mxu1 }
 0x21c   : > { %4183 = vst [vmem:[%s6439_s28 + $0xa8] sm:$0xff] %v4111_v2  ;;  %v3963_v32 = vmax.f32 %v3066_v31, %v3676_v28  ;;  %v5070_v34 = vpop.f32.mrb[98].mxu0  ;;  %v5158_v54 = vpop.f32.mrb[98].mxu1 }
 0x21d   : > { %v4037_v53 = vmax.f32 %v7024_v50, %v3965_v30  ;;  %v3966_v55 = vmax.f32 %v5070_v34, %v5158_v54  ;;  %v3069_v14 = vpop.f32.mrb[99].mxu0  ;;  %v3679_v57 = vpop.f32.mrb[99].mxu1  ;;  %v7046_v54 = vld [vmem:[#allocation17_spill] sm:$0xff]  ;;  %v7047_v50 = vld [vmem:[#allocation18_spill] sm:$0xff] }
 0x21e   : > { %v4035_v15 = vmax.f32 %v7027_v36, %v3963_v32  ;;  %v3964_v62 = vmax.f32 %v3069_v14, %v3679_v57  ;;  %v7050_v36 = vld [vmem:[#allocation20_spill] sm:$0xff] }
 0x21f   : > { %v4116_v63 = vadd.f32 %v6431_v59, %v4037_v53  ;;  %v4038_v4 = vmax.f32 %v7030_v3, %v3966_v55  ;;  %v7048_v53 = vmax.f32 %v7046_v54, %v7047_v50  ;;  %v7053_v3 = vld [vmem:[#allocation22_spill] sm:$0xff]  ;;  %v7070_v50 = vld [vmem:[#allocation33_spill] sm:$0xff] }
 0x220   : > { %v4114_v19 = vadd.f32 %v6431_v59, %v4035_v15  ;;  %v4036_v13 = vmax.f32 %v7033_v20, %v3964_v62  ;;  %v7051_v15 = vmax.f32 %v7049_v35, %v7050_v36  ;;  %v7056_v20 = vld [vmem:[#allocation24_spill] sm:$0xff]  ;;  %v7073_v36 = vld [vmem:[#allocation35_spill] sm:$0xff] }
 0x221   : > { %4188 = vst [vmem:[%s6439_s28 + $0xd0] sm:$0xff] %v4116_v63  ;;  %v4117_v18 = vadd.f32 %v6431_v59, %v4038_v4  ;;  %v7054_v4 = vmax.f32 %v7052_v24, %v7053_v3  ;;  %v7076_v3 = vld [vmem:[#allocation37_spill] sm:$0xff] }
 0x222   : > { %4186 = vst [vmem:[%s6439_s28 + $0xc0] sm:$0xff] %v4114_v19  ;;  %v4115_v21 = vadd.f32 %v6431_v59, %v4036_v13  ;;  %v5073_v6 = vpop.f32.mrb[100].mxu0  ;;  %v5161_v7 = vpop.f32.mrb[100].mxu1  ;;  %v7057_v13 = vmax.f32 %v7055_v1, %v7056_v20  ;;  %v7079_v20 = vld [vmem:[#allocation39_spill] sm:$0xff] }
 0x223   : > { %4189 = vst [vmem:[%s6439_s28 + $0xd8] sm:$0xff] %v4117_v18  ;;  %v3969_v38 = vmax.f32 %v5073_v6, %v5161_v7  ;;  %v3082_v39 = vpop.f32.mrb[101].mxu0  ;;  %v3692_v45 = vpop.f32.mrb[101].mxu1 }
 0x224   : > { %4187 = vst [vmem:[%s6439_s28 + $0xc8] sm:$0xff] %v4115_v21  ;;  %v3967_v11 = vmax.f32 %v3082_v39, %v3692_v45  ;;  %v5074_v12 = vpop.f32.mrb[102].mxu0  ;;  %v5162_v41 = vpop.f32.mrb[102].mxu1 }
 0x225   : > { %v4041_v61 = vmax.f32 %v7036_v42, %v3969_v38  ;;  %v3970_v37 = vmax.f32 %v5074_v12, %v5162_v41  ;;  %v3085_v43 = vpop.f32.mrb[103].mxu0  ;;  %v3695_v44 = vpop.f32.mrb[103].mxu1  ;;  %v7059_v42 = vld [vmem:[#allocation26_spill] sm:$0xff] }
 0x226   : > { %v4039_v0 = vmax.f32 %v7039_v60, %v3967_v11  ;;  %v3968_v47 = vmax.f32 %v3085_v43, %v3695_v44  ;;  %v7062_v60 = vld [vmem:[#allocation28_spill] sm:$0xff] }
 0x227   : > { %v4120_v9 = vadd.f32 %v6431_v59, %v4041_v61  ;;  %v4042_v23 = vmax.f32 %v7042_v52, %v3970_v37  ;;  %v7060_v61 = vmax.f32 %v7058_v27, %v7059_v42  ;;  %v7065_v52 = vld [vmem:[#allocation30_spill] sm:$0xff]  ;;  %v7082_v42 = vld [vmem:[#allocation41_spill] sm:$0xff] }
 0x228   : > { %v4118_v10 = vadd.f32 %v6431_v59, %v4039_v0  ;;  %v4040_v16 = vmax.f32 %v7045_v49, %v3968_v47  ;;  %v7063_v0 = vmax.f32 %v7061_v46, %v7062_v60  ;;  %v7068_v49 = vld [vmem:[#allocation32_spill] sm:$0xff]  ;;  %v7085_v60 = vld [vmem:[#allocation43_spill] sm:$0xff] }
 0x229   : > { %4192 = vst [vmem:[%s6439_s28 + $0xf0] sm:$0xff] %v4120_v9  ;;  %v4121_v33 = vadd.f32 %v6431_v59, %v4042_v23  ;;  %v7066_v23 = vmax.f32 %v7064_v51, %v7065_v52  ;;  %v7088_v52 = vld [vmem:[#allocation45_spill] sm:$0xff] }
 0x22a   : > { %4190 = vst [vmem:[%s6439_s28 + $0xe0] sm:$0xff] %v4118_v10  ;;  %v4119_v56 = vadd.f32 %v6431_v59, %v4040_v16  ;;  %v5077_v2 = vpop.f32.mrb[104].mxu0  ;;  %v5165_v5 = vpop.f32.mrb[104].mxu1  ;;  %v7069_v16 = vmax.f32 %v7067_v26, %v7068_v49  ;;  %v7091_v49 = vld [vmem:[#allocation47_spill] sm:$0xff] }
 0x22b   : > { %4193 = vst [vmem:[%s6439_s28 + $0xf8] sm:$0xff] %v4121_v33  ;;  %v3973_v8 = vmax.f32 %v5077_v2, %v5165_v5  ;;  %v3098_v30 = vpop.f32.mrb[105].mxu0  ;;  %v3708_v31 = vpop.f32.mrb[105].mxu1 }
 0x22c   : > { %4191 = vst [vmem:[%s6439_s28 + $0xe8] sm:$0xff] %v4119_v56  ;;  %v3971_v28 = vmax.f32 %v3098_v30, %v3708_v31  ;;  %v5078_v32 = vpop.f32.mrb[106].mxu0  ;;  %v5166_v34 = vpop.f32.mrb[106].mxu1 }
 0x22d   : > { %v4045_v55 = vmax.f32 %v7048_v53, %v3973_v8  ;;  %v3974_v14 = vmax.f32 %v5078_v32, %v5166_v34  ;;  %v3101_v57 = vpop.f32.mrb[107].mxu0  ;;  %v3711_v58 = vpop.f32.mrb[107].mxu1  ;;  %v7071_v53 = vld [vmem:[#allocation34_spill] sm:$0xff] }
 0x22e   : > { %v4043_v62 = vmax.f32 %v7051_v15, %v3971_v28  ;;  %v3972_v63 = vmax.f32 %v3101_v57, %v3711_v58  ;;  %v7074_v15 = vld [vmem:[#allocation36_spill] sm:$0xff] }
 0x22f   : > { %v4124_v29 = vadd.f32 %v6431_v59, %v4045_v55  ;;  %v4046_v19 = vmax.f32 %v7054_v4, %v3974_v14  ;;  %v7072_v55 = vmax.f32 %v7070_v50, %v7071_v53  ;;  %v7077_v4 = vld [vmem:[#allocation38_spill] sm:$0xff]  ;;  %v7094_v53 = vld [vmem:[#allocation49_spill] sm:$0xff] }
 0x230   : > { %v4122_v40 = vadd.f32 %v6431_v59, %v4043_v62  ;;  %v4044_v18 = vmax.f32 %v7057_v13, %v3972_v63  ;;  %v7075_v62 = vmax.f32 %v7073_v36, %v7074_v15  ;;  %v7080_v13 = vld [vmem:[#allocation40_spill] sm:$0xff]  ;;  %v7097_v15 = vld [vmem:[#allocation51_spill] sm:$0xff] }
 0x231   : > { %4196 = vst [vmem:[%s6439_s28 + $0x110] sm:$0xff] %v4124_v29  ;;  %v4125_v21 = vadd.f32 %v6431_v59, %v4046_v19  ;;  %v7078_v19 = vmax.f32 %v7076_v3, %v7077_v4  ;;  %v7100_v4 = vld [vmem:[#allocation53_spill] sm:$0xff] }
 0x232   : > { %4194 = vst [vmem:[%s6439_s28 + $0x100] sm:$0xff] %v4122_v40  ;;  %v4123_v6 = vadd.f32 %v6431_v59, %v4044_v18  ;;  %v5081_v7 = vpop.f32.mrb[108].mxu0  ;;  %v5169_v38 = vpop.f32.mrb[108].mxu1  ;;  %v7081_v18 = vmax.f32 %v7079_v20, %v7080_v13  ;;  %v7103_v13 = vld [vmem:[#allocation55_spill] sm:$0xff] }
 0x233   : > { %4197 = vst [vmem:[%s6439_s28 + $0x118] sm:$0xff] %v4125_v21  ;;  %v3977_v39 = vmax.f32 %v5081_v7, %v5169_v38  ;;  %v3114_v45 = vpop.f32.mrb[109].mxu0  ;;  %v3724_v11 = vpop.f32.mrb[109].mxu1 }
 0x234   : > { %4195 = vst [vmem:[%s6439_s28 + $0x108] sm:$0xff] %v4123_v6  ;;  %v3975_v12 = vmax.f32 %v3114_v45, %v3724_v11  ;;  %v5082_v41 = vpop.f32.mrb[110].mxu0  ;;  %v5170_v17 = vpop.f32.mrb[110].mxu1 }
 0x235   : > { %v4049_v37 = vmax.f32 %v7060_v61, %v3977_v39  ;;  %v3978_v43 = vmax.f32 %v5082_v41, %v5170_v17  ;;  %v3117_v44 = vpop.f32.mrb[111].mxu0  ;;  %v3727_v48 = vpop.f32.mrb[111].mxu1  ;;  %v7083_v61 = vld [vmem:[#allocation42_spill] sm:$0xff] }
 0x236   : > { %v4047_v47 = vmax.f32 %v7063_v0, %v3975_v12  ;;  %v3976_v9 = vmax.f32 %v3117_v44, %v3727_v48  ;;  %v7086_v0 = vld [vmem:[#allocation44_spill] sm:$0xff] }
 0x237   : > { %v4128_v22 = vadd.f32 %v6431_v59, %v4049_v37  ;;  %v4050_v10 = vmax.f32 %v7066_v23, %v3978_v43  ;;  %v7084_v37 = vmax.f32 %v7082_v42, %v7083_v61  ;;  %v7089_v23 = vld [vmem:[#allocation46_spill] sm:$0xff]  ;;  %v7106_v61 = vld [vmem:[#allocation57_spill] sm:$0xff] }
 0x238   : > { %v4126_v25 = vadd.f32 %v6431_v59, %v4047_v47  ;;  %v4048_v33 = vmax.f32 %v7069_v16, %v3976_v9  ;;  %v7087_v47 = vmax.f32 %v7085_v60, %v7086_v0  ;;  %v7092_v16 = vld [vmem:[#allocation48_spill] sm:$0xff]  ;;  %v7109_v0 = vld [vmem:[#allocation59_spill] sm:$0xff] }
 0x239   : > { %4200 = vst [vmem:[%s6439_s28 + $0x130] sm:$0xff] %v4128_v22  ;;  %v4129_v56 = vadd.f32 %v6431_v59, %v4050_v10  ;;  %v7090_v10 = vmax.f32 %v7088_v52, %v7089_v23  ;;  %v7112_v23 = vld [vmem:[#allocation61_spill] sm:$0xff] }
 0x23a   : > { %4198 = vst [vmem:[%s6439_s28 + $0x120] sm:$0xff] %v4126_v25  ;;  %v4127_v2 = vadd.f32 %v6431_v59, %v4048_v33  ;;  %v5085_v5 = vpop.f32.mrb[112].mxu0  ;;  %v5173_v8 = vpop.f32.mrb[112].mxu1  ;;  %v7093_v33 = vmax.f32 %v7091_v49, %v7092_v16  ;;  %v7115_v16 = vld [vmem:[#allocation63_spill] sm:$0xff] }
 0x23b   : > { %4201 = vst [vmem:[%s6439_s28 + $0x138] sm:$0xff] %v4129_v56  ;;  %v3981_v30 = vmax.f32 %v5085_v5, %v5173_v8  ;;  %v3130_v31 = vpop.f32.mrb[113].mxu0  ;;  %v3740_v28 = vpop.f32.mrb[113].mxu1 }
 0x23c   : > { %4199 = vst [vmem:[%s6439_s28 + $0x128] sm:$0xff] %v4127_v2  ;;  %v3979_v32 = vmax.f32 %v3130_v31, %v3740_v28  ;;  %v5086_v34 = vpop.f32.mrb[114].mxu0  ;;  %v5174_v54 = vpop.f32.mrb[114].mxu1 }
 0x23d   : > { %v4053_v14 = vmax.f32 %v7072_v55, %v3981_v30  ;;  %v3982_v57 = vmax.f32 %v5086_v34, %v5174_v54  ;;  %v3133_v58 = vpop.f32.mrb[115].mxu0  ;;  %v3743_v35 = vpop.f32.mrb[115].mxu1  ;;  %v7095_v55 = vld [vmem:[#allocation50_spill] sm:$0xff] }
 0x23e   : > { %v4051_v63 = vmax.f32 %v7075_v62, %v3979_v32  ;;  %v3980_v29 = vmax.f32 %v3133_v58, %v3743_v35  ;;  %v7098_v62 = vld [vmem:[#allocation52_spill] sm:$0xff] }
 0x23f   : > { %v4132_v24 = vadd.f32 %v6431_v59, %v4053_v14  ;;  %v4054_v40 = vmax.f32 %v7078_v19, %v3982_v57  ;;  %v7096_v14 = vmax.f32 %v7094_v53, %v7095_v55  ;;  %v7101_v19 = vld [vmem:[#allocation54_spill] sm:$0xff]  ;;  %v7118_v55 = vld [vmem:[#allocation65_spill] sm:$0xff] }
 0x240   : > { %v4130_v1 = vadd.f32 %v6431_v59, %v4051_v63  ;;  %v4052_v21 = vmax.f32 %v7081_v18, %v3980_v29  ;;  %v7099_v63 = vmax.f32 %v7097_v15, %v7098_v62  ;;  %v7104_v18 = vld [vmem:[#allocation56_spill] sm:$0xff]  ;;  %v7121_v62 = vld [vmem:[#allocation67_spill] sm:$0xff] }
 0x241   : > { %4204 = vst [vmem:[%s6439_s28 + $0x150] sm:$0xff] %v4132_v24  ;;  %v4133_v6 = vadd.f32 %v6431_v59, %v4054_v40  ;;  %v7102_v40 = vmax.f32 %v7100_v4, %v7101_v19  ;;  %v7124_v19 = vld [vmem:[#allocation69_spill] sm:$0xff] }
 0x242   : > { %4202 = vst [vmem:[%s6439_s28 + $0x140] sm:$0xff] %v4130_v1  ;;  %v4131_v7 = vadd.f32 %v6431_v59, %v4052_v21  ;;  %v5089_v38 = vpop.f32.mrb[116].mxu0  ;;  %v5177_v39 = vpop.f32.mrb[116].mxu1  ;;  %v7105_v21 = vmax.f32 %v7103_v13, %v7104_v18  ;;  %v7127_v18 = vld [vmem:[#allocation71_spill] sm:$0xff] }
 0x243   : > { %4205 = vst [vmem:[%s6439_s28 + $0x158] sm:$0xff] %v4133_v6  ;;  %v3985_v45 = vmax.f32 %v5089_v38, %v5177_v39  ;;  %v3146_v11 = vpop.f32.mrb[117].mxu0  ;;  %v3756_v12 = vpop.f32.mrb[117].mxu1 }
 0x244   : > { %4203 = vst [vmem:[%s6439_s28 + $0x148] sm:$0xff] %v4131_v7  ;;  %v3983_v41 = vmax.f32 %v3146_v11, %v3756_v12  ;;  %v5090_v17 = vpop.f32.mrb[118].mxu0  ;;  %v5178_v27 = vpop.f32.mrb[118].mxu1 }
 0x245   : > { %v4057_v43 = vmax.f32 %v7084_v37, %v3985_v45  ;;  %v3986_v44 = vmax.f32 %v5090_v17, %v5178_v27  ;;  %v3149_v48 = vpop.f32.mrb[119].mxu0  ;;  %v3759_v46 = vpop.f32.mrb[119].mxu1  ;;  %v7107_v37 = vld [vmem:[#allocation58_spill] sm:$0xff] }
 0x246   : > { %v4055_v9 = vmax.f32 %v7087_v47, %v3983_v41  ;;  %v3984_v22 = vmax.f32 %v3149_v48, %v3759_v46  ;;  %v7110_v47 = vld [vmem:[#allocation60_spill] sm:$0xff] }
 0x247   : > { %v4136_v51 = vadd.f32 %v6431_v59, %v4057_v43  ;;  %v4058_v25 = vmax.f32 %v7090_v10, %v3986_v44  ;;  %v7108_v43 = vmax.f32 %v7106_v61, %v7107_v37  ;;  %v7113_v10 = vld [vmem:[#allocation62_spill] sm:$0xff]  ;;  %v7130_v37 = vld [vmem:[#allocation73_spill] sm:$0xff] }
 0x248   : > { %v4134_v26 = vadd.f32 %v6431_v59, %v4055_v9  ;;  %v4056_v56 = vmax.f32 %v7093_v33, %v3984_v22  ;;  %v7111_v9 = vmax.f32 %v7109_v0, %v7110_v47  ;;  %v7116_v33 = vld [vmem:[#allocation64_spill] sm:$0xff]  ;;  %v7133_v47 = vld [vmem:[#allocation75_spill] sm:$0xff] }
 0x249   : > { %4208 = vst [vmem:[%s6439_s28 + $0x170] sm:$0xff] %v4136_v51  ;;  %v4137_v2 = vadd.f32 %v6431_v59, %v4058_v25  ;;  %v7114_v25 = vmax.f32 %v7112_v23, %v7113_v10  ;;  %v7136_v10 = vld [vmem:[#allocation77_spill] sm:$0xff] }
 0x24a   : > { %4206 = vst [vmem:[%s6439_s28 + $0x160] sm:$0xff] %v4134_v26  ;;  %v4135_v5 = vadd.f32 %v6431_v59, %v4056_v56  ;;  %v5093_v8 = vpop.f32.mrb[120].mxu0  ;;  %v5181_v30 = vpop.f32.mrb[120].mxu1  ;;  %v7117_v56 = vmax.f32 %v7115_v16, %v7116_v33  ;;  %v7139_v33 = vld [vmem:[#allocation79_spill] sm:$0xff] }
 0x24b   : > { %4209 = vst [vmem:[%s6439_s28 + $0x178] sm:$0xff] %v4137_v2  ;;  %v3989_v31 = vmax.f32 %v5093_v8, %v5181_v30  ;;  %v3162_v28 = vpop.f32.mrb[121].mxu0  ;;  %v3772_v32 = vpop.f32.mrb[121].mxu1 }
 0x24c   : > { %4207 = vst [vmem:[%s6439_s28 + $0x168] sm:$0xff] %v4135_v5  ;;  %v3987_v34 = vmax.f32 %v3162_v28, %v3772_v32  ;;  %v5094_v54 = vpop.f32.mrb[122].mxu0  ;;  %v5182_v50 = vpop.f32.mrb[122].mxu1 }
 0x24d   : > { %v4061_v57 = vmax.f32 %v7096_v14, %v3989_v31  ;;  %v3990_v58 = vmax.f32 %v5094_v54, %v5182_v50  ;;  %v3165_v35 = vpop.f32.mrb[123].mxu0  ;;  %v3775_v36 = vpop.f32.mrb[123].mxu1  ;;  %v7119_v14 = vld [vmem:[#allocation66_spill] sm:$0xff] }
 0x24e   : > { %v4059_v29 = vmax.f32 %v7099_v63, %v3987_v34  ;;  %v3988_v24 = vmax.f32 %v3165_v35, %v3775_v36  ;;  %v7122_v63 = vld [vmem:[#allocation68_spill] sm:$0xff] }
 0x24f   : > { %v4140_v3 = vadd.f32 %v6431_v59, %v4061_v57  ;;  %v4062_v1 = vmax.f32 %v7102_v40, %v3990_v58  ;;  %v7120_v57 = vmax.f32 %v7118_v55, %v7119_v14  ;;  %v7125_v40 = vld [vmem:[#allocation70_spill] sm:$0xff]  ;;  %v7142_v14 = vld [vmem:[#allocation81_spill] sm:$0xff] }
 0x250   : > { %v4138_v20 = vadd.f32 %v6431_v59, %v4059_v29  ;;  %v4060_v6 = vmax.f32 %v7105_v21, %v3988_v24  ;;  %v7123_v29 = vmax.f32 %v7121_v62, %v7122_v63  ;;  %v7128_v21 = vld [vmem:[#allocation72_spill] sm:$0xff]  ;;  %v7145_v63 = vld [vmem:[#allocation83_spill] sm:$0xff] }
 0x251   : > { %4212 = vst [vmem:[%s6439_s28 + $0x190] sm:$0xff] %v4140_v3  ;;  %v4141_v7 = vadd.f32 %v6431_v59, %v4062_v1  ;;  %v7126_v1 = vmax.f32 %v7124_v19, %v7125_v40  ;;  %v7148_v40 = vld [vmem:[#allocation85_spill] sm:$0xff] }
 0x252   : > { %4210 = vst [vmem:[%s6439_s28 + $0x180] sm:$0xff] %v4138_v20  ;;  %v4139_v38 = vadd.f32 %v6431_v59, %v4060_v6  ;;  %v5097_v39 = vpop.f32.mrb[124].mxu0  ;;  %v5185_v45 = vpop.f32.mrb[124].mxu1  ;;  %v7129_v6 = vmax.f32 %v7127_v18, %v7128_v21  ;;  %v7151_v21 = vld [vmem:[#allocation87_spill] sm:$0xff] }
 0x253   : > { %4213 = vst [vmem:[%s6439_s28 + $0x198] sm:$0xff] %v4141_v7  ;;  %v3993_v11 = vmax.f32 %v5097_v39, %v5185_v45  ;;  %v3178_v12 = vpop.f32.mrb[125].mxu0  ;;  %v3788_v41 = vpop.f32.mrb[125].mxu1 }
 0x254   : > { %4211 = vst [vmem:[%s6439_s28 + $0x188] sm:$0xff] %v4139_v38  ;;  %v3991_v17 = vmax.f32 %v3178_v12, %v3788_v41  ;;  %v5098_v27 = vpop.f32.mrb[126].mxu0  ;;  %v5186_v42 = vpop.f32.mrb[126].mxu1 }
 0x255   : > { %v4065_v44 = vmax.f32 %v7108_v43, %v3993_v11  ;;  %v3994_v48 = vmax.f32 %v5098_v27, %v5186_v42  ;;  %v3181_v46 = vpop.f32.mrb[127].mxu0  ;;  %v3791_v60 = vpop.f32.mrb[127].mxu1  ;;  %v7131_v43 = vld [vmem:[#allocation74_spill] sm:$0xff] }
 0x256   : > { %v4063_v22 = vmax.f32 %v7111_v9, %v3991_v17  ;;  %v3992_v51 = vmax.f32 %v3181_v46, %v3791_v60  ;;  %v7134_v9 = vld [vmem:[#allocation76_spill] sm:$0xff] }
 0x257   : > { %v4144_v52 = vadd.f32 %v6431_v59, %v4065_v44  ;;  %v4066_v26 = vmax.f32 %v7114_v25, %v3994_v48  ;;  %v7132_v44 = vmax.f32 %v7130_v37, %v7131_v43  ;;  %v7137_v25 = vld [vmem:[#allocation78_spill] sm:$0xff]  ;;  %v7154_v43 = vld [vmem:[#allocation89_spill] sm:$0xff] }
 0x258   : > { %v4142_v49 = vadd.f32 %v6431_v59, %v4063_v22  ;;  %v4064_v2 = vmax.f32 %v7117_v56, %v3992_v51  ;;  %v7135_v22 = vmax.f32 %v7133_v47, %v7134_v9  ;;  %v7140_v56 = vld [vmem:[#allocation80_spill] sm:$0xff]  ;;  %v7157_v9 = vld [vmem:[#allocation91_spill] sm:$0xff] }
 0x259   : > { %4216 = vst [vmem:[%s6439_s28 + $0x1b0] sm:$0xff] %v4144_v52  ;;  %v4145_v5 = vadd.f32 %v6431_v59, %v4066_v26  ;;  %v7138_v26 = vmax.f32 %v7136_v10, %v7137_v25  ;;  %v7160_v25 = vld [vmem:[#allocation93_spill] sm:$0xff] }
 0x25a   : > { %4214 = vst [vmem:[%s6439_s28 + $0x1a0] sm:$0xff] %v4142_v49  ;;  %v4143_v8 = vadd.f32 %v6431_v59, %v4064_v2  ;;  %v5101_v30 = vpop.f32.mrb[128].mxu0  ;;  %v5189_v31 = vpop.f32.mrb[128].mxu1  ;;  %v7141_v2 = vmax.f32 %v7139_v33, %v7140_v56  ;;  %v7163_v56 = vld [vmem:[#allocation95_spill] sm:$0xff] }
 0x25b   : > { %4217 = vst [vmem:[%s6439_s28 + $0x1b8] sm:$0xff] %v4145_v5  ;;  %v3997_v28 = vmax.f32 %v5101_v30, %v5189_v31  ;;  %v3194_v32 = vpop.f32.mrb[129].mxu0  ;;  %v3804_v34 = vpop.f32.mrb[129].mxu1 }
 0x25c   : > { %4215 = vst [vmem:[%s6439_s28 + $0x1a8] sm:$0xff] %v4143_v8  ;;  %v3995_v54 = vmax.f32 %v3194_v32, %v3804_v34  ;;  %v5102_v50 = vpop.f32.mrb[130].mxu0  ;;  %v5190_v53 = vpop.f32.mrb[130].mxu1 }
 0x25d   : > { %v4069_v58 = vmax.f32 %v7120_v57, %v3997_v28  ;;  %v3998_v35 = vmax.f32 %v5102_v50, %v5190_v53  ;;  %v3197_v36 = vpop.f32.mrb[131].mxu0  ;;  %v3807_v15 = vpop.f32.mrb[131].mxu1  ;;  %v7143_v57 = vld [vmem:[#allocation82_spill] sm:$0xff] }
 0x25e   : > { %v4067_v24 = vmax.f32 %v7123_v29, %v3995_v54  ;;  %v3996_v3 = vmax.f32 %v3197_v36, %v3807_v15  ;;  %v7146_v29 = vld [vmem:[#allocation84_spill] sm:$0xff] }
 0x25f   : > { %v4148_v4 = vadd.f32 %v6431_v59, %v4069_v58  ;;  %v4070_v20 = vmax.f32 %v7126_v1, %v3998_v35  ;;  %v7144_v58 = vmax.f32 %v7142_v14, %v7143_v57  ;;  %v7149_v1 = vld [vmem:[#allocation86_spill] sm:$0xff] }
 0x260   : > { %v4146_v13 = vadd.f32 %v6431_v59, %v4067_v24  ;;  %v4068_v7 = vmax.f32 %v7129_v6, %v3996_v3  ;;  %v7147_v24 = vmax.f32 %v7145_v63, %v7146_v29  ;;  %v7152_v6 = vld [vmem:[#allocation88_spill] sm:$0xff] }
 0x261   : > { %4220 = vst [vmem:[%s6439_s28 + $0x1d0] sm:$0xff] %v4148_v4  ;;  %v4149_v38 = vadd.f32 %v6431_v59, %v4070_v20  ;;  %v7150_v20 = vmax.f32 %v7148_v40, %v7149_v1 }
 0x262   : > { %4218 = vst [vmem:[%s6439_s28 + $0x1c0] sm:$0xff] %v4146_v13  ;;  %v4147_v39 = vadd.f32 %v6431_v59, %v4068_v7  ;;  %v5105_v45 = vpop.f32.mrb[132].mxu0  ;;  %v5193_v11 = vpop.f32.mrb[132].mxu1  ;;  %v7153_v7 = vmax.f32 %v7151_v21, %v7152_v6 }
 0x263   : > { %4221 = vst [vmem:[%s6439_s28 + $0x1d8] sm:$0xff] %v4149_v38  ;;  %v4001_v12 = vmax.f32 %v5105_v45, %v5193_v11  ;;  %v3210_v41 = vpop.f32.mrb[133].mxu0  ;;  %v3820_v17 = vpop.f32.mrb[133].mxu1 }
 0x264   : > { %4219 = vst [vmem:[%s6439_s28 + $0x1c8] sm:$0xff] %v4147_v39  ;;  %v3999_v27 = vmax.f32 %v3210_v41, %v3820_v17  ;;  %v5106_v42 = vpop.f32.mrb[134].mxu0  ;;  %v5194_v61 = vpop.f32.mrb[134].mxu1 }
 0x265   : > { %v4073_v48 = vmax.f32 %v7132_v44, %v4001_v12  ;;  %v4002_v46 = vmax.f32 %v5106_v42, %v5194_v61  ;;  %v3213_v60 = vpop.f32.mrb[135].mxu0  ;;  %v3823_v0 = vpop.f32.mrb[135].mxu1  ;;  %v7155_v44 = vld [vmem:[#allocation90_spill] sm:$0xff] }
 0x266   : > { %v4071_v51 = vmax.f32 %v7135_v22, %v3999_v27  ;;  %v4000_v52 = vmax.f32 %v3213_v60, %v3823_v0  ;;  %v7158_v22 = vld [vmem:[#allocation92_spill] sm:$0xff] }
 0x267   : > { %v4152_v23 = vadd.f32 %v6431_v59, %v4073_v48  ;;  %v4074_v49 = vmax.f32 %v7138_v26, %v4002_v46  ;;  %v7156_v48 = vmax.f32 %v7154_v43, %v7155_v44  ;;  %v7161_v26 = vld [vmem:[#allocation94_spill] sm:$0xff] }
 0x268   : > { %v4150_v16 = vadd.f32 %v6431_v59, %v4071_v51  ;;  %v4072_v5 = vmax.f32 %v7141_v2, %v4000_v52  ;;  %v7159_v51 = vmax.f32 %v7157_v9, %v7158_v22  ;;  %v7164_v2 = vld [vmem:[#allocation96_spill] sm:$0xff] }
 0x269   : > { %4224 = vst [vmem:[%s6439_s28 + $0x1f0] sm:$0xff] %v4152_v23  ;;  %v4153_v8 = vadd.f32 %v6431_v59, %v4074_v49  ;;  %v7162_v49 = vmax.f32 %v7160_v25, %v7161_v26 }
 0x26a   : > { %4222 = vst [vmem:[%s6439_s28 + $0x1e0] sm:$0xff] %v4150_v16  ;;  %v4151_v30 = vadd.f32 %v6431_v59, %v4072_v5  ;;  %v5109_v31 = vpop.f32.mrb[136].mxu0  ;;  %v5197_v28 = vpop.f32.mrb[136].mxu1  ;;  %v7165_v5 = vmax.f32 %v7163_v56, %v7164_v2 }
 0x26b   : > { %4225 = vst [vmem:[%s6439_s28 + $0x1f8] sm:$0xff] %v4153_v8  ;;  %v4005_v32 = vmax.f32 %v5109_v31, %v5197_v28  ;;  %v3226_v34 = vpop.f32.mrb[137].mxu0  ;;  %v3836_v54 = vpop.f32.mrb[137].mxu1 }
 0x26c   : > { %4223 = vst [vmem:[%s6439_s28 + $0x1e8] sm:$0xff] %v4151_v30  ;;  %v4003_v50 = vmax.f32 %v3226_v34, %v3836_v54  ;;  %v5110_v53 = vpop.f32.mrb[138].mxu0  ;;  %v5198_v55 = vpop.f32.mrb[138].mxu1 }
 0x26d   : > { %v4077_v35 = vmax.f32 %v7144_v58, %v4005_v32  ;;  %v4006_v36 = vmax.f32 %v5110_v53, %v5198_v55  ;;  %v3229_v15 = vpop.f32.mrb[139].mxu0  ;;  %v3839_v62 = vpop.f32.mrb[139].mxu1 }
 0x26e   : > { %v4075_v3 = vmax.f32 %v7147_v24, %v4003_v50  ;;  %v4004_v4 = vmax.f32 %v3229_v15, %v3839_v62 }
 0x26f   : > { %v4156_v19 = vadd.f32 %v6431_v59, %v4077_v35  ;;  %v4078_v13 = vmax.f32 %v7150_v20, %v4006_v36 }
 0x270   : > { %v4154_v18 = vadd.f32 %v6431_v59, %v4075_v3  ;;  %v4076_v38 = vmax.f32 %v7153_v7, %v4004_v4 }
 0x271   : > { %4228 = vst [vmem:[%s6439_s28 + $0x210] sm:$0xff] %v4156_v19  ;;  %v4157_v39 = vadd.f32 %v6431_v59, %v4078_v13 }
 0x272   : > { %4226 = vst [vmem:[%s6439_s28 + $0x200] sm:$0xff] %v4154_v18  ;;  %v4155_v45 = vadd.f32 %v6431_v59, %v4076_v38  ;;  %v5113_v11 = vpop.f32.mrb[140].mxu0  ;;  %v5201_v12 = vpop.f32.mrb[140].mxu1 }
 0x273   : > { %4229 = vst [vmem:[%s6439_s28 + $0x218] sm:$0xff] %v4157_v39  ;;  %v4009_v41 = vmax.f32 %v5113_v11, %v5201_v12  ;;  %v3242_v17 = vpop.f32.mrb[141].mxu0  ;;  %v3852_v27 = vpop.f32.mrb[141].mxu1 }
 0x274   : > { %4227 = vst [vmem:[%s6439_s28 + $0x208] sm:$0xff] %v4155_v45  ;;  %v4007_v42 = vmax.f32 %v3242_v17, %v3852_v27  ;;  %v5114_v61 = vpop.f32.mrb[142].mxu0  ;;  %v5202_v37 = vpop.f32.mrb[142].mxu1 }
 0x275   : > { %v4081_v46 = vmax.f32 %v7156_v48, %v4009_v41  ;;  %v4010_v60 = vmax.f32 %v5114_v61, %v5202_v37  ;;  %v3245_v0 = vpop.f32.mrb[143].mxu0  ;;  %v3855_v47 = vpop.f32.mrb[143].mxu1 }
 0x276   : > { %v4079_v52 = vmax.f32 %v7159_v51, %v4007_v42  ;;  %v4008_v23 = vmax.f32 %v3245_v0, %v3855_v47 }
 0x277   : > { %v4160_v10 = vadd.f32 %v6431_v59, %v4081_v46  ;;  %v4082_v16 = vmax.f32 %v7162_v49, %v4010_v60 }
 0x278   : > { %v4158_v33 = vadd.f32 %v6431_v59, %v4079_v52  ;;  %v4080_v8 = vmax.f32 %v7165_v5, %v4008_v23 }
 0x279   : > { %4232 = vst [vmem:[%s6439_s28 + $0x230] sm:$0xff] %v4160_v10  ;;  %v4161_v30 = vadd.f32 %v6431_v59, %v4082_v16 }
 0x27a   : > { %4230 = vst [vmem:[%s6439_s28 + $0x220] sm:$0xff] %v4158_v33  ;;  %v4159_v31 = vadd.f32 %v6431_v59, %v4080_v8 }
 0x27b   : > { %4233 = vst [vmem:[%s6439_s28 + $0x238] sm:$0xff] %v4161_v30 }
 0x27c   : > { %4231 = vst [vmem:[%s6439_s28 + $0x228] sm:$0xff] %v4159_v31 }
 0x27d PF: > { %p10_p9 = scmp.ge.s32.totalorder %s5442_s16, 4   ;;  %s7166_s12 = smov %s5399_s13 }
 0x27e   : > { %s7167_s13 = smov %s5451_s19  ;;  %s7168_s14 = smov %s5442_s16 }
 0x27f   :  { %12 = sbr.rel (!%p10_p9) target bundleno = 2 (0x2), region = 111 }

// kernel: mnist_tier_forward.4
= control target key start
LH: loop header
LB: loop body
LE: loop exit
PB: predicated region body
PF: predicated region fallthrough
CT: control target
= control target key end

     0   :  { %vm759_vm0 = vcmask 261120   ;;  %s7337_s1 = inlined_call_operand.vmem [shape: bf16[800,128], index: 1, kind: input, shape index: {}]   ;;  %s7338_s0 = inlined_call_operand.vmem [shape: bf16[4,128,800], index: 0, kind: input, shape index: {}]   ;;  %s7339_s2 = inlined_call_operand.vmem [shape: f32[1,128], index: 2, kind: input, shape index: {}]   ;;  %s7340_s3 = inlined_call_operand.vmem [shape: f32[128,128], index: 3, kind: output, shape index: {}]  }
   0x1   :  { %v5364_v0 = vld [vmem:[%s7337_s1 + $0x40] sm:$0xff]   ;;  %v5387_v4 = vld [vmem:[%s7337_s1 + $0x48] sm:$0xff]   ;;  %v5411_v8 = vld [vmem:[%s7337_s1 + $0x50] sm:$0xff]  }
   0x2   :  { %v5369_v1 = vld [vmem:[%s7337_s1 + $0xc0] sm:$0xff]   ;;  %4033 = vmatprep.subr.bf16.mxu0 %v5364_v0  ;;  %v5393_v5 = vld [vmem:[%s7337_s1 + $0xc8] sm:$0xff]   ;;  %v5417_v9 = vld [vmem:[%s7337_s1 + $0xd0] sm:$0xff]  }
   0x3   :  { %v5375_v2 = vld [vmem:[%s7337_s1] sm:$0xff]   ;;  %4097 = vmatprep.subr.bf16.mxu1 %v5369_v1  ;;  %v5399_v6 = vld [vmem:[%s7337_s1 + $0x8] sm:$0xff]   ;;  %v5423_v10 = vld [vmem:[%s7337_s1 + $0x10] sm:$0xff]  }
   0x4   :  { %v5381_v3 = vld [vmem:[%s7337_s1 + $0x80] sm:$0xff]   ;;  %4034 = vmatpush3.bf16.msra.mxu0 %v5375_v2  ;;  %v5405_v7 = vld [vmem:[%s7337_s1 + $0x88] sm:$0xff]   ;;  %v5429_v11 = vld [vmem:[%s7337_s1 + $0x90] sm:$0xff]  }
   0x5   :  { %4098 = vmatpush3.bf16.msra.mxu1 %v5381_v3  ;;  %4035 = vmatprep.subr.bf16.mxu0 %v5387_v4  ;;  %v5435_v12 = vld [vmem:[%s7337_s1 + $0x58] sm:$0xff]   ;;  %v5459_v16 = vld [vmem:[%s7337_s1 + $0x60] sm:$0xff]   ;;  %v5483_v20 = vld [vmem:[%s7337_s1 + $0x68] sm:$0xff]  }
   0x6   :  { %4099 = vmatprep.subr.bf16.mxu1 %v5393_v5  ;;  %v5441_v13 = vld [vmem:[%s7337_s1 + $0xd8] sm:$0xff]   ;;  %v5465_v17 = vld [vmem:[%s7337_s1 + $0xe0] sm:$0xff]   ;;  %v5489_v21 = vld [vmem:[%s7337_s1 + $0xe8] sm:$0xff]  }
   0x7   :  { %v5447_v14 = vld [vmem:[%s7337_s1 + $0x18] sm:$0xff]   ;;  %v5471_v18 = vld [vmem:[%s7337_s1 + $0x20] sm:$0xff]   ;;  %v5495_v22 = vld [vmem:[%s7337_s1 + $0x28] sm:$0xff]  }
   0x8   :  { %4036 = vmatpush3.bf16.msra.mxu0 %v5399_v6  ;;  %v5453_v15 = vld [vmem:[%s7337_s1 + $0x98] sm:$0xff]   ;;  %v5477_v19 = vld [vmem:[%s7337_s1 + $0xa0] sm:$0xff]   ;;  %v5501_v23 = vld [vmem:[%s7337_s1 + $0xa8] sm:$0xff]  }
   0x9   :  { %4100 = vmatpush3.bf16.msra.mxu1 %v5405_v7  ;;  %4037 = vmatprep.subr.bf16.mxu0 %v5411_v8  ;;  %v5507_v24 = vld [vmem:[%s7337_s1 + $0x70] sm:$0xff]   ;;  %v5531_v28 = vld [vmem:[%s7337_s1 + $0x78] sm:$0xff]   ;;  %v4955_v33 = vld [vmem:[%s7338_s0 + $0x4] ss:$28 sps:$4 sm:$0xff]  }
   0xa   :  { %4101 = vmatprep.subr.bf16.mxu1 %v5417_v9  ;;  %v5513_v25 = vld [vmem:[%s7337_s1 + $0xf0] sm:$0xff]   ;;  %v5537_v29 = vld [vmem:[%s7337_s1 + $0xf8] sm:$0xff]   ;;  %v4956_v34 = vld [vmem:[%s7338_s0 + $0x8] ss:$28 sps:$4 sm:$0xff]   ;;  %816 = vmatprep.mubr.bf16.mxu0 %v4955_v33 }
   0xb   :  { %v5519_v26 = vld [vmem:[%s7337_s1 + $0x30] sm:$0xff]   ;;  %v5543_v30 = vld [vmem:[%s7337_s1 + $0x38] sm:$0xff]   ;;  %v4958_v35 = vld [vmem:[%s7338_s0 + $0xc] ss:$28 sps:$4 sm:$0xff]  }
   0xc   :  { %4038 = vmatpush3.bf16.msra.mxu0 %v5423_v10  ;;  %v5525_v27 = vld [vmem:[%s7337_s1 + $0xb0] sm:$0xff]   ;;  %v5549_v31 = vld [vmem:[%s7337_s1 + $0xb8] sm:$0xff]   ;;  %v5568_v36 = vld [vmem:[%s7337_s1 + $0x180] sm:$0xff]   ;;  %913 = vmatprep.mubr.bf16.mxu1 %v4958_v35 }
   0xd   :  { %4102 = vmatpush3.bf16.msra.mxu1 %v5429_v11  ;;  %4039 = vmatprep.subr.bf16.mxu0 %v5435_v12  ;;  %v4953_v32 = vld [vmem:[%s7338_s0] ss:$28 sps:$4 sm:$0xff]   ;;  %v4966_v41 = vld [vmem:[%s7338_s0 + $0x38] ss:$28 sps:$4 sm:$0xff]   ;;  %v5599_v43 = vld [vmem:[%s7337_s1 + $0x148] sm:$0xff]  }
   0xe   :  { %4103 = vmatprep.subr.bf16.mxu1 %v5441_v13  ;;  %v5573_v37 = vld [vmem:[%s7337_s1 + $0x140] sm:$0xff]   ;;  %v4962_v39 = vld [vmem:[%s7338_s0 + $0x3c] ss:$28 sps:$4 sm:$0xff]   ;;  %v5604_v44 = vld [vmem:[%s7337_s1 + $0x108] sm:$0xff]  }
   0xf   :  { %v5579_v38 = vld [vmem:[%s7337_s1 + $0x100] sm:$0xff]   ;;  %v4970_v45 = vld [vmem:[%s7338_s0 + $0x74] ss:$28 sps:$4 sm:$0xff]   ;;  %v4972_v46 = vld [vmem:[%s7338_s0 + $0x7c] ss:$28 sps:$4 sm:$0xff]  }
  0x10   :  { %4040 = vmatpush3.bf16.msra.mxu0 %v5447_v14  ;;  %v4964_v40 = vld [vmem:[%s7338_s0 + $0x44] ss:$28 sps:$4 sm:$0xff]   ;;  %v5617_v47 = vld [vmem:[%s7337_s1 + $0x150] sm:$0xff]   ;;  %v4978_v51 = vld [vmem:[%s7338_s0 + $0xac] ss:$28 sps:$4 sm:$0xff]  }
  0x11   :  { %4104 = vmatpush3.bf16.msra.mxu1 %v5453_v15  ;;  %4041 = vmatprep.subr.bf16.mxu0 %v5459_v16  ;;  %v4967_v42 = vld [vmem:[%s7338_s0 + $0x40] ss:$28 sps:$4 sm:$0xff]   ;;  %v5622_v48 = vld [vmem:[%s7337_s1 + $0x110] sm:$0xff]   ;;  %v4982_v55 = vld [vmem:[%s7338_s0 + $0xa8] ss:$28 sps:$4 sm:$0xff]  }
  0x12   :  { %4105 = vmatprep.subr.bf16.mxu1 %v5465_v17  ;;  %v4974_v49 = vld [vmem:[%s7338_s0 + $0x70] ss:$28 sps:$4 sm:$0xff]   ;;  %v4975_v50 = vld [vmem:[%s7338_s0 + $0x78] ss:$28 sps:$4 sm:$0xff]   ;;  %v4986_v57 = vld [vmem:[%s7338_s0 + $0xe4] ss:$28 sps:$4 sm:$0xff]  }
  0x13   :  { %v4980_v52 = vld [vmem:[%s7338_s0 + $0xb4] ss:$28 sps:$4 sm:$0xff]   ;;  %v5641_v53 = vld [vmem:[%s7337_s1 + $0x158] sm:$0xff]   ;;  %v5662_v58 = vld [vmem:[%s7337_s1 + $0x188] sm:$0xff]  }
  0x14   :  { %4042 = vmatpush3.bf16.msra.mxu0 %v5471_v18  ;;  %v5646_v54 = vld [vmem:[%s7337_s1 + $0x118] sm:$0xff]   ;;  %v4983_v56 = vld [vmem:[%s7338_s0 + $0xb0] ss:$28 sps:$4 sm:$0xff]   ;;  %v5667_v59 = vld [vmem:[%s7337_s1 + $0x160] sm:$0xff]  }
  0x15   :  { %4106 = vmatpush3.bf16.msra.mxu1 %v5477_v19  ;;  %4043 = vmatprep.subr.bf16.mxu0 %v5483_v20  ;;  %v5673_v60 = vld [vmem:[%s7337_s1 + $0x120] sm:$0xff]   ;;  %v4988_v61 = vld [vmem:[%s7338_s0 + $0xec] ss:$28 sps:$4 sm:$0xff]   ;;  %v4995_v33 = vld [vmem:[%s7338_s0 + $0x11c] ss:$28 sps:$4 sm:$0xff]  }
  0x16   :  { %4107 = vmatprep.subr.bf16.mxu1 %v5489_v21  ;;  %v5685_v62 = vld [vmem:[%s7337_s1 + $0x168] sm:$0xff]   ;;  %v5709_v35 = vld [vmem:[%s7337_s1 + $0x170] sm:$0xff]  }
  0x17   :  { %v5690_v63 = vld [vmem:[%s7337_s1 + $0x128] sm:$0xff]  }
  0x18   :  { %4044 = vmatpush3.bf16.msra.mxu0 %v5495_v22 }
  0x19   :  { %4108 = vmatpush3.bf16.msra.mxu1 %v5501_v23  ;;  %4045 = vmatprep.subr.bf16.mxu0 %v5507_v24 }
  0x1a   :  { %4109 = vmatprep.subr.bf16.mxu1 %v5513_v25 }
  0x1c   :  { %4046 = vmatpush3.bf16.msra.mxu0 %v5519_v26 }
  0x1d   :  { %4110 = vmatpush3.bf16.msra.mxu1 %v5525_v27  ;;  %4047 = vmatprep.subr.bf16.mxu0 %v5531_v28 }
  0x1e   :  { %4111 = vmatprep.subr.bf16.mxu1 %v5537_v29 }
  0x20   :  { %4048 = vmatpush3.bf16.msra.mxu0 %v5543_v30 }
  0x21   :  { %4112 = vmatpush3.bf16.msra.mxu1 %v5549_v31  ;;  %4161 = vmatprep.subr.bf16.mxu0 %v5573_v37 }
  0x22   :  { %4841 = vmatprep.subr.bf16.mxu1 %v5568_v36 }
  0x23   :  { %817 = vmatmul.mubr.bf16.vlgmr.msra.gmra.mrb[0].mxu0 %v4953_v32  ;;  %v4990_v32 = vld [vmem:[%s7338_s0 + $0xe0] ss:$28 sps:$4 sm:$0xff]  }
  0x24   :  { %914 = vmatmul.mubr.bf16.vlgmr.msra.gmra.mrb[0].mxu1 %v4956_v34  ;;  %4162 = vmatpush3.bf16.msra.mxu0 %v5579_v38  ;;  %v4997_v34 = vld [vmem:[%s7338_s0 + $0x124] ss:$28 sps:$4 sm:$0xff]  }
  0x25   :  { %4842 = vmatpush3.bf16.msra.mxu1 %v5568_v36  ;;  %824 = vmatprep.mubr.bf16.mxu0 %v4962_v39  ;;  %v5714_v39 = vld [vmem:[%s7337_s1 + $0x130] sm:$0xff]  }
  0x26   :  { %921 = vmatprep.mubr.bf16.mxu1 %v4964_v40  ;;  %4163 = vmatprep.subr.bf16.mxu0 %v5599_v43  ;;  %v5721_v40 = vld [vmem:[%s7337_s1 + $0x178] sm:$0xff]  }
  0x27   :  { %4843 = vmatprep.subr.bf16.mxu1 %v5662_v58 }
  0x28   :  { %4164 = vmatpush3.bf16.msra.mxu0 %v5604_v44 }
  0x29   :  { %4165 = vmatprep.subr.bf16.mxu0 %v5617_v47  ;;  %4844 = vmatpush3.bf16.msra.mxu1 %v5662_v58 }
  0x2a   :  { %4235 = vmatprep.subr.bf16.mxu1 %v5364_v0  ;;  %v4991_v0 = vld [vmem:[%s7338_s0 + $0xe8] ss:$28 sps:$4 sm:$0xff]  }
  0x2b   :  { %825 = vmatmul.mubr.bf16.gmra.mrb[4].mxu0 %v4966_v41  ;;  %v5726_v41 = vld [vmem:[%s7337_s1 + $0x138] sm:$0xff]  }
  0x2c   :  { %922 = vmatmul.mubr.bf16.gmra.mrb[4].mxu1 %v4967_v42  ;;  %832 = vmatprep.mubr.bf16.mxu0 %v4970_v45  ;;  %v4999_v42 = vld [vmem:[%s7338_s0 + $0x118] ss:$28 sps:$4 sm:$0xff]   ;;  %v5000_v45 = vld [vmem:[%s7338_s0 + $0x120] ss:$28 sps:$4 sm:$0xff]  }
  0x2d   :  { %929 = vmatprep.mubr.bf16.mxu1 %v4972_v46  ;;  %4166 = vmatpush3.bf16.msra.mxu0 %v5622_v48  ;;  %v5003_v46 = vld [vmem:[%s7338_s0 + $0x154] ss:$28 sps:$4 sm:$0xff]  }
  0x2e   :  { %4167 = vmatprep.subr.bf16.mxu0 %v5641_v53 }
  0x31   :  { %4168 = vmatpush3.bf16.msra.mxu0 %v5646_v54 }
  0x32   :  { %4169 = vmatprep.subr.bf16.mxu0 %v5667_v59 }
  0x33   :  { %833 = vmatmul.mubr.bf16.gmra.mrb[8].mxu0 %v4974_v49  ;;  %v5005_v49 = vld [vmem:[%s7338_s0 + $0x15c] ss:$28 sps:$4 sm:$0xff]  }
  0x34   :  { %930 = vmatmul.mubr.bf16.gmra.mrb[8].mxu1 %v4975_v50  ;;  %840 = vmatprep.mubr.bf16.mxu0 %v4978_v51  ;;  %v5007_v50 = vld [vmem:[%s7338_s0 + $0x150] ss:$28 sps:$4 sm:$0xff]   ;;  %v5008_v51 = vld [vmem:[%s7338_s0 + $0x158] ss:$28 sps:$4 sm:$0xff]  }
  0x35   :  { %937 = vmatprep.mubr.bf16.mxu1 %v4980_v52  ;;  %4170 = vmatpush3.bf16.msra.mxu0 %v5673_v60  ;;  %v5011_v52 = vld [vmem:[%s7338_s0 + $0x18c] ss:$28 sps:$4 sm:$0xff]  }
  0x36   :  { %4171 = vmatprep.subr.bf16.mxu0 %v5685_v62 }
  0x39   :  { %4172 = vmatpush3.bf16.msra.mxu0 %v5690_v63 }
  0x3a   :  { %4173 = vmatprep.subr.bf16.mxu0 %v5709_v35 }
  0x3b   :  { %841 = vmatmul.mubr.bf16.gmra.mrb[12].mxu0 %v4982_v55  ;;  %v5015_v55 = vld [vmem:[%s7338_s0 + $0x188] ss:$28 sps:$4 sm:$0xff]  }
  0x3c   :  { %938 = vmatmul.mubr.bf16.gmra.mrb[12].mxu1 %v4983_v56  ;;  %848 = vmatprep.mubr.bf16.mxu0 %v4986_v57  ;;  %v5016_v56 = vld [vmem:[%s7338_s0 + $0x190] ss:$28 sps:$4 sm:$0xff]  }
  0x3d   :  { %945 = vmatprep.mubr.bf16.mxu1 %v4988_v61  ;;  %4174 = vmatpush3.bf16.msra.mxu0 %v5714_v39  ;;  %v5021_v57 = vld [vmem:[%s7338_s0 + $0x14] ss:$28 sps:$4 sm:$0xff]  }
  0x3e   :  { %4175 = vmatprep.subr.bf16.mxu0 %v5721_v40  ;;  %v5022_v61 = vld [vmem:[%s7338_s0 + $0x18] ss:$28 sps:$4 sm:$0xff]  }
  0x41   :  { %4176 = vmatpush3.bf16.msra.mxu0 %v5726_v41 }
  0x42   :  { %4299 = vmatprep.subr.bf16.mxu0 %v5369_v1  ;;  %v5013_v1 = vld [vmem:[%s7338_s0 + $0x194] ss:$28 sps:$4 sm:$0xff]  }
  0x43   :  { %849 = vmatmul.mubr.bf16.gmra.mrb[16].mxu0 %v4990_v32  ;;  %v5019_v32 = vld [vmem:[%s7338_s0 + $0x10] ss:$28 sps:$4 sm:$0xff]  }
  0x44   :  { %946 = vmatmul.mubr.bf16.gmra.mrb[16].mxu1 %v4991_v0  ;;  %856 = vmatprep.mubr.bf16.mxu0 %v4995_v33  ;;  %v5023_v0 = vld [vmem:[%s7338_s0 + $0x50] ss:$28 sps:$4 sm:$0xff]  }
  0x45   :  { %953 = vmatprep.mubr.bf16.mxu1 %v4997_v34  ;;  %v5024_v33 = vld [vmem:[%s7338_s0 + $0x4c] ss:$28 sps:$4 sm:$0xff]  }
  0x46   :  { %v5026_v34 = vld [vmem:[%s7338_s0 + $0x88] ss:$28 sps:$4 sm:$0xff]  }
  0x4b   :  { %857 = vmatmul.mubr.bf16.gmra.mrb[20].mxu0 %v4999_v42  ;;  %v5027_v42 = vld [vmem:[%s7338_s0 + $0x48] ss:$28 sps:$4 sm:$0xff]  }
  0x4c   :  { %954 = vmatmul.mubr.bf16.gmra.mrb[20].mxu1 %v5000_v45  ;;  %864 = vmatprep.mubr.bf16.mxu0 %v5003_v46  ;;  %v5028_v45 = vld [vmem:[%s7338_s0 + $0xc0] ss:$28 sps:$4 sm:$0xff]  }
  0x4d   :  { %961 = vmatprep.mubr.bf16.mxu1 %v5005_v49  ;;  %v5996_v46 = vld [vmem:[%s7337_s1 + $0x80] sm:$0xff]   ;;  %v6002_v49 = vld [vmem:[%s7337_s1 + $0xc8] sm:$0xff]  }
  0x53   :  { %865 = vmatmul.mubr.bf16.gmra.mrb[24].mxu0 %v5007_v50  ;;  %v5097_v50 = vld [vmem:[%s7338_s0 + $0x2e0] ss:$28 sps:$4 sm:$0xff]  }
  0x54   :  { %962 = vmatmul.mubr.bf16.gmra.mrb[24].mxu1 %v5008_v51  ;;  %872 = vmatprep.mubr.bf16.mxu0 %v5011_v52  ;;  %v5098_v51 = vld [vmem:[%s7338_s0 + $0x208] ss:$28 sps:$4 sm:$0xff]   ;;  %v5099_v52 = vld [vmem:[%s7338_s0 + $0x31c] ss:$28 sps:$4 sm:$0xff]  }
  0x55   :  { %969 = vmatprep.mubr.bf16.mxu1 %v5013_v1  ;;  %v6017_v1 = vld [vmem:[%s7337_s1 + $0x88] sm:$0xff]  }
  0x5b   :  { %873 = vmatmul.mubr.bf16.gmra.mrb[28].mxu0 %v5015_v55  ;;  %v5101_v55 = vld [vmem:[%s7338_s0 + $0x244] ss:$28 sps:$4 sm:$0xff]  }
  0x5c   :  { %970 = vmatmul.mubr.bf16.gmra.mrb[28].mxu1 %v5016_v56  ;;  %1010 = vmatprep.mubr.bf16.mxu0 %v5021_v57  ;;  %v6026_v56 = vld [vmem:[%s7337_s1 + $0xd0] sm:$0xff]  }
  0x5d   :  { %4845 = vmatprep.mubr.msk.bf16.mxu1 %vm759_vm0, %v5022_v61  ;;  %v6032_v57 = vld [vmem:[%s7337_s1 + $0x90] sm:$0xff]   ;;  %v6038_v61 = vld [vmem:[%s7337_s1 + $0xd8] sm:$0xff]  }
  0x63   :  { %1011 = vmatmul.mubr.bf16.vlgmr.msra.gmra.mrb[32].mxu0 %v5019_v32  ;;  %v5103_v32 = vld [vmem:[%s7338_s0 + $0x318] ss:$28 sps:$4 sm:$0xff]  }
  0x64   :  { %4846 = vmatmul.mubr.msk.bf16.vlgmr.msra.gmra.mrb[32].mxu1 %vm759_vm0, %v5023_v0  ;;  %4300 = vmatpush3.bf16.msra.mxu0 %v5381_v3  ;;  %v5031_v3 = vld [vmem:[%s7338_s0 + $0xf8] ss:$28 sps:$4 sm:$0xff]   ;;  %v5104_v0 = vld [vmem:[%s7338_s0 + $0x240] ss:$28 sps:$4 sm:$0xff]  }
  0x65   :  { %4236 = vmatpush3.bf16.msra.mxu1 %v5375_v2  ;;  %1018 = vmatprep.mubr.bf16.mxu0 %v5024_v33  ;;  %v5029_v2 = vld [vmem:[%s7338_s0 + $0x84] ss:$28 sps:$4 sm:$0xff]   ;;  %v5105_v33 = vld [vmem:[%s7338_s0 + $0x354] ss:$28 sps:$4 sm:$0xff]  }
  0x66   :  { %4237 = vmatprep.subr.bf16.mxu1 %v5387_v4  ;;  %4849 = vmatprep.mubr.msk.bf16.mxu1 %vm759_vm0, %v5026_v34  ;;  %v5032_v4 = vld [vmem:[%s7338_s0 + $0x80] ss:$28 sps:$4 sm:$0xff]  }
  0x67   :  { %4301 = vmatprep.subr.bf16.mxu0 %v5393_v5  ;;  %v5033_v5 = vld [vmem:[%s7338_s0 + $0x130] ss:$28 sps:$4 sm:$0xff]   ;;  %v5107_v34 = vld [vmem:[%s7338_s0 + $0x27c] ss:$28 sps:$4 sm:$0xff]  }
  0x68   :  { %4302 = vmatpush3.bf16.msra.mxu0 %v5405_v7  ;;  %v5036_v7 = vld [vmem:[%s7338_s0 + $0x168] ss:$28 sps:$4 sm:$0xff]  }
  0x69   :  { %4238 = vmatpush3.bf16.msra.mxu1 %v5399_v6  ;;  %4303 = vmatprep.subr.bf16.mxu0 %v5417_v9  ;;  %v5034_v6 = vld [vmem:[%s7338_s0 + $0xbc] ss:$28 sps:$4 sm:$0xff]  }
  0x6a   :  { %4239 = vmatprep.subr.bf16.mxu1 %v5411_v8  ;;  %v5037_v8 = vld [vmem:[%s7338_s0 + $0xb8] ss:$28 sps:$4 sm:$0xff]   ;;  %v5038_v9 = vld [vmem:[%s7338_s0 + $0x1a0] ss:$28 sps:$4 sm:$0xff]  }
  0x6b   :  { %1019 = vmatmul.mubr.bf16.gmra.mrb[36].mxu0 %v5027_v42  ;;  %v6056_v42 = vld [vmem:[%s7337_s1 + $0x98] sm:$0xff]  }
  0x6c   :  { %4850 = vmatmul.mubr.msk.bf16.gmra.mrb[36].mxu1 %vm759_vm0, %v5028_v45  ;;  %1026 = vmatprep.mubr.bf16.mxu0 %v5029_v2  ;;  %v6062_v45 = vld [vmem:[%s7337_s1 + $0xe0] sm:$0xff]  }
  0x6d   :  { %4240 = vmatpush3.bf16.msra.mxu1 %v5423_v10  ;;  %4853 = vmatprep.mubr.msk.bf16.mxu1 %vm759_vm0, %v5031_v3  ;;  %v5039_v10 = vld [vmem:[%s7338_s0 + $0xf4] ss:$28 sps:$4 sm:$0xff]   ;;  %v6068_v2 = vld [vmem:[%s7337_s1 + $0xa0] sm:$0xff]   ;;  %v6074_v3 = vld [vmem:[%s7337_s1 + $0xe8] sm:$0xff]  }
  0x6e   :  { %4241 = vmatprep.subr.bf16.mxu1 %v5435_v12  ;;  %4304 = vmatpush3.bf16.msra.mxu0 %v5429_v11  ;;  %v5043_v11 = vld [vmem:[%s7338_s0 + $0x1c4] ss:$28 sps:$4 sm:$0xff]  }
  0x6f   :  { %4305 = vmatprep.subr.bf16.mxu0 %v5441_v13  ;;  %v5041_v12 = vld [vmem:[%s7338_s0 + $0x1c0] ss:$28 sps:$4 sm:$0xff]   ;;  %v5044_v13 = vld [vmem:[%s7338_s0 + $0xf0] ss:$28 sps:$4 sm:$0xff]  }
  0x71   :  { %4242 = vmatpush3.bf16.msra.mxu1 %v5447_v14  ;;  %v5045_v14 = vld [vmem:[%s7338_s0 + $0x12c] ss:$28 sps:$4 sm:$0xff]  }
  0x72   :  { %4243 = vmatprep.subr.bf16.mxu1 %v5459_v16  ;;  %4306 = vmatpush3.bf16.msra.mxu0 %v5453_v15  ;;  %v5047_v15 = vld [vmem:[%s7338_s0 + $0x1fc] ss:$28 sps:$4 sm:$0xff]   ;;  %v5049_v16 = vld [vmem:[%s7338_s0 + $0x128] ss:$28 sps:$4 sm:$0xff]  }
  0x73   :  { %1027 = vmatmul.mubr.bf16.gmra.mrb[40].mxu0 %v5032_v4  ;;  %4307 = vmatprep.subr.bf16.mxu0 %v5465_v17  ;;  %v5050_v17 = vld [vmem:[%s7338_s0 + $0x1f8] ss:$28 sps:$4 sm:$0xff]   ;;  %v5109_v4 = vld [vmem:[%s7338_s0 + $0x350] ss:$28 sps:$4 sm:$0xff]  }
  0x74   :  { %4854 = vmatmul.mubr.msk.bf16.gmra.mrb[40].mxu1 %vm759_vm0, %v5033_v5  ;;  %1034 = vmatprep.mubr.bf16.mxu0 %v5034_v6  ;;  %v5110_v5 = vld [vmem:[%s7338_s0 + $0x278] ss:$28 sps:$4 sm:$0xff]  }
  0x75   :  { %4244 = vmatpush3.bf16.msra.mxu1 %v5471_v18  ;;  %4857 = vmatprep.mubr.msk.bf16.mxu1 %vm759_vm0, %v5036_v7  ;;  %v5051_v18 = vld [vmem:[%s7338_s0 + $0x164] ss:$28 sps:$4 sm:$0xff]   ;;  %v5113_v6 = vld [vmem:[%s7338_s0 + $0x1d8] ss:$28 sps:$4 sm:$0xff]  }
  0x76   :  { %4245 = vmatprep.subr.bf16.mxu1 %v5483_v20  ;;  %4308 = vmatpush3.bf16.msra.mxu0 %v5477_v19  ;;  %v5053_v19 = vld [vmem:[%s7338_s0 + $0x234] ss:$28 sps:$4 sm:$0xff]   ;;  %v5055_v20 = vld [vmem:[%s7338_s0 + $0x160] ss:$28 sps:$4 sm:$0xff]  }
  0x77   :  { %4309 = vmatprep.subr.bf16.mxu0 %v5489_v21  ;;  %v5056_v21 = vld [vmem:[%s7338_s0 + $0x230] ss:$28 sps:$4 sm:$0xff]  }
  0x78   :  { %v5111_v7 = vld [vmem:[%s7338_s0 + $0x2b4] ss:$28 sps:$4 sm:$0xff]  }
  0x79   :  { %4246 = vmatpush3.bf16.msra.mxu1 %v5495_v22  ;;  %v5057_v22 = vld [vmem:[%s7338_s0 + $0x19c] ss:$28 sps:$4 sm:$0xff]  }
  0x7a   :  { %4247 = vmatprep.subr.bf16.mxu1 %v5507_v24  ;;  %4310 = vmatpush3.bf16.msra.mxu0 %v5501_v23  ;;  %v5059_v23 = vld [vmem:[%s7338_s0 + $0x26c] ss:$28 sps:$4 sm:$0xff]   ;;  %v5061_v24 = vld [vmem:[%s7338_s0 + $0x198] ss:$28 sps:$4 sm:$0xff]  }
  0x7b   :  { %1035 = vmatmul.mubr.bf16.gmra.mrb[44].mxu0 %v5037_v8  ;;  %4311 = vmatprep.subr.bf16.mxu0 %v5513_v25  ;;  %v5062_v25 = vld [vmem:[%s7338_s0 + $0x268] ss:$28 sps:$4 sm:$0xff]  }
  0x7c   :  { %4858 = vmatmul.mubr.msk.bf16.gmra.mrb[44].mxu1 %vm759_vm0, %v5038_v9  ;;  %1042 = vmatprep.mubr.bf16.mxu0 %v5039_v10  ;;  %v6092_v8 = vld [vmem:[%s7337_s1 + $0xa8] sm:$0xff]   ;;  %v6098_v9 = vld [vmem:[%s7337_s1 + $0xf0] sm:$0xff]  }
  0x7d   :  { %4248 = vmatpush3.bf16.msra.mxu1 %v5519_v26  ;;  %1573 = vmatprep.mubr.bf16.mxu1 %v5043_v11  ;;  %v5067_v26 = vld [vmem:[%s7338_s0 + $0x1cc] ss:$28 sps:$4 sm:$0xff]   ;;  %v6105_v10 = vld [vmem:[%s7337_s1 + $0xb0] sm:$0xff]   ;;  %v6111_v11 = vld [vmem:[%s7337_s1 + $0xf8] sm:$0xff]  }
  0x7e   :  { %4249 = vmatprep.subr.bf16.mxu1 %v5531_v28  ;;  %4312 = vmatpush3.bf16.msra.mxu0 %v5525_v27  ;;  %v5063_v27 = vld [vmem:[%s7338_s0 + $0x2a4] ss:$28 sps:$4 sm:$0xff]  }
  0x7f   :  { %4313 = vmatprep.subr.bf16.mxu0 %v5537_v29  ;;  %v5065_v28 = vld [vmem:[%s7338_s0 + $0x1c8] ss:$28 sps:$4 sm:$0xff]   ;;  %v5068_v29 = vld [vmem:[%s7338_s0 + $0x2a0] ss:$28 sps:$4 sm:$0xff]  }
  0x81   :  { %4250 = vmatpush3.bf16.msra.mxu1 %v5543_v30  ;;  %v5069_v30 = vld [vmem:[%s7338_s0 + $0x2dc] ss:$28 sps:$4 sm:$0xff]  }
  0x82   :  { %4363 = vmatprep.subr.bf16.mxu1 %v5573_v37  ;;  %4314 = vmatpush3.bf16.msra.mxu0 %v5549_v31  ;;  %v5071_v31 = vld [vmem:[%s7338_s0 + $0x204] ss:$28 sps:$4 sm:$0xff]  }
  0x83   :  { %1043 = vmatmul.mubr.bf16.gmra.mrb[48].mxu0 %v5044_v13  ;;  %4861 = vmatprep.subr.bf16.mxu0 %v5568_v36  ;;  %v5933_v37 = vld [vmem:[%s7337_s1 + $0xc0] sm:$0xff]   ;;  %v5114_v13 = vld [vmem:[%s7338_s0 + $0x2b0] ss:$28 sps:$4 sm:$0xff]  }
  0x84   :  { %1574 = vmatmul.mubr.bf16.vlgmr.msra.gmra.mrb[48].mxu1 %v5041_v12  ;;  %1050 = vmatprep.mubr.bf16.mxu0 %v5045_v14  ;;  %v5115_v12 = vld [vmem:[%s7338_s0 + $0x210] ss:$28 sps:$4 sm:$0xff]  }
  0x85   :  { %4364 = vmatpush3.bf16.msra.mxu1 %v5579_v38  ;;  %1581 = vmatprep.mubr.bf16.mxu1 %v5047_v15  ;;  %v5074_v38 = vld [vmem:[%s7338_s0 + $0x200] ss:$28 sps:$4 sm:$0xff]   ;;  %v5116_v14 = vld [vmem:[%s7338_s0 + $0x2ec] ss:$28 sps:$4 sm:$0xff]  }
  0x86   :  { %4365 = vmatprep.subr.bf16.mxu1 %v5599_v43  ;;  %v5073_v43 = vld [vmem:[%s7338_s0 + $0x2d8] ss:$28 sps:$4 sm:$0xff]  }
  0x87   :  { %v6126_v15 = vld [vmem:[%s7337_s1 + $0xb8] sm:$0xff]  }
  0x89   :  { %4366 = vmatpush3.bf16.msra.mxu1 %v5604_v44  ;;  %v5077_v44 = vld [vmem:[%s7338_s0 + $0x23c] ss:$28 sps:$4 sm:$0xff]  }
  0x8a   :  { %4367 = vmatprep.subr.bf16.mxu1 %v5617_v47  ;;  %v5954_v47 = vld [vmem:[%s7337_s1 + $0x40] sm:$0xff]  }
  0x8b   :  { %1051 = vmatmul.mubr.bf16.gmra.mrb[52].mxu0 %v5049_v16  ;;  %v5118_v16 = vld [vmem:[%s7338_s0 + $0x248] ss:$28 sps:$4 sm:$0xff]  }
  0x8c   :  { %1582 = vmatmul.mubr.bf16.gmra.mrb[52].mxu1 %v5050_v17  ;;  %1058 = vmatprep.mubr.bf16.mxu0 %v5051_v18  ;;  %v6135_v17 = vld [vmem:[%s7337_s1 + $0x180] sm:$0xff]  }
  0x8d   :  { %1589 = vmatprep.mubr.bf16.mxu1 %v5053_v19  ;;  %4368 = vmatpush3.bf16.msra.mxu1 %v5622_v48  ;;  %v5080_v48 = vld [vmem:[%s7338_s0 + $0x238] ss:$28 sps:$4 sm:$0xff]   ;;  %v6142_v18 = vld [vmem:[%s7337_s1] sm:$0xff]   ;;  %v6148_v19 = vld [vmem:[%s7337_s1 + $0x48] sm:$0xff]  }
  0x8e   :  { %4369 = vmatprep.subr.bf16.mxu1 %v5641_v53  ;;  %v5079_v53 = vld [vmem:[%s7338_s0 + $0x310] ss:$28 sps:$4 sm:$0xff]  }
  0x91   :  { %4370 = vmatpush3.bf16.msra.mxu1 %v5646_v54  ;;  %v5083_v54 = vld [vmem:[%s7338_s0 + $0x274] ss:$28 sps:$4 sm:$0xff]  }
  0x92   :  { %4371 = vmatprep.subr.bf16.mxu1 %v5667_v59  ;;  %v5086_v59 = vld [vmem:[%s7338_s0 + $0x270] ss:$28 sps:$4 sm:$0xff]  }
  0x93   :  { %1059 = vmatmul.mubr.bf16.gmra.mrb[56].mxu0 %v5055_v20  ;;  %v5120_v20 = vld [vmem:[%s7338_s0 + $0x280] ss:$28 sps:$4 sm:$0xff]  }
  0x94   :  { %1590 = vmatmul.mubr.bf16.gmra.mrb[56].mxu1 %v5056_v21  ;;  %1066 = vmatprep.mubr.bf16.mxu0 %v5057_v22  ;;  %v6158_v21 = vld [vmem:[%s7337_s1 + $0x8] sm:$0xff]  }
  0x95   :  { %1597 = vmatprep.mubr.bf16.mxu1 %v5059_v23  ;;  %4372 = vmatpush3.bf16.msra.mxu1 %v5673_v60  ;;  %v5085_v60 = vld [vmem:[%s7338_s0 + $0x348] ss:$28 sps:$4 sm:$0xff]   ;;  %v6167_v23 = vld [vmem:[%s7337_s1 + $0x50] sm:$0xff]  }
  0x96   :  { %4373 = vmatprep.subr.bf16.mxu1 %v5685_v62  ;;  %v5087_v62 = vld [vmem:[%s7338_s0 + $0x2ac] ss:$28 sps:$4 sm:$0xff]  }
  0x97   :  { %v5119_v22 = vld [vmem:[%s7338_s0 + $0x2e8] ss:$28 sps:$4 sm:$0xff]  }
  0x99   :  { %4374 = vmatpush3.bf16.msra.mxu1 %v5690_v63  ;;  %v5091_v63 = vld [vmem:[%s7338_s0 + $0x1d4] ss:$28 sps:$4 sm:$0xff]  }
  0x9a   :  { %4375 = vmatprep.subr.bf16.mxu1 %v5709_v35  ;;  %v5092_v35 = vld [vmem:[%s7338_s0 + $0x2a8] ss:$28 sps:$4 sm:$0xff]  }
  0x9b   :  { %1067 = vmatmul.mubr.bf16.gmra.mrb[60].mxu0 %v5061_v24  ;;  %v5121_v24 = vld [vmem:[%s7338_s0 + $0x324] ss:$28 sps:$4 sm:$0xff]  }
  0x9c   :  { %1598 = vmatmul.mubr.bf16.gmra.mrb[60].mxu1 %v5062_v25  ;;  %1670 = vmatprep.mubr.bf16.mxu0 %v5067_v26  ;;  %v5123_v25 = vld [vmem:[%s7338_s0 + $0x2b8] ss:$28 sps:$4 sm:$0xff]  }
  0x9d   :  { %1605 = vmatprep.mubr.bf16.mxu1 %v5063_v27  ;;  %4376 = vmatpush3.bf16.msra.mxu1 %v5714_v39  ;;  %v5089_v39 = vld [vmem:[%s7338_s0 + $0x1d0] ss:$28 sps:$4 sm:$0xff]   ;;  %v6186_v27 = vld [vmem:[%s7337_s1 + $0x58] sm:$0xff]  }
  0x9e   :  { %4377 = vmatprep.subr.bf16.mxu1 %v5721_v40  ;;  %v5093_v40 = vld [vmem:[%s7338_s0 + $0x2e4] ss:$28 sps:$4 sm:$0xff]   ;;  %v6180_v26 = vld [vmem:[%s7337_s1 + $0x10] sm:$0xff]  }
  0xa1   :  { %4378 = vmatpush3.bf16.msra.mxu1 %v5726_v41  ;;  %v5095_v41 = vld [vmem:[%s7338_s0 + $0x20c] ss:$28 sps:$4 sm:$0xff]  }
  0xa2   :  { %4501 = vmatprep.subr.bf16.mxu1 %v5933_v37 }
  0xa3   :  { %1671 = vmatmul.mubr.bf16.vlgmr.msra.gmra.mrb[64].mxu0 %v5065_v28  ;;  %v5125_v28 = vld [vmem:[%s7338_s0 + $0x2f0] ss:$28 sps:$4 sm:$0xff]  }
  0xa4   :  { %1606 = vmatmul.mubr.bf16.gmra.mrb[64].mxu1 %v5068_v29  ;;  %4862 = vmatpush3.bf16.msra.mxu0 %v5568_v36  ;;  %v5075_v36 = vld [vmem:[%s7338_s0 + $0x314] ss:$28 sps:$4 sm:$0xff]   ;;  %v6196_v29 = vld [vmem:[%s7337_s1 + $0x18] sm:$0xff]  }
  0xa5   :  { %1613 = vmatprep.mubr.bf16.mxu1 %v5069_v30  ;;  %1678 = vmatprep.mubr.bf16.mxu0 %v5071_v31  ;;  %v5124_v30 = vld [vmem:[%s7338_s0 + $0x320] ss:$28 sps:$4 sm:$0xff]  }
  0xa6   :  { %4863 = vmatprep.subr.bf16.mxu0 %v5662_v58  ;;  %v6205_v31 = vld [vmem:[%s7337_s1 + $0x60] sm:$0xff]  }
  0xa8   :  { %4864 = vmatpush3.bf16.msra.mxu0 %v5662_v58  ;;  %v5081_v58 = vld [vmem:[%s7338_s0 + $0x34c] ss:$28 sps:$4 sm:$0xff]  }
  0xa9   :  { %4437 = vmatprep.subr.bf16.mxu0 %v5954_v47 }
  0xab   :  { %1679 = vmatmul.mubr.bf16.gmra.mrb[68].mxu0 %v5074_v38  ;;  %v5126_v38 = vld [vmem:[%s7338_s0 + $0x35c] ss:$28 sps:$4 sm:$0xff]  }
  0xac   :  { %1614 = vmatmul.mubr.bf16.gmra.mrb[68].mxu1 %v5073_v43  ;;  %1686 = vmatprep.mubr.bf16.mxu0 %v5077_v44  ;;  %v5128_v43 = vld [vmem:[%s7338_s0 + $0x328] ss:$28 sps:$4 sm:$0xff]  }
  0xad   :  { %1621 = vmatprep.mubr.bf16.mxu1 %v5075_v36  ;;  %v6218_v44 = vld [vmem:[%s7337_s1 + $0x20] sm:$0xff]   ;;  %v6224_v36 = vld [vmem:[%s7337_s1 + $0x68] sm:$0xff]  }
  0xb3   :  { %1687 = vmatmul.mubr.bf16.gmra.mrb[72].mxu0 %v5080_v48 }
  0xb4   :  { %1622 = vmatmul.mubr.bf16.gmra.mrb[72].mxu1 %v5079_v53  ;;  %1694 = vmatprep.mubr.bf16.mxu0 %v5083_v54 }
  0xb5   :  { %1629 = vmatprep.mubr.bf16.mxu1 %v5081_v58  ;;  %v5130_v58 = vld [vmem:[%s7338_s0 + $0x360] ss:$28 sps:$4 sm:$0xff]  }
  0xbb   :  { %1695 = vmatmul.mubr.bf16.gmra.mrb[76].mxu0 %v5086_v59 }
  0xbc   :  { %1630 = vmatmul.mubr.bf16.gmra.mrb[76].mxu1 %v5085_v60  ;;  %1702 = vmatprep.mubr.bf16.mxu0 %v5087_v62 }
  0xbd   :  { %1767 = vmatprep.mubr.bf16.mxu1 %v5091_v63  ;;  %v6234_v63 = vld [vmem:[%s7337_s1 + $0x28] sm:$0xff]  }
  0xc3   :  { %1703 = vmatmul.mubr.bf16.gmra.mrb[80].mxu0 %v5092_v35  ;;  %v5129_v35 = vld [vmem:[%s7338_s0 + $0x358] ss:$28 sps:$4 sm:$0xff]  }
  0xc4   :  { %1768 = vmatmul.mubr.bf16.vlgmr.msra.gmra.mrb[80].mxu1 %v5089_v39  ;;  %1710 = vmatprep.mubr.bf16.mxu0 %v5093_v40 }
  0xc5   :  { %4502 = vmatpush3.bf16.msra.mxu1 %v5996_v46  ;;  %1775 = vmatprep.mubr.bf16.mxu1 %v5095_v41 }
  0xc6   :  { %4503 = vmatprep.subr.bf16.mxu1 %v6002_v49 }
  0xc9   :  { %4504 = vmatpush3.bf16.msra.mxu1 %v6017_v1 }
  0xca   :  { %4505 = vmatprep.subr.bf16.mxu1 %v6026_v56 }
  0xcb   :  { %1711 = vmatmul.mubr.bf16.gmra.mrb[84].mxu0 %v5097_v50  ;;  %v6243_v50 = vld [vmem:[%s7337_s1 + $0x70] sm:$0xff]  }
  0xcc   :  { %1776 = vmatmul.mubr.bf16.gmra.mrb[84].mxu1 %v5098_v51  ;;  %1718 = vmatprep.mubr.bf16.mxu0 %v5099_v52  ;;  %v5133_v51 = vld [vmem:[%s7338_s0 + $0x384] ss:$28 sps:$4 sm:$0xff]  }
  0xcd   :  { %1783 = vmatprep.mubr.bf16.mxu1 %v5101_v55  ;;  %4506 = vmatpush3.bf16.msra.mxu1 %v6032_v57 }
  0xce   :  { %4507 = vmatprep.subr.bf16.mxu1 %v6038_v61 }
  0xd1   :  { %4508 = vmatpush3.bf16.msra.mxu1 %v6056_v42 }
  0xd2   :  { %4509 = vmatprep.subr.bf16.mxu1 %v6062_v45 }
  0xd3   :  { %1719 = vmatmul.mubr.bf16.gmra.mrb[88].mxu0 %v5103_v32  ;;  %v5136_v32 = vld [vmem:[%s7338_s0 + $0x38c] ss:$28 sps:$4 sm:$0xff]  }
  0xd4   :  { %1784 = vmatmul.mubr.bf16.gmra.mrb[88].mxu1 %v5104_v0  ;;  %1726 = vmatprep.mubr.bf16.mxu0 %v5105_v33 }
  0xd5   :  { %1791 = vmatprep.mubr.bf16.mxu1 %v5107_v34  ;;  %4510 = vmatpush3.bf16.msra.mxu1 %v6068_v2  ;;  %v6258_v34 = vld [vmem:[%s7337_s1 + $0x30] sm:$0xff]  }
  0xd6   :  { %4511 = vmatprep.subr.bf16.mxu1 %v6074_v3 }
  0xd9   :  { %4512 = vmatpush3.bf16.msra.mxu1 %v6092_v8 }
  0xda   :  { %4513 = vmatprep.subr.bf16.mxu1 %v6098_v9 }
  0xdb   :  { %1727 = vmatmul.mubr.bf16.gmra.mrb[92].mxu0 %v5109_v4 }
  0xdc   :  { %1792 = vmatmul.mubr.bf16.gmra.mrb[92].mxu1 %v5110_v5  ;;  %4865 = vmatprep.mubr.msk.bf16.mxu0 %vm759_vm0, %v5113_v6  ;;  %v6266_v5 = vld [vmem:[%s7337_s1 + $0x78] sm:$0xff]  }
  0xdd   :  { %1799 = vmatprep.mubr.bf16.mxu1 %v5111_v7  ;;  %4514 = vmatpush3.bf16.msra.mxu1 %v6105_v10 }
  0xde   :  { %4515 = vmatprep.subr.bf16.mxu1 %v6111_v11 }
  0xe1   :  { %4516 = vmatpush3.bf16.msra.mxu1 %v6126_v15 }
  0xe2   :  { %4881 = vmatprep.subr.bf16.mxu1 %v6135_v17 }
  0xe3   :  { %4866 = vmatmul.mubr.msk.bf16.vlgmr.msra.gmra.mrb[96].mxu0 %vm759_vm0, %v5115_v12 }
  0xe4   :  { %1800 = vmatmul.mubr.bf16.gmra.mrb[96].mxu1 %v5114_v13  ;;  %4438 = vmatpush3.bf16.msra.mxu0 %v6142_v18  ;;  %v5131_v13 = vld [vmem:[%s7338_s0 + $0x380] ss:$28 sps:$4 sm:$0xff]  }
  0xe5   :  { %4439 = vmatprep.subr.bf16.mxu0 %v6148_v19  ;;  %1807 = vmatprep.mubr.bf16.mxu1 %v5116_v14 }
  0xe6   :  { %4869 = vmatprep.mubr.msk.bf16.mxu0 %vm759_vm0, %v5118_v16 }
  0xe8   :  { %4440 = vmatpush3.bf16.msra.mxu0 %v6158_v21 }
  0xe9   :  { %4441 = vmatprep.subr.bf16.mxu0 %v6167_v23 }
  0xeb   :  { %4870 = vmatmul.mubr.msk.bf16.gmra.mrb[100].mxu0 %vm759_vm0, %v5120_v20 }
  0xec   :  { %1808 = vmatmul.mubr.bf16.gmra.mrb[100].mxu1 %v5119_v22  ;;  %4442 = vmatpush3.bf16.msra.mxu0 %v6180_v26  ;;  %v6275_v22 = vld [vmem:[%s7337_s1 + $0x38] sm:$0xff]  }
  0xed   :  { %4443 = vmatprep.subr.bf16.mxu0 %v6186_v27  ;;  %1815 = vmatprep.mubr.bf16.mxu1 %v5121_v24  ;;  %v5134_v24 = vld [vmem:[%s7338_s0 + $0x388] ss:$28 sps:$4 sm:$0xff]  }
  0xee   :  { %4873 = vmatprep.mubr.msk.bf16.mxu0 %vm759_vm0, %v5123_v25 }
  0xf0   :  { %4444 = vmatpush3.bf16.msra.mxu0 %v6196_v29 }
  0xf1   :  { %4445 = vmatprep.subr.bf16.mxu0 %v6205_v31 }
  0xf3   :  { %4874 = vmatmul.mubr.msk.bf16.gmra.mrb[104].mxu0 %vm759_vm0, %v5125_v28 }
  0xf4   :  { %1816 = vmatmul.mubr.bf16.gmra.mrb[104].mxu1 %v5124_v30  ;;  %4446 = vmatpush3.bf16.msra.mxu0 %v6218_v44 }
  0xf5   :  { %4447 = vmatprep.subr.bf16.mxu0 %v6224_v36  ;;  %1823 = vmatprep.mubr.bf16.mxu1 %v5126_v38  ;;  %v6284_v38 = vld [vmem:[%s7337_s1 + $0x140] sm:$0xff]  }
  0xf6   :  { %v4049_v48 = vpop.f32.mrb[0].mxu0  ;;  %4877 = vmatprep.mubr.msk.bf16.mxu0 %vm759_vm0, %v5128_v43  ;;  %v5137_v43 = vld [vmem:[%s7338_s0 + $0x3bc] ss:$28 sps:$4 sm:$0xff]  }
  0xf7   :  { %v4113_v53 = vpop.f32.mrb[0].mxu1  ;;  %v4050_v54 = vpop.f32.mrb[1].mxu0 }
  0xf8   :  { %v4051_v59 = vadd.f32 %v4050_v54, %v4049_v48  ;;  %v4114_v60 = vpop.f32.mrb[1].mxu1  ;;  %v4052_v62 = vpop.f32.mrb[2].mxu0  ;;  %4448 = vmatpush3.bf16.msra.mxu0 %v6234_v63  ;;  %v5139_v54 = vld [vmem:[%s7338_s0 + $0x3c4] ss:$28 sps:$4 sm:$0xff]  }
  0xf9   :  { %v4115_v39 = vadd.f32 %v4114_v60, %v4113_v53  ;;  %v4116_v40 = vpop.f32.mrb[2].mxu1  ;;  %v4053_v41 = vpop.f32.mrb[3].mxu0  ;;  %4449 = vmatprep.subr.bf16.mxu0 %v6243_v50  ;;  %v6298_v60 = vld [vmem:[%s7337_s1 + $0x100] sm:$0xff]  }
  0xfa   :  { %v4054_v52 = vadd.f32 %v4053_v41, %v4052_v62  ;;  %v4117_v55 = vpop.f32.mrb[3].mxu1  ;;  %7374 = vst [vmem:[#allocation2_spill] sm:$0xff] %v6298_v60 }
  0xfb   :  { %v6252_v0 = vadd.f32 %v4115_v39, %v4051_v59  ;;  %v4118_v33 = vadd.f32 %v4117_v55, %v4116_v40  ;;  %4878 = vmatmul.mubr.msk.bf16.gmra.mrb[108].mxu0 %vm759_vm0, %v5130_v58  ;;  %v6307_v39 = vld [vmem:[%s7337_s1 + $0x148] sm:$0xff]  }
  0xfc   :  { %1824 = vmatmul.mubr.bf16.gmra.mrb[108].mxu1 %v5129_v35  ;;  %4450 = vmatpush3.bf16.msra.mxu0 %v6258_v34  ;;  %7375 = vst [vmem:[#allocation3_spill] sm:$0xff] %v6307_v39 }
  0xfd   :  { %v6261_v4 = vadd.f32 %v4118_v33, %v4054_v52  ;;  %4451 = vmatprep.subr.bf16.mxu0 %v6266_v5  ;;  %2330 = vmatprep.mubr.bf16.mxu0 %v5133_v51  ;;  %v5141_v51 = vld [vmem:[%s7338_s0 + $0x3b8] ss:$28 sps:$4 sm:$0xff]   ;;  %v6316_v52 = vld [vmem:[%s7337_s1 + $0x188] sm:$0xff]  }
  0xfe   :  { %v4055_v6 = vpop.f32.mrb[4].mxu0  ;;  %2427 = vmatprep.mubr.bf16.mxu1 %v5136_v32  ;;  %7376 = vst [vmem:[#allocation4_spill] sm:$0xff] %v6316_v52 }
  0xff   :  { %v4119_v7 = vpop.f32.mrb[4].mxu1  ;;  %v4056_v12 = vpop.f32.mrb[5].mxu0 }
 0x100   :  { %v4057_v14 = vadd.f32 %v4056_v12, %v4055_v6  ;;  %v4120_v16 = vpop.f32.mrb[5].mxu1  ;;  %v4058_v20 = vpop.f32.mrb[6].mxu0  ;;  %4452 = vmatpush3.bf16.msra.mxu0 %v6275_v22  ;;  %v5142_v6 = vld [vmem:[%s7338_s0 + $0x3c0] ss:$28 sps:$4 sm:$0xff]   ;;  %v5143_v12 = vld [vmem:[%s7338_s0 + $0x3f4] ss:$28 sps:$4 sm:$0xff]  }
 0x101   :  { %v4121_v25 = vadd.f32 %v4120_v16, %v4119_v7  ;;  %v4122_v28 = vpop.f32.mrb[6].mxu1  ;;  %v4059_v30 = vpop.f32.mrb[7].mxu0  ;;  %4565 = vmatprep.subr.bf16.mxu0 %v6284_v38  ;;  %v6325_v7 = vld [vmem:[%s7337_s1 + $0x108] sm:$0xff]  }
 0x102   :  { %v4060_v48 = vadd.f32 %v4059_v30, %v4058_v20  ;;  %v4123_v53 = vpop.f32.mrb[7].mxu1  ;;  %7377 = vst [vmem:[#allocation5_spill] sm:$0xff] %v6325_v7  ;;  %v5145_v20 = vld [vmem:[%s7338_s0 + $0x3fc] ss:$28 sps:$4 sm:$0xff]  }
 0x103   :  { %v6293_v58 = vadd.f32 %v4121_v25, %v4057_v14  ;;  %v4124_v59 = vadd.f32 %v4123_v53, %v4122_v28  ;;  %2331 = vmatmul.mubr.bf16.vlgmr.msra.gmra.mrb[112].mxu0 %v5131_v13  ;;  %v6349_v53 = vld [vmem:[%s7337_s1 + $0x110] sm:$0xff]  }
 0x104   :  { %2428 = vmatmul.mubr.bf16.vlgmr.msra.gmra.mrb[112].mxu1 %v5134_v24  ;;  %4566 = vmatpush3.bf16.msra.mxu0 %v6298_v60  ;;  %v6337_v24 = vld [vmem:[%s7337_s1 + $0x150] sm:$0xff]   ;;  %7379 = vst [vmem:[#allocation7_spill] sm:$0xff] %v6349_v53 }
 0x105   :  { %v6301_v62 = vadd.f32 %v4124_v59, %v4060_v48  ;;  %4882 = vmatpush3.bf16.msra.mxu1 %v6135_v17  ;;  %2338 = vmatprep.mubr.bf16.mxu0 %v5137_v43  ;;  %7378 = vst [vmem:[#allocation6_spill] sm:$0xff] %v6337_v24 }
 0x106   :  { %v4061_v35 = vpop.f32.mrb[8].mxu0  ;;  %2435 = vmatprep.mubr.bf16.mxu1 %v5139_v54  ;;  %4567 = vmatprep.subr.bf16.mxu0 %v6307_v39 }
 0x107   :  { %v4125_v40 = vpop.f32.mrb[8].mxu1  ;;  %v4062_v41 = vpop.f32.mrb[9].mxu0  ;;  %4883 = vmatprep.subr.bf16.mxu1 %v6316_v52 }
 0x108   :  { %v4063_v55 = vadd.f32 %v4062_v41, %v4061_v35  ;;  %v4126_v32 = vpop.f32.mrb[9].mxu1  ;;  %v4064_v33 = vpop.f32.mrb[10].mxu0  ;;  %4568 = vmatpush3.bf16.msra.mxu0 %v6325_v7 }
 0x109   :  { %v4127_v13 = vadd.f32 %v4126_v32, %v4125_v40  ;;  %v4128_v14 = vpop.f32.mrb[10].mxu1  ;;  %v4065_v16 = vpop.f32.mrb[11].mxu0  ;;  %4569 = vmatprep.subr.bf16.mxu0 %v6337_v24  ;;  %4884 = vmatpush3.bf16.msra.mxu1 %v6316_v52  ;;  %v5147_v40 = vld [vmem:[%s7338_s0 + $0x3f0] ss:$28 sps:$4 sm:$0xff]   ;;  %v5148_v32 = vld [vmem:[%s7338_s0 + $0x3f8] ss:$28 sps:$4 sm:$0xff]  }
 0x10a   :  { %v4066_v25 = vadd.f32 %v4065_v16, %v4064_v33  ;;  %v4129_v28 = vpop.f32.mrb[11].mxu1  ;;  %4639 = vmatprep.subr.bf16.mxu1 %v5954_v47  ;;  %v6355_v47 = vld [vmem:[%s7337_s1 + $0x158] sm:$0xff]   ;;  %v5149_v33 = vld [vmem:[%s7338_s0 + $0x42c] ss:$28 sps:$4 sm:$0xff]  }
 0x10b   :  { %v6342_v30 = vadd.f32 %v4127_v13, %v4063_v55  ;;  %v4130_v43 = vadd.f32 %v4129_v28, %v4128_v14  ;;  %2339 = vmatmul.mubr.bf16.gmra.mrb[116].mxu0 %v5141_v51  ;;  %7380 = vst [vmem:[#allocation8_spill] sm:$0xff] %v6355_v47  ;;  %v5151_v14 = vld [vmem:[%s7338_s0 + $0x434] ss:$28 sps:$4 sm:$0xff]   ;;  %v6373_v16 = vld [vmem:[%s7337_s1 + $0x118] sm:$0xff]   ;;  %v6379_v28 = vld [vmem:[%s7337_s1 + $0x160] sm:$0xff]  }
 0x10c   :  { %2436 = vmatmul.mubr.bf16.gmra.mrb[116].mxu1 %v5142_v6  ;;  %2346 = vmatprep.mubr.bf16.mxu0 %v5143_v12  ;;  %7381 = vst [vmem:[#allocation9_spill] sm:$0xff] %v6373_v16  ;;  %7382 = vst [vmem:[#allocation10_spill] sm:$0xff] %v6379_v28  ;;  %v5157_v52 = vld [vmem:[%s7338_s0 + $0x46c] ss:$28 sps:$4 sm:$0xff]  }
 0x10d   :  { %v6344_v48 = vadd.f32 %v4130_v43, %v4066_v25  ;;  %2443 = vmatprep.mubr.bf16.mxu1 %v5145_v20  ;;  %4570 = vmatpush3.bf16.msra.mxu0 %v6349_v53 }
 0x10e   :  { %v4067_v54 = vpop.f32.mrb[12].mxu0  ;;  %4571 = vmatprep.subr.bf16.mxu0 %v6355_v47 }
 0x10f   :  { %v4131_v59 = vpop.f32.mrb[12].mxu1  ;;  %v4068_v35 = vpop.f32.mrb[13].mxu0 }
 0x110   :  { %v4069_v41 = vadd.f32 %v4068_v35, %v4067_v54  ;;  %v4132_v51 = vpop.f32.mrb[13].mxu1  ;;  %v4070_v55 = vpop.f32.mrb[14].mxu0  ;;  %v6389_v35 = vld [vmem:[%s7337_s1 + $0x120] sm:$0xff]  }
 0x111   :  { %v4133_v6 = vadd.f32 %v4132_v51, %v4131_v59  ;;  %v4134_v12 = vpop.f32.mrb[14].mxu1  ;;  %v4071_v13 = vpop.f32.mrb[15].mxu0  ;;  %4572 = vmatpush3.bf16.msra.mxu0 %v6373_v16  ;;  %7383 = vst [vmem:[#allocation11_spill] sm:$0xff] %v6389_v35 }
 0x112   :  { %v4072_v20 = vadd.f32 %v4071_v13, %v4070_v55  ;;  %v4135_v25 = vpop.f32.mrb[15].mxu1  ;;  %4573 = vmatprep.subr.bf16.mxu0 %v6379_v28  ;;  %v5154_v13 = vld [vmem:[%s7338_s0 + $0x430] ss:$28 sps:$4 sm:$0xff]  }
 0x113   :  { %v6382_v43 = vadd.f32 %v4133_v6, %v4069_v41  ;;  %v4136_v54 = vadd.f32 %v4135_v25, %v4134_v12  ;;  %2347 = vmatmul.mubr.bf16.gmra.mrb[120].mxu0 %v5147_v40  ;;  %v6395_v41 = vld [vmem:[%s7337_s1 + $0x168] sm:$0xff]  }
 0x114   :  { %2444 = vmatmul.mubr.bf16.gmra.mrb[120].mxu1 %v5148_v32  ;;  %2354 = vmatprep.mubr.bf16.mxu0 %v5149_v33  ;;  %7384 = vst [vmem:[#allocation12_spill] sm:$0xff] %v6395_v41  ;;  %v5153_v32 = vld [vmem:[%s7338_s0 + $0x428] ss:$28 sps:$4 sm:$0xff]  }
 0x115   :  { %v6384_v59 = vadd.f32 %v4136_v54, %v4072_v20  ;;  %2451 = vmatprep.mubr.bf16.mxu1 %v5151_v14  ;;  %4574 = vmatpush3.bf16.msra.mxu0 %v6389_v35  ;;  %v5155_v14 = vld [vmem:[%s7338_s0 + $0x464] ss:$28 sps:$4 sm:$0xff]   ;;  %v6419_v35 = vld [vmem:[%s7337_s1 + $0x170] sm:$0xff]  }
 0x116   :  { %v4073_v51 = vpop.f32.mrb[16].mxu0  ;;  %4575 = vmatprep.subr.bf16.mxu0 %v6395_v41  ;;  %7386 = vst [vmem:[#allocation14_spill] sm:$0xff] %v6419_v35 }
 0x117   :  { %v4137_v40 = vpop.f32.mrb[16].mxu1  ;;  %v4074_v55 = vpop.f32.mrb[17].mxu0 }
 0x118   :  { %v4075_v33 = vadd.f32 %v4074_v55, %v4073_v51  ;;  %v4138_v6 = vpop.f32.mrb[17].mxu1  ;;  %v4076_v12 = vpop.f32.mrb[18].mxu0  ;;  %v6413_v51 = vld [vmem:[%s7337_s1 + $0x128] sm:$0xff]  }
 0x119   :  { %v4139_v20 = vadd.f32 %v4138_v6, %v4137_v40  ;;  %v4140_v25 = vpop.f32.mrb[18].mxu1  ;;  %v4077_v54 = vpop.f32.mrb[19].mxu0  ;;  %7385 = vst [vmem:[#allocation13_spill] sm:$0xff] %v6413_v51  ;;  %4576 = vmatpush3.bf16.msra.mxu0 %v6413_v51 }
 0x11a   :  { %v4078_v55 = vadd.f32 %v4077_v54, %v4076_v12  ;;  %v4141_v41 = vpop.f32.mrb[19].mxu1  ;;  %4577 = vmatprep.subr.bf16.mxu0 %v6419_v35  ;;  %v6429_v12 = vld [vmem:[%s7337_s1 + $0x130] sm:$0xff]   ;;  %v5163_v35 = vld [vmem:[%s7338_s0 + $0x4a4] ss:$28 sps:$4 sm:$0xff]  }
 0x11b   :  { %v6422_v40 = vadd.f32 %v4139_v20, %v4075_v33  ;;  %v4142_v6 = vadd.f32 %v4141_v41, %v4140_v25  ;;  %2355 = vmatmul.mubr.bf16.gmra.mrb[124].mxu0 %v5153_v32  ;;  %7387 = vst [vmem:[#allocation15_spill] sm:$0xff] %v6429_v12  ;;  %v6435_v33 = vld [vmem:[%s7337_s1 + $0x178] sm:$0xff]   ;;  %v5160_v25 = vld [vmem:[%s7338_s0 + $0x468] ss:$28 sps:$4 sm:$0xff]  }
 0x11c   :  { %2452 = vmatmul.mubr.bf16.gmra.mrb[124].mxu1 %v5154_v13  ;;  %2362 = vmatprep.mubr.bf16.mxu0 %v5155_v14  ;;  %7388 = vst [vmem:[#allocation16_spill] sm:$0xff] %v6435_v33 }
 0x11d   :  { %v6424_v28 = vadd.f32 %v4142_v6, %v4078_v55  ;;  %2459 = vmatprep.mubr.bf16.mxu1 %v5157_v52  ;;  %4578 = vmatpush3.bf16.msra.mxu0 %v6429_v12  ;;  %v5159_v52 = vld [vmem:[%s7338_s0 + $0x460] ss:$28 sps:$4 sm:$0xff]  }
 0x11e   :  { %v4079_v54 = vpop.f32.mrb[20].mxu0  ;;  %4579 = vmatprep.subr.bf16.mxu0 %v6435_v33  ;;  %v5161_v55 = vld [vmem:[%s7338_s0 + $0x49c] ss:$28 sps:$4 sm:$0xff]  }
 0x11f   :  { %v4143_v41 = vpop.f32.mrb[20].mxu1  ;;  %v4080_v32 = vpop.f32.mrb[21].mxu0 }
 0x120   :  { %v4081_v13 = vadd.f32 %v4080_v32, %v4079_v54  ;;  %v4144_v14 = vpop.f32.mrb[21].mxu1  ;;  %v4082_v20 = vpop.f32.mrb[22].mxu0  ;;  %v6453_v54 = vld [vmem:[%s7337_s1 + $0x138] sm:$0xff]  }
 0x121   :  { %v4145_v6 = vadd.f32 %v4144_v14, %v4143_v41  ;;  %v4146_v12 = vpop.f32.mrb[22].mxu1  ;;  %v4083_v33 = vpop.f32.mrb[23].mxu0  ;;  %7389 = vst [vmem:[#allocation17_spill] sm:$0xff] %v6453_v54  ;;  %4580 = vmatpush3.bf16.msra.mxu0 %v6453_v54  ;;  %v5165_v54 = vld [vmem:[%s7338_s0 + $0x498] ss:$28 sps:$4 sm:$0xff]  }
 0x122   :  { %v4084_v32 = vadd.f32 %v4083_v33, %v4082_v20  ;;  %v4147_v51 = vpop.f32.mrb[23].mxu1  ;;  %4703 = vmatprep.subr.bf16.mxu0 %v5933_v37  ;;  %v5166_v37 = vld [vmem:[%s7338_s0 + $0x4a0] ss:$28 sps:$4 sm:$0xff]  }
 0x123   :  { %v6457_v16 = vadd.f32 %v4145_v6, %v4081_v13  ;;  %v4148_v41 = vadd.f32 %v4147_v51, %v4146_v12  ;;  %2363 = vmatmul.mubr.bf16.gmra.mrb[128].mxu0 %v5159_v52  ;;  %v5167_v51 = vld [vmem:[%s7338_s0 + $0x4d4] ss:$28 sps:$4 sm:$0xff]   ;;  %v5169_v13 = vld [vmem:[%s7338_s0 + $0x4dc] ss:$28 sps:$4 sm:$0xff]  }
 0x124   :  { %2460 = vmatmul.mubr.bf16.gmra.mrb[128].mxu1 %v5160_v25  ;;  %2370 = vmatprep.mubr.bf16.mxu0 %v5161_v55 }
 0x125   :  { %v6459_v14 = vadd.f32 %v4148_v41, %v4084_v32  ;;  %2467 = vmatprep.mubr.bf16.mxu1 %v5163_v35 }
 0x126   :  { %v4085_v47 = vpop.f32.mrb[24].mxu0 }
 0x127   :  { %v4149_v53 = vpop.f32.mrb[24].mxu1  ;;  %v4086_v24 = vpop.f32.mrb[25].mxu0 }
 0x128   :  { %v4087_v33 = vadd.f32 %v4086_v24, %v4085_v47  ;;  %v4150_v20 = vpop.f32.mrb[25].mxu1  ;;  %v4088_v7 = vpop.f32.mrb[26].mxu0 }
 0x129   :  { %v4151_v12 = vadd.f32 %v4150_v20, %v4149_v53  ;;  %v4152_v35 = vpop.f32.mrb[26].mxu1  ;;  %v4089_v52 = vpop.f32.mrb[27].mxu0  ;;  %v5171_v20 = vld [vmem:[%s7338_s0 + $0x4d0] ss:$28 sps:$4 sm:$0xff]  }
 0x12a   :  { %v4090_v25 = vadd.f32 %v4089_v52, %v4088_v7  ;;  %v4153_v55 = vpop.f32.mrb[27].mxu1 }
 0x12b   :  { %v6473_v24 = vadd.f32 %v4151_v12, %v4087_v33  ;;  %v4154_v47 = vadd.f32 %v4153_v55, %v4152_v35  ;;  %2371 = vmatmul.mubr.bf16.gmra.mrb[132].mxu0 %v5165_v54  ;;  %v5172_v33 = vld [vmem:[%s7338_s0 + $0x4d8] ss:$28 sps:$4 sm:$0xff]   ;;  %v5173_v54 = vld [vmem:[%s7338_s0 + $0x50c] ss:$28 sps:$4 sm:$0xff]  }
 0x12c   :  { %2468 = vmatmul.mubr.bf16.gmra.mrb[132].mxu1 %v5166_v37  ;;  %2378 = vmatprep.mubr.bf16.mxu0 %v5167_v51  ;;  %v5175_v35 = vld [vmem:[%s7338_s0 + $0x514] ss:$28 sps:$4 sm:$0xff]  }
 0x12d   :  { %7390 = vst [vmem:[#allocation18_spill] sm:$0xff] %v6473_v24  ;;  %v6475_v6 = vadd.f32 %v4154_v47, %v4090_v25  ;;  %2475 = vmatprep.mubr.bf16.mxu1 %v5169_v13 }
 0x12e   :  { %v4091_v32 = vpop.f32.mrb[28].mxu0 }
 0x12f   :  { %7391 = vst [vmem:[#allocation19_spill] sm:$0xff] %v6475_v6  ;;  %v4155_v41 = vpop.f32.mrb[28].mxu1  ;;  %v4092_v53 = vpop.f32.mrb[29].mxu0 }
 0x130   :  { %v4093_v39 = vadd.f32 %v4092_v53, %v4091_v32  ;;  %v4156_v60 = vpop.f32.mrb[29].mxu1  ;;  %v4094_v7 = vpop.f32.mrb[30].mxu0 }
 0x131   :  { %v4157_v37 = vadd.f32 %v4156_v60, %v4155_v41  ;;  %v4158_v51 = vpop.f32.mrb[30].mxu1  ;;  %v4095_v12 = vpop.f32.mrb[31].mxu0  ;;  %v5177_v41 = vld [vmem:[%s7338_s0 + $0x508] ss:$28 sps:$4 sm:$0xff]  }
 0x132   :  { %v4096_v52 = vadd.f32 %v4095_v12, %v4094_v7  ;;  %v4159_v13 = vpop.f32.mrb[31].mxu1 }
 0x133   :  { %v6489_v25 = vadd.f32 %v4157_v37, %v4093_v39  ;;  %v4160_v55 = vadd.f32 %v4159_v13, %v4158_v51  ;;  %2379 = vmatmul.mubr.bf16.gmra.mrb[136].mxu0 %v5171_v20  ;;  %v5178_v39 = vld [vmem:[%s7338_s0 + $0x510] ss:$28 sps:$4 sm:$0xff]   ;;  %v5182_v37 = vld [vmem:[%s7338_s0 + $0x398] ss:$28 sps:$4 sm:$0xff]  }
 0x134   :  { %2476 = vmatmul.mubr.bf16.gmra.mrb[136].mxu1 %v5172_v33  ;;  %2386 = vmatprep.mubr.bf16.mxu0 %v5173_v54  ;;  %v5181_v20 = vld [vmem:[%s7338_s0 + $0x394] ss:$28 sps:$4 sm:$0xff]  }
 0x135   :  { %v6491_v47 = vadd.f32 %v4160_v55, %v4096_v52  ;;  %2483 = vmatprep.mubr.bf16.mxu1 %v5175_v35 }
 0x136   :  { %v4177_v32 = vpop.f32.mrb[32].mxu0 }
 0x137   :  { %7392 = vst [vmem:[#allocation20_spill] sm:$0xff] %v6491_v47  ;;  %v4847_v53 = vpop.f32.mrb[32].mxu1  ;;  %v4178_v60 = vpop.f32.mrb[33].mxu0 }
 0x138   :  { %v4179_v6 = vadd.f32 %v4178_v60, %v4177_v32  ;;  %v1109_v24 = vpop.f32.mrb[33].mxu1  ;;  %v4180_v7 = vpop.f32.mrb[34].mxu0 }
 0x139   :  { %v4848_v33 = vpop.f32.mrb[34].mxu1  ;;  %v4181_v54 = vpop.f32.mrb[35].mxu0 }
 0x13a   :  { %v1013_v51 = vadd.f32 %v4179_v6, %v6252_v0  ;;  %v4182_v12 = vadd.f32 %v4181_v54, %v4180_v7  ;;  %v1112_v35 = vpop.f32.mrb[35].mxu1  ;;  %v5179_v0 = vld [vmem:[%s7338_s0 + $0x390] ss:$28 sps:$4 sm:$0xff]  }
 0x13b   :  { %2387 = vmatmul.mubr.bf16.gmra.mrb[140].mxu0 %v5177_v41 }
 0x13c   :  { %v6506_v52 = vadd.f32 %v1109_v24, %v1013_v51  ;;  %v1016_v13 = vadd.f32 %v4182_v12, %v6261_v4  ;;  %2484 = vmatmul.mubr.bf16.gmra.mrb[140].mxu1 %v5178_v39  ;;  %2524 = vmatprep.mubr.bf16.mxu0 %v5181_v20  ;;  %v5183_v4 = vld [vmem:[%s7338_s0 + $0x3d0] ss:$28 sps:$4 sm:$0xff]  }
 0x13d   :  { %4885 = vmatprep.mubr.msk.bf16.mxu1 %vm759_vm0, %v5182_v37  ;;  %v5184_v20 = vld [vmem:[%s7338_s0 + $0x3cc] ss:$28 sps:$4 sm:$0xff]  }
 0x13e   :  { %v6510_v55 = vadd.f32 %v1112_v35, %v1016_v13  ;;  %v4183_v32 = vpop.f32.mrb[36].mxu0 }
 0x13f   :  { %v6512_v60 = vpop.f32.mrb[36].mxu1  ;;  %v4184_v47 = vpop.f32.mrb[37].mxu0 }
 0x140   :  { %v4185_v6 = vadd.f32 %v4184_v47, %v4183_v32  ;;  %v1125_v41 = vpop.f32.mrb[37].mxu1  ;;  %v4186_v24 = vpop.f32.mrb[38].mxu0  ;;  %v5186_v47 = vld [vmem:[%s7338_s0 + $0x408] ss:$28 sps:$4 sm:$0xff]  }
 0x141   :  { %v6520_v7 = vpop.f32.mrb[38].mxu1  ;;  %v4187_v39 = vpop.f32.mrb[39].mxu0 }
 0x142   :  { %v1021_v54 = vadd.f32 %v4185_v6, %v6293_v58  ;;  %v4188_v37 = vadd.f32 %v4187_v39, %v4186_v24  ;;  %v1128_v51 = vpop.f32.mrb[39].mxu1 }
 0x143   :  { %2525 = vmatmul.mubr.bf16.vlgmr.msra.gmra.mrb[144].mxu0 %v5179_v0 }
 0x144   :  { %v1024_v12 = vadd.f32 %v4188_v37, %v6301_v62  ;;  %4886 = vmatmul.mubr.msk.bf16.vlgmr.msra.gmra.mrb[144].mxu1 %vm759_vm0, %v5183_v4  ;;  %4704 = vmatpush3.bf16.msra.mxu0 %v5996_v46  ;;  %v6532_v35 = vadd.f32 %v4847_v53, %v1021_v54  ;;  %v5187_v62 = vld [vmem:[%s7338_s0 + $0x3c8] ss:$28 sps:$4 sm:$0xff]  }
 0x145   :  { %4640 = vmatpush3.bf16.msra.mxu1 %v6142_v18  ;;  %2532 = vmatprep.mubr.bf16.mxu0 %v5184_v20 }
 0x146   :  { %v4189_v13 = vpop.f32.mrb[40].mxu0  ;;  %4641 = vmatprep.subr.bf16.mxu1 %v6148_v19  ;;  %4889 = vmatprep.mubr.msk.bf16.mxu1 %vm759_vm0, %v5186_v47  ;;  %v6537_v58 = vadd.f32 %v4848_v33, %v1024_v12  ;;  %v5188_v19 = vld [vmem:[%s7338_s0 + $0x440] ss:$28 sps:$4 sm:$0xff]  }
 0x147   :  { %v6539_v32 = vpop.f32.mrb[40].mxu1  ;;  %v4190_v0 = vpop.f32.mrb[41].mxu0  ;;  %4705 = vmatprep.subr.bf16.mxu0 %v6002_v49  ;;  %v5189_v33 = vld [vmem:[%s7338_s0 + $0x404] ss:$28 sps:$4 sm:$0xff]   ;;  %v5191_v49 = vld [vmem:[%s7338_s0 + $0x478] ss:$28 sps:$4 sm:$0xff]  }
 0x148   :  { %v4191_v46 = vadd.f32 %v4190_v0, %v4189_v13  ;;  %v6545_v53 = vpop.f32.mrb[41].mxu1  ;;  %v4192_v18 = vpop.f32.mrb[42].mxu0  ;;  %4706 = vmatpush3.bf16.msra.mxu0 %v6017_v1 }
 0x149   :  { %v6554_v6 = vpop.f32.mrb[42].mxu1  ;;  %4642 = vmatpush3.bf16.msra.mxu1 %v6158_v21  ;;  %v4193_v24 = vpop.f32.mrb[43].mxu0  ;;  %4707 = vmatprep.subr.bf16.mxu0 %v6026_v56 }
 0x14a   :  { %v1029_v4 = vadd.f32 %v4191_v46, %v6342_v30  ;;  %v4194_v39 = vadd.f32 %v4193_v24, %v4192_v18  ;;  %v6562_v20 = vpop.f32.mrb[43].mxu1  ;;  %4643 = vmatprep.subr.bf16.mxu1 %v6167_v23 }
 0x14b   :  { %2533 = vmatmul.mubr.bf16.gmra.mrb[148].mxu0 %v5187_v62 }
 0x14c   :  { %v1032_v1 = vadd.f32 %v4194_v39, %v6344_v48  ;;  %4890 = vmatmul.mubr.msk.bf16.gmra.mrb[148].mxu1 %vm759_vm0, %v5188_v19  ;;  %2540 = vmatprep.mubr.bf16.mxu0 %v5189_v33  ;;  %v6567_v21 = vadd.f32 %v1125_v41, %v1029_v4  ;;  %v5192_v48 = vld [vmem:[%s7338_s0 + $0x400] ss:$28 sps:$4 sm:$0xff]  }
 0x14d   :  { %4644 = vmatpush3.bf16.msra.mxu1 %v6180_v26  ;;  %4893 = vmatprep.mubr.msk.bf16.mxu1 %vm759_vm0, %v5191_v49 }
 0x14e   :  { %v4195_v56 = vpop.f32.mrb[44].mxu0  ;;  %4645 = vmatprep.subr.bf16.mxu1 %v6186_v27  ;;  %4708 = vmatpush3.bf16.msra.mxu0 %v6032_v57  ;;  %v6573_v30 = vadd.f32 %v1128_v51, %v1032_v1  ;;  %v5193_v27 = vld [vmem:[%s7338_s0 + $0x4b0] ss:$28 sps:$4 sm:$0xff]   ;;  %v5194_v57 = vld [vmem:[%s7338_s0 + $0x43c] ss:$28 sps:$4 sm:$0xff]  }
 0x14f   :  { %v6575_v23 = vpop.f32.mrb[44].mxu1  ;;  %v4196_v54 = vpop.f32.mrb[45].mxu0  ;;  %4709 = vmatprep.subr.bf16.mxu0 %v6038_v61  ;;  %v5196_v61 = vld [vmem:[%s7338_s0 + $0x4e8] ss:$28 sps:$4 sm:$0xff]  }
 0x150   :  { %v4197_v41 = vadd.f32 %v4196_v54, %v4195_v56  ;;  %v6581_v26 = vpop.f32.mrb[45].mxu1  ;;  %v4198_v37 = vpop.f32.mrb[46].mxu0 }
 0x151   :  { %v6589_v51 = vpop.f32.mrb[46].mxu1  ;;  %4646 = vmatpush3.bf16.msra.mxu1 %v6196_v29  ;;  %v4199_v47 = vpop.f32.mrb[47].mxu0 }
 0x152   :  { %v1037_v12 = vadd.f32 %v4197_v41, %v6382_v43  ;;  %v4200_v13 = vadd.f32 %v4199_v47, %v4198_v37  ;;  %v6596_v0 = vpop.f32.mrb[47].mxu1  ;;  %4647 = vmatprep.subr.bf16.mxu1 %v6205_v31  ;;  %4710 = vmatpush3.bf16.msra.mxu0 %v6056_v42  ;;  %v7396_v47 = vld [vmem:[#allocation2_spill] sm:$0xff] }
 0x153   :  { %2541 = vmatmul.mubr.bf16.gmra.mrb[152].mxu0 %v5192_v48  ;;  %4711 = vmatprep.subr.bf16.mxu0 %v6062_v45 }
 0x154   :  { %v1040_v62 = vadd.f32 %v4200_v13, %v6384_v59  ;;  %4894 = vmatmul.mubr.msk.bf16.gmra.mrb[152].mxu1 %vm759_vm0, %v5193_v27  ;;  %2548 = vmatprep.mubr.bf16.mxu0 %v5194_v57  ;;  %v6604_v29 = vadd.f32 %v6512_v60, %v1037_v12  ;;  %v5197_v59 = vld [vmem:[%s7338_s0 + $0x438] ss:$28 sps:$4 sm:$0xff]  }
 0x155   :  { %4648 = vmatpush3.bf16.msra.mxu1 %v6218_v44  ;;  %4897 = vmatprep.mubr.msk.bf16.mxu1 %vm759_vm0, %v5196_v61  ;;  %v7397_v61 = vld [vmem:[#allocation3_spill] sm:$0xff] }
 0x156   :  { %v4201_v43 = vpop.f32.mrb[48].mxu0  ;;  %4649 = vmatprep.subr.bf16.mxu1 %v6224_v36  ;;  %4712 = vmatpush3.bf16.msra.mxu0 %v6068_v2  ;;  %v6611_v42 = vadd.f32 %v6520_v7, %v1040_v62  ;;  %v5198_v36 = vld [vmem:[%s7338_s0 + $0x520] ss:$28 sps:$4 sm:$0xff]   ;;  %v5199_v2 = vld [vmem:[%s7338_s0 + $0x474] ss:$28 sps:$4 sm:$0xff]  }
 0x157   :  { %v4251_v45 = vpop.f32.mrb[48].mxu1  ;;  %v4202_v31 = vpop.f32.mrb[49].mxu0  ;;  %4713 = vmatprep.subr.bf16.mxu0 %v6074_v3  ;;  %v5203_v3 = vld [vmem:[%s7338_s0 + $0x544] ss:$28 sps:$4 sm:$0xff]  }
 0x158   :  { %v4203_v60 = vadd.f32 %v4202_v31, %v4201_v43  ;;  %v4252_v44 = vpop.f32.mrb[49].mxu1  ;;  %v4204_v46 = vpop.f32.mrb[50].mxu0 }
 0x159   :  { %v6623_v7 = vadd.f32 %v4252_v44, %v4251_v45  ;;  %v4254_v18 = vpop.f32.mrb[50].mxu1  ;;  %4650 = vmatpush3.bf16.msra.mxu1 %v6234_v63  ;;  %v4205_v19 = vpop.f32.mrb[51].mxu0  ;;  %v5211_v45 = vld [vmem:[%s7338_s0 + $0x4e4] ss:$28 sps:$4 sm:$0xff]   ;;  %v5213_v44 = vld [vmem:[%s7338_s0 + $0x5b4] ss:$28 sps:$4 sm:$0xff]  }
 0x15a   :  { %v1045_v33 = vadd.f32 %v4203_v60, %v6422_v40  ;;  %v4206_v24 = vadd.f32 %v4205_v19, %v4204_v46  ;;  %v4255_v49 = vpop.f32.mrb[51].mxu1  ;;  %4651 = vmatprep.subr.bf16.mxu1 %v6243_v50  ;;  %4714 = vmatpush3.bf16.msra.mxu0 %v6092_v8  ;;  %v7399_v60 = vld [vmem:[#allocation5_spill] sm:$0xff]  ;;  %v7400_v46 = vld [vmem:[#allocation18_spill] sm:$0xff] }
 0x15b   :  { %v6632_v4 = vadd.f32 %v4255_v49, %v4254_v18  ;;  %2549 = vmatmul.mubr.bf16.gmra.mrb[156].mxu0 %v5197_v59  ;;  %4715 = vmatprep.subr.bf16.mxu0 %v6098_v9  ;;  %v7401_v19 = vld [vmem:[#allocation6_spill] sm:$0xff] }
 0x15c   :  { %v1048_v63 = vadd.f32 %v4206_v24, %v6424_v28  ;;  %4898 = vmatmul.mubr.msk.bf16.gmra.mrb[156].mxu1 %vm759_vm0, %v5198_v36  ;;  %2556 = vmatprep.mubr.bf16.mxu0 %v5199_v2  ;;  %v6638_v39 = vadd.f32 %v6545_v53, %v1045_v33  ;;  %v5204_v28 = vld [vmem:[%s7338_s0 + $0x470] ss:$28 sps:$4 sm:$0xff]  }
 0x15d   :  { %4652 = vmatpush3.bf16.msra.mxu1 %v6258_v34  ;;  %3087 = vmatprep.mubr.bf16.mxu1 %v5203_v3  ;;  %v7402_v33 = vld [vmem:[#allocation19_spill] sm:$0xff] }
 0x15e   :  { %7393 = vst [vmem:[#allocation21_spill] sm:$0xff] %v6638_v39  ;;  %v4207_v40 = vpop.f32.mrb[52].mxu0  ;;  %4653 = vmatprep.subr.bf16.mxu1 %v6266_v5  ;;  %4716 = vmatpush3.bf16.msra.mxu0 %v6105_v10  ;;  %v6644_v8 = vadd.f32 %v6562_v20, %v1048_v63  ;;  %v5201_v5 = vld [vmem:[%s7338_s0 + $0x540] ss:$28 sps:$4 sm:$0xff]   ;;  %v5205_v10 = vld [vmem:[%s7338_s0 + $0x4ac] ss:$28 sps:$4 sm:$0xff]  }
 0x15f   :  { %v4257_v9 = vpop.f32.mrb[52].mxu1  ;;  %v4208_v50 = vpop.f32.mrb[53].mxu0  ;;  %4717 = vmatprep.subr.bf16.mxu0 %v6111_v11  ;;  %v5207_v11 = vld [vmem:[%s7338_s0 + $0x57c] ss:$28 sps:$4 sm:$0xff]   ;;  %v7404_v63 = vld [vmem:[#allocation7_spill] sm:$0xff] }
 0x160   :  { %7394 = vst [vmem:[#allocation22_spill] sm:$0xff] %v6644_v8  ;;  %v4209_v53 = vadd.f32 %v4208_v50, %v4207_v40  ;;  %v4258_v1 = vpop.f32.mrb[53].mxu1  ;;  %v4210_v34 = vpop.f32.mrb[54].mxu0 }
 0x161   :  { %v6656_v20 = vadd.f32 %v4258_v1, %v4257_v9  ;;  %v4260_v56 = vpop.f32.mrb[54].mxu1  ;;  %4654 = vmatpush3.bf16.msra.mxu1 %v6275_v22  ;;  %v4211_v54 = vpop.f32.mrb[55].mxu0  ;;  %v7405_v9 = vld [vmem:[#allocation8_spill] sm:$0xff]  ;;  %v5215_v1 = vld [vmem:[%s7338_s0 + $0x4e0] ss:$28 sps:$4 sm:$0xff]  }
 0x162   :  { %v1053_v48 = vadd.f32 %v4209_v53, %v6457_v16  ;;  %v4212_v41 = vadd.f32 %v4211_v54, %v4210_v34  ;;  %v4261_v37 = vpop.f32.mrb[55].mxu1  ;;  %4767 = vmatprep.subr.bf16.mxu1 %v6284_v38  ;;  %4718 = vmatpush3.bf16.msra.mxu0 %v6126_v15 }
 0x163   :  { %v6665_v27 = vadd.f32 %v4261_v37, %v4260_v56  ;;  %2557 = vmatmul.mubr.bf16.gmra.mrb[160].mxu0 %v5204_v28  ;;  %4901 = vmatprep.subr.bf16.mxu0 %v6135_v17  ;;  %v5217_v56 = vld [vmem:[%s7338_s0 + $0x51c] ss:$28 sps:$4 sm:$0xff]  }
 0x164   :  { %v1056_v22 = vadd.f32 %v4212_v41, %v6459_v14  ;;  %3088 = vmatmul.mubr.bf16.vlgmr.msra.gmra.mrb[160].mxu1 %v5201_v5  ;;  %2564 = vmatprep.mubr.bf16.mxu0 %v5205_v10  ;;  %v6670_v57 = vadd.f32 %v6539_v32, %v1053_v48  ;;  %v5209_v14 = vld [vmem:[%s7338_s0 + $0x4a8] ss:$28 sps:$4 sm:$0xff]   ;;  %v5210_v32 = vld [vmem:[%s7338_s0 + $0x578] ss:$28 sps:$4 sm:$0xff]  }
 0x165   :  { %4768 = vmatpush3.bf16.msra.mxu1 %v7396_v47  ;;  %3095 = vmatprep.mubr.bf16.mxu1 %v5207_v11  ;;  %v5219_v48 = vld [vmem:[%s7338_s0 + $0x5ec] ss:$28 sps:$4 sm:$0xff]   ;;  %v7407_v41 = vld [vmem:[#allocation9_spill] sm:$0xff] }
 0x166   :  { %7395 = vst [vmem:[#allocation23_spill] sm:$0xff] %v6670_v57  ;;  %v4213_v16 = vpop.f32.mrb[56].mxu0  ;;  %4769 = vmatprep.subr.bf16.mxu1 %v7397_v61  ;;  %v6675_v15 = vadd.f32 %v6554_v6, %v1056_v22 }
 0x167   :  { %v4263_v38 = vpop.f32.mrb[56].mxu1  ;;  %v4214_v12 = vpop.f32.mrb[57].mxu0 }
 0x168   :  { %7398 = vst [vmem:[#allocation2_spill] sm:$0xff] %v6675_v15  ;;  %v4215_v13 = vadd.f32 %v4214_v12, %v4213_v16  ;;  %v4264_v62 = vpop.f32.mrb[57].mxu1  ;;  %v4216_v43 = vpop.f32.mrb[58].mxu0  ;;  %v7408_v16 = vld [vmem:[#allocation10_spill] sm:$0xff]  ;;  %v7410_v12 = vld [vmem:[#allocation20_spill] sm:$0xff] }
 0x169   :  { %v6686_v31 = vadd.f32 %v4264_v62, %v4263_v38  ;;  %v4266_v6 = vpop.f32.mrb[58].mxu1  ;;  %v4217_v59 = vpop.f32.mrb[59].mxu0  ;;  %4770 = vmatpush3.bf16.msra.mxu1 %v7399_v60 }
 0x16a   :  { %v1061_v36 = vadd.f32 %v4215_v13, %v7400_v46  ;;  %v4218_v2 = vadd.f32 %v4217_v59, %v4216_v43  ;;  %v4267_v18 = vpop.f32.mrb[59].mxu1  ;;  %4771 = vmatprep.subr.bf16.mxu1 %v7401_v19  ;;  %v7411_v13 = vld [vmem:[#allocation11_spill] sm:$0xff]  ;;  %v7413_v43 = vld [vmem:[#allocation12_spill] sm:$0xff]  ;;  %v7414_v19 = vld [vmem:[#allocation13_spill] sm:$0xff] }
 0x16b   :  { %v6694_v3 = vadd.f32 %v4267_v18, %v4266_v6  ;;  %2565 = vmatmul.mubr.bf16.gmra.mrb[164].mxu0 %v5209_v14  ;;  %v5223_v18 = vld [vmem:[%s7338_s0 + $0x624] ss:$28 sps:$4 sm:$0xff]  }
 0x16c   :  { %v1064_v24 = vadd.f32 %v4218_v2, %v7402_v33  ;;  %3096 = vmatmul.mubr.bf16.gmra.mrb[164].mxu1 %v5210_v32  ;;  %2572 = vmatprep.mubr.bf16.mxu0 %v5211_v45  ;;  %v6698_v49 = vadd.f32 %v6581_v26, %v1061_v36  ;;  %v5216_v26 = vld [vmem:[%s7338_s0 + $0x5b0] ss:$28 sps:$4 sm:$0xff]  }
 0x16d   :  { %3103 = vmatprep.mubr.bf16.mxu1 %v5213_v44  ;;  %4772 = vmatpush3.bf16.msra.mxu1 %v7404_v63  ;;  %v5222_v44 = vld [vmem:[%s7338_s0 + $0x5e8] ss:$28 sps:$4 sm:$0xff]  }
 0x16e   :  { %7403 = vst [vmem:[#allocation3_spill] sm:$0xff] %v6698_v49  ;;  %v4219_v40 = vpop.f32.mrb[60].mxu0  ;;  %4773 = vmatprep.subr.bf16.mxu1 %v7405_v9  ;;  %v6703_v50 = vadd.f32 %v6596_v0, %v1064_v24 }
 0x16f   :  { %v4269_v28 = vpop.f32.mrb[60].mxu1  ;;  %v4220_v53 = vpop.f32.mrb[61].mxu0 }
 0x170   :  { %7406 = vst [vmem:[#allocation5_spill] sm:$0xff] %v6703_v50  ;;  %v4221_v34 = vadd.f32 %v4220_v53, %v4219_v40  ;;  %v4270_v5 = vpop.f32.mrb[61].mxu1  ;;  %v4222_v10 = vpop.f32.mrb[62].mxu0  ;;  %v7415_v40 = vld [vmem:[#allocation14_spill] sm:$0xff]  ;;  %v7416_v53 = vld [vmem:[#allocation15_spill] sm:$0xff] }
 0x171   :  { %v6714_v54 = vadd.f32 %v4270_v5, %v4269_v28  ;;  %v4272_v0 = vpop.f32.mrb[62].mxu1  ;;  %v4223_v11 = vpop.f32.mrb[63].mxu0  ;;  %4774 = vmatpush3.bf16.msra.mxu1 %v7407_v41 }
 0x172   :  { %v1069_v37 = vadd.f32 %v4221_v34, %v6489_v25  ;;  %v4224_v22 = vadd.f32 %v4223_v11, %v4222_v10  ;;  %v4273_v47 = vpop.f32.mrb[63].mxu1  ;;  %4775 = vmatprep.subr.bf16.mxu1 %v7408_v16  ;;  %v7417_v34 = vld [vmem:[#allocation16_spill] sm:$0xff]  ;;  %v5225_v10 = vld [vmem:[%s7338_s0 + $0x548] ss:$28 sps:$4 sm:$0xff]  }
 0x173   :  { %v6722_v61 = vadd.f32 %v4273_v47, %v4272_v0  ;;  %2573 = vmatmul.mubr.bf16.gmra.mrb[168].mxu0 %v5215_v1  ;;  %v7418_v47 = vld [vmem:[#allocation17_spill] sm:$0xff] }
 0x174   :  { %v6725_v38 = vadd.f32 %v6575_v23, %v1069_v37  ;;  %v1072_v14 = vadd.f32 %v4224_v22, %v7410_v12  ;;  %3104 = vmatmul.mubr.bf16.gmra.mrb[168].mxu1 %v5216_v26  ;;  %2580 = vmatprep.mubr.bf16.mxu0 %v5217_v56  ;;  %v5221_v23 = vld [vmem:[%s7338_s0 + $0x518] ss:$28 sps:$4 sm:$0xff]   ;;  %v5231_v22 = vld [vmem:[%s7338_s0 + $0x584] ss:$28 sps:$4 sm:$0xff]  }
 0x175   :  { %3111 = vmatprep.mubr.bf16.mxu1 %v5219_v48  ;;  %4776 = vmatpush3.bf16.msra.mxu1 %v7411_v13  ;;  %v5229_v37 = vld [vmem:[%s7338_s0 + $0x65c] ss:$28 sps:$4 sm:$0xff]  }
 0x176   :  { %7409 = vst [vmem:[#allocation18_spill] sm:$0xff] %v6725_v38  ;;  %v6730_v62 = vadd.f32 %v6589_v51, %v1072_v14  ;;  %v4315_v25 = vpop.f32.mrb[64].mxu0  ;;  %4777 = vmatprep.subr.bf16.mxu1 %v7413_v43  ;;  %v5227_v51 = vld [vmem:[%s7338_s0 + $0x54c] ss:$28 sps:$4 sm:$0xff]  }
 0x177   :  { %v4275_v32 = vpop.f32.mrb[64].mxu1  ;;  %v4316_v45 = vpop.f32.mrb[65].mxu0 }
 0x178   :  { %7412 = vst [vmem:[#allocation6_spill] sm:$0xff] %v6730_v62  ;;  %v4276_v6 = vpop.f32.mrb[65].mxu1  ;;  %v4317_v59 = vadd.f32 %v4316_v45, %v4315_v25  ;;  %v4318_v60 = vpop.f32.mrb[66].mxu0 }
 0x179   :  { %v6742_v46 = vadd.f32 %v4276_v6, %v4275_v32  ;;  %v4278_v36 = vpop.f32.mrb[66].mxu1  ;;  %v4319_v2 = vpop.f32.mrb[67].mxu0  ;;  %4778 = vmatpush3.bf16.msra.mxu1 %v7414_v19  ;;  %v7419_v32 = vld [vmem:[#allocation4_spill] sm:$0xff] }
 0x17a   :  { %v6749_v33 = vadd.f32 %v4317_v59, %v6623_v7  ;;  %v4279_v24 = vpop.f32.mrb[67].mxu1  ;;  %v4320_v63 = vadd.f32 %v4319_v2, %v4318_v60  ;;  %4779 = vmatprep.subr.bf16.mxu1 %v7415_v40  ;;  %v5235_v2 = vld [vmem:[%s7338_s0 + $0x694] ss:$28 sps:$4 sm:$0xff]  }
 0x17b   :  { %v6752_v9 = vadd.f32 %v4279_v24, %v4278_v36  ;;  %2581 = vmatmul.mubr.bf16.gmra.mrb[172].mxu0 %v5221_v23 }
 0x17c   :  { %v6755_v28 = vadd.f32 %v4320_v63, %v6632_v4  ;;  %3112 = vmatmul.mubr.bf16.gmra.mrb[172].mxu1 %v5222_v44  ;;  %3184 = vmatprep.mubr.bf16.mxu0 %v5227_v51  ;;  %v5228_v4 = vld [vmem:[%s7338_s0 + $0x620] ss:$28 sps:$4 sm:$0xff]  }
 0x17d   :  { %3119 = vmatprep.mubr.bf16.mxu1 %v5223_v18  ;;  %4780 = vmatpush3.bf16.msra.mxu1 %v7416_v53 }
 0x17e   :  { %v4321_v1 = vpop.f32.mrb[68].mxu0  ;;  %4781 = vmatprep.subr.bf16.mxu1 %v7417_v34 }
 0x17f   :  { %v4281_v7 = vpop.f32.mrb[68].mxu1  ;;  %v4322_v5 = vpop.f32.mrb[69].mxu0 }
 0x180   :  { %v4282_v26 = vpop.f32.mrb[69].mxu1  ;;  %v4323_v56 = vadd.f32 %v4322_v5, %v4321_v1  ;;  %v4324_v0 = vpop.f32.mrb[70].mxu0 }
 0x181   :  { %v6765_v11 = vadd.f32 %v4282_v26, %v4281_v7  ;;  %v4284_v48 = vpop.f32.mrb[70].mxu1  ;;  %v4325_v41 = vpop.f32.mrb[71].mxu0  ;;  %4782 = vmatpush3.bf16.msra.mxu1 %v7418_v47  ;;  %v5240_v7 = vld [vmem:[%s7338_s0 + $0x5b8] ss:$28 sps:$4 sm:$0xff]   ;;  %v5239_v26 = vld [vmem:[%s7338_s0 + $0x690] ss:$28 sps:$4 sm:$0xff]  }
 0x182   :  { %v6775_v16 = vadd.f32 %v4323_v56, %v6656_v20  ;;  %v4285_v12 = vpop.f32.mrb[71].mxu1  ;;  %v4326_v14 = vadd.f32 %v4325_v41, %v4324_v0  ;;  %v5234_v20 = vld [vmem:[%s7338_s0 + $0x580] ss:$28 sps:$4 sm:$0xff]  }
 0x183   :  { %v6777_v13 = vadd.f32 %v4285_v12, %v4284_v48  ;;  %3185 = vmatmul.mubr.bf16.vlgmr.msra.gmra.mrb[176].mxu0 %v5225_v10  ;;  %v5241_v48 = vld [vmem:[%s7338_s0 + $0x6cc] ss:$28 sps:$4 sm:$0xff]  }
 0x184   :  { %v6780_v25 = vadd.f32 %v4326_v14, %v6665_v27  ;;  %3120 = vmatmul.mubr.bf16.gmra.mrb[176].mxu1 %v5228_v4  ;;  %4902 = vmatpush3.bf16.msra.mxu0 %v6135_v17  ;;  %v5233_v27 = vld [vmem:[%s7338_s0 + $0x658] ss:$28 sps:$4 sm:$0xff]  }
 0x185   :  { %3127 = vmatprep.mubr.bf16.mxu1 %v5229_v37  ;;  %3192 = vmatprep.mubr.bf16.mxu0 %v5231_v22  ;;  %v5237_v17 = vld [vmem:[%s7338_s0 + $0x5bc] ss:$28 sps:$4 sm:$0xff]  }
 0x186   :  { %v4327_v43 = vpop.f32.mrb[72].mxu0  ;;  %4903 = vmatprep.subr.bf16.mxu0 %v7419_v32 }
 0x187   :  { %v4287_v45 = vpop.f32.mrb[72].mxu1  ;;  %v4328_v23 = vpop.f32.mrb[73].mxu0 }
 0x188   :  { %v4288_v6 = vpop.f32.mrb[73].mxu1  ;;  %v4329_v59 = vadd.f32 %v4328_v23, %v4327_v43  ;;  %v4330_v60 = vpop.f32.mrb[74].mxu0  ;;  %4904 = vmatpush3.bf16.msra.mxu0 %v7419_v32 }
 0x189   :  { %v6794_v44 = vadd.f32 %v4288_v6, %v4287_v45  ;;  %v4290_v51 = vpop.f32.mrb[74].mxu1  ;;  %v4331_v36 = vpop.f32.mrb[75].mxu0  ;;  %v5246_v45 = vld [vmem:[%s7338_s0 + $0x5f0] ss:$28 sps:$4 sm:$0xff]   ;;  %v5245_v6 = vld [vmem:[%s7338_s0 + $0x6c8] ss:$28 sps:$4 sm:$0xff]  }
 0x18a   :  { %v6800_v18 = vadd.f32 %v4329_v59, %v6686_v31  ;;  %v4291_v19 = vpop.f32.mrb[75].mxu1  ;;  %v4332_v24 = vadd.f32 %v4331_v36, %v4330_v60 }
 0x18b   :  { %v6802_v63 = vadd.f32 %v4291_v19, %v4290_v51  ;;  %3193 = vmatmul.mubr.bf16.gmra.mrb[180].mxu0 %v5234_v20 }
 0x18c   :  { %v6805_v40 = vadd.f32 %v4332_v24, %v6694_v3  ;;  %3128 = vmatmul.mubr.bf16.gmra.mrb[180].mxu1 %v5233_v27  ;;  %3200 = vmatprep.mubr.bf16.mxu0 %v5237_v17  ;;  %v5243_v3 = vld [vmem:[%s7338_s0 + $0x5f4] ss:$28 sps:$4 sm:$0xff]  }
 0x18d   :  { %3135 = vmatprep.mubr.bf16.mxu1 %v5235_v2  ;;  %v5251_v17 = vld [vmem:[%s7338_s0 + $0x554] ss:$28 sps:$4 sm:$0xff]  }
 0x18e   :  { %v4333_v53 = vpop.f32.mrb[76].mxu0 }
 0x18f   :  { %v4293_v1 = vpop.f32.mrb[76].mxu1  ;;  %v4334_v34 = vpop.f32.mrb[77].mxu0 }
 0x190   :  { %v4294_v31 = vpop.f32.mrb[77].mxu1  ;;  %v4335_v5 = vadd.f32 %v4334_v34, %v4333_v53  ;;  %v4336_v10 = vpop.f32.mrb[78].mxu0 }
 0x191   :  { %v6816_v56 = vadd.f32 %v4294_v31, %v4293_v1  ;;  %v4296_v0 = vpop.f32.mrb[78].mxu1  ;;  %v4337_v4 = vpop.f32.mrb[79].mxu0  ;;  %v5252_v31 = vld [vmem:[%s7338_s0 + $0x628] ss:$28 sps:$4 sm:$0xff]  }
 0x192   :  { %v6822_v41 = vadd.f32 %v4335_v5, %v6714_v54  ;;  %v4297_v37 = vpop.f32.mrb[79].mxu1  ;;  %v4338_v22 = vadd.f32 %v4337_v4, %v4336_v10  ;;  %v5255_v4 = vld [vmem:[%s7338_s0 + $0x58c] ss:$28 sps:$4 sm:$0xff]  }
 0x193   :  { %v6824_v47 = vadd.f32 %v4297_v37, %v4296_v0  ;;  %3201 = vmatmul.mubr.bf16.gmra.mrb[184].mxu0 %v5240_v7 }
 0x194   :  { %v6827_v12 = vadd.f32 %v4338_v22, %v6722_v61  ;;  %3136 = vmatmul.mubr.bf16.gmra.mrb[184].mxu1 %v5239_v26  ;;  %3208 = vmatprep.mubr.bf16.mxu0 %v5243_v3  ;;  %v5247_v61 = vld [vmem:[%s7338_s0 + $0x62c] ss:$28 sps:$4 sm:$0xff]   ;;  %v5253_v26 = vld [vmem:[%s7338_s0 + $0x664] ss:$28 sps:$4 sm:$0xff]  }
 0x195   :  { %3143 = vmatprep.mubr.bf16.mxu1 %v5241_v48 }
 0x196   :  { %v4339_v14 = vpop.f32.mrb[80].mxu0 }
 0x197   :  { %v4379_v43 = vpop.f32.mrb[80].mxu1  ;;  %v4340_v32 = vpop.f32.mrb[81].mxu0 }
 0x198   :  { %v4341_v54 = vadd.f32 %v4340_v32, %v4339_v14  ;;  %v4380_v23 = vpop.f32.mrb[81].mxu1  ;;  %v4342_v20 = vpop.f32.mrb[82].mxu0 }
 0x199   :  { %v4381_v59 = vadd.f32 %v4380_v23, %v4379_v43  ;;  %v4382_v60 = vpop.f32.mrb[82].mxu1  ;;  %v4343_v27 = vpop.f32.mrb[83].mxu0 }
 0x19a   :  { %v6842_v51 = vadd.f32 %v4341_v54, %v6742_v46  ;;  %v4344_v36 = vadd.f32 %v4343_v27, %v4342_v20  ;;  %v4383_v2 = vpop.f32.mrb[83].mxu1 }
 0x19b   :  { %v4384_v19 = vadd.f32 %v4383_v2, %v4382_v60  ;;  %3209 = vmatmul.mubr.bf16.gmra.mrb[188].mxu0 %v5246_v45  ;;  %v6845_v24 = vadd.f32 %v4381_v59, %v6749_v33 }
 0x19c   :  { %v6848_v53 = vadd.f32 %v4344_v36, %v6752_v9  ;;  %3144 = vmatmul.mubr.bf16.gmra.mrb[188].mxu1 %v5245_v6  ;;  %3216 = vmatprep.mubr.bf16.mxu0 %v5247_v61  ;;  %v5249_v9 = vld [vmem:[%s7338_s0 + $0x550] ss:$28 sps:$4 sm:$0xff]  }
 0x19d   :  { %3281 = vmatprep.mubr.bf16.mxu1 %v5251_v17  ;;  %v6851_v1 = vadd.f32 %v4384_v19, %v6755_v28  ;;  %v5261_v17 = vld [vmem:[%s7338_s0 + $0x5c4] ss:$28 sps:$4 sm:$0xff]  }
 0x19e   :  { %v4345_v34 = vpop.f32.mrb[84].mxu0 }
 0x19f   :  { %v4385_v7 = vpop.f32.mrb[84].mxu1  ;;  %v4346_v46 = vpop.f32.mrb[85].mxu0 }
 0x1a0   :  { %v4347_v5 = vadd.f32 %v4346_v46, %v4345_v34  ;;  %v4386_v10 = vpop.f32.mrb[85].mxu1  ;;  %v4348_v33 = vpop.f32.mrb[86].mxu0 }
 0x1a1   :  { %v4387_v28 = vadd.f32 %v4386_v10, %v4385_v7  ;;  %v4388_v3 = vpop.f32.mrb[86].mxu1  ;;  %v4349_v0 = vpop.f32.mrb[87].mxu0 }
 0x1a2   :  { %v6866_v48 = vadd.f32 %v4347_v5, %v6765_v11  ;;  %v4350_v37 = vadd.f32 %v4349_v0, %v4348_v33  ;;  %v4389_v22 = vpop.f32.mrb[87].mxu1  ;;  %v5257_v11 = vld [vmem:[%s7338_s0 + $0x660] ss:$28 sps:$4 sm:$0xff]   ;;  %v5263_v33 = vld [vmem:[%s7338_s0 + $0x698] ss:$28 sps:$4 sm:$0xff]  }
 0x1a3   :  { %v4390_v14 = vadd.f32 %v4389_v22, %v4388_v3  ;;  %3217 = vmatmul.mubr.bf16.gmra.mrb[192].mxu0 %v5252_v31  ;;  %v1778_v43 = vadd.f32 %v4387_v28, %v6775_v16  ;;  %v5258_v16 = vld [vmem:[%s7338_s0 + $0x588] ss:$28 sps:$4 sm:$0xff]   ;;  %v5265_v28 = vld [vmem:[%s7338_s0 + $0x6d4] ss:$28 sps:$4 sm:$0xff]  }
 0x1a4   :  { %v6870_v32 = vadd.f32 %v4350_v37, %v6777_v13  ;;  %3282 = vmatmul.mubr.bf16.vlgmr.msra.gmra.mrb[192].mxu1 %v5249_v9  ;;  %3224 = vmatprep.mubr.bf16.mxu0 %v5253_v26  ;;  %v5259_v13 = vld [vmem:[%s7338_s0 + $0x69c] ss:$28 sps:$4 sm:$0xff]  }
 0x1a5   :  { %3289 = vmatprep.mubr.bf16.mxu1 %v5255_v4  ;;  %v1781_v45 = vadd.f32 %v4390_v14, %v6780_v25  ;;  %v5267_v4 = vld [vmem:[%s7338_s0 + $0x5fc] ss:$28 sps:$4 sm:$0xff]  }
 0x1a6   :  { %v4351_v54 = vpop.f32.mrb[88].mxu0 }
 0x1a7   :  { %v4391_v23 = vpop.f32.mrb[88].mxu1  ;;  %v4352_v20 = vpop.f32.mrb[89].mxu0 }
 0x1a8   :  { %v4353_v6 = vadd.f32 %v4352_v20, %v4351_v54  ;;  %v4392_v61 = vpop.f32.mrb[89].mxu1  ;;  %v4354_v59 = vpop.f32.mrb[90].mxu0 }
 0x1a9   :  { %v4393_v60 = vadd.f32 %v4392_v61, %v4391_v23  ;;  %v4394_v25 = vpop.f32.mrb[90].mxu1  ;;  %v4355_v27 = vpop.f32.mrb[91].mxu0 }
 0x1aa   :  { %v6886_v36 = vadd.f32 %v4353_v6, %v6794_v44  ;;  %v4356_v2 = vadd.f32 %v4355_v27, %v4354_v59  ;;  %v4395_v19 = vpop.f32.mrb[91].mxu1 }
 0x1ab   :  { %v4396_v34 = vadd.f32 %v4395_v19, %v4394_v25  ;;  %3225 = vmatmul.mubr.bf16.gmra.mrb[196].mxu0 %v5257_v11  ;;  %v6889_v7 = vadd.f32 %v4393_v60, %v6800_v18  ;;  %v5270_v60 = vld [vmem:[%s7338_s0 + $0x5f8] ss:$28 sps:$4 sm:$0xff]  }
 0x1ac   :  { %v6892_v46 = vadd.f32 %v4356_v2, %v6802_v63  ;;  %3290 = vmatmul.mubr.bf16.gmra.mrb[196].mxu1 %v5258_v16  ;;  %3232 = vmatprep.mubr.bf16.mxu0 %v5259_v13  ;;  %v5264_v63 = vld [vmem:[%s7338_s0 + $0x5c0] ss:$28 sps:$4 sm:$0xff]   ;;  %v5269_v16 = vld [vmem:[%s7338_s0 + $0x6d0] ss:$28 sps:$4 sm:$0xff]  }
 0x1ad   :  { %3297 = vmatprep.mubr.bf16.mxu1 %v5261_v17  ;;  %v6895_v31 = vadd.f32 %v4396_v34, %v6805_v40 }
 0x1ae   :  { %v4357_v5 = vpop.f32.mrb[92].mxu0 }
 0x1af   :  { %v4397_v10 = vpop.f32.mrb[92].mxu1  ;;  %v4358_v44 = vpop.f32.mrb[93].mxu0 }
 0x1b0   :  { %v4359_v9 = vadd.f32 %v4358_v44, %v4357_v5  ;;  %v4398_v26 = vpop.f32.mrb[93].mxu1  ;;  %v4360_v18 = vpop.f32.mrb[94].mxu0 }
 0x1b1   :  { %v4399_v40 = vadd.f32 %v4398_v26, %v4397_v10  ;;  %v4400_v3 = vpop.f32.mrb[94].mxu1  ;;  %v4361_v0 = vpop.f32.mrb[95].mxu0 }
 0x1b2   :  { %v6910_v37 = vadd.f32 %v4359_v9, %v6816_v56  ;;  %v4362_v22 = vadd.f32 %v4361_v0, %v4360_v18  ;;  %v4401_v14 = vpop.f32.mrb[95].mxu1  ;;  %v5274_v0 = vld [vmem:[%s7338_s0 + $0x630] ss:$28 sps:$4 sm:$0xff]  }
 0x1b3   :  { %v4402_v54 = vadd.f32 %v4401_v14, %v4400_v3  ;;  %3233 = vmatmul.mubr.bf16.gmra.mrb[200].mxu0 %v5263_v33  ;;  %v1794_v23 = vadd.f32 %v4399_v40, %v6822_v41 }
 0x1b4   :  { %v6914_v20 = vadd.f32 %v4362_v22, %v6824_v47  ;;  %3298 = vmatmul.mubr.bf16.gmra.mrb[200].mxu1 %v5264_v63  ;;  %3240 = vmatprep.mubr.bf16.mxu0 %v5265_v28  ;;  %v5275_v28 = vld [vmem:[%s7338_s0 + $0x590] ss:$28 sps:$4 sm:$0xff]  }
 0x1b5   :  { %3305 = vmatprep.mubr.bf16.mxu1 %v5267_v4  ;;  %v1797_v11 = vadd.f32 %v4402_v54, %v6827_v12  ;;  %v5273_v12 = vld [vmem:[%s7338_s0 + $0x558] ss:$28 sps:$4 sm:$0xff]  }
 0x1b6   :  { %v4867_v6 = vpop.f32.mrb[96].mxu0 }
 0x1b7   :  { %v4403_v61 = vpop.f32.mrb[96].mxu1  ;;  %v6917_v59 = vadd.f32 %v4867_v6, %v1778_v43  ;;  %v1866_v56 = vpop.f32.mrb[97].mxu0 }
 0x1b8   :  { %v4404_v13 = vpop.f32.mrb[97].mxu1  ;;  %v6923_v41 = vadd.f32 %v1866_v56, %v6845_v24  ;;  %v4868_v47 = vpop.f32.mrb[98].mxu0  ;;  %v5271_v24 = vld [vmem:[%s7338_s0 + $0x634] ss:$28 sps:$4 sm:$0xff]  }
 0x1b9   :  { %v4405_v25 = vadd.f32 %v4404_v13, %v4403_v61  ;;  %v4406_v27 = vpop.f32.mrb[98].mxu1  ;;  %v6933_v17 = vadd.f32 %v4868_v47, %v1781_v45  ;;  %v1869_v2 = vpop.f32.mrb[99].mxu0 }
 0x1ba   :  { %v4407_v34 = vpop.f32.mrb[99].mxu1  ;;  %v6941_v5 = vadd.f32 %v1869_v2, %v6851_v1  ;;  %v5280_v2 = vld [vmem:[%s7338_s0 + $0x600] ss:$28 sps:$4 sm:$0xff]  }
 0x1bb   :  { %v4408_v44 = vadd.f32 %v4407_v34, %v4406_v27  ;;  %3241 = vmatmul.mubr.bf16.gmra.mrb[204].mxu0 %v5269_v16  ;;  %v1802_v45 = vadd.f32 %v4405_v25, %v6842_v51 }
 0x1bc   :  { %3306 = vmatmul.mubr.bf16.gmra.mrb[204].mxu1 %v5270_v60  ;;  %4905 = vmatprep.mubr.msk.bf16.mxu0 %vm759_vm0, %v5273_v12 }
 0x1bd   :  { %3313 = vmatprep.mubr.bf16.mxu1 %v5271_v24  ;;  %v1805_v9 = vadd.f32 %v4408_v44, %v6848_v53  ;;  %v5278_v53 = vld [vmem:[%s7338_s0 + $0x5c8] ss:$28 sps:$4 sm:$0xff]  }
 0x1be   :  { %v4871_v26 = vpop.f32.mrb[100].mxu0  ;;  %v5279_v44 = vld [vmem:[%s7338_s0 + $0x668] ss:$28 sps:$4 sm:$0xff]  }
 0x1bf   :  { %v4409_v18 = vpop.f32.mrb[100].mxu1  ;;  %v6950_v1 = vadd.f32 %v4871_v26, %v1794_v23  ;;  %v1882_v63 = vpop.f32.mrb[101].mxu0 }
 0x1c0   :  { %v4410_v40 = vpop.f32.mrb[101].mxu1  ;;  %v6956_v51 = vadd.f32 %v1882_v63, %v6889_v7  ;;  %v4872_v3 = vpop.f32.mrb[102].mxu0  ;;  %v5276_v7 = vld [vmem:[%s7338_s0 + $0x66c] ss:$28 sps:$4 sm:$0xff]  }
 0x1c1   :  { %v4411_v22 = vadd.f32 %v4410_v40, %v4409_v18  ;;  %v4412_v14 = vpop.f32.mrb[102].mxu1  ;;  %v6966_v54 = vadd.f32 %v4872_v3, %v1797_v11  ;;  %v1885_v23 = vpop.f32.mrb[103].mxu0 }
 0x1c2   :  { %v4413_v61 = vpop.f32.mrb[103].mxu1  ;;  %v6974_v56 = vadd.f32 %v1885_v23, %v6895_v31 }
 0x1c3   :  { %v4414_v13 = vadd.f32 %v4413_v61, %v4412_v14  ;;  %4906 = vmatmul.mubr.msk.bf16.vlgmr.msra.gmra.mrb[208].mxu0 %vm759_vm0, %v5275_v28  ;;  %v1810_v11 = vadd.f32 %v4411_v22, %v6866_v48 }
 0x1c4   :  { %3314 = vmatmul.mubr.bf16.gmra.mrb[208].mxu1 %v5274_v0  ;;  %4909 = vmatprep.mubr.msk.bf16.mxu0 %vm759_vm0, %v5278_v53 }
 0x1c5   :  { %v1813_v60 = vadd.f32 %v4414_v13, %v6870_v32  ;;  %3321 = vmatprep.mubr.bf16.mxu1 %v5276_v7  ;;  %v5283_v32 = vld [vmem:[%s7338_s0 + $0x638] ss:$28 sps:$4 sm:$0xff]  }
 0x1c6   :  { %v4875_v12 = vpop.f32.mrb[104].mxu0 }
 0x1c7   :  { %v4415_v31 = vpop.f32.mrb[104].mxu1  ;;  %v6984_v25 = vadd.f32 %v4875_v12, %v1810_v11  ;;  %v1898_v27 = vpop.f32.mrb[105].mxu0 }
 0x1c8   :  { %v4416_v24 = vpop.f32.mrb[105].mxu1  ;;  %v6989_v48 = vadd.f32 %v1898_v27, %v1802_v45  ;;  %v4876_v34 = vpop.f32.mrb[106].mxu0  ;;  %v5281_v45 = vld [vmem:[%s7338_s0 + $0x6a4] ss:$28 sps:$4 sm:$0xff]  }
 0x1c9   :  { %7420 = vst [vmem:[#allocation19_spill] sm:$0xff] %v6984_v25  ;;  %v4417_v18 = vadd.f32 %v4416_v24, %v4415_v31  ;;  %v4418_v63 = vpop.f32.mrb[106].mxu1  ;;  %v6999_v28 = vadd.f32 %v4876_v34, %v1813_v60  ;;  %v1901_v40 = vpop.f32.mrb[107].mxu0  ;;  %v5285_v60 = vld [vmem:[%s7338_s0 + $0x670] ss:$28 sps:$4 sm:$0xff]  }
 0x1ca   :  { %7421 = vst [vmem:[#allocation7_spill] sm:$0xff] %v6989_v48  ;;  %v4419_v0 = vpop.f32.mrb[107].mxu1  ;;  %v7006_v53 = vadd.f32 %v1901_v40, %v1805_v9  ;;  %v5284_v27 = vld [vmem:[%s7338_s0 + $0x6a0] ss:$28 sps:$4 sm:$0xff]  }
 0x1cb   :  { %7422 = vst [vmem:[#allocation8_spill] sm:$0xff] %v6999_v28  ;;  %v4420_v14 = vadd.f32 %v4419_v0, %v4418_v63  ;;  %4910 = vmatmul.mubr.msk.bf16.gmra.mrb[212].mxu0 %vm759_vm0, %v5280_v2  ;;  %v1818_v23 = vadd.f32 %v4417_v18, %v6886_v36 }
 0x1cc   :  { %7423 = vst [vmem:[#allocation9_spill] sm:$0xff] %v7006_v53  ;;  %3322 = vmatmul.mubr.bf16.gmra.mrb[212].mxu1 %v5279_v44  ;;  %4913 = vmatprep.mubr.msk.bf16.mxu0 %vm759_vm0, %v5283_v32  ;;  %v5286_v44 = vld [vmem:[%s7338_s0 + $0x6dc] ss:$28 sps:$4 sm:$0xff]  }
 0x1cd   :  { %v1821_v61 = vadd.f32 %v4420_v14, %v6892_v46  ;;  %3329 = vmatprep.mubr.bf16.mxu1 %v5281_v45  ;;  %v5288_v46 = vld [vmem:[%s7338_s0 + $0x6a8] ss:$28 sps:$4 sm:$0xff]  }
 0x1ce   :  { %v4879_v13 = vpop.f32.mrb[108].mxu0 }
 0x1cf   :  { %v4421_v9 = vpop.f32.mrb[108].mxu1  ;;  %v1914_v11 = vpop.f32.mrb[109].mxu0 }
 0x1d0   :  { %v4422_v12 = vpop.f32.mrb[109].mxu1  ;;  %v7019_v31 = vadd.f32 %v1914_v11, %v1818_v23  ;;  %v4880_v36 = vpop.f32.mrb[110].mxu0 }
 0x1d1   :  { %v4423_v2 = vadd.f32 %v4422_v12, %v4421_v9  ;;  %v4424_v24 = vpop.f32.mrb[110].mxu1  ;;  %v1917_v34 = vpop.f32.mrb[111].mxu0 }
 0x1d2   :  { %7424 = vst [vmem:[#allocation10_spill] sm:$0xff] %v7019_v31  ;;  %v4425_v18 = vpop.f32.mrb[111].mxu1  ;;  %v7032_v63 = vadd.f32 %v1917_v34, %v1821_v61 }
 0x1d3   :  { %v1826_v40 = vadd.f32 %v4423_v2, %v6910_v37  ;;  %v4426_v45 = vadd.f32 %v4425_v18, %v4424_v24  ;;  %4914 = vmatmul.mubr.msk.bf16.gmra.mrb[216].mxu0 %vm759_vm0, %v5285_v60  ;;  %v5290_v60 = vld [vmem:[%s7338_s0 + $0x6e0] ss:$28 sps:$4 sm:$0xff]  }
 0x1d4   :  { %7425 = vst [vmem:[#allocation20_spill] sm:$0xff] %v7032_v63  ;;  %3330 = vmatmul.mubr.bf16.gmra.mrb[216].mxu1 %v5284_v27  ;;  %4917 = vmatprep.mubr.msk.bf16.mxu0 %vm759_vm0, %v5288_v46 }
 0x1d5   :  { %v7039_v14 = vadd.f32 %v4879_v13, %v1826_v40  ;;  %v1829_v23 = vadd.f32 %v4426_v45, %v6914_v20  ;;  %3337 = vmatprep.mubr.bf16.mxu1 %v5286_v44  ;;  %v5289_v20 = vld [vmem:[%s7338_s0 + $0x6d8] ss:$28 sps:$4 sm:$0xff]  }
 0x1d6   :  { %v4453_v9 = vpop.f32.mrb[112].mxu0 }
 0x1d7   :  { %7426 = vst [vmem:[#allocation11_spill] sm:$0xff] %v7039_v14  ;;  %v7044_v11 = vadd.f32 %v4880_v36, %v1829_v23  ;;  %v4517_v37 = vpop.f32.mrb[112].mxu1  ;;  %v4454_v12 = vpop.f32.mrb[113].mxu0 }
 0x1d8   :  { %v4455_v27 = vadd.f32 %v4454_v12, %v4453_v9  ;;  %v4518_v2 = vpop.f32.mrb[113].mxu1  ;;  %v4456_v46 = vpop.f32.mrb[114].mxu0 }
 0x1d9   :  { %7427 = vst [vmem:[#allocation12_spill] sm:$0xff] %v7044_v11  ;;  %v4519_v24 = vadd.f32 %v4518_v2, %v4517_v37  ;;  %v4520_v34 = vpop.f32.mrb[114].mxu1  ;;  %v4457_v36 = vpop.f32.mrb[115].mxu0 }
 0x1da   :  { %v4458_v44 = vadd.f32 %v4457_v36, %v4456_v46  ;;  %v4521_v18 = vpop.f32.mrb[115].mxu1 }
 0x1db   :  { %v7054_v40 = vadd.f32 %v4519_v24, %v4455_v27  ;;  %v4522_v45 = vadd.f32 %v4521_v18, %v4520_v34  ;;  %4918 = vmatmul.mubr.msk.bf16.gmra.mrb[220].mxu0 %vm759_vm0, %v5290_v60 }
 0x1dc   :  { %3338 = vmatmul.mubr.bf16.gmra.mrb[220].mxu1 %v5289_v20 }
 0x1dd   :  { %v7057_v23 = vadd.f32 %v4522_v45, %v4458_v44 }
 0x1de   :  { %v4459_v9 = vpop.f32.mrb[116].mxu0 }
 0x1df   :  { %v4523_v12 = vpop.f32.mrb[116].mxu1  ;;  %v4460_v61 = vpop.f32.mrb[117].mxu0 }
 0x1e0   :  { %v4461_v0 = vadd.f32 %v4460_v61, %v4459_v9  ;;  %v4524_v32 = vpop.f32.mrb[117].mxu1  ;;  %v4462_v7 = vpop.f32.mrb[118].mxu0 }
 0x1e1   :  { %v4525_v13 = vadd.f32 %v4524_v32, %v4523_v12  ;;  %v4526_v37 = vpop.f32.mrb[118].mxu1  ;;  %v4463_v2 = vpop.f32.mrb[119].mxu0 }
 0x1e2   :  { %v4464_v22 = vadd.f32 %v4463_v2, %v4462_v7  ;;  %v4527_v46 = vpop.f32.mrb[119].mxu1 }
 0x1e3   :  { %v7059_v36 = vadd.f32 %v4525_v13, %v4461_v0  ;;  %v4528_v27 = vadd.f32 %v4527_v46, %v4526_v37 }
 0x1e5   :  { %v7061_v24 = vadd.f32 %v4528_v27, %v4464_v22 }
 0x1e6   :  { %v4465_v60 = vpop.f32.mrb[120].mxu0 }
 0x1e7   :  { %v4529_v20 = vpop.f32.mrb[120].mxu1  ;;  %v4466_v34 = vpop.f32.mrb[121].mxu0 }
 0x1e8   :  { %v4467_v44 = vadd.f32 %v4466_v34, %v4465_v60  ;;  %v4530_v18 = vpop.f32.mrb[121].mxu1  ;;  %v4468_v45 = vpop.f32.mrb[122].mxu0 }
 0x1e9   :  { %v4531_v3 = vadd.f32 %v4530_v18, %v4529_v20  ;;  %v4532_v61 = vpop.f32.mrb[122].mxu1  ;;  %v4469_v9 = vpop.f32.mrb[123].mxu0 }
 0x1ea   :  { %v4470_v26 = vadd.f32 %v4469_v9, %v4468_v45  ;;  %v4533_v32 = vpop.f32.mrb[123].mxu1 }
 0x1eb   :  { %v7063_v12 = vadd.f32 %v4531_v3, %v4467_v44  ;;  %v4534_v7 = vadd.f32 %v4533_v32, %v4532_v61 }
 0x1ed   :  { %v7065_v2 = vadd.f32 %v4534_v7, %v4470_v26 }
 0x1ee   :  { %v4471_v0 = vpop.f32.mrb[124].mxu0 }
 0x1ef   :  { %v4535_v13 = vpop.f32.mrb[124].mxu1  ;;  %v4472_v22 = vpop.f32.mrb[125].mxu0 }
 0x1f0   :  { %v4473_v37 = vadd.f32 %v4472_v22, %v4471_v0  ;;  %v4536_v46 = vpop.f32.mrb[125].mxu1  ;;  %v4474_v27 = vpop.f32.mrb[126].mxu0 }
 0x1f1   :  { %v4537_v47 = vadd.f32 %v4536_v46, %v4535_v13  ;;  %v4538_v60 = vpop.f32.mrb[126].mxu1  ;;  %v4475_v34 = vpop.f32.mrb[127].mxu0 }
 0x1f2   :  { %v4476_v16 = vadd.f32 %v4475_v34, %v4474_v27  ;;  %v4539_v20 = vpop.f32.mrb[127].mxu1 }
 0x1f3   :  { %v7067_v18 = vadd.f32 %v4537_v47, %v4473_v37  ;;  %v4540_v45 = vadd.f32 %v4539_v20, %v4538_v60 }
 0x1f5   :  { %v7069_v9 = vadd.f32 %v4540_v45, %v4476_v16 }
 0x1f6   :  { %v4477_v3 = vpop.f32.mrb[128].mxu0 }
 0x1f7   :  { %v4541_v44 = vpop.f32.mrb[128].mxu1  ;;  %v4478_v26 = vpop.f32.mrb[129].mxu0 }
 0x1f8   :  { %v4479_v61 = vadd.f32 %v4478_v26, %v4477_v3  ;;  %v4542_v32 = vpop.f32.mrb[129].mxu1  ;;  %v4480_v7 = vpop.f32.mrb[130].mxu0 }
 0x1f9   :  { %v4543_v6 = vadd.f32 %v4542_v32, %v4541_v44  ;;  %v4544_v0 = vpop.f32.mrb[130].mxu1  ;;  %v4481_v22 = vpop.f32.mrb[131].mxu0 }
 0x1fa   :  { %v4482_v4 = vadd.f32 %v4481_v22, %v4480_v7  ;;  %v4545_v13 = vpop.f32.mrb[131].mxu1 }
 0x1fb   :  { %v7071_v46 = vadd.f32 %v4543_v6, %v4479_v61  ;;  %v4546_v27 = vadd.f32 %v4545_v13, %v4544_v0 }
 0x1fd   :  { %v7073_v34 = vadd.f32 %v4546_v27, %v4482_v4 }
 0x1fe   :  { %v4483_v47 = vpop.f32.mrb[132].mxu0 }
 0x1ff   :  { %v4547_v37 = vpop.f32.mrb[132].mxu1  ;;  %v4484_v16 = vpop.f32.mrb[133].mxu0 }
 0x200   :  { %v4485_v60 = vadd.f32 %v4484_v16, %v4483_v47  ;;  %v4548_v20 = vpop.f32.mrb[133].mxu1  ;;  %v4486_v45 = vpop.f32.mrb[134].mxu0 }
 0x201   :  { %v4549_v33 = vadd.f32 %v4548_v20, %v4547_v37  ;;  %v4550_v3 = vpop.f32.mrb[134].mxu1  ;;  %v4487_v26 = vpop.f32.mrb[135].mxu0 }
 0x202   :  { %v4488_v10 = vadd.f32 %v4487_v26, %v4486_v45  ;;  %v4551_v44 = vpop.f32.mrb[135].mxu1 }
 0x203   :  { %v7075_v32 = vadd.f32 %v4549_v33, %v4485_v60  ;;  %v4552_v7 = vadd.f32 %v4551_v44, %v4550_v3 }
 0x205   :  { %v7077_v22 = vadd.f32 %v4552_v7, %v4488_v10 }
 0x206   :  { %v4489_v6 = vpop.f32.mrb[136].mxu0 }
 0x207   :  { %v4553_v61 = vpop.f32.mrb[136].mxu1  ;;  %v4490_v4 = vpop.f32.mrb[137].mxu0 }
 0x208   :  { %v4491_v0 = vadd.f32 %v4490_v4, %v4489_v6  ;;  %v4554_v13 = vpop.f32.mrb[137].mxu1  ;;  %v4492_v27 = vpop.f32.mrb[138].mxu0 }
 0x209   :  { %v4555_v19 = vadd.f32 %v4554_v13, %v4553_v61  ;;  %v4556_v47 = vpop.f32.mrb[138].mxu1  ;;  %v4493_v16 = vpop.f32.mrb[139].mxu0 }
 0x20a   :  { %v4494_v43 = vadd.f32 %v4493_v16, %v4492_v27  ;;  %v4557_v37 = vpop.f32.mrb[139].mxu1 }
 0x20b   :  { %v7079_v20 = vadd.f32 %v4555_v19, %v4491_v0  ;;  %v4558_v45 = vadd.f32 %v4557_v37, %v4556_v47 }
 0x20d   :  { %v7081_v26 = vadd.f32 %v4558_v45, %v4494_v43 }
 0x20e   :  { %v4495_v33 = vpop.f32.mrb[140].mxu0 }
 0x20f   :  { %v4559_v60 = vpop.f32.mrb[140].mxu1  ;;  %v4496_v10 = vpop.f32.mrb[141].mxu0 }
 0x210   :  { %v4497_v3 = vadd.f32 %v4496_v10, %v4495_v33  ;;  %v4560_v44 = vpop.f32.mrb[141].mxu1  ;;  %v4498_v7 = vpop.f32.mrb[142].mxu0 }
 0x211   :  { %v4561_v11 = vadd.f32 %v4560_v44, %v4559_v60  ;;  %v4562_v6 = vpop.f32.mrb[142].mxu1  ;;  %v4499_v4 = vpop.f32.mrb[143].mxu0 }
 0x212   :  { %v4500_v62 = vadd.f32 %v4499_v4, %v4498_v7  ;;  %v4563_v61 = vpop.f32.mrb[143].mxu1 }
 0x213   :  { %v7083_v13 = vadd.f32 %v4561_v11, %v4497_v3  ;;  %v4564_v27 = vadd.f32 %v4563_v61, %v4562_v6 }
 0x215   :  { %v7085_v16 = vadd.f32 %v4564_v27, %v4500_v62 }
 0x216   :  { %v4581_v19 = vpop.f32.mrb[144].mxu0 }
 0x217   :  { %v4887_v0 = vpop.f32.mrb[144].mxu1  ;;  %v4582_v43 = vpop.f32.mrb[145].mxu0 }
 0x218   :  { %v4583_v47 = vadd.f32 %v4582_v43, %v4581_v19  ;;  %v2623_v37 = vpop.f32.mrb[145].mxu1  ;;  %v4584_v45 = vpop.f32.mrb[146].mxu0 }
 0x219   :  { %v4888_v14 = vpop.f32.mrb[146].mxu1  ;;  %v4585_v33 = vpop.f32.mrb[147].mxu0 }
 0x21a   :  { %v2527_v10 = vadd.f32 %v4583_v47, %v7054_v40  ;;  %v4586_v60 = vadd.f32 %v4585_v33, %v4584_v45  ;;  %v2626_v44 = vpop.f32.mrb[147].mxu1 }
 0x21c   :  { %v7088_v38 = vadd.f32 %v2623_v37, %v2527_v10  ;;  %v2530_v11 = vadd.f32 %v4586_v60, %v7057_v23 }
 0x21e   :  { %v7091_v3 = vadd.f32 %v2626_v44, %v2530_v11  ;;  %v4587_v62 = vpop.f32.mrb[148].mxu0 }
 0x21f   :  { %v4891_v7 = vpop.f32.mrb[148].mxu1  ;;  %v4588_v6 = vpop.f32.mrb[149].mxu0 }
 0x220   :  { %v4589_v4 = vadd.f32 %v4588_v6, %v4587_v62  ;;  %v2639_v61 = vpop.f32.mrb[149].mxu1  ;;  %v4590_v27 = vpop.f32.mrb[150].mxu0 }
 0x221   :  { %v4892_v19 = vpop.f32.mrb[150].mxu1  ;;  %v4591_v43 = vpop.f32.mrb[151].mxu0 }
 0x222   :  { %v2535_v63 = vadd.f32 %v4589_v4, %v7059_v36  ;;  %v4592_v50 = vadd.f32 %v4591_v43, %v4590_v27  ;;  %v2642_v40 = vpop.f32.mrb[151].mxu1 }
 0x224   :  { %v2538_v47 = vadd.f32 %v4592_v50, %v7061_v24  ;;  %v7095_v37 = vadd.f32 %v4887_v0, %v2535_v63 }
 0x226   :  { %v4593_v45 = vpop.f32.mrb[152].mxu0  ;;  %v7097_v23 = vadd.f32 %v4888_v14, %v2538_v47 }
 0x227   :  { %v4895_v33 = vpop.f32.mrb[152].mxu1  ;;  %v4594_v10 = vpop.f32.mrb[153].mxu0 }
 0x228   :  { %v4595_v60 = vadd.f32 %v4594_v10, %v4593_v45  ;;  %v2655_v44 = vpop.f32.mrb[153].mxu1  ;;  %v4596_v11 = vpop.f32.mrb[154].mxu0 }
 0x229   :  { %v4896_v62 = vpop.f32.mrb[154].mxu1  ;;  %v4597_v6 = vpop.f32.mrb[155].mxu0 }
 0x22a   :  { %v2543_v31 = vadd.f32 %v4595_v60, %v7063_v12  ;;  %v4598_v49 = vadd.f32 %v4597_v6, %v4596_v11  ;;  %v2658_v36 = vpop.f32.mrb[155].mxu1 }
 0x22c   :  { %v2546_v4 = vadd.f32 %v4598_v49, %v7065_v2  ;;  %v7101_v27 = vadd.f32 %v2639_v61, %v2543_v31 }
 0x22e   :  { %v4599_v50 = vpop.f32.mrb[156].mxu0  ;;  %v7103_v63 = vadd.f32 %v2642_v40, %v2546_v4 }
 0x22f   :  { %v7105_v14 = vpop.f32.mrb[156].mxu1  ;;  %v4600_v24 = vpop.f32.mrb[157].mxu0 }
 0x230   :  { %v4601_v0 = vadd.f32 %v4600_v24, %v4599_v50  ;;  %v2671_v43 = vpop.f32.mrb[157].mxu1  ;;  %v4602_v47 = vpop.f32.mrb[158].mxu0 }
 0x231   :  { %v7107_v45 = vpop.f32.mrb[158].mxu1  ;;  %v4603_v10 = vpop.f32.mrb[159].mxu0 }
 0x232   :  { %v2551_v12 = vadd.f32 %v4601_v0, %v7067_v18  ;;  %v4604_v60 = vadd.f32 %v4603_v10, %v4602_v47  ;;  %v2674_v11 = vpop.f32.mrb[159].mxu1 }
 0x234   :  { %v2554_v49 = vadd.f32 %v4604_v60, %v7069_v9  ;;  %v7111_v31 = vadd.f32 %v4891_v7, %v2551_v12 }
 0x236   :  { %v4605_v2 = vpop.f32.mrb[160].mxu0  ;;  %v7113_v61 = vadd.f32 %v4892_v19, %v2554_v49 }
 0x237   :  { %v4655_v40 = vpop.f32.mrb[160].mxu1  ;;  %v4606_v6 = vpop.f32.mrb[161].mxu0 }
 0x238   :  { %v4607_v4 = vadd.f32 %v4606_v6, %v4605_v2  ;;  %v4656_v50 = vpop.f32.mrb[161].mxu1  ;;  %v4608_v24 = vpop.f32.mrb[162].mxu0 }
 0x239   :  { %v7115_v53 = vadd.f32 %v4656_v50, %v4655_v40  ;;  %v4658_v8 = vpop.f32.mrb[162].mxu1  ;;  %v4609_v28 = vpop.f32.mrb[163].mxu0 }
 0x23a   :  { %v2559_v18 = vadd.f32 %v4607_v4, %v7071_v46  ;;  %v4610_v0 = vadd.f32 %v4609_v28, %v4608_v24  ;;  %v4659_v47 = vpop.f32.mrb[163].mxu1 }
 0x23b   :  { %v7118_v10 = vadd.f32 %v4659_v47, %v4658_v8 }
 0x23c   :  { %v2562_v9 = vadd.f32 %v4610_v0, %v7073_v34  ;;  %v7121_v7 = vadd.f32 %v2655_v44, %v2559_v18 }
 0x23e   :  { %v4611_v19 = vpop.f32.mrb[164].mxu0  ;;  %v7123_v12 = vadd.f32 %v2658_v36, %v2562_v9 }
 0x23f   :  { %v4661_v60 = vpop.f32.mrb[164].mxu1  ;;  %v4612_v49 = vpop.f32.mrb[165].mxu0 }
 0x240   :  { %7428 = vst [vmem:[#allocation13_spill] sm:$0xff] %v7123_v12  ;;  %v4613_v2 = vadd.f32 %v4612_v49, %v4611_v19  ;;  %v4662_v40 = vpop.f32.mrb[165].mxu1  ;;  %v4614_v6 = vpop.f32.mrb[166].mxu0 }
 0x241   :  { %v7125_v50 = vadd.f32 %v4662_v40, %v4661_v60  ;;  %v4664_v15 = vpop.f32.mrb[166].mxu1  ;;  %v4615_v46 = vpop.f32.mrb[167].mxu0 }
 0x242   :  { %v2567_v28 = vadd.f32 %v4613_v2, %v7075_v32  ;;  %v4616_v8 = vadd.f32 %v4615_v46, %v4614_v6  ;;  %v4665_v4 = vpop.f32.mrb[167].mxu1 }
 0x243   :  { %v7128_v24 = vadd.f32 %v4665_v4, %v4664_v15 }
 0x244   :  { %v2570_v34 = vadd.f32 %v4616_v8, %v7077_v22  ;;  %v7131_v44 = vadd.f32 %v4895_v33, %v2567_v28 }
 0x246   :  { %v4617_v36 = vpop.f32.mrb[168].mxu0  ;;  %v7133_v18 = vadd.f32 %v4896_v62, %v2570_v34 }
 0x247   :  { %v4667_v0 = vpop.f32.mrb[168].mxu1  ;;  %v4618_v47 = vpop.f32.mrb[169].mxu0 }
 0x248   :  { %7429 = vst [vmem:[#allocation14_spill] sm:$0xff] %v7133_v18  ;;  %v4619_v9 = vadd.f32 %v4618_v47, %v4617_v36  ;;  %v4668_v19 = vpop.f32.mrb[169].mxu1  ;;  %v4620_v60 = vpop.f32.mrb[170].mxu0 }
 0x249   :  { %v7135_v49 = vadd.f32 %v4668_v19, %v4667_v0  ;;  %v4670_v40 = vpop.f32.mrb[170].mxu1  ;;  %v4621_v32 = vpop.f32.mrb[171].mxu0 }
 0x24a   :  { %v2575_v2 = vadd.f32 %v4619_v9, %v7079_v20  ;;  %v4622_v15 = vadd.f32 %v4621_v32, %v4620_v60  ;;  %v4671_v6 = vpop.f32.mrb[171].mxu1 }
 0x24b   :  { %v4672_v46 = vadd.f32 %v4671_v6, %v4670_v40 }
 0x24c   :  { %v2578_v22 = vadd.f32 %v4622_v15, %v7081_v26  ;;  %v7139_v33 = vadd.f32 %v2671_v43, %v2575_v2 }
 0x24e   :  { %7430 = vst [vmem:[#allocation15_spill] sm:$0xff] %v7139_v33  ;;  %v4623_v62 = vpop.f32.mrb[172].mxu0  ;;  %v7141_v28 = vadd.f32 %v2674_v11, %v2578_v22 }
 0x24f   :  { %v4673_v8 = vpop.f32.mrb[172].mxu1  ;;  %v4624_v4 = vpop.f32.mrb[173].mxu0 }
 0x250   :  { %7431 = vst [vmem:[#allocation16_spill] sm:$0xff] %v7141_v28  ;;  %v4625_v34 = vadd.f32 %v4624_v4, %v4623_v62  ;;  %v4674_v36 = vpop.f32.mrb[173].mxu1  ;;  %v4626_v0 = vpop.f32.mrb[174].mxu0 }
 0x251   :  { %v4675_v47 = vadd.f32 %v4674_v36, %v4673_v8  ;;  %v4676_v19 = vpop.f32.mrb[174].mxu1  ;;  %v4627_v12 = vpop.f32.mrb[175].mxu0 }
 0x252   :  { %v2583_v20 = vadd.f32 %v4625_v34, %v7083_v13  ;;  %v4628_v9 = vadd.f32 %v4627_v12, %v4626_v0  ;;  %v4677_v60 = vpop.f32.mrb[175].mxu1 }
 0x253   :  { %v4678_v40 = vadd.f32 %v4677_v60, %v4676_v19 }
 0x254   :  { %v7145_v26 = vadd.f32 %v7105_v14, %v2583_v20  ;;  %v2586_v43 = vadd.f32 %v4628_v9, %v7085_v16 }
 0x256   :  { %7432 = vst [vmem:[#allocation17_spill] sm:$0xff] %v7145_v26  ;;  %v7149_v11 = vadd.f32 %v7107_v45, %v2586_v43  ;;  %v4719_v32 = vpop.f32.mrb[176].mxu0 }
 0x257   :  { %v4679_v2 = vpop.f32.mrb[176].mxu1  ;;  %v4720_v15 = vpop.f32.mrb[177].mxu0 }
 0x258   :  { %7433 = vst [vmem:[#allocation4_spill] sm:$0xff] %v7149_v11  ;;  %v4680_v6 = vpop.f32.mrb[177].mxu1  ;;  %v4721_v22 = vadd.f32 %v4720_v15, %v4719_v32  ;;  %v4722_v62 = vpop.f32.mrb[178].mxu0 }
 0x259   :  { %v4681_v8 = vadd.f32 %v4680_v6, %v4679_v2  ;;  %v4682_v4 = vpop.f32.mrb[178].mxu1  ;;  %v4723_v13 = vpop.f32.mrb[179].mxu0 }
 0x25a   :  { %v3187_v12 = vadd.f32 %v4721_v22, %v7115_v53  ;;  %v4683_v34 = vpop.f32.mrb[179].mxu1  ;;  %v4724_v36 = vadd.f32 %v4723_v13, %v4722_v62 }
 0x25b   :  { %v4684_v14 = vadd.f32 %v4683_v34, %v4682_v4 }
 0x25c   :  { %v3190_v0 = vadd.f32 %v4724_v36, %v7118_v10 }
 0x25e   :  { %v4725_v16 = vpop.f32.mrb[180].mxu0 }
 0x25f   :  { %v4685_v19 = vpop.f32.mrb[180].mxu1  ;;  %v4726_v45 = vpop.f32.mrb[181].mxu0 }
 0x260   :  { %v4686_v20 = vpop.f32.mrb[181].mxu1  ;;  %v4727_v9 = vadd.f32 %v4726_v45, %v4725_v16  ;;  %v4728_v60 = vpop.f32.mrb[182].mxu0 }
 0x261   :  { %v4687_v43 = vadd.f32 %v4686_v20, %v4685_v19  ;;  %v4688_v11 = vpop.f32.mrb[182].mxu1  ;;  %v4729_v32 = vpop.f32.mrb[183].mxu0 }
 0x262   :  { %v3195_v2 = vadd.f32 %v4727_v9, %v7125_v50  ;;  %v4689_v15 = vpop.f32.mrb[183].mxu1  ;;  %v4730_v6 = vadd.f32 %v4729_v32, %v4728_v60 }
 0x263   :  { %v4690_v26 = vadd.f32 %v4689_v15, %v4688_v11 }
 0x264   :  { %v3198_v53 = vadd.f32 %v4730_v6, %v7128_v24 }
 0x266   :  { %v4731_v22 = vpop.f32.mrb[184].mxu0 }
 0x267   :  { %v4691_v62 = vpop.f32.mrb[184].mxu1  ;;  %v4732_v4 = vpop.f32.mrb[185].mxu0 }
 0x268   :  { %v4692_v10 = vpop.f32.mrb[185].mxu1  ;;  %v4733_v13 = vadd.f32 %v4732_v4, %v4731_v22  ;;  %v4734_v34 = vpop.f32.mrb[186].mxu0 }
 0x269   :  { %v7155_v36 = vadd.f32 %v4692_v10, %v4691_v62  ;;  %v4694_v16 = vpop.f32.mrb[186].mxu1  ;;  %v4735_v45 = vpop.f32.mrb[187].mxu0 }
 0x26a   :  { %v7158_v19 = vadd.f32 %v4733_v13, %v7135_v49  ;;  %v4695_v20 = vpop.f32.mrb[187].mxu1  ;;  %v4736_v50 = vadd.f32 %v4735_v45, %v4734_v34 }
 0x26b   :  { %v4696_v9 = vadd.f32 %v4695_v20, %v4694_v16 }
 0x26c   :  { %v3206_v60 = vadd.f32 %v4736_v50, %v4672_v46 }
 0x26e   :  { %v4737_v11 = vpop.f32.mrb[188].mxu0 }
 0x26f   :  { %v4697_v32 = vpop.f32.mrb[188].mxu1  ;;  %v4738_v24 = vpop.f32.mrb[189].mxu0 }
 0x270   :  { %v4698_v15 = vpop.f32.mrb[189].mxu1  ;;  %v4739_v6 = vadd.f32 %v4738_v24, %v4737_v11  ;;  %v4740_v28 = vpop.f32.mrb[190].mxu0 }
 0x271   :  { %v7160_v33 = vadd.f32 %v4698_v15, %v4697_v32  ;;  %v4700_v22 = vpop.f32.mrb[190].mxu1  ;;  %v4741_v62 = vpop.f32.mrb[191].mxu0 }
 0x272   :  { %v7162_v4 = vadd.f32 %v4739_v6, %v4675_v47  ;;  %v4701_v10 = vpop.f32.mrb[191].mxu1  ;;  %v4742_v48 = vadd.f32 %v4741_v62, %v4740_v28 }
 0x273   :  { %v7164_v49 = vadd.f32 %v4701_v10, %v4700_v22 }
 0x274   :  { %v7166_v13 = vadd.f32 %v4742_v48, %v4678_v40 }
 0x276   :  { %v4743_v34 = vpop.f32.mrb[192].mxu0 }
 0x277   :  { %v4783_v46 = vpop.f32.mrb[192].mxu1  ;;  %v4744_v16 = vpop.f32.mrb[193].mxu0 }
 0x278   :  { %v4745_v45 = vadd.f32 %v4744_v16, %v4743_v34  ;;  %v4784_v20 = vpop.f32.mrb[193].mxu1  ;;  %v4746_v50 = vpop.f32.mrb[194].mxu0 }
 0x279   :  { %v4785_v11 = vadd.f32 %v4784_v20, %v4783_v46  ;;  %v4786_v24 = vpop.f32.mrb[194].mxu1  ;;  %v4747_v32 = vpop.f32.mrb[195].mxu0 }
 0x27a   :  { %v7168_v15 = vadd.f32 %v4745_v45, %v4681_v8  ;;  %v4748_v39 = vadd.f32 %v4747_v32, %v4746_v50  ;;  %v4787_v47 = vpop.f32.mrb[195].mxu1 }
 0x27b   :  { %v4788_v6 = vadd.f32 %v4787_v47, %v4786_v24  ;;  %v3284_v18 = vadd.f32 %v4785_v11, %v3187_v12 }
 0x27c   :  { %v7170_v28 = vadd.f32 %v4748_v39, %v4684_v14 }
 0x27d   :  { %v7172_v22 = vadd.f32 %v4788_v6, %v3190_v0 }
 0x27e   :  { %v4749_v48 = vpop.f32.mrb[196].mxu0 }
 0x27f   :  { %v4789_v40 = vpop.f32.mrb[196].mxu1  ;;  %v4750_v62 = vpop.f32.mrb[197].mxu0 }
 0x280   :  { %v4751_v10 = vadd.f32 %v4750_v62, %v4749_v48  ;;  %v4790_v34 = vpop.f32.mrb[197].mxu1  ;;  %v4752_v16 = vpop.f32.mrb[198].mxu0 }
 0x281   :  { %v4791_v25 = vadd.f32 %v4790_v34, %v4789_v40  ;;  %v4792_v46 = vpop.f32.mrb[198].mxu1  ;;  %v4753_v20 = vpop.f32.mrb[199].mxu0 }
 0x282   :  { %v7174_v57 = vadd.f32 %v4751_v10, %v4687_v43  ;;  %v4754_v8 = vadd.f32 %v4753_v20, %v4752_v16  ;;  %v4793_v45 = vpop.f32.mrb[199].mxu1 }
 0x283   :  { %v4794_v50 = vadd.f32 %v4793_v45, %v4792_v46  ;;  %v3292_v24 = vadd.f32 %v4791_v25, %v3195_v2 }
 0x284   :  { %v7176_v12 = vadd.f32 %v4754_v8, %v4690_v26 }
 0x285   :  { %v3295_v39 = vadd.f32 %v4794_v50, %v3198_v53 }
 0x286   :  { %v4755_v14 = vpop.f32.mrb[200].mxu0 }
 0x287   :  { %v4795_v0 = vpop.f32.mrb[200].mxu1  ;;  %v4756_v11 = vpop.f32.mrb[201].mxu0 }
 0x288   :  { %v4757_v32 = vadd.f32 %v4756_v11, %v4755_v14  ;;  %v4796_v47 = vpop.f32.mrb[201].mxu1  ;;  %v4758_v6 = vpop.f32.mrb[202].mxu0 }
 0x289   :  { %v4797_v48 = vadd.f32 %v4796_v47, %v4795_v0  ;;  %v4798_v62 = vpop.f32.mrb[202].mxu1  ;;  %v4759_v40 = vpop.f32.mrb[203].mxu0 }
 0x28a   :  { %v7179_v34 = vadd.f32 %v4757_v32, %v7155_v36  ;;  %v4760_v43 = vadd.f32 %v4759_v40, %v4758_v6  ;;  %v4799_v10 = vpop.f32.mrb[203].mxu1 }
 0x28b   :  { %v4800_v16 = vadd.f32 %v4799_v10, %v4798_v62  ;;  %v3300_v25 = vadd.f32 %v4797_v48, %v7158_v19 }
 0x28c   :  { %v7182_v26 = vadd.f32 %v4760_v43, %v4696_v9 }
 0x28d   :  { %v7184_v2 = vadd.f32 %v4800_v16, %v3206_v60 }
 0x28e   :  { %v4761_v53 = vpop.f32.mrb[204].mxu0 }
 0x28f   :  { %v4801_v46 = vpop.f32.mrb[204].mxu1  ;;  %v4762_v20 = vpop.f32.mrb[205].mxu0 }
 0x290   :  { %v4763_v8 = vadd.f32 %v4762_v20, %v4761_v53  ;;  %v4802_v45 = vpop.f32.mrb[205].mxu1  ;;  %v4764_v50 = vpop.f32.mrb[206].mxu0 }
 0x291   :  { %v4803_v14 = vadd.f32 %v4802_v45, %v4801_v46  ;;  %v4804_v0 = vpop.f32.mrb[206].mxu1  ;;  %v4765_v11 = vpop.f32.mrb[207].mxu0 }
 0x292   :  { %v7187_v36 = vadd.f32 %v4763_v8, %v7160_v33  ;;  %v4766_v32 = vadd.f32 %v4765_v11, %v4764_v50  ;;  %v4805_v47 = vpop.f32.mrb[207].mxu1 }
 0x293   :  { %v4806_v6 = vadd.f32 %v4805_v47, %v4804_v0  ;;  %v3308_v19 = vadd.f32 %v4803_v14, %v7162_v4  ;;  %v7198_v4 = vld [vmem:[%s7339_s2] ss:$0 sm:$0xff]  ;;  %v7435_v0 = vmax.f32 %v6506_v52, %v6923_v41 }
 0x294   :  { %v7191_v9 = vadd.f32 %v4766_v32, %v7164_v49 }
 0x295   :  { %v3311_v60 = vadd.f32 %v4806_v6, %v7166_v13 }
 0x296   :  { %v4907_v48 = vpop.f32.mrb[208].mxu0 }
 0x297   :  { %v4807_v62 = vpop.f32.mrb[208].mxu1  ;;  %v3389_v40 = vadd.f32 %v4907_v48, %v3292_v24  ;;  %v3380_v43 = vpop.f32.mrb[209].mxu0 }
 0x298   :  { %v4808_v10 = vpop.f32.mrb[209].mxu1  ;;  %v3381_v16 = vadd.f32 %v3380_v43, %v3284_v18  ;;  %v4908_v53 = vpop.f32.mrb[210].mxu0  ;;  %v7434_v18 = vmax.f32 %v6532_v35, %v6917_v59 }
 0x299   :  { %v3461_v33 = vmax.f32 %v7095_v37, %v3389_v40  ;;  %v4809_v46 = vadd.f32 %v4808_v10, %v4807_v62  ;;  %v4810_v20 = vpop.f32.mrb[210].mxu1  ;;  %v3392_v8 = vadd.f32 %v4908_v53, %v3295_v39  ;;  %v3383_v45 = vpop.f32.mrb[211].mxu0  ;;  %v7438_v53 = vmax.f32 %v6604_v29, %v6950_v1 }
 0x29a   :  { %v3459_v49 = vmax.f32 %v7088_v38, %v3381_v16  ;;  %v4811_v13 = vpop.f32.mrb[211].mxu1  ;;  %v3384_v24 = vadd.f32 %v3383_v45, %v7172_v22  ;;  %v7436_v22 = vmax.f32 %v6537_v58, %v6933_v17 }
 0x29b   :  { %v3477_v50 = vmax.f32 %v7434_v18, %v3461_v33  ;;  %v3462_v37 = vmax.f32 %v7097_v23, %v3392_v8  ;;  %v4812_v14 = vadd.f32 %v4811_v13, %v4810_v20  ;;  %v3316_v39 = vadd.f32 %v4809_v46, %v7168_v15 }
 0x29c   :  { %v3475_v11 = vmax.f32 %v7435_v0, %v3459_v49  ;;  %v3460_v32 = vmax.f32 %v7091_v3, %v3384_v24  ;;  %v7437_v23 = vmax.f32 %v6510_v55, %v6941_v5 }
 0x29d   :  { %v3500_v38 = vadd.f32 %v7198_v4, %v3477_v50  ;;  %v3478_v47 = vmax.f32 %v7436_v22, %v3462_v37  ;;  %v3319_v35 = vadd.f32 %v4812_v14, %v7170_v28 }
 0x29e   :  { %v3498_v59 = vadd.f32 %v7198_v4, %v3475_v11  ;;  %v3476_v15 = vmax.f32 %v7437_v23, %v3460_v32  ;;  %v4911_v6 = vpop.f32.mrb[212].mxu0 }
 0x29f   :  { %3516 = vst [vmem:[%s7340_s3 + $0x10] sm:$0xff] %v3500_v38  ;;  %v3501_v52 = vadd.f32 %v7198_v4, %v3478_v47  ;;  %v4813_v41 = vpop.f32.mrb[212].mxu1  ;;  %v3405_v3 = vadd.f32 %v4911_v6, %v3308_v19  ;;  %v3396_v48 = vpop.f32.mrb[213].mxu0  ;;  %v7443_v38 = vld [vmem:[#allocation19_spill] sm:$0xff]  ;;  %v7446_v6 = vld [vmem:[#allocation21_spill] sm:$0xff] }
 0x2a0   :  { %3514 = vst [vmem:[%s7340_s3] sm:$0xff] %v3498_v59  ;;  %v3499_v58 = vadd.f32 %v7198_v4, %v3476_v15  ;;  %v4814_v17 = vpop.f32.mrb[213].mxu1  ;;  %v3397_v28 = vadd.f32 %v3396_v48, %v3300_v25  ;;  %v4912_v55 = vpop.f32.mrb[214].mxu0  ;;  %v7445_v59 = vld [vmem:[#allocation14_spill] sm:$0xff]  ;;  %v7449_v48 = vld [vmem:[#allocation13_spill] sm:$0xff] }
 0x2a1   :  { %3517 = vst [vmem:[%s7340_s3 + $0x18] sm:$0xff] %v3501_v52  ;;  %v3465_v5 = vmax.f32 %v7111_v31, %v3405_v3  ;;  %v4815_v62 = vadd.f32 %v4814_v17, %v4813_v41  ;;  %v4816_v40 = vpop.f32.mrb[214].mxu1  ;;  %v3408_v43 = vadd.f32 %v4912_v55, %v3311_v60  ;;  %v3399_v19 = vpop.f32.mrb[215].mxu0  ;;  %v7439_v60 = vmax.f32 %v6567_v21, %v6956_v51  ;;  %v7447_v52 = vld [vmem:[#allocation7_spill] sm:$0xff] }
 0x2a2   :  { %3515 = vst [vmem:[%s7340_s3 + $0x8] sm:$0xff] %v3499_v58  ;;  %v3463_v10 = vmax.f32 %v7101_v27, %v3397_v28  ;;  %v4817_v16 = vpop.f32.mrb[215].mxu1  ;;  %v3400_v25 = vadd.f32 %v3399_v19, %v7184_v2  ;;  %v7440_v2 = vmax.f32 %v6611_v42, %v6966_v54  ;;  %v7448_v41 = vmax.f32 %v7446_v6, %v7447_v52  ;;  %v7451_v28 = vld [vmem:[#allocation8_spill] sm:$0xff] }
 0x2a3   :  { %v3481_v33 = vmax.f32 %v7438_v53, %v3465_v5  ;;  %v3466_v46 = vmax.f32 %v7113_v61, %v3408_v43  ;;  %v4818_v31 = vadd.f32 %v4817_v16, %v4816_v40  ;;  %v3324_v20 = vadd.f32 %v4815_v62, %v7174_v57  ;;  %v7453_v40 = vld [vmem:[#allocation22_spill] sm:$0xff]  ;;  %v7454_v43 = vld [vmem:[#allocation9_spill] sm:$0xff] }
 0x2a4   :  { %v3479_v8 = vmax.f32 %v7439_v60, %v3463_v10  ;;  %v3464_v45 = vmax.f32 %v7103_v63, %v3400_v25  ;;  %v7441_v61 = vmax.f32 %v6573_v30, %v6974_v56  ;;  %v7455_v19 = vmax.f32 %v7453_v40, %v7454_v43 }
 0x2a5   :  { %v3504_v27 = vadd.f32 %v7198_v4, %v3481_v33  ;;  %v3482_v49 = vmax.f32 %v7440_v2, %v3466_v46  ;;  %v3327_v29 = vadd.f32 %v4818_v31, %v7176_v12 }
 0x2a6   :  { %v3502_v1 = vadd.f32 %v7198_v4, %v3479_v8  ;;  %v3480_v57 = vmax.f32 %v7441_v61, %v3464_v45  ;;  %v4915_v13 = vpop.f32.mrb[216].mxu0  ;;  %v7456_v45 = vld [vmem:[#allocation15_spill] sm:$0xff] }
 0x2a7   :  { %3520 = vst [vmem:[%s7340_s3 + $0x30] sm:$0xff] %v3504_v27  ;;  %v3505_v21 = vadd.f32 %v7198_v4, %v3482_v49  ;;  %v4819_v51 = vpop.f32.mrb[216].mxu1  ;;  %v3421_v63 = vadd.f32 %v4915_v13, %v3324_v20  ;;  %v3412_v24 = vpop.f32.mrb[217].mxu0  ;;  %v7457_v61 = vld [vmem:[#allocation3_spill] sm:$0xff] }
 0x2a8   :  { %3518 = vst [vmem:[%s7340_s3 + $0x20] sm:$0xff] %v3502_v1  ;;  %v3503_v42 = vadd.f32 %v7198_v4, %v3480_v57  ;;  %v4820_v54 = vpop.f32.mrb[217].mxu1  ;;  %v3413_v12 = vadd.f32 %v3412_v24, %v3316_v39  ;;  %v4916_v30 = vpop.f32.mrb[218].mxu0  ;;  %v7442_v39 = vld [vmem:[#allocation23_spill] sm:$0xff]  ;;  %v7458_v57 = vld [vmem:[#allocation10_spill] sm:$0xff] }
 0x2a9   :  { %3521 = vst [vmem:[%s7340_s3 + $0x38] sm:$0xff] %v3505_v21  ;;  %v3469_v56 = vmax.f32 %v7131_v44, %v3421_v63  ;;  %v4821_v18 = vadd.f32 %v4820_v54, %v4819_v51  ;;  %v4822_v50 = vpop.f32.mrb[218].mxu1  ;;  %v3424_v37 = vadd.f32 %v4916_v30, %v3327_v29  ;;  %v3415_v14 = vpop.f32.mrb[219].mxu0  ;;  %v7444_v22 = vmax.f32 %v7442_v39, %v7443_v38  ;;  %v7460_v51 = vld [vmem:[#allocation16_spill] sm:$0xff] }
 0x2aa   :  { %3519 = vst [vmem:[%s7340_s3 + $0x28] sm:$0xff] %v3503_v42  ;;  %v3467_v0 = vmax.f32 %v7121_v7, %v3413_v12  ;;  %v4823_v11 = vpop.f32.mrb[219].mxu1  ;;  %v3416_v32 = vadd.f32 %v3415_v14, %v3319_v35  ;;  %v7450_v7 = vld [vmem:[#allocation2_spill] sm:$0xff]  ;;  %v7459_v13 = vmax.f32 %v7457_v61, %v7458_v57  ;;  %v7461_v12 = vld [vmem:[#allocation5_spill] sm:$0xff]  ;;  %v7462_v30 = vld [vmem:[#allocation20_spill] sm:$0xff] }
 0x2ab   :  { %v3485_v47 = vmax.f32 %v7444_v22, %v3469_v56  ;;  %v3470_v23 = vmax.f32 %v7445_v59, %v3424_v37  ;;  %v4824_v15 = vadd.f32 %v4823_v11, %v4822_v50  ;;  %v3332_v44 = vadd.f32 %v4821_v18, %v7179_v34  ;;  %v7464_v50 = vld [vmem:[#allocation17_spill] sm:$0xff]  ;;  %v7466_v11 = vld [vmem:[#allocation11_spill] sm:$0xff]  ;;  %v7470_v59 = vld [vmem:[#allocation12_spill] sm:$0xff] }
 0x2ac   :  { %v3483_v3 = vmax.f32 %v7448_v41, %v3467_v0  ;;  %v3468_v58 = vmax.f32 %v7449_v48, %v3416_v32  ;;  %v7452_v35 = vmax.f32 %v7450_v7, %v7451_v28  ;;  %v7463_v56 = vmax.f32 %v7461_v12, %v7462_v30  ;;  %v7465_v0 = vld [vmem:[#allocation18_spill] sm:$0xff] }
 0x2ad   :  { %v3508_v17 = vadd.f32 %v7198_v4, %v3485_v47  ;;  %v3335_v5 = vadd.f32 %v4824_v15, %v7182_v26  ;;  %v7467_v32 = vmax.f32 %v7465_v0, %v7466_v11  ;;  %v7469_v47 = vld [vmem:[#allocation6_spill] sm:$0xff] }
 0x2ae   :  { %v3486_v55 = vmax.f32 %v7452_v35, %v3470_v23  ;;  %v3506_v62 = vadd.f32 %v7198_v4, %v3483_v3  ;;  %v3484_v34 = vmax.f32 %v7455_v19, %v3468_v58  ;;  %v4919_v10 = vpop.f32.mrb[220].mxu0  ;;  %v7471_v23 = vmax.f32 %v7469_v47, %v7470_v59 }
 0x2af   :  { %3524 = vst [vmem:[%s7340_s3 + $0x50] sm:$0xff] %v3508_v17  ;;  %v4825_v25 = vpop.f32.mrb[220].mxu1  ;;  %v3428_v53 = vpop.f32.mrb[221].mxu0 }
 0x2b0   :  { %v3509_v16 = vadd.f32 %v7198_v4, %v3486_v55  ;;  %3522 = vst [vmem:[%s7340_s3 + $0x40] sm:$0xff] %v3506_v62  ;;  %v3507_v26 = vadd.f32 %v7198_v4, %v3484_v34  ;;  %v4826_v33 = vpop.f32.mrb[221].mxu1  ;;  %v3429_v46 = vadd.f32 %v3428_v53, %v3332_v44  ;;  %v4920_v31 = vpop.f32.mrb[222].mxu0 }
 0x2b1   :  { %v4827_v20 = vadd.f32 %v4826_v33, %v4825_v25  ;;  %v4828_v60 = vpop.f32.mrb[222].mxu1  ;;  %v3431_v8 = vpop.f32.mrb[223].mxu0 }
 0x2b2   :  { %3525 = vst [vmem:[%s7340_s3 + $0x58] sm:$0xff] %v3509_v16  ;;  %3523 = vst [vmem:[%s7340_s3 + $0x48] sm:$0xff] %v3507_v26  ;;  %v3471_v27 = vmax.f32 %v7456_v45, %v3429_v46  ;;  %v4829_v2 = vpop.f32.mrb[223].mxu1  ;;  %v3432_v49 = vadd.f32 %v3431_v8, %v3335_v5 }
 0x2b3   :  { %v3340_v29 = vadd.f32 %v4827_v20, %v7187_v36  ;;  %v4830_v1 = vadd.f32 %v4829_v2, %v4828_v60 }
 0x2b4   :  { %v3487_v21 = vmax.f32 %v7459_v13, %v3471_v27  ;;  %v3472_v63 = vmax.f32 %v7460_v51, %v3432_v49 }
 0x2b5   :  { %v3437_v24 = vadd.f32 %v4919_v10, %v3340_v29  ;;  %v3343_v42 = vadd.f32 %v4830_v1, %v7191_v9  ;;  %v7468_v9 = vld [vmem:[#allocation4_spill] sm:$0xff] }
 0x2b6   :  { %v3510_v54 = vadd.f32 %v7198_v4, %v3487_v21  ;;  %v3488_v18 = vmax.f32 %v7463_v56, %v3472_v63 }
 0x2b7   :  { %v3473_v37 = vmax.f32 %v7464_v50, %v3437_v24  ;;  %v3440_v14 = vadd.f32 %v4920_v31, %v3343_v42 }
 0x2b8   :  { %3526 = vst [vmem:[%s7340_s3 + $0x60] sm:$0xff] %v3510_v54  ;;  %v3511_v36 = vadd.f32 %v7198_v4, %v3488_v18 }
 0x2b9   :  { %v3489_v39 = vmax.f32 %v7467_v32, %v3473_v37  ;;  %v3474_v38 = vmax.f32 %v7468_v9, %v3440_v14 }
 0x2ba   :  { %3527 = vst [vmem:[%s7340_s3 + $0x68] sm:$0xff] %v3511_v36 }
 0x2bb   :  { %v3512_v22 = vadd.f32 %v7198_v4, %v3489_v39  ;;  %v3490_v15 = vmax.f32 %v7471_v23, %v3474_v38 }
 0x2bd   :  { %3528 = vst [vmem:[%s7340_s3 + $0x70] sm:$0xff] %v3512_v22  ;;  %v3513_v44 = vadd.f32 %v7198_v4, %v3490_v15 }
 0x2bf   :  { %3529 = vst [vmem:[%s7340_s3 + $0x78] sm:$0xff] %v3513_v44 }

// kernel: mnist_tier_forward.5
= control target key start
LH: loop header
LB: loop body
LE: loop exit
PB: predicated region body
PF: predicated region fallthrough
CT: control target
= control target key end

     0   :  { %s4076_s1 = inlined_call_operand.vmem [shape: bf16[1024,512], index: 1, kind: input, shape index: {}]   ;;  %s4077_s0 = inlined_call_operand.vmem [shape: bf16[16,1024], index: 0, kind: input, shape index: {}]   ;;  %s4078_s3 = inlined_call_operand.vmem [shape: f32[512,128], index: 3, kind: input, shape index: {}]   ;;  %s4079_s2 = inlined_call_operand.vmem [shape: f32[1,512], index: 2, kind: input, shape index: {}]   ;;  %s4080_s4 = inlined_call_operand.vmem [shape: f32[1,128], index: 4, kind: input, shape index: {}]   ;;  %s4081_s5 = inlined_call_operand.vmem [shape: f32[16,128], index: 5, kind: output, shape index: {}]  }
   0x1   :  { %v2642_v0 = vld [vmem:[%s4076_s1 + $0x4] ss:$16 sps:$4 sm:$0xff]   ;;  %v2644_v1 = vld [vmem:[%s4076_s1 + $0xc] ss:$16 sps:$4 sm:$0xff]   ;;  %v2646_v2 = vld [vmem:[%s4076_s1] ss:$16 sps:$4 sm:$0xff]  }
   0x2   :  { %1626 = vmatprep.subr.bf16.mxu0 %v2642_v0  ;;  %v2647_v3 = vld [vmem:[%s4076_s1 + $0x8] ss:$16 sps:$4 sm:$0xff]   ;;  %1798 = vmatprep.subr.bf16.mxu1 %v2644_v1  ;;  %v2648_v4 = vld [vmem:[%s4076_s1 + $0x24] ss:$16 sps:$4 sm:$0xff]   ;;  %v2650_v5 = vld [vmem:[%s4076_s1 + $0x2c] ss:$16 sps:$4 sm:$0xff]  }
   0x3   :  { %1627 = vmatpush1.bf16.msra.mxu0 %v2646_v2  ;;  %1799 = vmatpush1.bf16.msra.mxu1 %v2647_v3  ;;  %v2652_v6 = vld [vmem:[%s4076_s1 + $0x20] ss:$16 sps:$4 sm:$0xff]   ;;  %v2653_v7 = vld [vmem:[%s4076_s1 + $0x28] ss:$16 sps:$4 sm:$0xff]   ;;  %v2654_v8 = vld [vmem:[%s4076_s1 + $0x44] ss:$16 sps:$4 sm:$0xff]  }
   0x4   :  { %1628 = vmatprep.subr.bf16.mxu0 %v2648_v4  ;;  %1800 = vmatprep.subr.bf16.mxu1 %v2650_v5  ;;  %v2656_v9 = vld [vmem:[%s4076_s1 + $0x4c] ss:$16 sps:$4 sm:$0xff]   ;;  %v2658_v10 = vld [vmem:[%s4076_s1 + $0x40] ss:$16 sps:$4 sm:$0xff]   ;;  %v2659_v11 = vld [vmem:[%s4076_s1 + $0x48] ss:$16 sps:$4 sm:$0xff]  }
   0x5   :  { %v2660_v12 = vld [vmem:[%s4076_s1 + $0x64] ss:$16 sps:$4 sm:$0xff]   ;;  %v2662_v13 = vld [vmem:[%s4076_s1 + $0x6c] ss:$16 sps:$4 sm:$0xff]   ;;  %v2664_v14 = vld [vmem:[%s4076_s1 + $0x60] ss:$16 sps:$4 sm:$0xff]  }
   0x6   :  { %v2665_v15 = vld [vmem:[%s4076_s1 + $0x68] ss:$16 sps:$4 sm:$0xff]   ;;  %v2666_v16 = vld [vmem:[%s4076_s1 + $0x84] ss:$16 sps:$4 sm:$0xff]   ;;  %v2668_v17 = vld [vmem:[%s4076_s1 + $0x8c] ss:$16 sps:$4 sm:$0xff]  }
   0x7   :  { %1629 = vmatpush1.bf16.msra.mxu0 %v2652_v6  ;;  %1801 = vmatpush1.bf16.msra.mxu1 %v2653_v7  ;;  %v2670_v18 = vld [vmem:[%s4076_s1 + $0x80] ss:$16 sps:$4 sm:$0xff]   ;;  %v2671_v19 = vld [vmem:[%s4076_s1 + $0x88] ss:$16 sps:$4 sm:$0xff]   ;;  %v2672_v20 = vld [vmem:[%s4076_s1 + $0xa4] ss:$16 sps:$4 sm:$0xff]  }
   0x8   :  { %1630 = vmatprep.subr.bf16.mxu0 %v2654_v8  ;;  %1802 = vmatprep.subr.bf16.mxu1 %v2656_v9  ;;  %v2674_v21 = vld [vmem:[%s4076_s1 + $0xac] ss:$16 sps:$4 sm:$0xff]   ;;  %v2676_v22 = vld [vmem:[%s4076_s1 + $0xa0] ss:$16 sps:$4 sm:$0xff]   ;;  %v2677_v23 = vld [vmem:[%s4076_s1 + $0xa8] ss:$16 sps:$4 sm:$0xff]  }
   0x9   :  { %v2678_v24 = vld [vmem:[%s4076_s1 + $0xc4] ss:$16 sps:$4 sm:$0xff]   ;;  %v2680_v25 = vld [vmem:[%s4076_s1 + $0xcc] ss:$16 sps:$4 sm:$0xff]   ;;  %v2682_v26 = vld [vmem:[%s4076_s1 + $0xc0] ss:$16 sps:$4 sm:$0xff]  }
   0xa   :  { %v2683_v27 = vld [vmem:[%s4076_s1 + $0xc8] ss:$16 sps:$4 sm:$0xff]   ;;  %v2684_v28 = vld [vmem:[%s4076_s1 + $0xe4] ss:$16 sps:$4 sm:$0xff]   ;;  %v2686_v29 = vld [vmem:[%s4076_s1 + $0xec] ss:$16 sps:$4 sm:$0xff]  }
   0xb   :  { %1631 = vmatpush1.bf16.msra.mxu0 %v2658_v10  ;;  %1803 = vmatpush1.bf16.msra.mxu1 %v2659_v11  ;;  %v2688_v30 = vld [vmem:[%s4076_s1 + $0xe0] ss:$16 sps:$4 sm:$0xff]   ;;  %v2689_v31 = vld [vmem:[%s4076_s1 + $0xe8] ss:$16 sps:$4 sm:$0xff]   ;;  %v2690_v32 = vld [vmem:[%s4076_s1 + $0x104] ss:$16 sps:$4 sm:$0xff]  }
   0xc   :  { %1632 = vmatprep.subr.bf16.mxu0 %v2660_v12  ;;  %1804 = vmatprep.subr.bf16.mxu1 %v2662_v13  ;;  %v2692_v33 = vld [vmem:[%s4076_s1 + $0x10c] ss:$16 sps:$4 sm:$0xff]   ;;  %v2694_v34 = vld [vmem:[%s4076_s1 + $0x100] ss:$16 sps:$4 sm:$0xff]   ;;  %v2695_v35 = vld [vmem:[%s4076_s1 + $0x108] ss:$16 sps:$4 sm:$0xff]  }
   0xd   :  { %v2696_v36 = vld [vmem:[%s4076_s1 + $0x124] ss:$16 sps:$4 sm:$0xff]   ;;  %v2698_v37 = vld [vmem:[%s4076_s1 + $0x12c] ss:$16 sps:$4 sm:$0xff]   ;;  %v2700_v38 = vld [vmem:[%s4076_s1 + $0x120] ss:$16 sps:$4 sm:$0xff]  }
   0xe   :  { %v2701_v39 = vld [vmem:[%s4076_s1 + $0x128] ss:$16 sps:$4 sm:$0xff]   ;;  %v2702_v40 = vld [vmem:[%s4076_s1 + $0x144] ss:$16 sps:$4 sm:$0xff]   ;;  %v2704_v41 = vld [vmem:[%s4076_s1 + $0x14c] ss:$16 sps:$4 sm:$0xff]  }
   0xf   :  { %1633 = vmatpush1.bf16.msra.mxu0 %v2664_v14  ;;  %1805 = vmatpush1.bf16.msra.mxu1 %v2665_v15  ;;  %v2706_v42 = vld [vmem:[%s4076_s1 + $0x140] ss:$16 sps:$4 sm:$0xff]   ;;  %v2707_v43 = vld [vmem:[%s4076_s1 + $0x148] ss:$16 sps:$4 sm:$0xff]   ;;  %v2708_v44 = vld [vmem:[%s4076_s1 + $0x164] ss:$16 sps:$4 sm:$0xff]  }
  0x10   :  { %1634 = vmatprep.subr.bf16.mxu0 %v2666_v16  ;;  %1806 = vmatprep.subr.bf16.mxu1 %v2668_v17  ;;  %v2710_v45 = vld [vmem:[%s4076_s1 + $0x16c] ss:$16 sps:$4 sm:$0xff]   ;;  %v20_v46 = vld [vmem:[%s4077_s0] sm:$0xff]  ;;  %v2713_v49 = vld [vmem:[%s4076_s1 + $0x168] ss:$16 sps:$4 sm:$0xff]  }
  0x11   :  { %v24_v47 = vld [vmem:[%s4077_s0 + $0x20] sm:$0xff]  ;;  %v2716_v52 = vld [vmem:[%s4076_s1 + $0x18c] ss:$16 sps:$4 sm:$0xff]   ;;  %v2719_v54 = vld [vmem:[%s4076_s1 + $0x188] ss:$16 sps:$4 sm:$0xff]  }
  0x12   :  { %v2712_v48 = vld [vmem:[%s4076_s1 + $0x160] ss:$16 sps:$4 sm:$0xff]   ;;  %v2206_v50 = vcombine.high %v20_v46, %v24_v47  ;;  %v2714_v51 = vld [vmem:[%s4076_s1 + $0x184] ss:$16 sps:$4 sm:$0xff]   ;;  %v2722_v56 = vld [vmem:[%s4076_s1 + $0x1ac] ss:$16 sps:$4 sm:$0xff]   ;;  %v2205_v5 = vcombine.low %v20_v46, %v24_v47 }
  0x13   :  { %1635 = vmatpush1.bf16.msra.mxu0 %v2670_v18  ;;  %1807 = vmatpush1.bf16.msra.mxu1 %v2671_v19  ;;  %v2718_v53 = vld [vmem:[%s4076_s1 + $0x180] ss:$16 sps:$4 sm:$0xff]   ;;  %v2720_v55 = vld [vmem:[%s4076_s1 + $0x1a4] ss:$16 sps:$4 sm:$0xff]   ;;  %v2725_v58 = vld [vmem:[%s4076_s1 + $0x1a8] ss:$16 sps:$4 sm:$0xff]  }
  0x14   :  { %1636 = vmatprep.subr.bf16.mxu0 %v2672_v20  ;;  %1808 = vmatprep.subr.bf16.mxu1 %v2674_v21  ;;  %v2724_v57 = vld [vmem:[%s4076_s1 + $0x1a0] ss:$16 sps:$4 sm:$0xff]   ;;  %v2726_v59 = vld [vmem:[%s4076_s1 + $0x1c4] ss:$16 sps:$4 sm:$0xff]   ;;  %v2728_v60 = vld [vmem:[%s4076_s1 + $0x1cc] ss:$16 sps:$4 sm:$0xff]  }
  0x15   :  { %1658 = vmatprep.mubr.bf16.mxu0 %v2206_v50  ;;  %1830 = vmatprep.mubr.bf16.mxu1 %v2206_v50  ;;  %v2730_v61 = vld [vmem:[%s4076_s1 + $0x1c0] ss:$16 sps:$4 sm:$0xff]   ;;  %v2731_v62 = vld [vmem:[%s4076_s1 + $0x1c8] ss:$16 sps:$4 sm:$0xff]   ;;  %v2732_v63 = vld [vmem:[%s4076_s1 + $0x1e4] ss:$16 sps:$4 sm:$0xff]  }
  0x16   :  { %v2734_v0 = vld [vmem:[%s4076_s1 + $0x1ec] ss:$16 sps:$4 sm:$0xff]   ;;  %v2736_v1 = vld [vmem:[%s4076_s1 + $0x1e0] ss:$16 sps:$4 sm:$0xff]   ;;  %v2737_v2 = vld [vmem:[%s4076_s1 + $0x1e8] ss:$16 sps:$4 sm:$0xff]  }
  0x17   :  { %1637 = vmatpush1.bf16.msra.mxu0 %v2676_v22  ;;  %1809 = vmatpush1.bf16.msra.mxu1 %v2677_v23  ;;  %v2740_v3 = vld [vmem:[%s4076_s1 + $0x204] ss:$16 sps:$4 sm:$0xff]   ;;  %v2743_v4 = vld [vmem:[%s4076_s1 + $0x20c] ss:$16 sps:$4 sm:$0xff]   ;;  %v2738_v6 = vld [vmem:[%s4076_s1 + $0x200] ss:$16 sps:$4 sm:$0xff]  }
  0x18   :  { %1638 = vmatprep.subr.bf16.mxu0 %v2678_v24  ;;  %1810 = vmatprep.subr.bf16.mxu1 %v2680_v25  ;;  %v2741_v7 = vld [vmem:[%s4076_s1 + $0x208] ss:$16 sps:$4 sm:$0xff]   ;;  %v2746_v8 = vld [vmem:[%s4076_s1 + $0x224] ss:$16 sps:$4 sm:$0xff]   ;;  %v2749_v9 = vld [vmem:[%s4076_s1 + $0x22c] ss:$16 sps:$4 sm:$0xff]  }
  0x19   :  { %v2744_v10 = vld [vmem:[%s4076_s1 + $0x220] ss:$16 sps:$4 sm:$0xff]   ;;  %v2747_v11 = vld [vmem:[%s4076_s1 + $0x228] ss:$16 sps:$4 sm:$0xff]   ;;  %v2752_v12 = vld [vmem:[%s4076_s1 + $0x244] ss:$16 sps:$4 sm:$0xff]  }
  0x1a   :  { %v2755_v13 = vld [vmem:[%s4076_s1 + $0x24c] ss:$16 sps:$4 sm:$0xff]   ;;  %v2750_v14 = vld [vmem:[%s4076_s1 + $0x240] ss:$16 sps:$4 sm:$0xff]   ;;  %v2753_v15 = vld [vmem:[%s4076_s1 + $0x248] ss:$16 sps:$4 sm:$0xff]  }
  0x1b   :  { %1639 = vmatpush1.bf16.msra.mxu0 %v2682_v26  ;;  %1811 = vmatpush1.bf16.msra.mxu1 %v2683_v27  ;;  %v2758_v16 = vld [vmem:[%s4076_s1 + $0x264] ss:$16 sps:$4 sm:$0xff]   ;;  %v2761_v17 = vld [vmem:[%s4076_s1 + $0x26c] ss:$16 sps:$4 sm:$0xff]   ;;  %v2756_v18 = vld [vmem:[%s4076_s1 + $0x260] ss:$16 sps:$4 sm:$0xff]  }
  0x1c   :  { %1640 = vmatprep.subr.bf16.mxu0 %v2684_v28  ;;  %1812 = vmatprep.subr.bf16.mxu1 %v2686_v29  ;;  %v2759_v19 = vld [vmem:[%s4076_s1 + $0x268] ss:$16 sps:$4 sm:$0xff]   ;;  %v2764_v20 = vld [vmem:[%s4076_s1 + $0x284] ss:$16 sps:$4 sm:$0xff]   ;;  %v2767_v21 = vld [vmem:[%s4076_s1 + $0x28c] ss:$16 sps:$4 sm:$0xff]  }
  0x1d   :  { %v2762_v22 = vld [vmem:[%s4076_s1 + $0x280] ss:$16 sps:$4 sm:$0xff]   ;;  %v2765_v23 = vld [vmem:[%s4076_s1 + $0x288] ss:$16 sps:$4 sm:$0xff]   ;;  %v2770_v24 = vld [vmem:[%s4076_s1 + $0x2a4] ss:$16 sps:$4 sm:$0xff]  }
  0x1e   :  { %v2773_v25 = vld [vmem:[%s4076_s1 + $0x2ac] ss:$16 sps:$4 sm:$0xff]   ;;  %v2768_v26 = vld [vmem:[%s4076_s1 + $0x2a0] ss:$16 sps:$4 sm:$0xff]   ;;  %v2771_v27 = vld [vmem:[%s4076_s1 + $0x2a8] ss:$16 sps:$4 sm:$0xff]  }
  0x1f   :  { %1641 = vmatpush1.bf16.msra.mxu0 %v2688_v30  ;;  %1813 = vmatpush1.bf16.msra.mxu1 %v2689_v31  ;;  %v2776_v28 = vld [vmem:[%s4076_s1 + $0x2c4] ss:$16 sps:$4 sm:$0xff]   ;;  %v2779_v29 = vld [vmem:[%s4076_s1 + $0x2cc] ss:$16 sps:$4 sm:$0xff]   ;;  %v2795_v46 = vld [vmem:[%s4076_s1 + $0x328] ss:$16 sps:$4 sm:$0xff]  }
  0x20   :  { %1642 = vmatprep.subr.bf16.mxu0 %v2690_v32  ;;  %1814 = vmatprep.subr.bf16.mxu1 %v2692_v33  ;;  %v3335_v30 = vld [vmem:[%s4077_s0 + $0x8] sm:$0xff]  ;;  %v2774_v32 = vld [vmem:[%s4076_s1 + $0x2c0] ss:$16 sps:$4 sm:$0xff]   ;;  %v2800_v47 = vld [vmem:[%s4076_s1 + $0x344] ss:$16 sps:$4 sm:$0xff]  }
  0x21   :  { %v3340_v31 = vld [vmem:[%s4077_s0 + $0x28] sm:$0xff] }
  0x22   :  { %v2777_v33 = vld [vmem:[%s4076_s1 + $0x2c8] ss:$16 sps:$4 sm:$0xff]  }
  0x23   :  { %1643 = vmatpush1.bf16.msra.mxu0 %v2694_v34  ;;  %1815 = vmatpush1.bf16.msra.mxu1 %v2695_v35  ;;  %v2208_v34 = vcombine.high %v3335_v30, %v3340_v31  ;;  %v2782_v35 = vld [vmem:[%s4076_s1 + $0x2e4] ss:$16 sps:$4 sm:$0xff]   ;;  %v2801_v50 = vld [vmem:[%s4076_s1 + $0x348] ss:$16 sps:$4 sm:$0xff]  }
  0x24   :  { %1644 = vmatprep.subr.bf16.mxu0 %v2696_v36  ;;  %1816 = vmatprep.subr.bf16.mxu1 %v2698_v37  ;;  %v2785_v36 = vld [vmem:[%s4076_s1 + $0x2ec] ss:$16 sps:$4 sm:$0xff]   ;;  %v2780_v37 = vld [vmem:[%s4076_s1 + $0x2e0] ss:$16 sps:$4 sm:$0xff]  }
  0x27   :  { %1645 = vmatpush1.bf16.msra.mxu0 %v2700_v38  ;;  %1817 = vmatpush1.bf16.msra.mxu1 %v2701_v39  ;;  %v2783_v38 = vld [vmem:[%s4076_s1 + $0x2e8] ss:$16 sps:$4 sm:$0xff]   ;;  %v2788_v39 = vld [vmem:[%s4076_s1 + $0x304] ss:$16 sps:$4 sm:$0xff]  }
  0x28   :  { %1646 = vmatprep.subr.bf16.mxu0 %v2702_v40  ;;  %1818 = vmatprep.subr.bf16.mxu1 %v2704_v41  ;;  %v2791_v40 = vld [vmem:[%s4076_s1 + $0x30c] ss:$16 sps:$4 sm:$0xff]   ;;  %v2786_v41 = vld [vmem:[%s4076_s1 + $0x300] ss:$16 sps:$4 sm:$0xff]  }
  0x2b   :  { %1647 = vmatpush1.bf16.msra.mxu0 %v2706_v42  ;;  %1819 = vmatpush1.bf16.msra.mxu1 %v2707_v43  ;;  %v2789_v42 = vld [vmem:[%s4076_s1 + $0x308] ss:$16 sps:$4 sm:$0xff]   ;;  %v2794_v43 = vld [vmem:[%s4076_s1 + $0x324] ss:$16 sps:$4 sm:$0xff]  }
  0x2c   :  { %1648 = vmatprep.subr.bf16.mxu0 %v2708_v44  ;;  %1820 = vmatprep.subr.bf16.mxu1 %v2710_v45  ;;  %v2797_v44 = vld [vmem:[%s4076_s1 + $0x32c] ss:$16 sps:$4 sm:$0xff]   ;;  %v2792_v45 = vld [vmem:[%s4076_s1 + $0x320] ss:$16 sps:$4 sm:$0xff]  }
  0x2f   :  { %1649 = vmatpush1.bf16.msra.mxu0 %v2712_v48  ;;  %1821 = vmatpush1.bf16.msra.mxu1 %v2713_v49  ;;  %v2803_v48 = vld [vmem:[%s4076_s1 + $0x34c] ss:$16 sps:$4 sm:$0xff]   ;;  %v2798_v49 = vld [vmem:[%s4076_s1 + $0x340] ss:$16 sps:$4 sm:$0xff]  }
  0x30   :  { %1650 = vmatprep.subr.bf16.mxu0 %v2714_v51  ;;  %1822 = vmatprep.subr.bf16.mxu1 %v2716_v52  ;;  %v2806_v51 = vld [vmem:[%s4076_s1 + $0x364] ss:$16 sps:$4 sm:$0xff]   ;;  %v2809_v52 = vld [vmem:[%s4076_s1 + $0x36c] ss:$16 sps:$4 sm:$0xff]  }
  0x33   :  { %1651 = vmatpush1.bf16.msra.mxu0 %v2718_v53  ;;  %1823 = vmatpush1.bf16.msra.mxu1 %v2719_v54  ;;  %v2804_v53 = vld [vmem:[%s4076_s1 + $0x360] ss:$16 sps:$4 sm:$0xff]   ;;  %v2807_v54 = vld [vmem:[%s4076_s1 + $0x368] ss:$16 sps:$4 sm:$0xff]  }
  0x34   :  { %1652 = vmatprep.subr.bf16.mxu0 %v2720_v55  ;;  %1824 = vmatprep.subr.bf16.mxu1 %v2722_v56  ;;  %v2812_v55 = vld [vmem:[%s4076_s1 + $0x384] ss:$16 sps:$4 sm:$0xff]   ;;  %v2815_v56 = vld [vmem:[%s4076_s1 + $0x38c] ss:$16 sps:$4 sm:$0xff]  }
  0x37   :  { %1653 = vmatpush1.bf16.msra.mxu0 %v2724_v57  ;;  %1825 = vmatpush1.bf16.msra.mxu1 %v2725_v58  ;;  %v2810_v57 = vld [vmem:[%s4076_s1 + $0x380] ss:$16 sps:$4 sm:$0xff]   ;;  %v2813_v58 = vld [vmem:[%s4076_s1 + $0x388] ss:$16 sps:$4 sm:$0xff]  }
  0x38   :  { %1654 = vmatprep.subr.bf16.mxu0 %v2726_v59  ;;  %1826 = vmatprep.subr.bf16.mxu1 %v2728_v60  ;;  %v2818_v59 = vld [vmem:[%s4076_s1 + $0x3a4] ss:$16 sps:$4 sm:$0xff]   ;;  %v2821_v60 = vld [vmem:[%s4076_s1 + $0x3ac] ss:$16 sps:$4 sm:$0xff]  }
  0x3b   :  { %1655 = vmatpush1.bf16.msra.mxu0 %v2730_v61  ;;  %1827 = vmatpush1.bf16.msra.mxu1 %v2731_v62  ;;  %v2816_v61 = vld [vmem:[%s4076_s1 + $0x3a0] ss:$16 sps:$4 sm:$0xff]   ;;  %v2819_v62 = vld [vmem:[%s4076_s1 + $0x3a8] ss:$16 sps:$4 sm:$0xff]  }
  0x3c   :  { %1656 = vmatprep.subr.bf16.mxu0 %v2732_v63  ;;  %1828 = vmatprep.subr.bf16.mxu1 %v2734_v0  ;;  %v2824_v63 = vld [vmem:[%s4076_s1 + $0x3c4] ss:$16 sps:$4 sm:$0xff]   ;;  %v2827_v0 = vld [vmem:[%s4076_s1 + $0x3cc] ss:$16 sps:$4 sm:$0xff]  }
  0x3f   :  { %1657 = vmatpush1.bf16.msra.mxu0 %v2736_v1  ;;  %1829 = vmatpush1.bf16.msra.mxu1 %v2737_v2  ;;  %v2822_v1 = vld [vmem:[%s4076_s1 + $0x3c0] ss:$16 sps:$4 sm:$0xff]   ;;  %v2825_v2 = vld [vmem:[%s4076_s1 + $0x3c8] ss:$16 sps:$4 sm:$0xff]  }
  0x40   :  { %1669 = vmatprep.subr.bf16.mxu0 %v2740_v3  ;;  %1841 = vmatprep.subr.bf16.mxu1 %v2743_v4  ;;  %v2830_v3 = vld [vmem:[%s4076_s1 + $0x3e4] ss:$16 sps:$4 sm:$0xff]   ;;  %v2833_v4 = vld [vmem:[%s4076_s1 + $0x3ec] ss:$16 sps:$4 sm:$0xff]  }
  0x42   :  { %1659 = vmatmul.mubr.bf16.vlgmr.msra.gmra.mrb[0].mxu0 %v2205_v5  ;;  %1831 = vmatmul.mubr.bf16.vlgmr.msra.gmra.mrb[0].mxu1 %v2205_v5  ;;  %v2828_v5 = vld [vmem:[%s4076_s1 + $0x3e0] ss:$16 sps:$4 sm:$0xff]  }
  0x43   :  { %1670 = vmatpush1.bf16.msra.mxu0 %v2738_v6  ;;  %1842 = vmatpush1.bf16.msra.mxu1 %v2741_v7  ;;  %v2831_v6 = vld [vmem:[%s4076_s1 + $0x3e8] ss:$16 sps:$4 sm:$0xff]   ;;  %v2836_v7 = vld [vmem:[%s4076_s1 + $0x404] ss:$16 sps:$4 sm:$0xff]  }
  0x44   :  { %1671 = vmatprep.subr.bf16.mxu0 %v2746_v8  ;;  %1843 = vmatprep.subr.bf16.mxu1 %v2749_v9  ;;  %v2839_v8 = vld [vmem:[%s4076_s1 + $0x40c] ss:$16 sps:$4 sm:$0xff]   ;;  %v2207_v9 = vcombine.low %v3335_v30, %v3340_v31  ;;  %v2861_v30 = vld [vmem:[%s4076_s1 + $0x488] ss:$16 sps:$4 sm:$0xff]   ;;  %v2866_v31 = vld [vmem:[%s4076_s1 + $0x4a4] ss:$16 sps:$4 sm:$0xff]  }
  0x45   :  { %1701 = vmatprep.mubr.bf16.mxu0 %v2208_v34  ;;  %1873 = vmatprep.mubr.bf16.mxu1 %v2208_v34  ;;  %v2867_v34 = vld [vmem:[%s4076_s1 + $0x4a8] ss:$16 sps:$4 sm:$0xff]  }
  0x47   :  { %1672 = vmatpush1.bf16.msra.mxu0 %v2744_v10  ;;  %1844 = vmatpush1.bf16.msra.mxu1 %v2747_v11  ;;  %v2834_v10 = vld [vmem:[%s4076_s1 + $0x400] ss:$16 sps:$4 sm:$0xff]   ;;  %v2837_v11 = vld [vmem:[%s4076_s1 + $0x408] ss:$16 sps:$4 sm:$0xff]  }
  0x48   :  { %1673 = vmatprep.subr.bf16.mxu0 %v2752_v12  ;;  %1845 = vmatprep.subr.bf16.mxu1 %v2755_v13  ;;  %v2842_v12 = vld [vmem:[%s4076_s1 + $0x424] ss:$16 sps:$4 sm:$0xff]   ;;  %v2845_v13 = vld [vmem:[%s4076_s1 + $0x42c] ss:$16 sps:$4 sm:$0xff]  }
  0x4b   :  { %1674 = vmatpush1.bf16.msra.mxu0 %v2750_v14  ;;  %1846 = vmatpush1.bf16.msra.mxu1 %v2753_v15  ;;  %v3481_v14 = vld [vmem:[%s4077_s0 + $0x10] sm:$0xff] }
  0x4c   :  { %1675 = vmatprep.subr.bf16.mxu0 %v2758_v16  ;;  %1847 = vmatprep.subr.bf16.mxu1 %v2761_v17  ;;  %v3486_v15 = vld [vmem:[%s4077_s0 + $0x30] sm:$0xff] }
  0x4d   :  { %v2210_v16 = vcombine.high %v3481_v14, %v3486_v15  ;;  %v2840_v17 = vld [vmem:[%s4076_s1 + $0x420] ss:$16 sps:$4 sm:$0xff]  }
  0x4f   :  { %1676 = vmatpush1.bf16.msra.mxu0 %v2756_v18  ;;  %1848 = vmatpush1.bf16.msra.mxu1 %v2759_v19  ;;  %v2843_v18 = vld [vmem:[%s4076_s1 + $0x428] ss:$16 sps:$4 sm:$0xff]   ;;  %v2848_v19 = vld [vmem:[%s4076_s1 + $0x444] ss:$16 sps:$4 sm:$0xff]  }
  0x50   :  { %1677 = vmatprep.subr.bf16.mxu0 %v2764_v20  ;;  %1849 = vmatprep.subr.bf16.mxu1 %v2767_v21  ;;  %v2851_v20 = vld [vmem:[%s4076_s1 + $0x44c] ss:$16 sps:$4 sm:$0xff]   ;;  %v2846_v21 = vld [vmem:[%s4076_s1 + $0x440] ss:$16 sps:$4 sm:$0xff]  }
  0x53   :  { %1678 = vmatpush1.bf16.msra.mxu0 %v2762_v22  ;;  %1850 = vmatpush1.bf16.msra.mxu1 %v2765_v23  ;;  %v2849_v22 = vld [vmem:[%s4076_s1 + $0x448] ss:$16 sps:$4 sm:$0xff]   ;;  %v2854_v23 = vld [vmem:[%s4076_s1 + $0x464] ss:$16 sps:$4 sm:$0xff]  }
  0x54   :  { %1679 = vmatprep.subr.bf16.mxu0 %v2770_v24  ;;  %1851 = vmatprep.subr.bf16.mxu1 %v2773_v25  ;;  %v2857_v24 = vld [vmem:[%s4076_s1 + $0x46c] ss:$16 sps:$4 sm:$0xff]   ;;  %v2852_v25 = vld [vmem:[%s4076_s1 + $0x460] ss:$16 sps:$4 sm:$0xff]  }
  0x57   :  { %1680 = vmatpush1.bf16.msra.mxu0 %v2768_v26  ;;  %1852 = vmatpush1.bf16.msra.mxu1 %v2771_v27  ;;  %v2855_v26 = vld [vmem:[%s4076_s1 + $0x468] ss:$16 sps:$4 sm:$0xff]   ;;  %v2860_v27 = vld [vmem:[%s4076_s1 + $0x484] ss:$16 sps:$4 sm:$0xff]  }
  0x58   :  { %1681 = vmatprep.subr.bf16.mxu0 %v2776_v28  ;;  %1853 = vmatprep.subr.bf16.mxu1 %v2779_v29  ;;  %v2863_v28 = vld [vmem:[%s4076_s1 + $0x48c] ss:$16 sps:$4 sm:$0xff]   ;;  %v2858_v29 = vld [vmem:[%s4076_s1 + $0x480] ss:$16 sps:$4 sm:$0xff]  }
  0x5b   :  { %1682 = vmatpush1.bf16.msra.mxu0 %v2774_v32  ;;  %1854 = vmatpush1.bf16.msra.mxu1 %v2777_v33  ;;  %v2869_v32 = vld [vmem:[%s4076_s1 + $0x4ac] ss:$16 sps:$4 sm:$0xff]   ;;  %v2864_v33 = vld [vmem:[%s4076_s1 + $0x4a0] ss:$16 sps:$4 sm:$0xff]  }
  0x5c   :  { %1683 = vmatprep.subr.bf16.mxu0 %v2782_v35  ;;  %1855 = vmatprep.subr.bf16.mxu1 %v2785_v36  ;;  %v2872_v35 = vld [vmem:[%s4076_s1 + $0x4c4] ss:$16 sps:$4 sm:$0xff]   ;;  %v2875_v36 = vld [vmem:[%s4076_s1 + $0x4cc] ss:$16 sps:$4 sm:$0xff]  }
  0x5f   :  { %1684 = vmatpush1.bf16.msra.mxu0 %v2780_v37  ;;  %1856 = vmatpush1.bf16.msra.mxu1 %v2783_v38  ;;  %v2870_v37 = vld [vmem:[%s4076_s1 + $0x4c0] ss:$16 sps:$4 sm:$0xff]   ;;  %v2873_v38 = vld [vmem:[%s4076_s1 + $0x4c8] ss:$16 sps:$4 sm:$0xff]  }
  0x60   :  { %1685 = vmatprep.subr.bf16.mxu0 %v2788_v39  ;;  %1857 = vmatprep.subr.bf16.mxu1 %v2791_v40  ;;  %v2878_v39 = vld [vmem:[%s4076_s1 + $0x4e4] ss:$16 sps:$4 sm:$0xff]   ;;  %v2881_v40 = vld [vmem:[%s4076_s1 + $0x4ec] ss:$16 sps:$4 sm:$0xff]  }
  0x63   :  { %1686 = vmatpush1.bf16.msra.mxu0 %v2786_v41  ;;  %1858 = vmatpush1.bf16.msra.mxu1 %v2789_v42  ;;  %v2876_v41 = vld [vmem:[%s4076_s1 + $0x4e0] ss:$16 sps:$4 sm:$0xff]   ;;  %v2879_v42 = vld [vmem:[%s4076_s1 + $0x4e8] ss:$16 sps:$4 sm:$0xff]  }
  0x64   :  { %1687 = vmatprep.subr.bf16.mxu0 %v2794_v43  ;;  %1859 = vmatprep.subr.bf16.mxu1 %v2797_v44  ;;  %v2884_v43 = vld [vmem:[%s4076_s1 + $0x504] ss:$16 sps:$4 sm:$0xff]   ;;  %v2887_v44 = vld [vmem:[%s4076_s1 + $0x50c] ss:$16 sps:$4 sm:$0xff]  }
  0x67   :  { %1688 = vmatpush1.bf16.msra.mxu0 %v2792_v45  ;;  %1860 = vmatpush1.bf16.msra.mxu1 %v2795_v46  ;;  %v2882_v45 = vld [vmem:[%s4076_s1 + $0x500] ss:$16 sps:$4 sm:$0xff]   ;;  %v2885_v46 = vld [vmem:[%s4076_s1 + $0x508] ss:$16 sps:$4 sm:$0xff]  }
  0x68   :  { %1689 = vmatprep.subr.bf16.mxu0 %v2800_v47  ;;  %1861 = vmatprep.subr.bf16.mxu1 %v2803_v48  ;;  %v2890_v47 = vld [vmem:[%s4076_s1 + $0x524] ss:$16 sps:$4 sm:$0xff]   ;;  %v2893_v48 = vld [vmem:[%s4076_s1 + $0x52c] ss:$16 sps:$4 sm:$0xff]  }
  0x6b   :  { %1690 = vmatpush1.bf16.msra.mxu0 %v2798_v49  ;;  %1862 = vmatpush1.bf16.msra.mxu1 %v2801_v50  ;;  %v2888_v49 = vld [vmem:[%s4076_s1 + $0x520] ss:$16 sps:$4 sm:$0xff]   ;;  %v2891_v50 = vld [vmem:[%s4076_s1 + $0x528] ss:$16 sps:$4 sm:$0xff]  }
  0x6c   :  { %1691 = vmatprep.subr.bf16.mxu0 %v2806_v51  ;;  %1863 = vmatprep.subr.bf16.mxu1 %v2809_v52  ;;  %v2896_v51 = vld [vmem:[%s4076_s1 + $0x544] ss:$16 sps:$4 sm:$0xff]   ;;  %v2899_v52 = vld [vmem:[%s4076_s1 + $0x54c] ss:$16 sps:$4 sm:$0xff]  }
  0x6f   :  { %1692 = vmatpush1.bf16.msra.mxu0 %v2804_v53  ;;  %1864 = vmatpush1.bf16.msra.mxu1 %v2807_v54  ;;  %v2894_v53 = vld [vmem:[%s4076_s1 + $0x540] ss:$16 sps:$4 sm:$0xff]   ;;  %v2897_v54 = vld [vmem:[%s4076_s1 + $0x548] ss:$16 sps:$4 sm:$0xff]  }
  0x70   :  { %1693 = vmatprep.subr.bf16.mxu0 %v2812_v55  ;;  %1865 = vmatprep.subr.bf16.mxu1 %v2815_v56  ;;  %v2902_v55 = vld [vmem:[%s4076_s1 + $0x564] ss:$16 sps:$4 sm:$0xff]   ;;  %v2905_v56 = vld [vmem:[%s4076_s1 + $0x56c] ss:$16 sps:$4 sm:$0xff]  }
  0x73   :  { %1694 = vmatpush1.bf16.msra.mxu0 %v2810_v57  ;;  %1866 = vmatpush1.bf16.msra.mxu1 %v2813_v58  ;;  %v2900_v57 = vld [vmem:[%s4076_s1 + $0x560] ss:$16 sps:$4 sm:$0xff]   ;;  %v2903_v58 = vld [vmem:[%s4076_s1 + $0x568] ss:$16 sps:$4 sm:$0xff]  }
  0x74   :  { %1695 = vmatprep.subr.bf16.mxu0 %v2818_v59  ;;  %1867 = vmatprep.subr.bf16.mxu1 %v2821_v60  ;;  %v2908_v59 = vld [vmem:[%s4076_s1 + $0x584] ss:$16 sps:$4 sm:$0xff]   ;;  %v2911_v60 = vld [vmem:[%s4076_s1 + $0x58c] ss:$16 sps:$4 sm:$0xff]  }
  0x77   :  { %1696 = vmatpush1.bf16.msra.mxu0 %v2816_v61  ;;  %1868 = vmatpush1.bf16.msra.mxu1 %v2819_v62  ;;  %v2906_v61 = vld [vmem:[%s4076_s1 + $0x580] ss:$16 sps:$4 sm:$0xff]   ;;  %v2909_v62 = vld [vmem:[%s4076_s1 + $0x588] ss:$16 sps:$4 sm:$0xff]  }
  0x78   :  { %1697 = vmatprep.subr.bf16.mxu0 %v2824_v63  ;;  %1869 = vmatprep.subr.bf16.mxu1 %v2827_v0  ;;  %v2914_v63 = vld [vmem:[%s4076_s1 + $0x5a4] ss:$16 sps:$4 sm:$0xff]   ;;  %v2917_v0 = vld [vmem:[%s4076_s1 + $0x5ac] ss:$16 sps:$4 sm:$0xff]  }
  0x7b   :  { %1698 = vmatpush1.bf16.msra.mxu0 %v2822_v1  ;;  %1870 = vmatpush1.bf16.msra.mxu1 %v2825_v2  ;;  %v2912_v1 = vld [vmem:[%s4076_s1 + $0x5a0] ss:$16 sps:$4 sm:$0xff]   ;;  %v2915_v2 = vld [vmem:[%s4076_s1 + $0x5a8] ss:$16 sps:$4 sm:$0xff]  }
  0x7c   :  { %1699 = vmatprep.subr.bf16.mxu0 %v2830_v3  ;;  %1871 = vmatprep.subr.bf16.mxu1 %v2833_v4  ;;  %v2920_v3 = vld [vmem:[%s4076_s1 + $0x5c4] ss:$16 sps:$4 sm:$0xff]   ;;  %v2923_v4 = vld [vmem:[%s4076_s1 + $0x5cc] ss:$16 sps:$4 sm:$0xff]  }
  0x7f   :  { %1700 = vmatpush1.bf16.msra.mxu0 %v2828_v5  ;;  %1872 = vmatpush1.bf16.msra.mxu1 %v2831_v6  ;;  %v2918_v5 = vld [vmem:[%s4076_s1 + $0x5c0] ss:$16 sps:$4 sm:$0xff]   ;;  %v2921_v6 = vld [vmem:[%s4076_s1 + $0x5c8] ss:$16 sps:$4 sm:$0xff]  }
  0x80   :  { %1712 = vmatprep.subr.bf16.mxu0 %v2836_v7  ;;  %1884 = vmatprep.subr.bf16.mxu1 %v2839_v8  ;;  %v2926_v7 = vld [vmem:[%s4076_s1 + $0x5e4] ss:$16 sps:$4 sm:$0xff]   ;;  %v2929_v8 = vld [vmem:[%s4076_s1 + $0x5ec] ss:$16 sps:$4 sm:$0xff]  }
  0x82   :  { %1702 = vmatmul.mubr.bf16.vlgmr.msra.gmra.mrb[0].mxu0 %v2207_v9  ;;  %1874 = vmatmul.mubr.bf16.vlgmr.msra.gmra.mrb[0].mxu1 %v2207_v9  ;;  %v2924_v9 = vld [vmem:[%s4076_s1 + $0x5e0] ss:$16 sps:$4 sm:$0xff]  }
  0x83   :  { %1713 = vmatpush1.bf16.msra.mxu0 %v2834_v10  ;;  %1885 = vmatpush1.bf16.msra.mxu1 %v2837_v11  ;;  %v2927_v10 = vld [vmem:[%s4076_s1 + $0x5e8] ss:$16 sps:$4 sm:$0xff]   ;;  %v2932_v11 = vld [vmem:[%s4076_s1 + $0x604] ss:$16 sps:$4 sm:$0xff]  }
  0x84   :  { %1714 = vmatprep.subr.bf16.mxu0 %v2842_v12  ;;  %1886 = vmatprep.subr.bf16.mxu1 %v2845_v13  ;;  %v2935_v12 = vld [vmem:[%s4076_s1 + $0x60c] ss:$16 sps:$4 sm:$0xff]   ;;  %v2209_v13 = vcombine.low %v3481_v14, %v3486_v15  ;;  %v2933_v14 = vld [vmem:[%s4076_s1 + $0x608] ss:$16 sps:$4 sm:$0xff]   ;;  %v2938_v15 = vld [vmem:[%s4076_s1 + $0x624] ss:$16 sps:$4 sm:$0xff]  }
  0x85   :  { %1744 = vmatprep.mubr.bf16.mxu0 %v2210_v16  ;;  %1916 = vmatprep.mubr.bf16.mxu1 %v2210_v16  ;;  %v3675_v16 = vld [vmem:[%s4077_s0 + $0x18] sm:$0xff] }
  0x87   :  { %1715 = vmatpush1.bf16.msra.mxu0 %v2840_v17  ;;  %1887 = vmatpush1.bf16.msra.mxu1 %v2843_v18  ;;  %v3680_v17 = vld [vmem:[%s4077_s0 + $0x38] sm:$0xff]  ;;  %v2930_v18 = vld [vmem:[%s4076_s1 + $0x600] ss:$16 sps:$4 sm:$0xff]  }
  0x88   :  { %1716 = vmatprep.subr.bf16.mxu0 %v2848_v19  ;;  %1888 = vmatprep.subr.bf16.mxu1 %v2851_v20  ;;  %v2941_v19 = vld [vmem:[%s4076_s1 + $0x62c] ss:$16 sps:$4 sm:$0xff]   ;;  %v2212_v20 = vcombine.high %v3675_v16, %v3680_v17 }
  0x8b   :  { %1717 = vmatpush1.bf16.msra.mxu0 %v2846_v21  ;;  %1889 = vmatpush1.bf16.msra.mxu1 %v2849_v22  ;;  %v2936_v21 = vld [vmem:[%s4076_s1 + $0x620] ss:$16 sps:$4 sm:$0xff]   ;;  %v2939_v22 = vld [vmem:[%s4076_s1 + $0x628] ss:$16 sps:$4 sm:$0xff]  }
  0x8c   :  { %1718 = vmatprep.subr.bf16.mxu0 %v2854_v23  ;;  %1890 = vmatprep.subr.bf16.mxu1 %v2857_v24  ;;  %v2944_v23 = vld [vmem:[%s4076_s1 + $0x644] ss:$16 sps:$4 sm:$0xff]   ;;  %v2947_v24 = vld [vmem:[%s4076_s1 + $0x64c] ss:$16 sps:$4 sm:$0xff]  }
  0x8f   :  { %1719 = vmatpush1.bf16.msra.mxu0 %v2852_v25  ;;  %1891 = vmatpush1.bf16.msra.mxu1 %v2855_v26  ;;  %v2942_v25 = vld [vmem:[%s4076_s1 + $0x640] ss:$16 sps:$4 sm:$0xff]   ;;  %v2945_v26 = vld [vmem:[%s4076_s1 + $0x648] ss:$16 sps:$4 sm:$0xff]  }
  0x90   :  { %1720 = vmatprep.subr.bf16.mxu0 %v2860_v27  ;;  %1892 = vmatprep.subr.bf16.mxu1 %v2863_v28  ;;  %v2950_v27 = vld [vmem:[%s4076_s1 + $0x664] ss:$16 sps:$4 sm:$0xff]   ;;  %v2953_v28 = vld [vmem:[%s4076_s1 + $0x66c] ss:$16 sps:$4 sm:$0xff]  }
  0x93   :  { %1721 = vmatpush1.bf16.msra.mxu0 %v2858_v29  ;;  %1893 = vmatpush1.bf16.msra.mxu1 %v2861_v30  ;;  %v2948_v29 = vld [vmem:[%s4076_s1 + $0x660] ss:$16 sps:$4 sm:$0xff]   ;;  %v2951_v30 = vld [vmem:[%s4076_s1 + $0x668] ss:$16 sps:$4 sm:$0xff]  }
  0x94   :  { %1722 = vmatprep.subr.bf16.mxu0 %v2866_v31  ;;  %1894 = vmatprep.subr.bf16.mxu1 %v2869_v32  ;;  %v2956_v31 = vld [vmem:[%s4076_s1 + $0x684] ss:$16 sps:$4 sm:$0xff]   ;;  %v2959_v32 = vld [vmem:[%s4076_s1 + $0x68c] ss:$16 sps:$4 sm:$0xff]  }
  0x97   :  { %1723 = vmatpush1.bf16.msra.mxu0 %v2864_v33  ;;  %1895 = vmatpush1.bf16.msra.mxu1 %v2867_v34  ;;  %v2954_v33 = vld [vmem:[%s4076_s1 + $0x680] ss:$16 sps:$4 sm:$0xff]   ;;  %v2957_v34 = vld [vmem:[%s4076_s1 + $0x688] ss:$16 sps:$4 sm:$0xff]  }
  0x98   :  { %1724 = vmatprep.subr.bf16.mxu0 %v2872_v35  ;;  %1896 = vmatprep.subr.bf16.mxu1 %v2875_v36  ;;  %v2962_v35 = vld [vmem:[%s4076_s1 + $0x6a4] ss:$16 sps:$4 sm:$0xff]   ;;  %v2965_v36 = vld [vmem:[%s4076_s1 + $0x6ac] ss:$16 sps:$4 sm:$0xff]  }
  0x9b   :  { %1725 = vmatpush1.bf16.msra.mxu0 %v2870_v37  ;;  %1897 = vmatpush1.bf16.msra.mxu1 %v2873_v38  ;;  %v2960_v37 = vld [vmem:[%s4076_s1 + $0x6a0] ss:$16 sps:$4 sm:$0xff]   ;;  %v2963_v38 = vld [vmem:[%s4076_s1 + $0x6a8] ss:$16 sps:$4 sm:$0xff]  }
  0x9c   :  { %1726 = vmatprep.subr.bf16.mxu0 %v2878_v39  ;;  %1898 = vmatprep.subr.bf16.mxu1 %v2881_v40  ;;  %v2968_v39 = vld [vmem:[%s4076_s1 + $0x6c4] ss:$16 sps:$4 sm:$0xff]   ;;  %v2971_v40 = vld [vmem:[%s4076_s1 + $0x6cc] ss:$16 sps:$4 sm:$0xff]  }
  0x9f   :  { %1727 = vmatpush1.bf16.msra.mxu0 %v2876_v41  ;;  %1899 = vmatpush1.bf16.msra.mxu1 %v2879_v42  ;;  %v2966_v41 = vld [vmem:[%s4076_s1 + $0x6c0] ss:$16 sps:$4 sm:$0xff]   ;;  %v2969_v42 = vld [vmem:[%s4076_s1 + $0x6c8] ss:$16 sps:$4 sm:$0xff]  }
  0xa0   :  { %1728 = vmatprep.subr.bf16.mxu0 %v2884_v43  ;;  %1900 = vmatprep.subr.bf16.mxu1 %v2887_v44  ;;  %v2974_v43 = vld [vmem:[%s4076_s1 + $0x6e4] ss:$16 sps:$4 sm:$0xff]   ;;  %v2977_v44 = vld [vmem:[%s4076_s1 + $0x6ec] ss:$16 sps:$4 sm:$0xff]  }
  0xa3   :  { %1729 = vmatpush1.bf16.msra.mxu0 %v2882_v45  ;;  %1901 = vmatpush1.bf16.msra.mxu1 %v2885_v46  ;;  %v2972_v45 = vld [vmem:[%s4076_s1 + $0x6e0] ss:$16 sps:$4 sm:$0xff]   ;;  %v2975_v46 = vld [vmem:[%s4076_s1 + $0x6e8] ss:$16 sps:$4 sm:$0xff]  }
  0xa4   :  { %1730 = vmatprep.subr.bf16.mxu0 %v2890_v47  ;;  %1902 = vmatprep.subr.bf16.mxu1 %v2893_v48  ;;  %v2980_v47 = vld [vmem:[%s4076_s1 + $0x704] ss:$16 sps:$4 sm:$0xff]   ;;  %v2983_v48 = vld [vmem:[%s4076_s1 + $0x70c] ss:$16 sps:$4 sm:$0xff]  }
  0xa7   :  { %1731 = vmatpush1.bf16.msra.mxu0 %v2888_v49  ;;  %1903 = vmatpush1.bf16.msra.mxu1 %v2891_v50  ;;  %v2978_v49 = vld [vmem:[%s4076_s1 + $0x700] ss:$16 sps:$4 sm:$0xff]   ;;  %v2981_v50 = vld [vmem:[%s4076_s1 + $0x708] ss:$16 sps:$4 sm:$0xff]  }
  0xa8   :  { %1732 = vmatprep.subr.bf16.mxu0 %v2896_v51  ;;  %1904 = vmatprep.subr.bf16.mxu1 %v2899_v52  ;;  %v2986_v51 = vld [vmem:[%s4076_s1 + $0x724] ss:$16 sps:$4 sm:$0xff]   ;;  %v2989_v52 = vld [vmem:[%s4076_s1 + $0x72c] ss:$16 sps:$4 sm:$0xff]  }
  0xab   :  { %1733 = vmatpush1.bf16.msra.mxu0 %v2894_v53  ;;  %1905 = vmatpush1.bf16.msra.mxu1 %v2897_v54  ;;  %v2984_v53 = vld [vmem:[%s4076_s1 + $0x720] ss:$16 sps:$4 sm:$0xff]   ;;  %v2987_v54 = vld [vmem:[%s4076_s1 + $0x728] ss:$16 sps:$4 sm:$0xff]  }
  0xac   :  { %1734 = vmatprep.subr.bf16.mxu0 %v2902_v55  ;;  %1906 = vmatprep.subr.bf16.mxu1 %v2905_v56  ;;  %v2992_v55 = vld [vmem:[%s4076_s1 + $0x744] ss:$16 sps:$4 sm:$0xff]   ;;  %v2995_v56 = vld [vmem:[%s4076_s1 + $0x74c] ss:$16 sps:$4 sm:$0xff]  }
  0xaf   :  { %1735 = vmatpush1.bf16.msra.mxu0 %v2900_v57  ;;  %1907 = vmatpush1.bf16.msra.mxu1 %v2903_v58  ;;  %v2990_v57 = vld [vmem:[%s4076_s1 + $0x740] ss:$16 sps:$4 sm:$0xff]   ;;  %v2993_v58 = vld [vmem:[%s4076_s1 + $0x748] ss:$16 sps:$4 sm:$0xff]  }
  0xb0   :  { %1736 = vmatprep.subr.bf16.mxu0 %v2908_v59  ;;  %1908 = vmatprep.subr.bf16.mxu1 %v2911_v60  ;;  %v2998_v59 = vld [vmem:[%s4076_s1 + $0x764] ss:$16 sps:$4 sm:$0xff]   ;;  %v3001_v60 = vld [vmem:[%s4076_s1 + $0x76c] ss:$16 sps:$4 sm:$0xff]  }
  0xb3   :  { %1737 = vmatpush1.bf16.msra.mxu0 %v2906_v61  ;;  %1909 = vmatpush1.bf16.msra.mxu1 %v2909_v62  ;;  %v2996_v61 = vld [vmem:[%s4076_s1 + $0x760] ss:$16 sps:$4 sm:$0xff]   ;;  %v2999_v62 = vld [vmem:[%s4076_s1 + $0x768] ss:$16 sps:$4 sm:$0xff]  }
  0xb4   :  { %1738 = vmatprep.subr.bf16.mxu0 %v2914_v63  ;;  %1910 = vmatprep.subr.bf16.mxu1 %v2917_v0  ;;  %v3004_v63 = vld [vmem:[%s4076_s1 + $0x784] ss:$16 sps:$4 sm:$0xff]   ;;  %v3007_v0 = vld [vmem:[%s4076_s1 + $0x78c] ss:$16 sps:$4 sm:$0xff]  }
  0xb7   :  { %1739 = vmatpush1.bf16.msra.mxu0 %v2912_v1  ;;  %1911 = vmatpush1.bf16.msra.mxu1 %v2915_v2  ;;  %v3002_v1 = vld [vmem:[%s4076_s1 + $0x780] ss:$16 sps:$4 sm:$0xff]   ;;  %v3005_v2 = vld [vmem:[%s4076_s1 + $0x788] ss:$16 sps:$4 sm:$0xff]  }
  0xb8   :  { %1740 = vmatprep.subr.bf16.mxu0 %v2920_v3  ;;  %1912 = vmatprep.subr.bf16.mxu1 %v2923_v4  ;;  %v3010_v3 = vld [vmem:[%s4076_s1 + $0x7a4] ss:$16 sps:$4 sm:$0xff]   ;;  %v3013_v4 = vld [vmem:[%s4076_s1 + $0x7ac] ss:$16 sps:$4 sm:$0xff]  }
  0xbb   :  { %1741 = vmatpush1.bf16.msra.mxu0 %v2918_v5  ;;  %1913 = vmatpush1.bf16.msra.mxu1 %v2921_v6  ;;  %v3008_v5 = vld [vmem:[%s4076_s1 + $0x7a0] ss:$16 sps:$4 sm:$0xff]   ;;  %v3011_v6 = vld [vmem:[%s4076_s1 + $0x7a8] ss:$16 sps:$4 sm:$0xff]  }
  0xbc   :  { %1742 = vmatprep.subr.bf16.mxu0 %v2926_v7  ;;  %1914 = vmatprep.subr.bf16.mxu1 %v2929_v8  ;;  %v3016_v7 = vld [vmem:[%s4076_s1 + $0x7c4] ss:$16 sps:$4 sm:$0xff]   ;;  %v3019_v8 = vld [vmem:[%s4076_s1 + $0x7cc] ss:$16 sps:$4 sm:$0xff]  }
  0xbf   :  { %1743 = vmatpush1.bf16.msra.mxu0 %v2924_v9  ;;  %1915 = vmatpush1.bf16.msra.mxu1 %v2927_v10  ;;  %v3014_v9 = vld [vmem:[%s4076_s1 + $0x7c0] ss:$16 sps:$4 sm:$0xff]   ;;  %v3017_v10 = vld [vmem:[%s4076_s1 + $0x7c8] ss:$16 sps:$4 sm:$0xff]  }
  0xc0   :  { %1755 = vmatprep.subr.bf16.mxu0 %v2932_v11  ;;  %1927 = vmatprep.subr.bf16.mxu1 %v2935_v12  ;;  %v3022_v11 = vld [vmem:[%s4076_s1 + $0x7e4] ss:$16 sps:$4 sm:$0xff]   ;;  %v3025_v12 = vld [vmem:[%s4076_s1 + $0x7ec] ss:$16 sps:$4 sm:$0xff]  }
  0xc2   :  { %1745 = vmatmul.mubr.bf16.vlgmr.msra.gmra.mrb[0].mxu0 %v2209_v13  ;;  %1917 = vmatmul.mubr.bf16.vlgmr.msra.gmra.mrb[0].mxu1 %v2209_v13  ;;  %v1994_v13 = vld [vmem:[%s4078_s3 + $0x80] sm:$0xff] }
  0xc3   :  { %1756 = vmatpush1.bf16.msra.mxu0 %v2930_v18  ;;  %1928 = vmatpush1.bf16.msra.mxu1 %v2933_v14  ;;  %v1995_v18 = vld [vmem:[%s4078_s3 + $0x88] sm:$0xff]  ;;  %v2026_v14 = vld [vmem:[%s4078_s3 + $0x180] sm:$0xff] }
  0xc4   :  { %1757 = vmatprep.subr.bf16.mxu0 %v2938_v15  ;;  %1929 = vmatprep.subr.bf16.mxu1 %v2941_v19  ;;  %v2027_v15 = vld [vmem:[%s4078_s3 + $0x188] sm:$0xff]  ;;  %v3020_v19 = vld [vmem:[%s4076_s1 + $0x7e0] ss:$16 sps:$4 sm:$0xff]  }
  0xc5   :  { %1787 = vmatprep.mubr.bf16.mxu0 %v2212_v20  ;;  %1959 = vmatprep.mubr.bf16.mxu1 %v2212_v20  ;;  %v3023_v20 = vld [vmem:[%s4076_s1 + $0x7e8] ss:$16 sps:$4 sm:$0xff]  }
  0xc7   :  { %1758 = vmatpush1.bf16.msra.mxu0 %v2936_v21  ;;  %1930 = vmatpush1.bf16.msra.mxu1 %v2939_v22  ;;  %v1978_v21 = vld [vmem:[%s4078_s3] sm:$0xff]  ;;  %v1979_v22 = vld [vmem:[%s4078_s3 + $0x8] sm:$0xff] }
  0xc8   :  { %1759 = vmatprep.subr.bf16.mxu0 %v2944_v23  ;;  %1931 = vmatprep.subr.bf16.mxu1 %v2947_v24  ;;  %v2546_v23 = vpack.c.bf16 %v1995_v18, %v1994_v13  ;;  %v2578_v24 = vpack.c.bf16 %v2027_v15, %v2026_v14  ;;  %v2037_v13 = vld [vmem:[%s4078_s3 + $0x1d8] sm:$0xff]  ;;  %v1988_v15 = vld [vmem:[%s4078_s3 + $0x50] sm:$0xff] }
  0xcb   :  { %1760 = vmatpush1.bf16.msra.mxu0 %v2942_v25  ;;  %1932 = vmatpush1.bf16.msra.mxu1 %v2945_v26  ;;  %v2010_v25 = vld [vmem:[%s4078_s3 + $0x100] sm:$0xff]  ;;  %v2011_v26 = vld [vmem:[%s4078_s3 + $0x108] sm:$0xff] }
  0xcc   :  { %1761 = vmatprep.subr.bf16.mxu0 %v2950_v27  ;;  %1933 = vmatprep.subr.bf16.mxu1 %v2953_v28  ;;  %v1996_v27 = vld [vmem:[%s4078_s3 + $0x90] sm:$0xff]  ;;  %v1997_v28 = vld [vmem:[%s4078_s3 + $0x98] sm:$0xff] }
  0xcf   :  { %1762 = vmatpush1.bf16.msra.mxu0 %v2948_v29  ;;  %1934 = vmatpush1.bf16.msra.mxu1 %v2951_v30  ;;  %v2028_v29 = vld [vmem:[%s4078_s3 + $0x190] sm:$0xff]  ;;  %v2029_v30 = vld [vmem:[%s4078_s3 + $0x198] sm:$0xff] }
  0xd0   :  { %1763 = vmatprep.subr.bf16.mxu0 %v2956_v31  ;;  %1935 = vmatprep.subr.bf16.mxu1 %v2959_v32  ;;  %v2211_v31 = vcombine.low %v3675_v16, %v3680_v17  ;;  %v2548_v32 = vpack.c.bf16 %v1979_v22, %v1978_v21  ;;  %v2012_v16 = vld [vmem:[%s4078_s3 + $0x110] sm:$0xff]  ;;  %v2013_v17 = vld [vmem:[%s4078_s3 + $0x118] sm:$0xff] }
  0xd1   :  { %v2020_v22 = vld [vmem:[%s4078_s3 + $0x150] sm:$0xff] }
  0xd3   :  { %1764 = vmatpush1.bf16.msra.mxu0 %v2954_v33  ;;  %1936 = vmatpush1.bf16.msra.mxu1 %v2957_v34  ;;  %v2580_v33 = vpack.c.bf16 %v2011_v26, %v2010_v25  ;;  %v1980_v34 = vld [vmem:[%s4078_s3 + $0x10] sm:$0xff]  ;;  %v2007_v25 = vld [vmem:[%s4078_s3 + $0xe8] sm:$0xff]  ;;  %v2038_v26 = vld [vmem:[%s4078_s3 + $0x1e0] sm:$0xff] }
  0xd4   :  { %1765 = vmatprep.subr.bf16.mxu0 %v2962_v35  ;;  %1937 = vmatprep.subr.bf16.mxu1 %v2965_v36  ;;  %v1981_v35 = vld [vmem:[%s4078_s3 + $0x18] sm:$0xff]  ;;  %v2550_v36 = vpack.c.bf16 %v1997_v28, %v1996_v27  ;;  %v2039_v27 = vld [vmem:[%s4078_s3 + $0x1e8] sm:$0xff] }
  0xd7   :  { %1766 = vmatpush1.bf16.msra.mxu0 %v2960_v37  ;;  %1938 = vmatpush1.bf16.msra.mxu1 %v2963_v38  ;;  %v2582_v37 = vpack.c.bf16 %v2029_v30, %v2028_v29  ;;  %v1998_v38 = vld [vmem:[%s4078_s3 + $0xa0] sm:$0xff] }
  0xd8   :  { %1767 = vmatprep.subr.bf16.mxu0 %v2968_v39  ;;  %1939 = vmatprep.subr.bf16.mxu1 %v2971_v40  ;;  %v1999_v39 = vld [vmem:[%s4078_s3 + $0xa8] sm:$0xff]  ;;  %v2030_v40 = vld [vmem:[%s4078_s3 + $0x1a0] sm:$0xff] }
  0xdb   :  { %1768 = vmatpush1.bf16.msra.mxu0 %v2966_v41  ;;  %1940 = vmatpush1.bf16.msra.mxu1 %v2969_v42  ;;  %v2031_v41 = vld [vmem:[%s4078_s3 + $0x1a8] sm:$0xff]  ;;  %v2552_v42 = vpack.c.bf16 %v1981_v35, %v1980_v34  ;;  %v2022_v34 = vld [vmem:[%s4078_s3 + $0x160] sm:$0xff] }
  0xdc   :  { %1769 = vmatprep.subr.bf16.mxu0 %v2974_v43  ;;  %1941 = vmatprep.subr.bf16.mxu1 %v2977_v44  ;;  %v2584_v43 = vpack.c.bf16 %v2013_v17, %v2012_v16  ;;  %v1982_v44 = vld [vmem:[%s4078_s3 + $0x20] sm:$0xff]  ;;  %v2008_v16 = vld [vmem:[%s4078_s3 + $0xf0] sm:$0xff]  ;;  %v2009_v17 = vld [vmem:[%s4078_s3 + $0xf8] sm:$0xff] }
  0xdf   :  { %1770 = vmatpush1.bf16.msra.mxu0 %v2972_v45  ;;  %1942 = vmatpush1.bf16.msra.mxu1 %v2975_v46  ;;  %v1983_v45 = vld [vmem:[%s4078_s3 + $0x28] sm:$0xff]  ;;  %v2554_v46 = vpack.c.bf16 %v1999_v39, %v1998_v38  ;;  %v2040_v38 = vld [vmem:[%s4078_s3 + $0x1f0] sm:$0xff]  ;;  %v2574_v39 = vpack.c.bf16 %v2009_v17, %v2008_v16 }
  0xe0   :  { %1771 = vmatprep.subr.bf16.mxu0 %v2980_v47  ;;  %1943 = vmatprep.subr.bf16.mxu1 %v2983_v48  ;;  %v2586_v47 = vpack.c.bf16 %v2031_v41, %v2030_v40  ;;  %v2014_v48 = vld [vmem:[%s4078_s3 + $0x120] sm:$0xff]  ;;  %v2041_v40 = vld [vmem:[%s4078_s3 + $0x1f8] sm:$0xff]  ;;  %v1992_v41 = vld [vmem:[%s4078_s3 + $0x70] sm:$0xff] }
  0xe3   :  { %1772 = vmatpush1.bf16.msra.mxu0 %v2978_v49  ;;  %1944 = vmatpush1.bf16.msra.mxu1 %v2981_v50  ;;  %v2015_v49 = vld [vmem:[%s4078_s3 + $0x128] sm:$0xff]  ;;  %v2000_v50 = vld [vmem:[%s4078_s3 + $0xb0] sm:$0xff] }
  0xe4   :  { %1773 = vmatprep.subr.bf16.mxu0 %v2986_v51  ;;  %1945 = vmatprep.subr.bf16.mxu1 %v2989_v52  ;;  %v2001_v51 = vld [vmem:[%s4078_s3 + $0xb8] sm:$0xff]  ;;  %v2032_v52 = vld [vmem:[%s4078_s3 + $0x1b0] sm:$0xff] }
  0xe7   :  { %1774 = vmatpush1.bf16.msra.mxu0 %v2984_v53  ;;  %1946 = vmatpush1.bf16.msra.mxu1 %v2987_v54  ;;  %v2033_v53 = vld [vmem:[%s4078_s3 + $0x1b8] sm:$0xff]  ;;  %v2556_v54 = vpack.c.bf16 %v1983_v45, %v1982_v44  ;;  %v2024_v45 = vld [vmem:[%s4078_s3 + $0x170] sm:$0xff] }
  0xe8   :  { %1775 = vmatprep.subr.bf16.mxu0 %v2992_v55  ;;  %1947 = vmatprep.subr.bf16.mxu1 %v2995_v56  ;;  %v2588_v55 = vpack.c.bf16 %v2015_v49, %v2014_v48  ;;  %v1984_v56 = vld [vmem:[%s4078_s3 + $0x30] sm:$0xff]  ;;  %v286_v48 = vlaneseq }
  0xea   :  { %v287_v49 = vshrl.u32 %v286_v48, 7 }
  0xeb   :  { %1776 = vmatpush1.bf16.msra.mxu0 %v2990_v57  ;;  %1948 = vmatpush1.bf16.msra.mxu1 %v2993_v58  ;;  %v1985_v57 = vld [vmem:[%s4078_s3 + $0x38] sm:$0xff]  ;;  %v2558_v58 = vpack.c.bf16 %v2001_v51, %v2000_v50 }
  0xec   :  { %1777 = vmatprep.subr.bf16.mxu0 %v2998_v59  ;;  %1949 = vmatprep.subr.bf16.mxu1 %v3001_v60  ;;  %v2590_v59 = vpack.c.bf16 %v2033_v53, %v2032_v52  ;;  %v2016_v60 = vld [vmem:[%s4078_s3 + $0x130] sm:$0xff]  ;;  %v288_v50 = vsub.s32 0, %v287_v49  ;;  %v296_v51 = vsub.s32 2, %v287_v49  ;;  %v284_v52 = vld [vmem:[%s4079_s2] sm:$0xf]  ;;  %v292_v53 = vsub.s32 1, %v287_v49 }
  0xef   :  { %1778 = vmatpush1.bf16.msra.mxu0 %v2996_v61  ;;  %1950 = vmatpush1.bf16.msra.mxu1 %v2999_v62  ;;  %v2017_v61 = vld [vmem:[%s4078_s3 + $0x138] sm:$0xff]  ;;  %v2002_v62 = vld [vmem:[%s4078_s3 + $0xc0] sm:$0xff] }
  0xf0   :  { %1779 = vmatprep.subr.bf16.mxu0 %v3004_v63  ;;  %1951 = vmatprep.subr.bf16.mxu1 %v3007_v0  ;;  %v2003_v63 = vld [vmem:[%s4078_s3 + $0xc8] sm:$0xff]  ;;  %v2034_v0 = vld [vmem:[%s4078_s3 + $0x1c0] sm:$0xff] }
  0xf3   :  { %1780 = vmatpush1.bf16.msra.mxu0 %v3002_v1  ;;  %1952 = vmatpush1.bf16.msra.mxu1 %v3005_v2  ;;  %v2035_v1 = vld [vmem:[%s4078_s3 + $0x1c8] sm:$0xff]  ;;  %v2560_v2 = vpack.c.bf16 %v1985_v57, %v1984_v56  ;;  %v297_v56 = vrot.slane %v284_v52, %v296_v51  ;;  %v293_v57 = vrot.slane %v284_v52, %v292_v53 }
  0xf4   :  { %1781 = vmatprep.subr.bf16.mxu0 %v3010_v3  ;;  %1953 = vmatprep.subr.bf16.mxu1 %v3013_v4  ;;  %v2592_v3 = vpack.c.bf16 %v2017_v61, %v2016_v60  ;;  %v1986_v4 = vld [vmem:[%s4078_s3 + $0x40] sm:$0xff] }
  0xf7   :  { %1782 = vmatpush1.bf16.msra.mxu0 %v3008_v5  ;;  %1954 = vmatpush1.bf16.msra.mxu1 %v3011_v6  ;;  %v1987_v5 = vld [vmem:[%s4078_s3 + $0x48] sm:$0xff]  ;;  %v2562_v6 = vpack.c.bf16 %v2003_v63, %v2002_v62 }
  0xf8   :  { %1783 = vmatprep.subr.bf16.mxu0 %v3016_v7  ;;  %1955 = vmatprep.subr.bf16.mxu1 %v3019_v8  ;;  %v2594_v7 = vpack.c.bf16 %v2035_v1, %v2034_v0  ;;  %v2018_v8 = vld [vmem:[%s4078_s3 + $0x140] sm:$0xff]  ;;  %v2564_v18 = vpack.c.bf16 %v1987_v5, %v1986_v4 }
  0xfb   :  { %1784 = vmatpush1.bf16.msra.mxu0 %v3014_v9  ;;  %1956 = vmatpush1.bf16.msra.mxu1 %v3017_v10  ;;  %v2019_v9 = vld [vmem:[%s4078_s3 + $0x148] sm:$0xff]  ;;  %v2004_v10 = vld [vmem:[%s4078_s3 + $0xd0] sm:$0xff] }
  0xfc   :  { %1785 = vmatprep.subr.bf16.mxu0 %v3022_v11  ;;  %1957 = vmatprep.subr.bf16.mxu1 %v3025_v12  ;;  %v2005_v11 = vld [vmem:[%s4078_s3 + $0xd8] sm:$0xff]  ;;  %v2036_v12 = vld [vmem:[%s4078_s3 + $0x1d0] sm:$0xff]  ;;  %v2596_v14 = vpack.c.bf16 %v2019_v9, %v2018_v8 }
  0xfd   :  { %v2598_v21 = vpack.c.bf16 %v2037_v13, %v2036_v12 }
  0xff   :  { %1786 = vmatpush1.bf16.msra.mxu0 %v3020_v19  ;;  %1958 = vmatpush1.bf16.msra.mxu1 %v3023_v20  ;;  %v1989_v19 = vld [vmem:[%s4078_s3 + $0x58] sm:$0xff]  ;;  %v2566_v20 = vpack.c.bf16 %v2005_v11, %v2004_v10 }
 0x100   :  { %2547 = vmatprep.subr.bf16.mxu0 %v2546_v23  ;;  %2579 = vmatprep.subr.bf16.mxu1 %v2578_v24  ;;  %v2021_v23 = vld [vmem:[%s4078_s3 + $0x158] sm:$0xff]  ;;  %v2006_v24 = vld [vmem:[%s4078_s3 + $0xe0] sm:$0xff]  ;;  %v2568_v28 = vpack.c.bf16 %v1989_v19, %v1988_v15 }
 0x101   :  { %v2600_v29 = vpack.c.bf16 %v2021_v23, %v2020_v22  ;;  %v2570_v30 = vpack.c.bf16 %v2007_v25, %v2006_v24  ;;  %v2469_v23 = vld [vmem:[%s4080_s4] ss:$0 sm:$0xff] }
 0x102   :  { %1788 = vmatmul.mubr.bf16.vlgmr.msra.gmra.mrb[0].mxu0 %v2211_v31  ;;  %1960 = vmatmul.mubr.bf16.vlgmr.msra.gmra.mrb[0].mxu1 %v2211_v31  ;;  %v2602_v31 = vpack.c.bf16 %v2039_v27, %v2038_v26 }
 0x103   :  { %2549 = vmatpush3.bf16.msra.mxu0 %v2548_v32  ;;  %2581 = vmatpush3.bf16.msra.mxu1 %v2580_v33  ;;  %v1990_v32 = vld [vmem:[%s4078_s3 + $0x60] sm:$0xff]  ;;  %v1991_v33 = vld [vmem:[%s4078_s3 + $0x68] sm:$0xff] }
 0x104   :  { %2551 = vmatprep.subr.bf16.mxu0 %v2550_v36  ;;  %2583 = vmatprep.subr.bf16.mxu1 %v2582_v37  ;;  %v2572_v35 = vpack.c.bf16 %v1991_v33, %v1990_v32  ;;  %v2023_v36 = vld [vmem:[%s4078_s3 + $0x168] sm:$0xff] }
 0x105   :  { %v2604_v37 = vpack.c.bf16 %v2023_v36, %v2022_v34 }
 0x107   :  { %2553 = vmatpush3.bf16.msra.mxu0 %v2552_v42  ;;  %2585 = vmatpush3.bf16.msra.mxu1 %v2584_v43  ;;  %v1993_v42 = vld [vmem:[%s4078_s3 + $0x78] sm:$0xff]  ;;  %v2606_v43 = vpack.c.bf16 %v2041_v40, %v2040_v38 }
 0x108   :  { %2555 = vmatprep.subr.bf16.mxu0 %v2554_v46  ;;  %2587 = vmatprep.subr.bf16.mxu1 %v2586_v47  ;;  %v2576_v44 = vpack.c.bf16 %v1993_v42, %v1992_v41  ;;  %v2025_v46 = vld [vmem:[%s4078_s3 + $0x178] sm:$0xff] }
 0x109   :  { %v2608_v47 = vpack.c.bf16 %v2025_v46, %v2024_v45 }
 0x10b   :  { %2557 = vmatpush3.bf16.msra.mxu0 %v2556_v54  ;;  %2589 = vmatpush3.bf16.msra.mxu1 %v2588_v55  ;;  %v300_v54 = vsub.s32 3, %v287_v49  ;;  %v289_v55 = vrot.slane %v284_v52, %v288_v50 }
 0x10c   :  { %2559 = vmatprep.subr.bf16.mxu0 %v2558_v58  ;;  %2591 = vmatprep.subr.bf16.mxu1 %v2590_v59 }
 0x10d   :  { %v301_v58 = vrot.slane %v284_v52, %v300_v54 }
 0x10f   :  { %2561 = vmatpush3.bf16.msra.mxu0 %v2560_v2  ;;  %2593 = vmatpush3.bf16.msra.mxu1 %v2592_v3 }
 0x110   :  { %2563 = vmatprep.subr.bf16.mxu0 %v2562_v6  ;;  %2595 = vmatprep.subr.bf16.mxu1 %v2594_v7 }
 0x113   :  { %2565 = vmatpush3.bf16.msra.mxu0 %v2564_v18  ;;  %2597 = vmatpush3.bf16.msra.mxu1 %v2596_v14 }
 0x114   :  { %2567 = vmatprep.subr.bf16.mxu0 %v2566_v20  ;;  %2599 = vmatprep.subr.bf16.mxu1 %v2598_v21 }
 0x117   :  { %2569 = vmatpush3.bf16.msra.mxu0 %v2568_v28  ;;  %2601 = vmatpush3.bf16.msra.mxu1 %v2600_v29 }
 0x118   :  { %2571 = vmatprep.subr.bf16.mxu0 %v2570_v30  ;;  %2603 = vmatprep.subr.bf16.mxu1 %v2602_v31 }
 0x11b   :  { %2573 = vmatpush3.bf16.msra.mxu0 %v2572_v35  ;;  %2605 = vmatpush3.bf16.msra.mxu1 %v2604_v37 }
 0x11c   :  { %2575 = vmatprep.subr.bf16.mxu0 %v2574_v39  ;;  %2607 = vmatprep.subr.bf16.mxu1 %v2606_v43 }
 0x11f   :  { %2577 = vmatpush3.bf16.msra.mxu0 %v2576_v44  ;;  %2609 = vmatpush3.bf16.msra.mxu1 %v2608_v47 }
 0x1d5   :  { %v1789_v59 = vpop.f32.mrb[0].mxu0  ;;  %v1961_v60 = vpop.f32.mrb[0].mxu1 }
 0x1d6   :  { %v2610_v61 = vadd.f32 %v1789_v59, %v289_v55  ;;  %v2614_v62 = vadd.f32 %v1961_v60, %v297_v56  ;;  %v1791_v63 = vpop.f32.mrb[1].mxu0  ;;  %v1963_v0 = vpop.f32.mrb[1].mxu1 }
 0x1d7   :  { %v2611_v1 = vadd.f32 %v1791_v63, %v293_v57  ;;  %v2615_v2 = vadd.f32 %v1963_v0, %v301_v58  ;;  %v1793_v3 = vpop.f32.mrb[2].mxu0  ;;  %v1965_v4 = vpop.f32.mrb[2].mxu1 }
 0x1d8   :  { %v1795_v5 = vpop.f32.mrb[3].mxu0  ;;  %v1967_v6 = vpop.f32.mrb[3].mxu1  ;;  %v1970_v11 = vmax.f32 %v2610_v61, 0.0  ;;  %v1972_v12 = vmax.f32 %v2614_v62, 0.0  ;;  %v2612_v13 = vadd.f32 %v1793_v3, %v289_v55  ;;  %v2616_v18 = vadd.f32 %v1965_v4, %v297_v56 }
 0x1d9   :  { %v1971_v7 = vmax.f32 %v2611_v1, 0.0  ;;  %v1973_v8 = vmax.f32 %v2615_v2, 0.0  ;;  %v2613_v9 = vadd.f32 %v1795_v5, %v293_v57  ;;  %v2617_v10 = vadd.f32 %v1967_v6, %v301_v58 }
 0x1da   :  { %v1974_v19 = vmax.f32 %v2612_v13, 0.0  ;;  %v1976_v20 = vmax.f32 %v2616_v18, 0.0 }
 0x1db   :  { %v1975_v14 = vmax.f32 %v2613_v9, 0.0  ;;  %v1977_v15 = vmax.f32 %v2617_v10, 0.0  ;;  %2113 = vmatprep.mubr.f32.mxu0 %v1971_v7  ;;  %2188 = vmatprep.mubr.f32.mxu1 %v1973_v8 }
 0x1dc   :  { %2114 = vmatmul.mubr.f32.vlgmr.msra.gmra.mrb[4].mxu0 %v1970_v11  ;;  %2189 = vmatmul.mubr.f32.vlgmr.msra.gmra.mrb[4].mxu1 %v1972_v12 }
 0x1dd   :  { %2118 = vmatprep.mubr.f32.mxu0 %v1975_v14  ;;  %2193 = vmatprep.mubr.f32.mxu1 %v1977_v15 }
 0x1e0   :  { %2119 = vmatmul.mubr.f32.gmra.mrb[6].mxu0 %v1974_v19  ;;  %2194 = vmatmul.mubr.f32.gmra.mrb[6].mxu1 %v1976_v20 }
 0x2af   :  { %v2502_v21 = vpop.f32.mrb[4].mxu0  ;;  %v2540_v22 = vpop.f32.mrb[4].mxu1 }
 0x2b0   :  { %v2503_v24 = vpop.f32.mrb[5].mxu0  ;;  %v2541_v25 = vpop.f32.mrb[5].mxu1 }
 0x2b1   :  { %v2504_v26 = vadd.f32 %v2503_v24, %v2502_v21  ;;  %v2542_v27 = vadd.f32 %v2541_v25, %v2540_v22 }
 0x2b3   :  { %v2116_v28 = vadd.f32 %v2504_v26, %v2469_v23  ;;  %v2505_v29 = vpop.f32.mrb[6].mxu0  ;;  %v2543_v30 = vpop.f32.mrb[6].mxu1 }
 0x2b4   :  { %v2506_v31 = vpop.f32.mrb[7].mxu0  ;;  %v2544_v32 = vpop.f32.mrb[7].mxu1 }
 0x2b5   :  { %v2191_v33 = vadd.f32 %v2542_v27, %v2116_v28  ;;  %v2507_v34 = vadd.f32 %v2506_v31, %v2505_v29  ;;  %v2545_v35 = vadd.f32 %v2544_v32, %v2543_v30 }
 0x2b7   :  { %2199 = vst [vmem:[%s4081_s5] sm:$0xff] %v2191_v33  ;;  %v2121_v36 = vadd.f32 %v2507_v34, %v2469_v23 }
 0x2b9   :  { %v2196_v37 = vadd.f32 %v2545_v35, %v2121_v36 }
 0x2bb   :  { %2200 = vst [vmem:[%s4081_s5 + $0x8] sm:$0xff] %v2196_v37 }

</bundles_post_ra>
